<compile_context>
chip_gen: v5e
topology: v5e:2x2
jax: 0.10.0
libtpu: 0.0.40
codegen_flags: <defaults>
</compile_context>

<pallas_src>
import jax
import jax.numpy as jnp
from jax import lax
from jax.experimental import pallas as pl
from jax.experimental.pallas import tpu as pltpu


def lstm_kernel(x_ref,     # [T, Bp, I]   time-major, batch padded (f32)
                wih0_ref,  # [I, 4Hp]     layer-0 input weights, gate-padded cols (f32)
                whh0_ref,  # [Hp, 4Hp]    layer-0 recurrent weights (matmul dtype)
                b0_ref,    # [1, 4Hp]     b_ih_l0 + b_hh_l0 (f32)
                wih1_ref,  # [Hp, 4Hp]    layer-1 input (=h0) weights (matmul dtype)
                whh1_ref,  # [Hp, 4Hp]    layer-1 recurrent weights (matmul dtype)
                b1_ref,    # [1, 4Hp]     b_ih_l1 + b_hh_l1 (f32)
                fcw_ref,   # [Hp, Op]     fc weight, zero-padded (matmul dtype)
                fcb_ref,   # [1, Op]      fc bias, zero-padded (f32)
                out_ref):  # [Bp, Op]     f32
    T, Bp, I = x_ref.shape
    Hp, G = whh0_ref.shape
    mm_dtype = whh0_ref.dtype           # bf16 on v6e/v7x, f32 for exact parity / v5e

    # Small operands hoisted once (a few vregs each).  Big weights stay in VMEM and are
    # loaded inside the dots each step (3 free vld slots, hidden under MXU latency).
    b0 = jnp.broadcast_to(b0_ref[...], (Bp, G))
    b1 = jnp.broadcast_to(b1_ref[...], (Bp, G))
    if I == 1:
        wih0_row = jnp.broadcast_to(wih0_ref[...], (Bp, G))    # 4 vregs, held once

    def sigmoid(z):
        # 1 EUP push (tanh) instead of exp + reciprocal (2 pushes).
        return 0.5 * jnp.tanh(0.5 * z) + 0.5

    def gates_to_hc(g, c_prev):
        # Lane-aligned gate slices (Hp is a multiple of 128); PyTorch order i, f, g, o.
        i_g = sigmoid(g[:, 0 * Hp:1 * Hp])
        f_g = sigmoid(g[:, 1 * Hp:2 * Hp])
        g_g = jnp.tanh(g[:, 2 * Hp:3 * Hp])
        o_g = sigmoid(g[:, 3 * Hp:4 * Hp])
        c_new = f_g * c_prev + i_g * g_g
        return o_g * jnp.tanh(c_new), c_new

    def step(t, carry):
        h0, c0, h1, c1 = carry
        # h1-dependent half of layer-1: independent of this step's h0 -> off the
        # critical path; can overlap with layer-0's recurrent matmul below.
        g1_rec = jnp.dot(h1.astype(mm_dtype), whh1_ref[...],
                         preferred_element_type=jnp.float32) + b1
        # layer 0: input projection computed on the fly (no T-scaled scratch)
        if I == 1:
            xproj = x_ref[t] * wih0_row               # [Bp,1]*[Bp,G] broadcast FMA (VPU)
        else:
            xproj = jnp.dot(x_ref[t], wih0_ref[...],
                            preferred_element_type=jnp.float32)
        g0 = xproj + b0 + jnp.dot(h0.astype(mm_dtype), whh0_ref[...],
                                  preferred_element_type=jnp.float32)
        h0, c0 = gates_to_hc(g0, c0)
        # layer 1 (inter-layer dropout is identity in eval mode)
        g1 = g1_rec + jnp.dot(h0.astype(mm_dtype), wih1_ref[...],
                              preferred_element_type=jnp.float32)
        h1, c1 = gates_to_hc(g1, c1)
        return h0, c0, h1, c1

    zeros = jnp.zeros((Bp, Hp), jnp.float32)
    carry = (zeros, zeros, zeros, zeros)
    if T <= 8:
        for t in range(T):                            # full unroll only for very short T
            carry = step(t, carry)
    else:
        carry = lax.fori_loop(0, T, step, carry, unroll=8)
    _, _, h1, _ = carry

    # fc on the last timestep's top-layer hidden state; lane-dense [Bp, Op] store.
    out_ref[...] = (jnp.dot(h1.astype(mm_dtype), fcw_ref[...],
                            preferred_element_type=jnp.float32)
                    + fcb_ref[...]).astype(out_ref.dtype)


def _round_up(x, m):
    return ((x + m - 1) // m) * m


def _pad_gate_cols(w, H, Hp):
    """w: [K, 4H] in PyTorch gate order -> [K, 4Hp], each gate block zero-padded."""
    K = w.shape[0]
    return jnp.pad(w.reshape(K, 4, H), ((0, 0), (0, 0), (0, Hp - H))).reshape(K, 4 * Hp)


def lstm_model_forward(x, params, *, hidden_size, matmul_dtype=jnp.float32):
    """x: [B, T, I] (batch_first, like the PyTorch module).  Returns [B, O].

    matmul_dtype=jnp.bfloat16 halves weight VMEM / MXU feed traffic on v6e/v7x (f32
    accumulate, all gate elementwise math stays f32).  Keep f32 on v5e / for tight parity.
    """
    B, T, I = x.shape
    H = hidden_size
    O = params["fc_w"].shape[0]

    Hp = _round_up(H, 128)          # lane-aligned per-gate blocks
    Op = _round_up(O, 128)          # lane-dense output store
    Bp = _round_up(max(B, 8), 8)    # sublane-aligned batch
    f32 = jnp.float32
    mmdt = matmul_dtype

    # time-major, batch padded
    x_tm = jnp.transpose(x, (1, 0, 2)).astype(f32)              # [T, B, I]
    x_tm = jnp.pad(x_tm, ((0, 0), (0, Bp - B), (0, 0)))         # [T, Bp, I]

    # layer 0 (input-projection weight kept f32: used on the VPU path when I == 1)
    wih0 = _pad_gate_cols(params["w_ih_l0"].T.astype(f32), H, Hp)                # [I, 4Hp]
    whh0 = jnp.pad(_pad_gate_cols(params["w_hh_l0"].T.astype(f32), H, Hp),
                   ((0, Hp - H), (0, 0))).astype(mmdt)                           # [Hp, 4Hp]
    b0 = _pad_gate_cols(
        (params["b_ih_l0"] + params["b_hh_l0"]).astype(f32).reshape(1, 4 * H), H, Hp)

    # layer 1 (un-fused: two separate K=Hp matmuls inside the kernel)
    wih1 = jnp.pad(_pad_gate_cols(params["w_ih_l1"].T.astype(f32), H, Hp),
                   ((0, Hp - H), (0, 0))).astype(mmdt)                           # [Hp, 4Hp]
    whh1 = jnp.pad(_pad_gate_cols(params["w_hh_l1"].T.astype(f32), H, Hp),
                   ((0, Hp - H), (0, 0))).astype(mmdt)                           # [Hp, 4Hp]
    b1 = _pad_gate_cols(
        (params["b_ih_l1"] + params["b_hh_l1"]).astype(f32).reshape(1, 4 * H), H, Hp)

    # fc (zero-padded so padded h columns contribute nothing)
    fcw = jnp.pad(params["fc_w"].T.astype(f32), ((0, Hp - H), (0, Op - O))).astype(mmdt)
    fcb = jnp.pad(params["fc_b"].astype(f32).reshape(1, O), ((0, 0), (0, Op - O)))

    vmem = pl.BlockSpec(memory_space=pltpu.MemorySpace.VMEM)

    out = pl.pallas_call(
        lstm_kernel,
        out_shape=jax.ShapeDtypeStruct((Bp, Op), f32),
        in_specs=[vmem] * 9,
        out_specs=vmem,
    )(x_tm, wih0, whh0, b0, wih1, whh1, b1, fcw, fcb)

    return out[:B, :O]


def init_params(key, input_size, hidden_size, output_size):
    """Deterministic init matching PyTorch LSTM/Linear parameter shapes."""
    H = hidden_size
    k = 1.0 / jnp.sqrt(H)
    keys = jax.random.split(key, 10)
    u = lambda kk, shape: jax.random.uniform(kk, shape, jnp.float32, -k, k)
    return {
        "w_ih_l0": u(keys[0], (4 * H, input_size)),
        "w_hh_l0": u(keys[1], (4 * H, H)),
        "b_ih_l0": u(keys[2], (4 * H,)),
        "b_hh_l0": u(keys[3], (4 * H,)),
        "w_ih_l1": u(keys[4], (4 * H, H)),
        "w_hh_l1": u(keys[5], (4 * H, H)),
        "b_ih_l1": u(keys[6], (4 * H,)),
        "b_hh_l1": u(keys[7], (4 * H,)),
        "fc_w":    u(keys[8], (output_size, H)),
        "fc_b":    u(keys[9], (output_size,)),
    }


def reference_forward(x, params, *, hidden_size):
    """Pure-JAX reference of the same LSTM forward (for correctness check)."""
    H = hidden_size
    B, T, I = x.shape

    def cell(x_t, h, c, wih, whh, b):
        g = x_t @ wih.T + h @ whh.T + b
        i_g = jax.nn.sigmoid(g[:, 0 * H:1 * H])
        f_g = jax.nn.sigmoid(g[:, 1 * H:2 * H])
        g_g = jnp.tanh(g[:, 2 * H:3 * H])
        o_g = jax.nn.sigmoid(g[:, 3 * H:4 * H])
        c_new = f_g * c + i_g * g_g
        return o_g * jnp.tanh(c_new), c_new

    h0 = jnp.zeros((B, H)); c0 = jnp.zeros((B, H))
    h1 = jnp.zeros((B, H)); c1 = jnp.zeros((B, H))
    b0 = params["b_ih_l0"] + params["b_hh_l0"]
    b1 = params["b_ih_l1"] + params["b_hh_l1"]
    for t in range(T):
        h0, c0 = cell(x[:, t, :], h0, c0, params["w_ih_l0"], params["w_hh_l0"], b0)
        h1, c1 = cell(h0, h1, c1, params["w_ih_l1"], params["w_hh_l1"], b1)
    return h1 @ params["fc_w"].T + params["fc_b"]


if __name__ == "__main__":
    B, T, I, H, O = 4, 8, 1, 64, 1
    key = jax.random.PRNGKey(0)
    k_x, k_p = jax.random.split(key)
    x = jax.random.normal(k_x, (B, T, I), dtype=jnp.float32)
    params = init_params(k_p, I, H, O)

    ref = reference_forward(x, params, hidden_size=H)

    # f32 matmul path (exact-parity path, use on v5e)
    out_f32 = jax.block_until_ready(
        lstm_model_forward(x, params, hidden_size=H, matmul_dtype=jnp.float32))
    assert out_f32.shape == (B, O)
    assert jnp.allclose(out_f32, ref, atol=1e-4, rtol=1e-4), (out_f32, ref)

    # bf16 matmul-operand path (v6e/v7x MXU; f32 accumulate + f32 elementwise)
    out_bf16 = jax.block_until_ready(
        lstm_model_forward(x, params, hidden_size=H, matmul_dtype=jnp.bfloat16))
    assert out_bf16.shape == (B, O)
    assert jnp.allclose(out_bf16, ref, atol=3e-2, rtol=3e-2), (out_bf16, ref)

    print("KERNEL_OK")
</pallas_src>

<mosaic_0001>
module attributes {stable_mosaic.version = 11 : i64} {
  func.func @lstm_kernel(%arg0: memref<8x8x1xf32, #tpu.memory_space<vmem>>, %arg1: memref<1x512xf32, #tpu.memory_space<vmem>>, %arg2: memref<128x512xf32, #tpu.memory_space<vmem>>, %arg3: memref<1x512xf32, #tpu.memory_space<vmem>>, %arg4: memref<128x512xf32, #tpu.memory_space<vmem>>, %arg5: memref<128x512xf32, #tpu.memory_space<vmem>>, %arg6: memref<1x512xf32, #tpu.memory_space<vmem>>, %arg7: memref<128x128xf32, #tpu.memory_space<vmem>>, %arg8: memref<1x128xf32, #tpu.memory_space<vmem>>, %arg9: memref<8x128xf32, #tpu.memory_space<vmem>>) attributes {dimension_semantics = [], scalar_prefetch = 0 : i64, scratch_operands = 0 : i64, tpu.core_type = #tpu.core_type<tc>} {
    %c0 = arith.constant 0 : index
    %c0_0 = arith.constant 0 : index
    %0 = vector.load %arg3[%c0, %c0_0] : memref<1x512xf32, #tpu.memory_space<vmem>>, vector<1x512xf32>
    %1 = vector.shape_cast %0 : vector<1x512xf32> to vector<1x512xf32>
    %2 = vector.broadcast %1 : vector<1x512xf32> to vector<8x512xf32>
    %c0_1 = arith.constant 0 : index
    %c0_2 = arith.constant 0 : index
    %3 = vector.load %arg6[%c0_1, %c0_2] : memref<1x512xf32, #tpu.memory_space<vmem>>, vector<1x512xf32>
    %4 = vector.shape_cast %3 : vector<1x512xf32> to vector<1x512xf32>
    %5 = vector.broadcast %4 : vector<1x512xf32> to vector<8x512xf32>
    %c0_3 = arith.constant 0 : index
    %c0_4 = arith.constant 0 : index
    %6 = vector.load %arg1[%c0_3, %c0_4] : memref<1x512xf32, #tpu.memory_space<vmem>>, vector<1x512xf32>
    %7 = vector.shape_cast %6 : vector<1x512xf32> to vector<1x512xf32>
    %8 = vector.broadcast %7 : vector<1x512xf32> to vector<8x512xf32>
    %cst = arith.constant 0.000000e+00 : f32
    %9 = vector.broadcast %cst : f32 to vector<8x128xf32>
    %c0_5 = arith.constant 0 : index
    %c0_6 = arith.constant 0 : index
    %10 = vector.load %arg5[%c0_5, %c0_6] : memref<128x512xf32, #tpu.memory_space<vmem>>, vector<128x512xf32>
    %cst_7 = arith.constant dense<0.000000e+00> : vector<8x512xf32>
    %11 = tpu.matmul %9, %10, %cst_7 {dimension_numbers = #tpu.dot_dimension_numbers<[1], [0], [0], [1], [0, 0, 1, 1], [], []>} : vector<8x128xf32>, vector<128x512xf32>, vector<8x512xf32> -> vector<8x512xf32>
    %12 = arith.addf %11, %5 : vector<8x512xf32>
    %c0_8 = arith.constant 0 : index
    %c0_9 = arith.constant 0 : index
    %c0_10 = arith.constant 0 : index
    %13 = vector.load %arg0[%c0_8, %c0_9, %c0_10] : memref<8x8x1xf32, #tpu.memory_space<vmem>>, vector<1x8x1xf32>
    %14 = vector.shape_cast %13 : vector<1x8x1xf32> to vector<8x1xf32>
    %15 = vector.broadcast %14 : vector<8x1xf32> to vector<8x512xf32>
    %16 = arith.mulf %15, %8 : vector<8x512xf32>
    %17 = arith.addf %16, %2 : vector<8x512xf32>
    %c0_11 = arith.constant 0 : index
    %c0_12 = arith.constant 0 : index
    %18 = vector.load %arg2[%c0_11, %c0_12] : memref<128x512xf32, #tpu.memory_space<vmem>>, vector<128x512xf32>
    %cst_13 = arith.constant dense<0.000000e+00> : vector<8x512xf32>
    %19 = tpu.matmul %9, %18, %cst_13 {dimension_numbers = #tpu.dot_dimension_numbers<[1], [0], [0], [1], [0, 0, 1, 1], [], []>} : vector<8x128xf32>, vector<128x512xf32>, vector<8x512xf32> -> vector<8x512xf32>
    %20 = arith.addf %17, %19 : vector<8x512xf32>
    %21 = vector.extract_strided_slice %20 {offsets = [0, 0], sizes = [8, 128], strides = [1, 1]} : vector<8x512xf32> to vector<8x128xf32>
    %cst_14 = arith.constant 5.000000e-01 : f32
    %22 = vector.broadcast %cst_14 : f32 to vector<8x128xf32>
    %23 = arith.mulf %22, %21 : vector<8x128xf32>
    %24 = math.tanh %23 : vector<8x128xf32>
    %cst_15 = arith.constant 5.000000e-01 : f32
    %25 = vector.broadcast %cst_15 : f32 to vector<8x128xf32>
    %26 = arith.mulf %25, %24 : vector<8x128xf32>
    %cst_16 = arith.constant 5.000000e-01 : f32
    %27 = vector.broadcast %cst_16 : f32 to vector<8x128xf32>
    %28 = arith.addf %26, %27 : vector<8x128xf32>
    %29 = vector.extract_strided_slice %20 {offsets = [0, 128], sizes = [8, 128], strides = [1, 1]} : vector<8x512xf32> to vector<8x128xf32>
    %cst_17 = arith.constant 5.000000e-01 : f32
    %30 = vector.broadcast %cst_17 : f32 to vector<8x128xf32>
    %31 = arith.mulf %30, %29 : vector<8x128xf32>
    %32 = math.tanh %31 : vector<8x128xf32>
    %cst_18 = arith.constant 5.000000e-01 : f32
    %33 = vector.broadcast %cst_18 : f32 to vector<8x128xf32>
    %34 = arith.mulf %33, %32 : vector<8x128xf32>
    %cst_19 = arith.constant 5.000000e-01 : f32
    %35 = vector.broadcast %cst_19 : f32 to vector<8x128xf32>
    %36 = arith.addf %34, %35 : vector<8x128xf32>
    %37 = vector.extract_strided_slice %20 {offsets = [0, 256], sizes = [8, 128], strides = [1, 1]} : vector<8x512xf32> to vector<8x128xf32>
    %38 = math.tanh %37 : vector<8x128xf32>
    %39 = vector.extract_strided_slice %20 {offsets = [0, 384], sizes = [8, 128], strides = [1, 1]} : vector<8x512xf32> to vector<8x128xf32>
    %cst_20 = arith.constant 5.000000e-01 : f32
    %40 = vector.broadcast %cst_20 : f32 to vector<8x128xf32>
    %41 = arith.mulf %40, %39 : vector<8x128xf32>
    %42 = math.tanh %41 : vector<8x128xf32>
    %cst_21 = arith.constant 5.000000e-01 : f32
    %43 = vector.broadcast %cst_21 : f32 to vector<8x128xf32>
    %44 = arith.mulf %43, %42 : vector<8x128xf32>
    %cst_22 = arith.constant 5.000000e-01 : f32
    %45 = vector.broadcast %cst_22 : f32 to vector<8x128xf32>
    %46 = arith.addf %44, %45 : vector<8x128xf32>
    %47 = arith.mulf %36, %9 : vector<8x128xf32>
    %48 = arith.mulf %28, %38 : vector<8x128xf32>
    %49 = arith.addf %47, %48 : vector<8x128xf32>
    %50 = math.tanh %49 : vector<8x128xf32>
    %51 = arith.mulf %46, %50 : vector<8x128xf32>
    %c0_23 = arith.constant 0 : index
    %c0_24 = arith.constant 0 : index
    %52 = vector.load %arg4[%c0_23, %c0_24] : memref<128x512xf32, #tpu.memory_space<vmem>>, vector<128x512xf32>
    %cst_25 = arith.constant dense<0.000000e+00> : vector<8x512xf32>
    %53 = tpu.matmul %51, %52, %cst_25 {dimension_numbers = #tpu.dot_dimension_numbers<[1], [0], [0], [1], [0, 0, 1, 1], [], []>} : vector<8x128xf32>, vector<128x512xf32>, vector<8x512xf32> -> vector<8x512xf32>
    %54 = arith.addf %12, %53 : vector<8x512xf32>
    %55 = vector.extract_strided_slice %54 {offsets = [0, 0], sizes = [8, 128], strides = [1, 1]} : vector<8x512xf32> to vector<8x128xf32>
    %cst_26 = arith.constant 5.000000e-01 : f32
    %56 = vector.broadcast %cst_26 : f32 to vector<8x128xf32>
    %57 = arith.mulf %56, %55 : vector<8x128xf32>
    %58 = math.tanh %57 : vector<8x128xf32>
    %cst_27 = arith.constant 5.000000e-01 : f32
    %59 = vector.broadcast %cst_27 : f32 to vector<8x128xf32>
    %60 = arith.mulf %59, %58 : vector<8x128xf32>
    %cst_28 = arith.constant 5.000000e-01 : f32
    %61 = vector.broadcast %cst_28 : f32 to vector<8x128xf32>
    %62 = arith.addf %60, %61 : vector<8x128xf32>
    %63 = vector.extract_strided_slice %54 {offsets = [0, 128], sizes = [8, 128], strides = [1, 1]} : vector<8x512xf32> to vector<8x128xf32>
    %cst_29 = arith.constant 5.000000e-01 : f32
    %64 = vector.broadcast %cst_29 : f32 to vector<8x128xf32>
    %65 = arith.mulf %64, %63 : vector<8x128xf32>
    %66 = math.tanh %65 : vector<8x128xf32>
    %cst_30 = arith.constant 5.000000e-01 : f32
    %67 = vector.broadcast %cst_30 : f32 to vector<8x128xf32>
    %68 = arith.mulf %67, %66 : vector<8x128xf32>
    %cst_31 = arith.constant 5.000000e-01 : f32
    %69 = vector.broadcast %cst_31 : f32 to vector<8x128xf32>
    %70 = arith.addf %68, %69 : vector<8x128xf32>
    %71 = vector.extract_strided_slice %54 {offsets = [0, 256], sizes = [8, 128], strides = [1, 1]} : vector<8x512xf32> to vector<8x128xf32>
    %72 = math.tanh %71 : vector<8x128xf32>
    %73 = vector.extract_strided_slice %54 {offsets = [0, 384], sizes = [8, 128], strides = [1, 1]} : vector<8x512xf32> to vector<8x128xf32>
    %cst_32 = arith.constant 5.000000e-01 : f32
    %74 = vector.broadcast %cst_32 : f32 to vector<8x128xf32>
    %75 = arith.mulf %74, %73 : vector<8x128xf32>
    %76 = math.tanh %75 : vector<8x128xf32>
    %cst_33 = arith.constant 5.000000e-01 : f32
    %77 = vector.broadcast %cst_33 : f32 to vector<8x128xf32>
    %78 = arith.mulf %77, %76 : vector<8x128xf32>
    %cst_34 = arith.constant 5.000000e-01 : f32
    %79 = vector.broadcast %cst_34 : f32 to vector<8x128xf32>
    %80 = arith.addf %78, %79 : vector<8x128xf32>
    %81 = arith.mulf %70, %9 : vector<8x128xf32>
    %82 = arith.mulf %62, %72 : vector<8x128xf32>
    %83 = arith.addf %81, %82 : vector<8x128xf32>
    %84 = math.tanh %83 : vector<8x128xf32>
    %85 = arith.mulf %80, %84 : vector<8x128xf32>
    %c0_35 = arith.constant 0 : index
    %c0_36 = arith.constant 0 : index
    %86 = vector.load %arg5[%c0_35, %c0_36] : memref<128x512xf32, #tpu.memory_space<vmem>>, vector<128x512xf32>
    %cst_37 = arith.constant dense<0.000000e+00> : vector<8x512xf32>
    %87 = tpu.matmul %85, %86, %cst_37 {dimension_numbers = #tpu.dot_dimension_numbers<[1], [0], [0], [1], [0, 0, 1, 1], [], []>} : vector<8x128xf32>, vector<128x512xf32>, vector<8x512xf32> -> vector<8x512xf32>
    %88 = arith.addf %87, %5 : vector<8x512xf32>
    %c1 = arith.constant 1 : index
    %c0_38 = arith.constant 0 : index
    %c0_39 = arith.constant 0 : index
    %89 = vector.load %arg0[%c1, %c0_38, %c0_39] : memref<8x8x1xf32, #tpu.memory_space<vmem>>, vector<1x8x1xf32>
    %90 = vector.shape_cast %89 : vector<1x8x1xf32> to vector<8x1xf32>
    %91 = vector.broadcast %90 : vector<8x1xf32> to vector<8x512xf32>
    %92 = arith.mulf %91, %8 : vector<8x512xf32>
    %93 = arith.addf %92, %2 : vector<8x512xf32>
    %c0_40 = arith.constant 0 : index
    %c0_41 = arith.constant 0 : index
    %94 = vector.load %arg2[%c0_40, %c0_41] : memref<128x512xf32, #tpu.memory_space<vmem>>, vector<128x512xf32>
    %cst_42 = arith.constant dense<0.000000e+00> : vector<8x512xf32>
    %95 = tpu.matmul %51, %94, %cst_42 {dimension_numbers = #tpu.dot_dimension_numbers<[1], [0], [0], [1], [0, 0, 1, 1], [], []>} : vector<8x128xf32>, vector<128x512xf32>, vector<8x512xf32> -> vector<8x512xf32>
    %96 = arith.addf %93, %95 : vector<8x512xf32>
    %97 = vector.extract_strided_slice %96 {offsets = [0, 0], sizes = [8, 128], strides = [1, 1]} : vector<8x512xf32> to vector<8x128xf32>
    %cst_43 = arith.constant 5.000000e-01 : f32
    %98 = vector.broadcast %cst_43 : f32 to vector<8x128xf32>
    %99 = arith.mulf %98, %97 : vector<8x128xf32>
    %100 = math.tanh %99 : vector<8x128xf32>
    %cst_44 = arith.constant 5.000000e-01 : f32
    %101 = vector.broadcast %cst_44 : f32 to vector<8x128xf32>
    %102 = arith.mulf %101, %100 : vector<8x128xf32>
    %cst_45 = arith.constant 5.000000e-01 : f32
    %103 = vector.broadcast %cst_45 : f32 to vector<8x128xf32>
    %104 = arith.addf %102, %103 : vector<8x128xf32>
    %105 = vector.extract_strided_slice %96 {offsets = [0, 128], sizes = [8, 128], strides = [1, 1]} : vector<8x512xf32> to vector<8x128xf32>
    %cst_46 = arith.constant 5.000000e-01 : f32
    %106 = vector.broadcast %cst_46 : f32 to vector<8x128xf32>
    %107 = arith.mulf %106, %105 : vector<8x128xf32>
    %108 = math.tanh %107 : vector<8x128xf32>
    %cst_47 = arith.constant 5.000000e-01 : f32
    %109 = vector.broadcast %cst_47 : f32 to vector<8x128xf32>
    %110 = arith.mulf %109, %108 : vector<8x128xf32>
    %cst_48 = arith.constant 5.000000e-01 : f32
    %111 = vector.broadcast %cst_48 : f32 to vector<8x128xf32>
    %112 = arith.addf %110, %111 : vector<8x128xf32>
    %113 = vector.extract_strided_slice %96 {offsets = [0, 256], sizes = [8, 128], strides = [1, 1]} : vector<8x512xf32> to vector<8x128xf32>
    %114 = math.tanh %113 : vector<8x128xf32>
    %115 = vector.extract_strided_slice %96 {offsets = [0, 384], sizes = [8, 128], strides = [1, 1]} : vector<8x512xf32> to vector<8x128xf32>
    %cst_49 = arith.constant 5.000000e-01 : f32
    %116 = vector.broadcast %cst_49 : f32 to vector<8x128xf32>
    %117 = arith.mulf %116, %115 : vector<8x128xf32>
    %118 = math.tanh %117 : vector<8x128xf32>
    %cst_50 = arith.constant 5.000000e-01 : f32
    %119 = vector.broadcast %cst_50 : f32 to vector<8x128xf32>
    %120 = arith.mulf %119, %118 : vector<8x128xf32>
    %cst_51 = arith.constant 5.000000e-01 : f32
    %121 = vector.broadcast %cst_51 : f32 to vector<8x128xf32>
    %122 = arith.addf %120, %121 : vector<8x128xf32>
    %123 = arith.mulf %112, %49 : vector<8x128xf32>
    %124 = arith.mulf %104, %114 : vector<8x128xf32>
    %125 = arith.addf %123, %124 : vector<8x128xf32>
    %126 = math.tanh %125 : vector<8x128xf32>
    %127 = arith.mulf %122, %126 : vector<8x128xf32>
    %c0_52 = arith.constant 0 : index
    %c0_53 = arith.constant 0 : index
    %128 = vector.load %arg4[%c0_52, %c0_53] : memref<128x512xf32, #tpu.memory_space<vmem>>, vector<128x512xf32>
    %cst_54 = arith.constant dense<0.000000e+00> : vector<8x512xf32>
    %129 = tpu.matmul %127, %128, %cst_54 {dimension_numbers = #tpu.dot_dimension_numbers<[1], [0], [0], [1], [0, 0, 1, 1], [], []>} : vector<8x128xf32>, vector<128x512xf32>, vector<8x512xf32> -> vector<8x512xf32>
    %130 = arith.addf %88, %129 : vector<8x512xf32>
    %131 = vector.extract_strided_slice %130 {offsets = [0, 0], sizes = [8, 128], strides = [1, 1]} : vector<8x512xf32> to vector<8x128xf32>
    %cst_55 = arith.constant 5.000000e-01 : f32
    %132 = vector.broadcast %cst_55 : f32 to vector<8x128xf32>
    %133 = arith.mulf %132, %131 : vector<8x128xf32>
    %134 = math.tanh %133 : vector<8x128xf32>
    %cst_56 = arith.constant 5.000000e-01 : f32
    %135 = vector.broadcast %cst_56 : f32 to vector<8x128xf32>
    %136 = arith.mulf %135, %134 : vector<8x128xf32>
    %cst_57 = arith.constant 5.000000e-01 : f32
    %137 = vector.broadcast %cst_57 : f32 to vector<8x128xf32>
    %138 = arith.addf %136, %137 : vector<8x128xf32>
    %139 = vector.extract_strided_slice %130 {offsets = [0, 128], sizes = [8, 128], strides = [1, 1]} : vector<8x512xf32> to vector<8x128xf32>
    %cst_58 = arith.constant 5.000000e-01 : f32
    %140 = vector.broadcast %cst_58 : f32 to vector<8x128xf32>
    %141 = arith.mulf %140, %139 : vector<8x128xf32>
    %142 = math.tanh %141 : vector<8x128xf32>
    %cst_59 = arith.constant 5.000000e-01 : f32
    %143 = vector.broadcast %cst_59 : f32 to vector<8x128xf32>
    %144 = arith.mulf %143, %142 : vector<8x128xf32>
    %cst_60 = arith.constant 5.000000e-01 : f32
    %145 = vector.broadcast %cst_60 : f32 to vector<8x128xf32>
    %146 = arith.addf %144, %145 : vector<8x128xf32>
    %147 = vector.extract_strided_slice %130 {offsets = [0, 256], sizes = [8, 128], strides = [1, 1]} : vector<8x512xf32> to vector<8x128xf32>
    %148 = math.tanh %147 : vector<8x128xf32>
    %149 = vector.extract_strided_slice %130 {offsets = [0, 384], sizes = [8, 128], strides = [1, 1]} : vector<8x512xf32> to vector<8x128xf32>
    %cst_61 = arith.constant 5.000000e-01 : f32
    %150 = vector.broadcast %cst_61 : f32 to vector<8x128xf32>
    %151 = arith.mulf %150, %149 : vector<8x128xf32>
    %152 = math.tanh %151 : vector<8x128xf32>
    %cst_62 = arith.constant 5.000000e-01 : f32
    %153 = vector.broadcast %cst_62 : f32 to vector<8x128xf32>
    %154 = arith.mulf %153, %152 : vector<8x128xf32>
    %cst_63 = arith.constant 5.000000e-01 : f32
    %155 = vector.broadcast %cst_63 : f32 to vector<8x128xf32>
    %156 = arith.addf %154, %155 : vector<8x128xf32>
    %157 = arith.mulf %146, %83 : vector<8x128xf32>
    %158 = arith.mulf %138, %148 : vector<8x128xf32>
    %159 = arith.addf %157, %158 : vector<8x128xf32>
    %160 = math.tanh %159 : vector<8x128xf32>
    %161 = arith.mulf %156, %160 : vector<8x128xf32>
    %c0_64 = arith.constant 0 : index
    %c0_65 = arith.constant 0 : index
    %162 = vector.load %arg5[%c0_64, %c0_65] : memref<128x512xf32, #tpu.memory_space<vmem>>, vector<128x512xf32>
    %cst_66 = arith.constant dense<0.000000e+00> : vector<8x512xf32>
    %163 = tpu.matmul %161, %162, %cst_66 {dimension_numbers = #tpu.dot_dimension_numbers<[1], [0], [0], [1], [0, 0, 1, 1], [], []>} : vector<8x128xf32>, vector<128x512xf32>, vector<8x512xf32> -> vector<8x512xf32>
    %164 = arith.addf %163, %5 : vector<8x512xf32>
    %c2 = arith.constant 2 : index
    %c0_67 = arith.constant 0 : index
    %c0_68 = arith.constant 0 : index
    %165 = vector.load %arg0[%c2, %c0_67, %c0_68] : memref<8x8x1xf32, #tpu.memory_space<vmem>>, vector<1x8x1xf32>
    %166 = vector.shape_cast %165 : vector<1x8x1xf32> to vector<8x1xf32>
    %167 = vector.broadcast %166 : vector<8x1xf32> to vector<8x512xf32>
    %168 = arith.mulf %167, %8 : vector<8x512xf32>
    %169 = arith.addf %168, %2 : vector<8x512xf32>
    %c0_69 = arith.constant 0 : index
    %c0_70 = arith.constant 0 : index
    %170 = vector.load %arg2[%c0_69, %c0_70] : memref<128x512xf32, #tpu.memory_space<vmem>>, vector<128x512xf32>
    %cst_71 = arith.constant dense<0.000000e+00> : vector<8x512xf32>
    %171 = tpu.matmul %127, %170, %cst_71 {dimension_numbers = #tpu.dot_dimension_numbers<[1], [0], [0], [1], [0, 0, 1, 1], [], []>} : vector<8x128xf32>, vector<128x512xf32>, vector<8x512xf32> -> vector<8x512xf32>
    %172 = arith.addf %169, %171 : vector<8x512xf32>
    %173 = vector.extract_strided_slice %172 {offsets = [0, 0], sizes = [8, 128], strides = [1, 1]} : vector<8x512xf32> to vector<8x128xf32>
    %cst_72 = arith.constant 5.000000e-01 : f32
    %174 = vector.broadcast %cst_72 : f32 to vector<8x128xf32>
    %175 = arith.mulf %174, %173 : vector<8x128xf32>
    %176 = math.tanh %175 : vector<8x128xf32>
    %cst_73 = arith.constant 5.000000e-01 : f32
    %177 = vector.broadcast %cst_73 : f32 to vector<8x128xf32>
    %178 = arith.mulf %177, %176 : vector<8x128xf32>
    %cst_74 = arith.constant 5.000000e-01 : f32
    %179 = vector.broadcast %cst_74 : f32 to vector<8x128xf32>
    %180 = arith.addf %178, %179 : vector<8x128xf32>
    %181 = vector.extract_strided_slice %172 {offsets = [0, 128], sizes = [8, 128], strides = [1, 1]} : vector<8x512xf32> to vector<8x128xf32>
    %cst_75 = arith.constant 5.000000e-01 : f32
    %182 = vector.broadcast %cst_75 : f32 to vector<8x128xf32>
    %183 = arith.mulf %182, %181 : vector<8x128xf32>
    %184 = math.tanh %183 : vector<8x128xf32>
    %cst_76 = arith.constant 5.000000e-01 : f32
    %185 = vector.broadcast %cst_76 : f32 to vector<8x128xf32>
    %186 = arith.mulf %185, %184 : vector<8x128xf32>
    %cst_77 = arith.constant 5.000000e-01 : f32
    %187 = vector.broadcast %cst_77 : f32 to vector<8x128xf32>
    %188 = arith.addf %186, %187 : vector<8x128xf32>
    %189 = vector.extract_strided_slice %172 {offsets = [0, 256], sizes = [8, 128], strides = [1, 1]} : vector<8x512xf32> to vector<8x128xf32>
    %190 = math.tanh %189 : vector<8x128xf32>
    %191 = vector.extract_strided_slice %172 {offsets = [0, 384], sizes = [8, 128], strides = [1, 1]} : vector<8x512xf32> to vector<8x128xf32>
    %cst_78 = arith.constant 5.000000e-01 : f32
    %192 = vector.broadcast %cst_78 : f32 to vector<8x128xf32>
    %193 = arith.mulf %192, %191 : vector<8x128xf32>
    %194 = math.tanh %193 : vector<8x128xf32>
    %cst_79 = arith.constant 5.000000e-01 : f32
    %195 = vector.broadcast %cst_79 : f32 to vector<8x128xf32>
    %196 = arith.mulf %195, %194 : vector<8x128xf32>
    %cst_80 = arith.constant 5.000000e-01 : f32
    %197 = vector.broadcast %cst_80 : f32 to vector<8x128xf32>
    %198 = arith.addf %196, %197 : vector<8x128xf32>
    %199 = arith.mulf %188, %125 : vector<8x128xf32>
    %200 = arith.mulf %180, %190 : vector<8x128xf32>
    %201 = arith.addf %199, %200 : vector<8x128xf32>
    %202 = math.tanh %201 : vector<8x128xf32>
    %203 = arith.mulf %198, %202 : vector<8x128xf32>
    %c0_81 = arith.constant 0 : index
    %c0_82 = arith.constant 0 : index
    %204 = vector.load %arg4[%c0_81, %c0_82] : memref<128x512xf32, #tpu.memory_space<vmem>>, vector<128x512xf32>
    %cst_83 = arith.constant dense<0.000000e+00> : vector<8x512xf32>
    %205 = tpu.matmul %203, %204, %cst_83 {dimension_numbers = #tpu.dot_dimension_numbers<[1], [0], [0], [1], [0, 0, 1, 1], [], []>} : vector<8x128xf32>, vector<128x512xf32>, vector<8x512xf32> -> vector<8x512xf32>
    %206 = arith.addf %164, %205 : vector<8x512xf32>
    %207 = vector.extract_strided_slice %206 {offsets = [0, 0], sizes = [8, 128], strides = [1, 1]} : vector<8x512xf32> to vector<8x128xf32>
    %cst_84 = arith.constant 5.000000e-01 : f32
    %208 = vector.broadcast %cst_84 : f32 to vector<8x128xf32>
    %209 = arith.mulf %208, %207 : vector<8x128xf32>
    %210 = math.tanh %209 : vector<8x128xf32>
    %cst_85 = arith.constant 5.000000e-01 : f32
    %211 = vector.broadcast %cst_85 : f32 to vector<8x128xf32>
    %212 = arith.mulf %211, %210 : vector<8x128xf32>
    %cst_86 = arith.constant 5.000000e-01 : f32
    %213 = vector.broadcast %cst_86 : f32 to vector<8x128xf32>
    %214 = arith.addf %212, %213 : vector<8x128xf32>
    %215 = vector.extract_strided_slice %206 {offsets = [0, 128], sizes = [8, 128], strides = [1, 1]} : vector<8x512xf32> to vector<8x128xf32>
    %cst_87 = arith.constant 5.000000e-01 : f32
    %216 = vector.broadcast %cst_87 : f32 to vector<8x128xf32>
    %217 = arith.mulf %216, %215 : vector<8x128xf32>
    %218 = math.tanh %217 : vector<8x128xf32>
    %cst_88 = arith.constant 5.000000e-01 : f32
    %219 = vector.broadcast %cst_88 : f32 to vector<8x128xf32>
    %220 = arith.mulf %219, %218 : vector<8x128xf32>
    %cst_89 = arith.constant 5.000000e-01 : f32
    %221 = vector.broadcast %cst_89 : f32 to vector<8x128xf32>
    %222 = arith.addf %220, %221 : vector<8x128xf32>
    %223 = vector.extract_strided_slice %206 {offsets = [0, 256], sizes = [8, 128], strides = [1, 1]} : vector<8x512xf32> to vector<8x128xf32>
    %224 = math.tanh %223 : vector<8x128xf32>
    %225 = vector.extract_strided_slice %206 {offsets = [0, 384], sizes = [8, 128], strides = [1, 1]} : vector<8x512xf32> to vector<8x128xf32>
    %cst_90 = arith.constant 5.000000e-01 : f32
    %226 = vector.broadcast %cst_90 : f32 to vector<8x128xf32>
    %227 = arith.mulf %226, %225 : vector<8x128xf32>
    %228 = math.tanh %227 : vector<8x128xf32>
    %cst_91 = arith.constant 5.000000e-01 : f32
    %229 = vector.broadcast %cst_91 : f32 to vector<8x128xf32>
    %230 = arith.mulf %229, %228 : vector<8x128xf32>
    %cst_92 = arith.constant 5.000000e-01 : f32
    %231 = vector.broadcast %cst_92 : f32 to vector<8x128xf32>
    %232 = arith.addf %230, %231 : vector<8x128xf32>
    %233 = arith.mulf %222, %159 : vector<8x128xf32>
    %234 = arith.mulf %214, %224 : vector<8x128xf32>
    %235 = arith.addf %233, %234 : vector<8x128xf32>
    %236 = math.tanh %235 : vector<8x128xf32>
    %237 = arith.mulf %232, %236 : vector<8x128xf32>
    %c0_93 = arith.constant 0 : index
    %c0_94 = arith.constant 0 : index
    %238 = vector.load %arg5[%c0_93, %c0_94] : memref<128x512xf32, #tpu.memory_space<vmem>>, vector<128x512xf32>
    %cst_95 = arith.constant dense<0.000000e+00> : vector<8x512xf32>
    %239 = tpu.matmul %237, %238, %cst_95 {dimension_numbers = #tpu.dot_dimension_numbers<[1], [0], [0], [1], [0, 0, 1, 1], [], []>} : vector<8x128xf32>, vector<128x512xf32>, vector<8x512xf32> -> vector<8x512xf32>
    %240 = arith.addf %239, %5 : vector<8x512xf32>
    %c3 = arith.constant 3 : index
    %c0_96 = arith.constant 0 : index
    %c0_97 = arith.constant 0 : index
    %241 = vector.load %arg0[%c3, %c0_96, %c0_97] : memref<8x8x1xf32, #tpu.memory_space<vmem>>, vector<1x8x1xf32>
    %242 = vector.shape_cast %241 : vector<1x8x1xf32> to vector<8x1xf32>
    %243 = vector.broadcast %242 : vector<8x1xf32> to vector<8x512xf32>
    %244 = arith.mulf %243, %8 : vector<8x512xf32>
    %245 = arith.addf %244, %2 : vector<8x512xf32>
    %c0_98 = arith.constant 0 : index
    %c0_99 = arith.constant 0 : index
    %246 = vector.load %arg2[%c0_98, %c0_99] : memref<128x512xf32, #tpu.memory_space<vmem>>, vector<128x512xf32>
    %cst_100 = arith.constant dense<0.000000e+00> : vector<8x512xf32>
    %247 = tpu.matmul %203, %246, %cst_100 {dimension_numbers = #tpu.dot_dimension_numbers<[1], [0], [0], [1], [0, 0, 1, 1], [], []>} : vector<8x128xf32>, vector<128x512xf32>, vector<8x512xf32> -> vector<8x512xf32>
    %248 = arith.addf %245, %247 : vector<8x512xf32>
    %249 = vector.extract_strided_slice %248 {offsets = [0, 0], sizes = [8, 128], strides = [1, 1]} : vector<8x512xf32> to vector<8x128xf32>
    %cst_101 = arith.constant 5.000000e-01 : f32
    %250 = vector.broadcast %cst_101 : f32 to vector<8x128xf32>
    %251 = arith.mulf %250, %249 : vector<8x128xf32>
    %252 = math.tanh %251 : vector<8x128xf32>
    %cst_102 = arith.constant 5.000000e-01 : f32
    %253 = vector.broadcast %cst_102 : f32 to vector<8x128xf32>
    %254 = arith.mulf %253, %252 : vector<8x128xf32>
    %cst_103 = arith.constant 5.000000e-01 : f32
    %255 = vector.broadcast %cst_103 : f32 to vector<8x128xf32>
    %256 = arith.addf %254, %255 : vector<8x128xf32>
    %257 = vector.extract_strided_slice %248 {offsets = [0, 128], sizes = [8, 128], strides = [1, 1]} : vector<8x512xf32> to vector<8x128xf32>
    %cst_104 = arith.constant 5.000000e-01 : f32
    %258 = vector.broadcast %cst_104 : f32 to vector<8x128xf32>
    %259 = arith.mulf %258, %257 : vector<8x128xf32>
    %260 = math.tanh %259 : vector<8x128xf32>
    %cst_105 = arith.constant 5.000000e-01 : f32
    %261 = vector.broadcast %cst_105 : f32 to vector<8x128xf32>
    %262 = arith.mulf %261, %260 : vector<8x128xf32>
    %cst_106 = arith.constant 5.000000e-01 : f32
    %263 = vector.broadcast %cst_106 : f32 to vector<8x128xf32>
    %264 = arith.addf %262, %263 : vector<8x128xf32>
    %265 = vector.extract_strided_slice %248 {offsets = [0, 256], sizes = [8, 128], strides = [1, 1]} : vector<8x512xf32> to vector<8x128xf32>
    %266 = math.tanh %265 : vector<8x128xf32>
    %267 = vector.extract_strided_slice %248 {offsets = [0, 384], sizes = [8, 128], strides = [1, 1]} : vector<8x512xf32> to vector<8x128xf32>
    %cst_107 = arith.constant 5.000000e-01 : f32
    %268 = vector.broadcast %cst_107 : f32 to vector<8x128xf32>
    %269 = arith.mulf %268, %267 : vector<8x128xf32>
    %270 = math.tanh %269 : vector<8x128xf32>
    %cst_108 = arith.constant 5.000000e-01 : f32
    %271 = vector.broadcast %cst_108 : f32 to vector<8x128xf32>
    %272 = arith.mulf %271, %270 : vector<8x128xf32>
    %cst_109 = arith.constant 5.000000e-01 : f32
    %273 = vector.broadcast %cst_109 : f32 to vector<8x128xf32>
    %274 = arith.addf %272, %273 : vector<8x128xf32>
    %275 = arith.mulf %264, %201 : vector<8x128xf32>
    %276 = arith.mulf %256, %266 : vector<8x128xf32>
    %277 = arith.addf %275, %276 : vector<8x128xf32>
    %278 = math.tanh %277 : vector<8x128xf32>
    %279 = arith.mulf %274, %278 : vector<8x128xf32>
    %c0_110 = arith.constant 0 : index
    %c0_111 = arith.constant 0 : index
    %280 = vector.load %arg4[%c0_110, %c0_111] : memref<128x512xf32, #tpu.memory_space<vmem>>, vector<128x512xf32>
    %cst_112 = arith.constant dense<0.000000e+00> : vector<8x512xf32>
    %281 = tpu.matmul %279, %280, %cst_112 {dimension_numbers = #tpu.dot_dimension_numbers<[1], [0], [0], [1], [0, 0, 1, 1], [], []>} : vector<8x128xf32>, vector<128x512xf32>, vector<8x512xf32> -> vector<8x512xf32>
    %282 = arith.addf %240, %281 : vector<8x512xf32>
    %283 = vector.extract_strided_slice %282 {offsets = [0, 0], sizes = [8, 128], strides = [1, 1]} : vector<8x512xf32> to vector<8x128xf32>
    %cst_113 = arith.constant 5.000000e-01 : f32
    %284 = vector.broadcast %cst_113 : f32 to vector<8x128xf32>
    %285 = arith.mulf %284, %283 : vector<8x128xf32>
    %286 = math.tanh %285 : vector<8x128xf32>
    %cst_114 = arith.constant 5.000000e-01 : f32
    %287 = vector.broadcast %cst_114 : f32 to vector<8x128xf32>
    %288 = arith.mulf %287, %286 : vector<8x128xf32>
    %cst_115 = arith.constant 5.000000e-01 : f32
    %289 = vector.broadcast %cst_115 : f32 to vector<8x128xf32>
    %290 = arith.addf %288, %289 : vector<8x128xf32>
    %291 = vector.extract_strided_slice %282 {offsets = [0, 128], sizes = [8, 128], strides = [1, 1]} : vector<8x512xf32> to vector<8x128xf32>
    %cst_116 = arith.constant 5.000000e-01 : f32
    %292 = vector.broadcast %cst_116 : f32 to vector<8x128xf32>
    %293 = arith.mulf %292, %291 : vector<8x128xf32>
    %294 = math.tanh %293 : vector<8x128xf32>
    %cst_117 = arith.constant 5.000000e-01 : f32
    %295 = vector.broadcast %cst_117 : f32 to vector<8x128xf32>
    %296 = arith.mulf %295, %294 : vector<8x128xf32>
    %cst_118 = arith.constant 5.000000e-01 : f32
    %297 = vector.broadcast %cst_118 : f32 to vector<8x128xf32>
    %298 = arith.addf %296, %297 : vector<8x128xf32>
    %299 = vector.extract_strided_slice %282 {offsets = [0, 256], sizes = [8, 128], strides = [1, 1]} : vector<8x512xf32> to vector<8x128xf32>
    %300 = math.tanh %299 : vector<8x128xf32>
    %301 = vector.extract_strided_slice %282 {offsets = [0, 384], sizes = [8, 128], strides = [1, 1]} : vector<8x512xf32> to vector<8x128xf32>
    %cst_119 = arith.constant 5.000000e-01 : f32
    %302 = vector.broadcast %cst_119 : f32 to vector<8x128xf32>
    %303 = arith.mulf %302, %301 : vector<8x128xf32>
    %304 = math.tanh %303 : vector<8x128xf32>
    %cst_120 = arith.constant 5.000000e-01 : f32
    %305 = vector.broadcast %cst_120 : f32 to vector<8x128xf32>
    %306 = arith.mulf %305, %304 : vector<8x128xf32>
    %cst_121 = arith.constant 5.000000e-01 : f32
    %307 = vector.broadcast %cst_121 : f32 to vector<8x128xf32>
    %308 = arith.addf %306, %307 : vector<8x128xf32>
    %309 = arith.mulf %298, %235 : vector<8x128xf32>
    %310 = arith.mulf %290, %300 : vector<8x128xf32>
    %311 = arith.addf %309, %310 : vector<8x128xf32>
    %312 = math.tanh %311 : vector<8x128xf32>
    %313 = arith.mulf %308, %312 : vector<8x128xf32>
    %c0_122 = arith.constant 0 : index
    %c0_123 = arith.constant 0 : index
    %314 = vector.load %arg5[%c0_122, %c0_123] : memref<128x512xf32, #tpu.memory_space<vmem>>, vector<128x512xf32>
    %cst_124 = arith.constant dense<0.000000e+00> : vector<8x512xf32>
    %315 = tpu.matmul %313, %314, %cst_124 {dimension_numbers = #tpu.dot_dimension_numbers<[1], [0], [0], [1], [0, 0, 1, 1], [], []>} : vector<8x128xf32>, vector<128x512xf32>, vector<8x512xf32> -> vector<8x512xf32>
    %316 = arith.addf %315, %5 : vector<8x512xf32>
    %c4 = arith.constant 4 : index
    %c0_125 = arith.constant 0 : index
    %c0_126 = arith.constant 0 : index
    %317 = vector.load %arg0[%c4, %c0_125, %c0_126] : memref<8x8x1xf32, #tpu.memory_space<vmem>>, vector<1x8x1xf32>
    %318 = vector.shape_cast %317 : vector<1x8x1xf32> to vector<8x1xf32>
    %319 = vector.broadcast %318 : vector<8x1xf32> to vector<8x512xf32>
    %320 = arith.mulf %319, %8 : vector<8x512xf32>
    %321 = arith.addf %320, %2 : vector<8x512xf32>
    %c0_127 = arith.constant 0 : index
    %c0_128 = arith.constant 0 : index
    %322 = vector.load %arg2[%c0_127, %c0_128] : memref<128x512xf32, #tpu.memory_space<vmem>>, vector<128x512xf32>
    %cst_129 = arith.constant dense<0.000000e+00> : vector<8x512xf32>
    %323 = tpu.matmul %279, %322, %cst_129 {dimension_numbers = #tpu.dot_dimension_numbers<[1], [0], [0], [1], [0, 0, 1, 1], [], []>} : vector<8x128xf32>, vector<128x512xf32>, vector<8x512xf32> -> vector<8x512xf32>
    %324 = arith.addf %321, %323 : vector<8x512xf32>
    %325 = vector.extract_strided_slice %324 {offsets = [0, 0], sizes = [8, 128], strides = [1, 1]} : vector<8x512xf32> to vector<8x128xf32>
    %cst_130 = arith.constant 5.000000e-01 : f32
    %326 = vector.broadcast %cst_130 : f32 to vector<8x128xf32>
    %327 = arith.mulf %326, %325 : vector<8x128xf32>
    %328 = math.tanh %327 : vector<8x128xf32>
    %cst_131 = arith.constant 5.000000e-01 : f32
    %329 = vector.broadcast %cst_131 : f32 to vector<8x128xf32>
    %330 = arith.mulf %329, %328 : vector<8x128xf32>
    %cst_132 = arith.constant 5.000000e-01 : f32
    %331 = vector.broadcast %cst_132 : f32 to vector<8x128xf32>
    %332 = arith.addf %330, %331 : vector<8x128xf32>
    %333 = vector.extract_strided_slice %324 {offsets = [0, 128], sizes = [8, 128], strides = [1, 1]} : vector<8x512xf32> to vector<8x128xf32>
    %cst_133 = arith.constant 5.000000e-01 : f32
    %334 = vector.broadcast %cst_133 : f32 to vector<8x128xf32>
    %335 = arith.mulf %334, %333 : vector<8x128xf32>
    %336 = math.tanh %335 : vector<8x128xf32>
    %cst_134 = arith.constant 5.000000e-01 : f32
    %337 = vector.broadcast %cst_134 : f32 to vector<8x128xf32>
    %338 = arith.mulf %337, %336 : vector<8x128xf32>
    %cst_135 = arith.constant 5.000000e-01 : f32
    %339 = vector.broadcast %cst_135 : f32 to vector<8x128xf32>
    %340 = arith.addf %338, %339 : vector<8x128xf32>
    %341 = vector.extract_strided_slice %324 {offsets = [0, 256], sizes = [8, 128], strides = [1, 1]} : vector<8x512xf32> to vector<8x128xf32>
    %342 = math.tanh %341 : vector<8x128xf32>
    %343 = vector.extract_strided_slice %324 {offsets = [0, 384], sizes = [8, 128], strides = [1, 1]} : vector<8x512xf32> to vector<8x128xf32>
    %cst_136 = arith.constant 5.000000e-01 : f32
    %344 = vector.broadcast %cst_136 : f32 to vector<8x128xf32>
    %345 = arith.mulf %344, %343 : vector<8x128xf32>
    %346 = math.tanh %345 : vector<8x128xf32>
    %cst_137 = arith.constant 5.000000e-01 : f32
    %347 = vector.broadcast %cst_137 : f32 to vector<8x128xf32>
    %348 = arith.mulf %347, %346 : vector<8x128xf32>
    %cst_138 = arith.constant 5.000000e-01 : f32
    %349 = vector.broadcast %cst_138 : f32 to vector<8x128xf32>
    %350 = arith.addf %348, %349 : vector<8x128xf32>
    %351 = arith.mulf %340, %277 : vector<8x128xf32>
    %352 = arith.mulf %332, %342 : vector<8x128xf32>
    %353 = arith.addf %351, %352 : vector<8x128xf32>
    %354 = math.tanh %353 : vector<8x128xf32>
    %355 = arith.mulf %350, %354 : vector<8x128xf32>
    %c0_139 = arith.constant 0 : index
    %c0_140 = arith.constant 0 : index
    %356 = vector.load %arg4[%c0_139, %c0_140] : memref<128x512xf32, #tpu.memory_space<vmem>>, vector<128x512xf32>
    %cst_141 = arith.constant dense<0.000000e+00> : vector<8x512xf32>
    %357 = tpu.matmul %355, %356, %cst_141 {dimension_numbers = #tpu.dot_dimension_numbers<[1], [0], [0], [1], [0, 0, 1, 1], [], []>} : vector<8x128xf32>, vector<128x512xf32>, vector<8x512xf32> -> vector<8x512xf32>
    %358 = arith.addf %316, %357 : vector<8x512xf32>
    %359 = vector.extract_strided_slice %358 {offsets = [0, 0], sizes = [8, 128], strides = [1, 1]} : vector<8x512xf32> to vector<8x128xf32>
    %cst_142 = arith.constant 5.000000e-01 : f32
    %360 = vector.broadcast %cst_142 : f32 to vector<8x128xf32>
    %361 = arith.mulf %360, %359 : vector<8x128xf32>
    %362 = math.tanh %361 : vector<8x128xf32>
    %cst_143 = arith.constant 5.000000e-01 : f32
    %363 = vector.broadcast %cst_143 : f32 to vector<8x128xf32>
    %364 = arith.mulf %363, %362 : vector<8x128xf32>
    %cst_144 = arith.constant 5.000000e-01 : f32
    %365 = vector.broadcast %cst_144 : f32 to vector<8x128xf32>
    %366 = arith.addf %364, %365 : vector<8x128xf32>
    %367 = vector.extract_strided_slice %358 {offsets = [0, 128], sizes = [8, 128], strides = [1, 1]} : vector<8x512xf32> to vector<8x128xf32>
    %cst_145 = arith.constant 5.000000e-01 : f32
    %368 = vector.broadcast %cst_145 : f32 to vector<8x128xf32>
    %369 = arith.mulf %368, %367 : vector<8x128xf32>
    %370 = math.tanh %369 : vector<8x128xf32>
    %cst_146 = arith.constant 5.000000e-01 : f32
    %371 = vector.broadcast %cst_146 : f32 to vector<8x128xf32>
    %372 = arith.mulf %371, %370 : vector<8x128xf32>
    %cst_147 = arith.constant 5.000000e-01 : f32
    %373 = vector.broadcast %cst_147 : f32 to vector<8x128xf32>
    %374 = arith.addf %372, %373 : vector<8x128xf32>
    %375 = vector.extract_strided_slice %358 {offsets = [0, 256], sizes = [8, 128], strides = [1, 1]} : vector<8x512xf32> to vector<8x128xf32>
    %376 = math.tanh %375 : vector<8x128xf32>
    %377 = vector.extract_strided_slice %358 {offsets = [0, 384], sizes = [8, 128], strides = [1, 1]} : vector<8x512xf32> to vector<8x128xf32>
    %cst_148 = arith.constant 5.000000e-01 : f32
    %378 = vector.broadcast %cst_148 : f32 to vector<8x128xf32>
    %379 = arith.mulf %378, %377 : vector<8x128xf32>
    %380 = math.tanh %379 : vector<8x128xf32>
    %cst_149 = arith.constant 5.000000e-01 : f32
    %381 = vector.broadcast %cst_149 : f32 to vector<8x128xf32>
    %382 = arith.mulf %381, %380 : vector<8x128xf32>
    %cst_150 = arith.constant 5.000000e-01 : f32
    %383 = vector.broadcast %cst_150 : f32 to vector<8x128xf32>
    %384 = arith.addf %382, %383 : vector<8x128xf32>
    %385 = arith.mulf %374, %311 : vector<8x128xf32>
    %386 = arith.mulf %366, %376 : vector<8x128xf32>
    %387 = arith.addf %385, %386 : vector<8x128xf32>
    %388 = math.tanh %387 : vector<8x128xf32>
    %389 = arith.mulf %384, %388 : vector<8x128xf32>
    %c0_151 = arith.constant 0 : index
    %c0_152 = arith.constant 0 : index
    %390 = vector.load %arg5[%c0_151, %c0_152] : memref<128x512xf32, #tpu.memory_space<vmem>>, vector<128x512xf32>
    %cst_153 = arith.constant dense<0.000000e+00> : vector<8x512xf32>
    %391 = tpu.matmul %389, %390, %cst_153 {dimension_numbers = #tpu.dot_dimension_numbers<[1], [0], [0], [1], [0, 0, 1, 1], [], []>} : vector<8x128xf32>, vector<128x512xf32>, vector<8x512xf32> -> vector<8x512xf32>
    %392 = arith.addf %391, %5 : vector<8x512xf32>
    %c5 = arith.constant 5 : index
    %c0_154 = arith.constant 0 : index
    %c0_155 = arith.constant 0 : index
    %393 = vector.load %arg0[%c5, %c0_154, %c0_155] : memref<8x8x1xf32, #tpu.memory_space<vmem>>, vector<1x8x1xf32>
    %394 = vector.shape_cast %393 : vector<1x8x1xf32> to vector<8x1xf32>
    %395 = vector.broadcast %394 : vector<8x1xf32> to vector<8x512xf32>
    %396 = arith.mulf %395, %8 : vector<8x512xf32>
    %397 = arith.addf %396, %2 : vector<8x512xf32>
    %c0_156 = arith.constant 0 : index
    %c0_157 = arith.constant 0 : index
    %398 = vector.load %arg2[%c0_156, %c0_157] : memref<128x512xf32, #tpu.memory_space<vmem>>, vector<128x512xf32>
    %cst_158 = arith.constant dense<0.000000e+00> : vector<8x512xf32>
    %399 = tpu.matmul %355, %398, %cst_158 {dimension_numbers = #tpu.dot_dimension_numbers<[1], [0], [0], [1], [0, 0, 1, 1], [], []>} : vector<8x128xf32>, vector<128x512xf32>, vector<8x512xf32> -> vector<8x512xf32>
    %400 = arith.addf %397, %399 : vector<8x512xf32>
    %401 = vector.extract_strided_slice %400 {offsets = [0, 0], sizes = [8, 128], strides = [1, 1]} : vector<8x512xf32> to vector<8x128xf32>
    %cst_159 = arith.constant 5.000000e-01 : f32
    %402 = vector.broadcast %cst_159 : f32 to vector<8x128xf32>
    %403 = arith.mulf %402, %401 : vector<8x128xf32>
    %404 = math.tanh %403 : vector<8x128xf32>
    %cst_160 = arith.constant 5.000000e-01 : f32
    %405 = vector.broadcast %cst_160 : f32 to vector<8x128xf32>
    %406 = arith.mulf %405, %404 : vector<8x128xf32>
    %cst_161 = arith.constant 5.000000e-01 : f32
    %407 = vector.broadcast %cst_161 : f32 to vector<8x128xf32>
    %408 = arith.addf %406, %407 : vector<8x128xf32>
    %409 = vector.extract_strided_slice %400 {offsets = [0, 128], sizes = [8, 128], strides = [1, 1]} : vector<8x512xf32> to vector<8x128xf32>
    %cst_162 = arith.constant 5.000000e-01 : f32
    %410 = vector.broadcast %cst_162 : f32 to vector<8x128xf32>
    %411 = arith.mulf %410, %409 : vector<8x128xf32>
    %412 = math.tanh %411 : vector<8x128xf32>
    %cst_163 = arith.constant 5.000000e-01 : f32
    %413 = vector.broadcast %cst_163 : f32 to vector<8x128xf32>
    %414 = arith.mulf %413, %412 : vector<8x128xf32>
    %cst_164 = arith.constant 5.000000e-01 : f32
    %415 = vector.broadcast %cst_164 : f32 to vector<8x128xf32>
    %416 = arith.addf %414, %415 : vector<8x128xf32>
    %417 = vector.extract_strided_slice %400 {offsets = [0, 256], sizes = [8, 128], strides = [1, 1]} : vector<8x512xf32> to vector<8x128xf32>
    %418 = math.tanh %417 : vector<8x128xf32>
    %419 = vector.extract_strided_slice %400 {offsets = [0, 384], sizes = [8, 128], strides = [1, 1]} : vector<8x512xf32> to vector<8x128xf32>
    %cst_165 = arith.constant 5.000000e-01 : f32
    %420 = vector.broadcast %cst_165 : f32 to vector<8x128xf32>
    %421 = arith.mulf %420, %419 : vector<8x128xf32>
    %422 = math.tanh %421 : vector<8x128xf32>
    %cst_166 = arith.constant 5.000000e-01 : f32
    %423 = vector.broadcast %cst_166 : f32 to vector<8x128xf32>
    %424 = arith.mulf %423, %422 : vector<8x128xf32>
    %cst_167 = arith.constant 5.000000e-01 : f32
    %425 = vector.broadcast %cst_167 : f32 to vector<8x128xf32>
    %426 = arith.addf %424, %425 : vector<8x128xf32>
    %427 = arith.mulf %416, %353 : vector<8x128xf32>
    %428 = arith.mulf %408, %418 : vector<8x128xf32>
    %429 = arith.addf %427, %428 : vector<8x128xf32>
    %430 = math.tanh %429 : vector<8x128xf32>
    %431 = arith.mulf %426, %430 : vector<8x128xf32>
    %c0_168 = arith.constant 0 : index
    %c0_169 = arith.constant 0 : index
    %432 = vector.load %arg4[%c0_168, %c0_169] : memref<128x512xf32, #tpu.memory_space<vmem>>, vector<128x512xf32>
    %cst_170 = arith.constant dense<0.000000e+00> : vector<8x512xf32>
    %433 = tpu.matmul %431, %432, %cst_170 {dimension_numbers = #tpu.dot_dimension_numbers<[1], [0], [0], [1], [0, 0, 1, 1], [], []>} : vector<8x128xf32>, vector<128x512xf32>, vector<8x512xf32> -> vector<8x512xf32>
    %434 = arith.addf %392, %433 : vector<8x512xf32>
    %435 = vector.extract_strided_slice %434 {offsets = [0, 0], sizes = [8, 128], strides = [1, 1]} : vector<8x512xf32> to vector<8x128xf32>
    %cst_171 = arith.constant 5.000000e-01 : f32
    %436 = vector.broadcast %cst_171 : f32 to vector<8x128xf32>
    %437 = arith.mulf %436, %435 : vector<8x128xf32>
    %438 = math.tanh %437 : vector<8x128xf32>
    %cst_172 = arith.constant 5.000000e-01 : f32
    %439 = vector.broadcast %cst_172 : f32 to vector<8x128xf32>
    %440 = arith.mulf %439, %438 : vector<8x128xf32>
    %cst_173 = arith.constant 5.000000e-01 : f32
    %441 = vector.broadcast %cst_173 : f32 to vector<8x128xf32>
    %442 = arith.addf %440, %441 : vector<8x128xf32>
    %443 = vector.extract_strided_slice %434 {offsets = [0, 128], sizes = [8, 128], strides = [1, 1]} : vector<8x512xf32> to vector<8x128xf32>
    %cst_174 = arith.constant 5.000000e-01 : f32
    %444 = vector.broadcast %cst_174 : f32 to vector<8x128xf32>
    %445 = arith.mulf %444, %443 : vector<8x128xf32>
    %446 = math.tanh %445 : vector<8x128xf32>
    %cst_175 = arith.constant 5.000000e-01 : f32
    %447 = vector.broadcast %cst_175 : f32 to vector<8x128xf32>
    %448 = arith.mulf %447, %446 : vector<8x128xf32>
    %cst_176 = arith.constant 5.000000e-01 : f32
    %449 = vector.broadcast %cst_176 : f32 to vector<8x128xf32>
    %450 = arith.addf %448, %449 : vector<8x128xf32>
    %451 = vector.extract_strided_slice %434 {offsets = [0, 256], sizes = [8, 128], strides = [1, 1]} : vector<8x512xf32> to vector<8x128xf32>
    %452 = math.tanh %451 : vector<8x128xf32>
    %453 = vector.extract_strided_slice %434 {offsets = [0, 384], sizes = [8, 128], strides = [1, 1]} : vector<8x512xf32> to vector<8x128xf32>
    %cst_177 = arith.constant 5.000000e-01 : f32
    %454 = vector.broadcast %cst_177 : f32 to vector<8x128xf32>
    %455 = arith.mulf %454, %453 : vector<8x128xf32>
    %456 = math.tanh %455 : vector<8x128xf32>
    %cst_178 = arith.constant 5.000000e-01 : f32
    %457 = vector.broadcast %cst_178 : f32 to vector<8x128xf32>
    %458 = arith.mulf %457, %456 : vector<8x128xf32>
    %cst_179 = arith.constant 5.000000e-01 : f32
    %459 = vector.broadcast %cst_179 : f32 to vector<8x128xf32>
    %460 = arith.addf %458, %459 : vector<8x128xf32>
    %461 = arith.mulf %450, %387 : vector<8x128xf32>
    %462 = arith.mulf %442, %452 : vector<8x128xf32>
    %463 = arith.addf %461, %462 : vector<8x128xf32>
    %464 = math.tanh %463 : vector<8x128xf32>
    %465 = arith.mulf %460, %464 : vector<8x128xf32>
    %c0_180 = arith.constant 0 : index
    %c0_181 = arith.constant 0 : index
    %466 = vector.load %arg5[%c0_180, %c0_181] : memref<128x512xf32, #tpu.memory_space<vmem>>, vector<128x512xf32>
    %cst_182 = arith.constant dense<0.000000e+00> : vector<8x512xf32>
    %467 = tpu.matmul %465, %466, %cst_182 {dimension_numbers = #tpu.dot_dimension_numbers<[1], [0], [0], [1], [0, 0, 1, 1], [], []>} : vector<8x128xf32>, vector<128x512xf32>, vector<8x512xf32> -> vector<8x512xf32>
    %468 = arith.addf %467, %5 : vector<8x512xf32>
    %c6 = arith.constant 6 : index
    %c0_183 = arith.constant 0 : index
    %c0_184 = arith.constant 0 : index
    %469 = vector.load %arg0[%c6, %c0_183, %c0_184] : memref<8x8x1xf32, #tpu.memory_space<vmem>>, vector<1x8x1xf32>
    %470 = vector.shape_cast %469 : vector<1x8x1xf32> to vector<8x1xf32>
    %471 = vector.broadcast %470 : vector<8x1xf32> to vector<8x512xf32>
    %472 = arith.mulf %471, %8 : vector<8x512xf32>
    %473 = arith.addf %472, %2 : vector<8x512xf32>
    %c0_185 = arith.constant 0 : index
    %c0_186 = arith.constant 0 : index
    %474 = vector.load %arg2[%c0_185, %c0_186] : memref<128x512xf32, #tpu.memory_space<vmem>>, vector<128x512xf32>
    %cst_187 = arith.constant dense<0.000000e+00> : vector<8x512xf32>
    %475 = tpu.matmul %431, %474, %cst_187 {dimension_numbers = #tpu.dot_dimension_numbers<[1], [0], [0], [1], [0, 0, 1, 1], [], []>} : vector<8x128xf32>, vector<128x512xf32>, vector<8x512xf32> -> vector<8x512xf32>
    %476 = arith.addf %473, %475 : vector<8x512xf32>
    %477 = vector.extract_strided_slice %476 {offsets = [0, 0], sizes = [8, 128], strides = [1, 1]} : vector<8x512xf32> to vector<8x128xf32>
    %cst_188 = arith.constant 5.000000e-01 : f32
    %478 = vector.broadcast %cst_188 : f32 to vector<8x128xf32>
    %479 = arith.mulf %478, %477 : vector<8x128xf32>
    %480 = math.tanh %479 : vector<8x128xf32>
    %cst_189 = arith.constant 5.000000e-01 : f32
    %481 = vector.broadcast %cst_189 : f32 to vector<8x128xf32>
    %482 = arith.mulf %481, %480 : vector<8x128xf32>
    %cst_190 = arith.constant 5.000000e-01 : f32
    %483 = vector.broadcast %cst_190 : f32 to vector<8x128xf32>
    %484 = arith.addf %482, %483 : vector<8x128xf32>
    %485 = vector.extract_strided_slice %476 {offsets = [0, 128], sizes = [8, 128], strides = [1, 1]} : vector<8x512xf32> to vector<8x128xf32>
    %cst_191 = arith.constant 5.000000e-01 : f32
    %486 = vector.broadcast %cst_191 : f32 to vector<8x128xf32>
    %487 = arith.mulf %486, %485 : vector<8x128xf32>
    %488 = math.tanh %487 : vector<8x128xf32>
    %cst_192 = arith.constant 5.000000e-01 : f32
    %489 = vector.broadcast %cst_192 : f32 to vector<8x128xf32>
    %490 = arith.mulf %489, %488 : vector<8x128xf32>
    %cst_193 = arith.constant 5.000000e-01 : f32
    %491 = vector.broadcast %cst_193 : f32 to vector<8x128xf32>
    %492 = arith.addf %490, %491 : vector<8x128xf32>
    %493 = vector.extract_strided_slice %476 {offsets = [0, 256], sizes = [8, 128], strides = [1, 1]} : vector<8x512xf32> to vector<8x128xf32>
    %494 = math.tanh %493 : vector<8x128xf32>
    %495 = vector.extract_strided_slice %476 {offsets = [0, 384], sizes = [8, 128], strides = [1, 1]} : vector<8x512xf32> to vector<8x128xf32>
    %cst_194 = arith.constant 5.000000e-01 : f32
    %496 = vector.broadcast %cst_194 : f32 to vector<8x128xf32>
    %497 = arith.mulf %496, %495 : vector<8x128xf32>
    %498 = math.tanh %497 : vector<8x128xf32>
    %cst_195 = arith.constant 5.000000e-01 : f32
    %499 = vector.broadcast %cst_195 : f32 to vector<8x128xf32>
    %500 = arith.mulf %499, %498 : vector<8x128xf32>
    %cst_196 = arith.constant 5.000000e-01 : f32
    %501 = vector.broadcast %cst_196 : f32 to vector<8x128xf32>
    %502 = arith.addf %500, %501 : vector<8x128xf32>
    %503 = arith.mulf %492, %429 : vector<8x128xf32>
    %504 = arith.mulf %484, %494 : vector<8x128xf32>
    %505 = arith.addf %503, %504 : vector<8x128xf32>
    %506 = math.tanh %505 : vector<8x128xf32>
    %507 = arith.mulf %502, %506 : vector<8x128xf32>
    %c0_197 = arith.constant 0 : index
    %c0_198 = arith.constant 0 : index
    %508 = vector.load %arg4[%c0_197, %c0_198] : memref<128x512xf32, #tpu.memory_space<vmem>>, vector<128x512xf32>
    %cst_199 = arith.constant dense<0.000000e+00> : vector<8x512xf32>
    %509 = tpu.matmul %507, %508, %cst_199 {dimension_numbers = #tpu.dot_dimension_numbers<[1], [0], [0], [1], [0, 0, 1, 1], [], []>} : vector<8x128xf32>, vector<128x512xf32>, vector<8x512xf32> -> vector<8x512xf32>
    %510 = arith.addf %468, %509 : vector<8x512xf32>
    %511 = vector.extract_strided_slice %510 {offsets = [0, 0], sizes = [8, 128], strides = [1, 1]} : vector<8x512xf32> to vector<8x128xf32>
    %cst_200 = arith.constant 5.000000e-01 : f32
    %512 = vector.broadcast %cst_200 : f32 to vector<8x128xf32>
    %513 = arith.mulf %512, %511 : vector<8x128xf32>
    %514 = math.tanh %513 : vector<8x128xf32>
    %cst_201 = arith.constant 5.000000e-01 : f32
    %515 = vector.broadcast %cst_201 : f32 to vector<8x128xf32>
    %516 = arith.mulf %515, %514 : vector<8x128xf32>
    %cst_202 = arith.constant 5.000000e-01 : f32
    %517 = vector.broadcast %cst_202 : f32 to vector<8x128xf32>
    %518 = arith.addf %516, %517 : vector<8x128xf32>
    %519 = vector.extract_strided_slice %510 {offsets = [0, 128], sizes = [8, 128], strides = [1, 1]} : vector<8x512xf32> to vector<8x128xf32>
    %cst_203 = arith.constant 5.000000e-01 : f32
    %520 = vector.broadcast %cst_203 : f32 to vector<8x128xf32>
    %521 = arith.mulf %520, %519 : vector<8x128xf32>
    %522 = math.tanh %521 : vector<8x128xf32>
    %cst_204 = arith.constant 5.000000e-01 : f32
    %523 = vector.broadcast %cst_204 : f32 to vector<8x128xf32>
    %524 = arith.mulf %523, %522 : vector<8x128xf32>
    %cst_205 = arith.constant 5.000000e-01 : f32
    %525 = vector.broadcast %cst_205 : f32 to vector<8x128xf32>
    %526 = arith.addf %524, %525 : vector<8x128xf32>
    %527 = vector.extract_strided_slice %510 {offsets = [0, 256], sizes = [8, 128], strides = [1, 1]} : vector<8x512xf32> to vector<8x128xf32>
    %528 = math.tanh %527 : vector<8x128xf32>
    %529 = vector.extract_strided_slice %510 {offsets = [0, 384], sizes = [8, 128], strides = [1, 1]} : vector<8x512xf32> to vector<8x128xf32>
    %cst_206 = arith.constant 5.000000e-01 : f32
    %530 = vector.broadcast %cst_206 : f32 to vector<8x128xf32>
    %531 = arith.mulf %530, %529 : vector<8x128xf32>
    %532 = math.tanh %531 : vector<8x128xf32>
    %cst_207 = arith.constant 5.000000e-01 : f32
    %533 = vector.broadcast %cst_207 : f32 to vector<8x128xf32>
    %534 = arith.mulf %533, %532 : vector<8x128xf32>
    %cst_208 = arith.constant 5.000000e-01 : f32
    %535 = vector.broadcast %cst_208 : f32 to vector<8x128xf32>
    %536 = arith.addf %534, %535 : vector<8x128xf32>
    %537 = arith.mulf %526, %463 : vector<8x128xf32>
    %538 = arith.mulf %518, %528 : vector<8x128xf32>
    %539 = arith.addf %537, %538 : vector<8x128xf32>
    %540 = math.tanh %539 : vector<8x128xf32>
    %541 = arith.mulf %536, %540 : vector<8x128xf32>
    %c0_209 = arith.constant 0 : index
    %c0_210 = arith.constant 0 : index
    %542 = vector.load %arg5[%c0_209, %c0_210] : memref<128x512xf32, #tpu.memory_space<vmem>>, vector<128x512xf32>
    %cst_211 = arith.constant dense<0.000000e+00> : vector<8x512xf32>
    %543 = tpu.matmul %541, %542, %cst_211 {dimension_numbers = #tpu.dot_dimension_numbers<[1], [0], [0], [1], [0, 0, 1, 1], [], []>} : vector<8x128xf32>, vector<128x512xf32>, vector<8x512xf32> -> vector<8x512xf32>
    %544 = arith.addf %543, %5 : vector<8x512xf32>
    %c7 = arith.constant 7 : index
    %c0_212 = arith.constant 0 : index
    %c0_213 = arith.constant 0 : index
    %545 = vector.load %arg0[%c7, %c0_212, %c0_213] : memref<8x8x1xf32, #tpu.memory_space<vmem>>, vector<1x8x1xf32>
    %546 = vector.shape_cast %545 : vector<1x8x1xf32> to vector<8x1xf32>
    %547 = vector.broadcast %546 : vector<8x1xf32> to vector<8x512xf32>
    %548 = arith.mulf %547, %8 : vector<8x512xf32>
    %549 = arith.addf %548, %2 : vector<8x512xf32>
    %c0_214 = arith.constant 0 : index
    %c0_215 = arith.constant 0 : index
    %550 = vector.load %arg2[%c0_214, %c0_215] : memref<128x512xf32, #tpu.memory_space<vmem>>, vector<128x512xf32>
    %cst_216 = arith.constant dense<0.000000e+00> : vector<8x512xf32>
    %551 = tpu.matmul %507, %550, %cst_216 {dimension_numbers = #tpu.dot_dimension_numbers<[1], [0], [0], [1], [0, 0, 1, 1], [], []>} : vector<8x128xf32>, vector<128x512xf32>, vector<8x512xf32> -> vector<8x512xf32>
    %552 = arith.addf %549, %551 : vector<8x512xf32>
    %553 = vector.extract_strided_slice %552 {offsets = [0, 0], sizes = [8, 128], strides = [1, 1]} : vector<8x512xf32> to vector<8x128xf32>
    %cst_217 = arith.constant 5.000000e-01 : f32
    %554 = vector.broadcast %cst_217 : f32 to vector<8x128xf32>
    %555 = arith.mulf %554, %553 : vector<8x128xf32>
    %556 = math.tanh %555 : vector<8x128xf32>
    %cst_218 = arith.constant 5.000000e-01 : f32
    %557 = vector.broadcast %cst_218 : f32 to vector<8x128xf32>
    %558 = arith.mulf %557, %556 : vector<8x128xf32>
    %cst_219 = arith.constant 5.000000e-01 : f32
    %559 = vector.broadcast %cst_219 : f32 to vector<8x128xf32>
    %560 = arith.addf %558, %559 : vector<8x128xf32>
    %561 = vector.extract_strided_slice %552 {offsets = [0, 128], sizes = [8, 128], strides = [1, 1]} : vector<8x512xf32> to vector<8x128xf32>
    %cst_220 = arith.constant 5.000000e-01 : f32
    %562 = vector.broadcast %cst_220 : f32 to vector<8x128xf32>
    %563 = arith.mulf %562, %561 : vector<8x128xf32>
    %564 = math.tanh %563 : vector<8x128xf32>
    %cst_221 = arith.constant 5.000000e-01 : f32
    %565 = vector.broadcast %cst_221 : f32 to vector<8x128xf32>
    %566 = arith.mulf %565, %564 : vector<8x128xf32>
    %cst_222 = arith.constant 5.000000e-01 : f32
    %567 = vector.broadcast %cst_222 : f32 to vector<8x128xf32>
    %568 = arith.addf %566, %567 : vector<8x128xf32>
    %569 = vector.extract_strided_slice %552 {offsets = [0, 256], sizes = [8, 128], strides = [1, 1]} : vector<8x512xf32> to vector<8x128xf32>
    %570 = math.tanh %569 : vector<8x128xf32>
    %571 = vector.extract_strided_slice %552 {offsets = [0, 384], sizes = [8, 128], strides = [1, 1]} : vector<8x512xf32> to vector<8x128xf32>
    %cst_223 = arith.constant 5.000000e-01 : f32
    %572 = vector.broadcast %cst_223 : f32 to vector<8x128xf32>
    %573 = arith.mulf %572, %571 : vector<8x128xf32>
    %574 = math.tanh %573 : vector<8x128xf32>
    %cst_224 = arith.constant 5.000000e-01 : f32
    %575 = vector.broadcast %cst_224 : f32 to vector<8x128xf32>
    %576 = arith.mulf %575, %574 : vector<8x128xf32>
    %cst_225 = arith.constant 5.000000e-01 : f32
    %577 = vector.broadcast %cst_225 : f32 to vector<8x128xf32>
    %578 = arith.addf %576, %577 : vector<8x128xf32>
    %579 = arith.mulf %568, %505 : vector<8x128xf32>
    %580 = arith.mulf %560, %570 : vector<8x128xf32>
    %581 = arith.addf %579, %580 : vector<8x128xf32>
    %582 = math.tanh %581 : vector<8x128xf32>
    %583 = arith.mulf %578, %582 : vector<8x128xf32>
    %c0_226 = arith.constant 0 : index
    %c0_227 = arith.constant 0 : index
    %584 = vector.load %arg4[%c0_226, %c0_227] : memref<128x512xf32, #tpu.memory_space<vmem>>, vector<128x512xf32>
    %cst_228 = arith.constant dense<0.000000e+00> : vector<8x512xf32>
    %585 = tpu.matmul %583, %584, %cst_228 {dimension_numbers = #tpu.dot_dimension_numbers<[1], [0], [0], [1], [0, 0, 1, 1], [], []>} : vector<8x128xf32>, vector<128x512xf32>, vector<8x512xf32> -> vector<8x512xf32>
    %586 = arith.addf %544, %585 : vector<8x512xf32>
    %587 = vector.extract_strided_slice %586 {offsets = [0, 0], sizes = [8, 128], strides = [1, 1]} : vector<8x512xf32> to vector<8x128xf32>
    %cst_229 = arith.constant 5.000000e-01 : f32
    %588 = vector.broadcast %cst_229 : f32 to vector<8x128xf32>
    %589 = arith.mulf %588, %587 : vector<8x128xf32>
    %590 = math.tanh %589 : vector<8x128xf32>
    %cst_230 = arith.constant 5.000000e-01 : f32
    %591 = vector.broadcast %cst_230 : f32 to vector<8x128xf32>
    %592 = arith.mulf %591, %590 : vector<8x128xf32>
    %cst_231 = arith.constant 5.000000e-01 : f32
    %593 = vector.broadcast %cst_231 : f32 to vector<8x128xf32>
    %594 = arith.addf %592, %593 : vector<8x128xf32>
    %595 = vector.extract_strided_slice %586 {offsets = [0, 128], sizes = [8, 128], strides = [1, 1]} : vector<8x512xf32> to vector<8x128xf32>
    %cst_232 = arith.constant 5.000000e-01 : f32
    %596 = vector.broadcast %cst_232 : f32 to vector<8x128xf32>
    %597 = arith.mulf %596, %595 : vector<8x128xf32>
    %598 = math.tanh %597 : vector<8x128xf32>
    %cst_233 = arith.constant 5.000000e-01 : f32
    %599 = vector.broadcast %cst_233 : f32 to vector<8x128xf32>
    %600 = arith.mulf %599, %598 : vector<8x128xf32>
    %cst_234 = arith.constant 5.000000e-01 : f32
    %601 = vector.broadcast %cst_234 : f32 to vector<8x128xf32>
    %602 = arith.addf %600, %601 : vector<8x128xf32>
    %603 = vector.extract_strided_slice %586 {offsets = [0, 256], sizes = [8, 128], strides = [1, 1]} : vector<8x512xf32> to vector<8x128xf32>
    %604 = math.tanh %603 : vector<8x128xf32>
    %605 = vector.extract_strided_slice %586 {offsets = [0, 384], sizes = [8, 128], strides = [1, 1]} : vector<8x512xf32> to vector<8x128xf32>
    %cst_235 = arith.constant 5.000000e-01 : f32
    %606 = vector.broadcast %cst_235 : f32 to vector<8x128xf32>
    %607 = arith.mulf %606, %605 : vector<8x128xf32>
    %608 = math.tanh %607 : vector<8x128xf32>
    %cst_236 = arith.constant 5.000000e-01 : f32
    %609 = vector.broadcast %cst_236 : f32 to vector<8x128xf32>
    %610 = arith.mulf %609, %608 : vector<8x128xf32>
    %cst_237 = arith.constant 5.000000e-01 : f32
    %611 = vector.broadcast %cst_237 : f32 to vector<8x128xf32>
    %612 = arith.addf %610, %611 : vector<8x128xf32>
    %613 = arith.mulf %602, %539 : vector<8x128xf32>
    %614 = arith.mulf %594, %604 : vector<8x128xf32>
    %615 = arith.addf %613, %614 : vector<8x128xf32>
    %616 = math.tanh %615 : vector<8x128xf32>
    %617 = arith.mulf %612, %616 : vector<8x128xf32>
    %c0_238 = arith.constant 0 : index
    %c0_239 = arith.constant 0 : index
    %618 = vector.load %arg7[%c0_238, %c0_239] : memref<128x128xf32, #tpu.memory_space<vmem>>, vector<128x128xf32>
    %cst_240 = arith.constant dense<0.000000e+00> : vector<8x128xf32>
    %619 = tpu.matmul %617, %618, %cst_240 {dimension_numbers = #tpu.dot_dimension_numbers<[1], [0], [0], [1], [0, 0, 1, 1], [], []>} : vector<8x128xf32>, vector<128x128xf32>, vector<8x128xf32> -> vector<8x128xf32>
    %c0_241 = arith.constant 0 : index
    %c0_242 = arith.constant 0 : index
    %620 = vector.load %arg8[%c0_241, %c0_242] : memref<1x128xf32, #tpu.memory_space<vmem>>, vector<1x128xf32>
    %621 = vector.broadcast %620 : vector<1x128xf32> to vector<8x128xf32>
    %622 = arith.addf %619, %621 : vector<8x128xf32>
    %c0_243 = arith.constant 0 : index
    %c0_244 = arith.constant 0 : index
    %623 = vector.load %arg9[%c0_243, %c0_244] : memref<8x128xf32, #tpu.memory_space<vmem>>, vector<8x128xf32>
    tpu.vector_store %arg9[%c0_243, %c0_244], %622 {strides = array<i32>} : memref<8x128xf32, #tpu.memory_space<vmem>>, vector<8x128xf32>,
    return
  }
}

</mosaic_0001>

<bundles_post_ra>
// kernel: tpu_custom_call.1
= control target key start
LH: loop header
LB: loop body
LE: loop exit
PB: predicated region body
PF: predicated region fallthrough
CT: control target
= control target key end

     0   :  { %14 = vsyncpa [#allocation3], 0  ;;  %s7187_s0 = inlined_call_operand.vmem [shape: f32[8,8,1], index: 0, kind: input, shape index: {}]   ;;  %s7188_s1 = inlined_call_operand.vmem [shape: f32[1,512], index: 1, kind: input, shape index: {}]   ;;  %s7189_s2 = inlined_call_operand.hbm [shape: f32[128,512], index: 2, kind: input, shape index: {}]   ;;  %s7190_s3 = inlined_call_operand.vmem [shape: f32[1,512], index: 3, kind: input, shape index: {}]   ;;  %s7191_s4 = inlined_call_operand.hbm [shape: f32[128,512], index: 4, kind: input, shape index: {}]   ;;  %s7192_s5 = inlined_call_operand.hbm [shape: f32[128,512], index: 5, kind: input, shape index: {}]   ;;  %s7193_s6 = inlined_call_operand.vmem [shape: f32[1,512], index: 6, kind: input, shape index: {}]   ;;  %s7194_s7 = inlined_call_operand.hbm [shape: f32[128,128], index: 7, kind: input, shape index: {}]   ;;  %s7195_s8 = inlined_call_operand.vmem [shape: f32[1,128], index: 8, kind: input, shape index: {}]   ;;  %s7196_s9 = inlined_call_operand.hbm [shape: f32[8,128], index: 9, kind: output, shape index: {}]  }
   0x1   :  { %15 = vsyncpa [#allocation6], 0 }
   0x2   :  { %16 = vsyncpa [#allocation9], 0 }
   0x3   :  { %17 = vsyncpa [#allocation4], 0  ;;  %s41_s11 = sshll.u32 %s7191_s4, 4  ;;  %s3655_s12 = smov [#allocation5]   ;;  %s42_s11 = int_to_ptr.hbm [resolvable:$true] %s41_s11 }
   0x4   :  { %s43_s13 = sshll.u32 %s3655_s12, 4  ;;  %s26_s16 = sshll.u32 %s7189_s2, 4  ;;  %s44_s13 = int_to_ptr.vmem [resolvable:$true] %s43_s13  ;;  %s27_s16 = int_to_ptr.hbm [resolvable:$true] %s26_s16 }
   0x5   :  { %s3656_s17 = smov 512   ;;  %s3657_s18 = smov 32  }
   0x6   :  { %49 = dma.hbm_to_vmem [thread:$0]  %s42_s11, 8192, %s44_s13, [#allocation6], %s3656_s17, %s3656_s17, %s3657_s18  }
   0x7   :  { %s3658_s19 = smov [#allocation2]   ;;  %s54_s23 = sshll.u32 %s7192_s5, 4  ;;  %s55_s23 = int_to_ptr.hbm [resolvable:$true] %s54_s23 }
   0x8   :  { %s28_s20 = sshll.u32 %s3658_s19, 4  ;;  %s69_s25 = sshll.u32 %s7194_s7, 4  ;;  %s29_s20 = int_to_ptr.vmem [resolvable:$true] %s28_s20  ;;  %s70_s25 = int_to_ptr.hbm [resolvable:$true] %s69_s25 }
   0x9   :  { %34 = dma.hbm_to_vmem [thread:$0]  %s27_s16, 8192, %s29_s20, [#allocation3], %s3656_s17, %s3656_s17, %s3657_s18  }
   0xa   :  { %s3659_s26 = smov [#allocation7]   ;;  %s3660_s2 = smov [#allocation8]  }
   0xb   :  { %s56_s27 = sshll.u32 %s3659_s26, 4  ;;  %s71_s28 = sshll.u32 %s3660_s2, 4  ;;  %s57_s27 = int_to_ptr.vmem [resolvable:$true] %s56_s27  ;;  %s72_s28 = int_to_ptr.vmem [resolvable:$true] %s71_s28 }
   0xc   :  { %62 = dma.hbm_to_vmem [thread:$0]  %s55_s23, 8192, %s57_s27, [#allocation6], %s3656_s17, %s3656_s17, %s3657_s18  }
   0xd   :  { %s3661_s29 = smov 128   ;;  %s3662_s30 = smov 8  }
   0xe   :  { %77 = dma.hbm_to_vmem [thread:$0]  %s70_s25, 2048, %s72_s28, [#allocation9], %s3661_s29, %s3661_s29, %s3662_s30  }
   0xf   :  { %3647 = dma.done.wait [#allocation3], 8192  }
  0x10   :  { %3648 = vsyncadd [#allocation3], 4294959104 }
  0x11   :  { %3649 = dma.done.wait [#allocation6], 16384  }
  0x12   :  { %3650 = vsyncadd [#allocation6], 4294950912 }
  0x13   :  { %3651 = dma.done.wait [#allocation9], 2048  }
  0x14   :  { %3652 = vsyncadd [#allocation9], 4294965248  ;;  %v3728_v0 = vld [vmem:[#allocation7 + $0x1e0] sm:$0xff]  ;;  %v3730_v1 = vld [vmem:[#allocation7 + $0x1e8] sm:$0xff]  ;;  %s3665_s27 = smov [#allocation10]   ;;  %s2757_s30 = sshll.u32 %s7196_s9, 4  ;;  %s2758_s30 = int_to_ptr.hbm [resolvable:$true] %s2757_s30 }
  0x15   :  { %v3732_v2 = vld [vmem:[#allocation7 + $0x1f0] sm:$0xff]  ;;  %190 = vmatpush.msra.mxu0 %v3728_v0  ;;  %210 = vmatpush.msra.mxu1 %v3730_v1  ;;  %v3736_v3 = vld [vmem:[#allocation7 + $0x1f8] sm:$0xff]  ;;  %v3738_v4 = vld [vmem:[#allocation7 + $0x1c0] sm:$0xff]  ;;  %s2755_s2 = sshll.u32 %s3665_s27, 4  ;;  %s2756_s2 = int_to_ptr.vmem [resolvable:$true] %s2755_s2 }
  0x16   :  { %v3740_v5 = vld [vmem:[#allocation7 + $0x1c8] sm:$0xff]  ;;  %230 = vmatpush.msra.mxu2 %v3732_v2  ;;  %250 = vmatpush.msra.mxu3 %v3736_v3  ;;  %v3744_v6 = vld [vmem:[#allocation7 + $0x1d0] sm:$0xff]  ;;  %v3746_v7 = vld [vmem:[#allocation7 + $0x1d8] sm:$0xff] }
  0x17   :  { %v3748_v8 = vld [vmem:[#allocation7 + $0x1a0] sm:$0xff]  ;;  %191 = vmatpush.msra.mxu0 %v3738_v4  ;;  %211 = vmatpush.msra.mxu1 %v3740_v5  ;;  %v3752_v9 = vld [vmem:[#allocation7 + $0x1a8] sm:$0xff]  ;;  %v3754_v10 = vld [vmem:[#allocation7 + $0x1b0] sm:$0xff] }
  0x18   :  { %v3756_v11 = vld [vmem:[#allocation7 + $0x1b8] sm:$0xff]  ;;  %231 = vmatpush.msra.mxu2 %v3744_v6  ;;  %251 = vmatpush.msra.mxu3 %v3746_v7  ;;  %v3760_v12 = vld [vmem:[#allocation7 + $0x180] sm:$0xff]  ;;  %v3762_v13 = vld [vmem:[#allocation7 + $0x188] sm:$0xff] }
  0x19   :  { %192 = vmatpush.msra.mxu0 %v3748_v8  ;;  %212 = vmatpush.msra.mxu1 %v3752_v9  ;;  %v3766_v14 = vld [vmem:[#allocation7 + $0x190] sm:$0xff]  ;;  %v3768_v15 = vld [vmem:[#allocation7 + $0x198] sm:$0xff]  ;;  %v3772_v16 = vld [vmem:[#allocation7 + $0x160] sm:$0xff] }
  0x1a   :  { %232 = vmatpush.msra.mxu2 %v3754_v10  ;;  %252 = vmatpush.msra.mxu3 %v3756_v11  ;;  %v3774_v17 = vld [vmem:[#allocation7 + $0x168] sm:$0xff]  ;;  %v3778_v18 = vld [vmem:[#allocation7 + $0x170] sm:$0xff]  ;;  %v3780_v19 = vld [vmem:[#allocation7 + $0x178] sm:$0xff] }
  0x1b   :  { %193 = vmatpush.msra.mxu0 %v3760_v12  ;;  %213 = vmatpush.msra.mxu1 %v3762_v13  ;;  %v3784_v20 = vld [vmem:[#allocation7 + $0x140] sm:$0xff]  ;;  %v3786_v21 = vld [vmem:[#allocation7 + $0x148] sm:$0xff]  ;;  %v3790_v22 = vld [vmem:[#allocation7 + $0x150] sm:$0xff] }
  0x1c   :  { %233 = vmatpush.msra.mxu2 %v3766_v14  ;;  %253 = vmatpush.msra.mxu3 %v3768_v15  ;;  %v3792_v23 = vld [vmem:[#allocation7 + $0x158] sm:$0xff]  ;;  %v3796_v24 = vld [vmem:[#allocation7 + $0x120] sm:$0xff]  ;;  %v3798_v25 = vld [vmem:[#allocation7 + $0x128] sm:$0xff] }
  0x1d   :  { %194 = vmatpush.msra.mxu0 %v3772_v16  ;;  %214 = vmatpush.msra.mxu1 %v3774_v17  ;;  %v3802_v26 = vld [vmem:[#allocation7 + $0x130] sm:$0xff]  ;;  %v3804_v27 = vld [vmem:[#allocation7 + $0x138] sm:$0xff]  ;;  %v3808_v28 = vld [vmem:[#allocation7 + $0x100] sm:$0xff] }
  0x1e   :  { %234 = vmatpush.msra.mxu2 %v3778_v18  ;;  %254 = vmatpush.msra.mxu3 %v3780_v19  ;;  %v3810_v29 = vld [vmem:[#allocation7 + $0x108] sm:$0xff]  ;;  %v3814_v30 = vld [vmem:[#allocation7 + $0x110] sm:$0xff]  ;;  %v3816_v31 = vld [vmem:[#allocation7 + $0x118] sm:$0xff] }
  0x1f   :  { %195 = vmatpush.msra.mxu0 %v3784_v20  ;;  %215 = vmatpush.msra.mxu1 %v3786_v21  ;;  %v3820_v32 = vld [vmem:[#allocation7 + $0xe0] sm:$0xff]  ;;  %v3822_v33 = vld [vmem:[#allocation7 + $0xe8] sm:$0xff]  ;;  %v3826_v34 = vld [vmem:[#allocation7 + $0xf0] sm:$0xff] }
  0x20   :  { %235 = vmatpush.msra.mxu2 %v3790_v22  ;;  %255 = vmatpush.msra.mxu3 %v3792_v23  ;;  %v3828_v35 = vld [vmem:[#allocation7 + $0xf8] sm:$0xff]  ;;  %v3832_v36 = vld [vmem:[#allocation7 + $0xc0] sm:$0xff]  ;;  %v3834_v37 = vld [vmem:[#allocation7 + $0xc8] sm:$0xff] }
  0x21   :  { %196 = vmatpush.msra.mxu0 %v3796_v24  ;;  %216 = vmatpush.msra.mxu1 %v3798_v25  ;;  %v3838_v38 = vld [vmem:[#allocation7 + $0xd0] sm:$0xff]  ;;  %v3840_v39 = vld [vmem:[#allocation7 + $0xd8] sm:$0xff]  ;;  %v3844_v40 = vld [vmem:[#allocation7 + $0xa0] sm:$0xff] }
  0x22   :  { %236 = vmatpush.msra.mxu2 %v3802_v26  ;;  %256 = vmatpush.msra.mxu3 %v3804_v27  ;;  %v3846_v41 = vld [vmem:[#allocation7 + $0xa8] sm:$0xff]  ;;  %v3850_v42 = vld [vmem:[#allocation7 + $0xb0] sm:$0xff]  ;;  %v3852_v43 = vld [vmem:[#allocation7 + $0xb8] sm:$0xff] }
  0x23   :  { %197 = vmatpush.msra.mxu0 %v3808_v28  ;;  %217 = vmatpush.msra.mxu1 %v3810_v29  ;;  %v3856_v44 = vld [vmem:[#allocation7 + $0x80] sm:$0xff]  ;;  %v3858_v45 = vld [vmem:[#allocation7 + $0x88] sm:$0xff]  ;;  %v3862_v46 = vld [vmem:[#allocation7 + $0x90] sm:$0xff] }
  0x24   :  { %237 = vmatpush.msra.mxu2 %v3814_v30  ;;  %257 = vmatpush.msra.mxu3 %v3816_v31  ;;  %7776 = vst [vmem:[#allocation15_spill] sm:$0xff] %v3856_v44  ;;  %v3864_v47 = vld [vmem:[#allocation7 + $0x98] sm:$0xff]  ;;  %v3868_v48 = vld [vmem:[#allocation7 + $0x60] sm:$0xff]  ;;  %v3870_v49 = vld [vmem:[#allocation7 + $0x68] sm:$0xff] }
  0x25   :  { %198 = vmatpush.msra.mxu0 %v3820_v32  ;;  %218 = vmatpush.msra.mxu1 %v3822_v33  ;;  %7777 = vst [vmem:[#allocation16_spill] sm:$0xff] %v3858_v45  ;;  %v3874_v50 = vld [vmem:[#allocation7 + $0x70] sm:$0xff]  ;;  %v3876_v51 = vld [vmem:[#allocation7 + $0x78] sm:$0xff]  ;;  %v3880_v52 = vld [vmem:[#allocation7 + $0x40] sm:$0xff] }
  0x26   :  { %238 = vmatpush.msra.mxu2 %v3826_v34  ;;  %258 = vmatpush.msra.mxu3 %v3828_v35  ;;  %7778 = vst [vmem:[#allocation17_spill] sm:$0xff] %v3862_v46  ;;  %v3882_v53 = vld [vmem:[#allocation7 + $0x48] sm:$0xff]  ;;  %v3886_v54 = vld [vmem:[#allocation7 + $0x50] sm:$0xff]  ;;  %v3888_v55 = vld [vmem:[#allocation7 + $0x58] sm:$0xff] }
  0x27   :  { %199 = vmatpush.msra.mxu0 %v3832_v36  ;;  %219 = vmatpush.msra.mxu1 %v3834_v37  ;;  %7779 = vst [vmem:[#allocation18_spill] sm:$0xff] %v3864_v47  ;;  %v3892_v56 = vld [vmem:[#allocation7 + $0x20] sm:$0xff]  ;;  %v3894_v57 = vld [vmem:[#allocation7 + $0x28] sm:$0xff]  ;;  %v3898_v58 = vld [vmem:[#allocation7 + $0x30] sm:$0xff] }
  0x28   :  { %239 = vmatpush.msra.mxu2 %v3838_v38  ;;  %259 = vmatpush.msra.mxu3 %v3840_v39  ;;  %7780 = vst [vmem:[#allocation19_spill] sm:$0xff] %v3868_v48  ;;  %v3900_v59 = vld [vmem:[#allocation7 + $0x38] sm:$0xff]  ;;  %v3904_v60 = vld [vmem:[#allocation7] sm:$0xff]  ;;  %v3906_v61 = vld [vmem:[#allocation7 + $0x8] sm:$0xff] }
  0x29   :  { %200 = vmatpush.msra.mxu0 %v3844_v40  ;;  %220 = vmatpush.msra.mxu1 %v3846_v41  ;;  %7781 = vst [vmem:[#allocation20_spill] sm:$0xff] %v3870_v49  ;;  %v3910_v62 = vld [vmem:[#allocation7 + $0x10] sm:$0xff]  ;;  %v3912_v63 = vld [vmem:[#allocation7 + $0x18] sm:$0xff] }
  0x2a   :  { %240 = vmatpush.msra.mxu2 %v3850_v42  ;;  %260 = vmatpush.msra.mxu3 %v3852_v43  ;;  %7782 = vst [vmem:[#allocation21_spill] sm:$0xff] %v3874_v50 }
  0x2b   :  { %201 = vmatpush.msra.mxu0 %v3856_v44  ;;  %221 = vmatpush.msra.mxu1 %v3858_v45  ;;  %7783 = vst [vmem:[#allocation22_spill] sm:$0xff] %v3876_v51 }
  0x2c   :  { %241 = vmatpush.msra.mxu2 %v3862_v46  ;;  %261 = vmatpush.msra.mxu3 %v3864_v47  ;;  %7784 = vst [vmem:[#allocation23_spill] sm:$0xff] %v3880_v52  ;;  %v4318_v46 = vld [vmem:[#allocation5 + $0x38] sm:$0xff] }
  0x2d   :  { %7785 = vst [vmem:[#allocation24_spill] sm:$0xff] %v3882_v53  ;;  %202 = vmatpush.msra.mxu0 %v3868_v48  ;;  %222 = vmatpush.msra.mxu1 %v3870_v49  ;;  %v4300_v48 = vld [vmem:[#allocation5 + $0x50] sm:$0xff] }
  0x2e   :  { %7786 = vst [vmem:[#allocation25_spill] sm:$0xff] %v3886_v54  ;;  %242 = vmatpush.msra.mxu2 %v3874_v50  ;;  %262 = vmatpush.msra.mxu3 %v3876_v51  ;;  %v4093_v51 = vld [vmem:[#allocation2 + $0x30] sm:$0xff] }
  0x2f   :  { %7787 = vst [vmem:[#allocation26_spill] sm:$0xff] %v3888_v55  ;;  %203 = vmatpush.msra.mxu0 %v3880_v52  ;;  %223 = vmatpush.msra.mxu1 %v3882_v53  ;;  %v3916_v53 = vld [vmem:[#allocation2 + $0x1e0] sm:$0xff]  ;;  %v4089_v52 = vld [vmem:[#allocation2 + $0x28] sm:$0xff]  ;;  %v4285_v50 = vld [vmem:[#allocation5 + $0x70] sm:$0xff] }
  0x30   :  { %7788 = vst [vmem:[#allocation27_spill] sm:$0xff] %v3892_v56  ;;  %243 = vmatpush.msra.mxu2 %v3886_v54  ;;  %263 = vmatpush.msra.mxu3 %v3888_v55  ;;  %v3918_v54 = vld [vmem:[#allocation2 + $0x1e8] sm:$0xff]  ;;  %v3922_v55 = vld [vmem:[#allocation2 + $0x1f0] sm:$0xff] }
  0x31   :  { %7789 = vst [vmem:[#allocation28_spill] sm:$0xff] %v3894_v57  ;;  %204 = vmatpush.msra.mxu0 %v3892_v56  ;;  %224 = vmatpush.msra.mxu1 %v3894_v57  ;;  %v3924_v56 = vld [vmem:[#allocation2 + $0x1f8] sm:$0xff]  ;;  %v3928_v57 = vld [vmem:[#allocation2 + $0x1c0] sm:$0xff] }
  0x32   :  { %7790 = vst [vmem:[#allocation29_spill] sm:$0xff] %v3898_v58  ;;  %244 = vmatpush.msra.mxu2 %v3898_v58  ;;  %264 = vmatpush.msra.mxu3 %v3900_v59  ;;  %v3930_v58 = vld [vmem:[#allocation2 + $0x1c8] sm:$0xff] }
  0x33   :  { %7791 = vst [vmem:[#allocation30_spill] sm:$0xff] %v3900_v59  ;;  %205 = vmatpush.msra.mxu0 %v3904_v60  ;;  %225 = vmatpush.msra.mxu1 %v3906_v61  ;;  %v3934_v59 = vld [vmem:[#allocation2 + $0x1d0] sm:$0xff] }
  0x34   :  { %7792 = vst [vmem:[#allocation31_spill] sm:$0xff] %v3904_v60  ;;  %245 = vmatpush.msra.mxu2 %v3910_v62  ;;  %265 = vmatpush.msra.mxu3 %v3912_v63  ;;  %v3936_v60 = vld [vmem:[#allocation2 + $0x1d8] sm:$0xff] }
  0x35   :  { %7793 = vst [vmem:[#allocation32_spill] sm:$0xff] %v3906_v61  ;;  %348 = vmatpush.msrb.mxu0 %v3916_v53  ;;  %368 = vmatpush.msrb.mxu1 %v3918_v54  ;;  %v3940_v61 = vld [vmem:[#allocation2 + $0x1a0] sm:$0xff] }
  0x36   :  { %7794 = vst [vmem:[#allocation33_spill] sm:$0xff] %v3910_v62  ;;  %388 = vmatpush.msrb.mxu2 %v3922_v55  ;;  %408 = vmatpush.msrb.mxu3 %v3924_v56  ;;  %v3942_v62 = vld [vmem:[#allocation2 + $0x1a8] sm:$0xff] }
  0x37   :  { %7795 = vst [vmem:[#allocation34_spill] sm:$0xff] %v3912_v63  ;;  %349 = vmatpush.msrb.mxu0 %v3928_v57  ;;  %369 = vmatpush.msrb.mxu1 %v3930_v58  ;;  %v3946_v63 = vld [vmem:[#allocation2 + $0x1b0] sm:$0xff] }
  0x38   :  { %7796 = vst [vmem:[#allocation35_spill] sm:$0xff] %v3916_v53  ;;  %v3948_v53 = vld [vmem:[#allocation2 + $0x1b8] sm:$0xff]  ;;  %389 = vmatpush.msrb.mxu2 %v3934_v59  ;;  %409 = vmatpush.msrb.mxu3 %v3936_v60 }
  0x39   :  { %7797 = vst [vmem:[#allocation36_spill] sm:$0xff] %v3918_v54  ;;  %v3952_v54 = vld [vmem:[#allocation2 + $0x180] sm:$0xff]  ;;  %350 = vmatpush.msrb.mxu0 %v3940_v61  ;;  %370 = vmatpush.msrb.mxu1 %v3942_v62 }
  0x3a   :  { %7798 = vst [vmem:[#allocation37_spill] sm:$0xff] %v3922_v55  ;;  %v3954_v55 = vld [vmem:[#allocation2 + $0x188] sm:$0xff]  ;;  %390 = vmatpush.msrb.mxu2 %v3946_v63  ;;  %410 = vmatpush.msrb.mxu3 %v3948_v53 }
  0x3b   :  { %7799 = vst [vmem:[#allocation38_spill] sm:$0xff] %v3924_v56  ;;  %v3958_v56 = vld [vmem:[#allocation2 + $0x190] sm:$0xff]  ;;  %351 = vmatpush.msrb.mxu0 %v3952_v54  ;;  %371 = vmatpush.msrb.mxu1 %v3954_v55 }
  0x3c   :  { %7800 = vst [vmem:[#allocation39_spill] sm:$0xff] %v3928_v57  ;;  %v3960_v57 = vld [vmem:[#allocation2 + $0x198] sm:$0xff]  ;;  %391 = vmatpush.msrb.mxu2 %v3958_v56 }
  0x3d   :  { %7801 = vst [vmem:[#allocation40_spill] sm:$0xff] %v3930_v58  ;;  %v3964_v58 = vld [vmem:[#allocation2 + $0x160] sm:$0xff]  ;;  %411 = vmatpush.msrb.mxu3 %v3960_v57 }
  0x3e   :  { %7802 = vst [vmem:[#allocation41_spill] sm:$0xff] %v3934_v59  ;;  %v3966_v59 = vld [vmem:[#allocation2 + $0x168] sm:$0xff]  ;;  %352 = vmatpush.msrb.mxu0 %v3964_v58 }
  0x3f   :  { %7803 = vst [vmem:[#allocation42_spill] sm:$0xff] %v3936_v60  ;;  %v3970_v60 = vld [vmem:[#allocation2 + $0x170] sm:$0xff]  ;;  %372 = vmatpush.msrb.mxu1 %v3966_v59 }
  0x40   :  { %7804 = vst [vmem:[#allocation43_spill] sm:$0xff] %v3940_v61  ;;  %v3972_v61 = vld [vmem:[#allocation2 + $0x178] sm:$0xff]  ;;  %392 = vmatpush.msrb.mxu2 %v3970_v60 }
  0x41   :  { %7805 = vst [vmem:[#allocation44_spill] sm:$0xff] %v3942_v62  ;;  %v3976_v62 = vld [vmem:[#allocation2 + $0x140] sm:$0xff]  ;;  %412 = vmatpush.msrb.mxu3 %v3972_v61 }
  0x42   :  { %7806 = vst [vmem:[#allocation45_spill] sm:$0xff] %v3946_v63  ;;  %v3978_v63 = vld [vmem:[#allocation2 + $0x148] sm:$0xff]  ;;  %353 = vmatpush.msrb.mxu0 %v3976_v62 }
  0x43   :  { %7807 = vst [vmem:[#allocation46_spill] sm:$0xff] %v3948_v53  ;;  %v3982_v53 = vld [vmem:[#allocation2 + $0x150] sm:$0xff]  ;;  %373 = vmatpush.msrb.mxu1 %v3978_v63 }
  0x44   :  { %7808 = vst [vmem:[#allocation47_spill] sm:$0xff] %v3952_v54  ;;  %v3984_v54 = vld [vmem:[#allocation2 + $0x158] sm:$0xff]  ;;  %393 = vmatpush.msrb.mxu2 %v3982_v53 }
  0x45   :  { %7809 = vst [vmem:[#allocation48_spill] sm:$0xff] %v3954_v55  ;;  %v3988_v55 = vld [vmem:[#allocation2 + $0x120] sm:$0xff]  ;;  %413 = vmatpush.msrb.mxu3 %v3984_v54 }
  0x46   :  { %7810 = vst [vmem:[#allocation49_spill] sm:$0xff] %v3958_v56  ;;  %v3990_v56 = vld [vmem:[#allocation2 + $0x128] sm:$0xff]  ;;  %354 = vmatpush.msrb.mxu0 %v3988_v55 }
  0x47   :  { %7811 = vst [vmem:[#allocation50_spill] sm:$0xff] %v3960_v57  ;;  %v3994_v57 = vld [vmem:[#allocation2 + $0x130] sm:$0xff]  ;;  %374 = vmatpush.msrb.mxu1 %v3990_v56 }
  0x48   :  { %7812 = vst [vmem:[#allocation51_spill] sm:$0xff] %v3964_v58  ;;  %v3996_v58 = vld [vmem:[#allocation2 + $0x138] sm:$0xff]  ;;  %394 = vmatpush.msrb.mxu2 %v3994_v57 }
  0x49   :  { %7813 = vst [vmem:[#allocation52_spill] sm:$0xff] %v3966_v59  ;;  %v4000_v59 = vld [vmem:[#allocation2 + $0x100] sm:$0xff]  ;;  %414 = vmatpush.msrb.mxu3 %v3996_v58 }
  0x4a   :  { %7814 = vst [vmem:[#allocation53_spill] sm:$0xff] %v3970_v60  ;;  %v4002_v60 = vld [vmem:[#allocation2 + $0x108] sm:$0xff]  ;;  %355 = vmatpush.msrb.mxu0 %v4000_v59 }
  0x4b   :  { %7815 = vst [vmem:[#allocation54_spill] sm:$0xff] %v3972_v61  ;;  %v4006_v61 = vld [vmem:[#allocation2 + $0x110] sm:$0xff]  ;;  %375 = vmatpush.msrb.mxu1 %v4002_v60 }
  0x4c   :  { %7816 = vst [vmem:[#allocation55_spill] sm:$0xff] %v3976_v62  ;;  %v4008_v62 = vld [vmem:[#allocation2 + $0x118] sm:$0xff]  ;;  %395 = vmatpush.msrb.mxu2 %v4006_v61 }
  0x4d   :  { %7817 = vst [vmem:[#allocation56_spill] sm:$0xff] %v3978_v63  ;;  %v4012_v63 = vld [vmem:[#allocation2 + $0xe0] sm:$0xff]  ;;  %415 = vmatpush.msrb.mxu3 %v4008_v62 }
  0x4e   :  { %7818 = vst [vmem:[#allocation57_spill] sm:$0xff] %v3982_v53  ;;  %v4014_v53 = vld [vmem:[#allocation2 + $0xe8] sm:$0xff]  ;;  %356 = vmatpush.msrb.mxu0 %v4012_v63 }
  0x4f   :  { %7819 = vst [vmem:[#allocation58_spill] sm:$0xff] %v3984_v54  ;;  %v4018_v54 = vld [vmem:[#allocation2 + $0xf0] sm:$0xff]  ;;  %376 = vmatpush.msrb.mxu1 %v4014_v53 }
  0x50   :  { %7820 = vst [vmem:[#allocation59_spill] sm:$0xff] %v3988_v55  ;;  %v4020_v55 = vld [vmem:[#allocation2 + $0xf8] sm:$0xff]  ;;  %396 = vmatpush.msrb.mxu2 %v4018_v54 }
  0x51   :  { %7821 = vst [vmem:[#allocation60_spill] sm:$0xff] %v3990_v56  ;;  %v4024_v56 = vld [vmem:[#allocation2 + $0xc0] sm:$0xff]  ;;  %416 = vmatpush.msrb.mxu3 %v4020_v55 }
  0x52   :  { %7822 = vst [vmem:[#allocation61_spill] sm:$0xff] %v3994_v57  ;;  %v4026_v57 = vld [vmem:[#allocation2 + $0xc8] sm:$0xff]  ;;  %357 = vmatpush.msrb.mxu0 %v4024_v56 }
  0x53   :  { %7823 = vst [vmem:[#allocation62_spill] sm:$0xff] %v3996_v58  ;;  %v4030_v58 = vld [vmem:[#allocation2 + $0xd0] sm:$0xff]  ;;  %377 = vmatpush.msrb.mxu1 %v4026_v57 }
  0x54   :  { %7824 = vst [vmem:[#allocation63_spill] sm:$0xff] %v4000_v59  ;;  %v4032_v59 = vld [vmem:[#allocation2 + $0xd8] sm:$0xff]  ;;  %397 = vmatpush.msrb.mxu2 %v4030_v58 }
  0x55   :  { %7825 = vst [vmem:[#allocation64_spill] sm:$0xff] %v4002_v60  ;;  %v4036_v60 = vld [vmem:[#allocation2 + $0xa0] sm:$0xff]  ;;  %417 = vmatpush.msrb.mxu3 %v4032_v59 }
  0x56   :  { %7826 = vst [vmem:[#allocation65_spill] sm:$0xff] %v4006_v61  ;;  %v4038_v61 = vld [vmem:[#allocation2 + $0xa8] sm:$0xff]  ;;  %358 = vmatpush.msrb.mxu0 %v4036_v60 }
  0x57   :  { %7827 = vst [vmem:[#allocation66_spill] sm:$0xff] %v4008_v62  ;;  %v4042_v62 = vld [vmem:[#allocation2 + $0xb0] sm:$0xff]  ;;  %378 = vmatpush.msrb.mxu1 %v4038_v61 }
  0x58   :  { %7828 = vst [vmem:[#allocation67_spill] sm:$0xff] %v4012_v63  ;;  %v4044_v63 = vld [vmem:[#allocation2 + $0xb8] sm:$0xff]  ;;  %398 = vmatpush.msrb.mxu2 %v4042_v62 }
  0x59   :  { %7829 = vst [vmem:[#allocation68_spill] sm:$0xff] %v4014_v53  ;;  %v4048_v53 = vld [vmem:[#allocation2 + $0x80] sm:$0xff]  ;;  %418 = vmatpush.msrb.mxu3 %v4044_v63 }
  0x5a   :  { %7830 = vst [vmem:[#allocation69_spill] sm:$0xff] %v4018_v54  ;;  %359 = vmatpush.msrb.mxu0 %v4048_v53  ;;  %v4073_v54 = vld [vmem:[#allocation2 + $0x78] sm:$0xff] }
  0x5b   :  { %7831 = vst [vmem:[#allocation70_spill] sm:$0xff] %v4020_v55  ;;  %v4055_v55 = vld [vmem:[#allocation2 + $0x88] sm:$0xff] }
  0x5c   :  { %7832 = vst [vmem:[#allocation71_spill] sm:$0xff] %v4024_v56  ;;  %v270_v56 = vld [vmem:[%s7187_s0] sm:$0xff]  ;;  %379 = vmatpush.msrb.mxu1 %v4055_v55 }
  0x5d   :  { %7833 = vst [vmem:[#allocation72_spill] sm:$0xff] %v4026_v57  ;;  %v4059_v57 = vld [vmem:[#allocation2 + $0x90] sm:$0xff] }
  0x5e   :  { %7834 = vst [vmem:[#allocation73_spill] sm:$0xff] %v4030_v58  ;;  %v4061_v58 = vld [vmem:[#allocation2 + $0x98] sm:$0xff]  ;;  %399 = vmatpush.msrb.mxu2 %v4059_v57 }
  0x5f   :  { %7835 = vst [vmem:[#allocation74_spill] sm:$0xff] %v4032_v59  ;;  %v3663_v59 = vmov 0   ;;  %419 = vmatpush.msrb.mxu3 %v4061_v58 }
  0x60   :  { %7836 = vst [vmem:[#allocation75_spill] sm:$0xff] %v4036_v60  ;;  %2787 = vset.pattern.permute.xlu0 %v3663_v59  ;;  %v4071_v60 = vld [vmem:[#allocation2 + $0x70] sm:$0xff]  ;;  %2788 = vset.pattern.permute.xlu1 %v3663_v59 }
  0x61   :  { %7837 = vst [vmem:[#allocation76_spill] sm:$0xff] %v4038_v61  ;;  %273 = vperm.xlu0 %2787, %v270_v56   ;;  %v4067_v61 = vld [vmem:[#allocation2 + $0x60] sm:$0xff]  ;;  %400 = vmatpush.msrb.mxu2 %v4071_v60 }
  0x62   :  { %7838 = vst [vmem:[#allocation77_spill] sm:$0xff] %v4042_v62  ;;  %v4069_v62 = vld [vmem:[#allocation2 + $0x68] sm:$0xff]  ;;  %v4075_v56 = vld [vmem:[#allocation2 + $0x40] sm:$0xff]  ;;  %360 = vmatpush.msrb.mxu0 %v4067_v61  ;;  %420 = vmatpush.msrb.mxu3 %v4073_v54 }
  0x63   :  { %7839 = vst [vmem:[#allocation78_spill] sm:$0xff] %v4044_v63  ;;  %v3664_v63 = vmov 0.0   ;;  %380 = vmatpush.msrb.mxu1 %v4069_v62  ;;  %2789 = vset.pattern.permute.xlu2 %v3663_v59  ;;  %v4135_v59 = vld [vmem:[#allocation5 + $0x1c8] sm:$0xff] }
  0x64   :  { %7840 = vst [vmem:[#allocation79_spill] sm:$0xff] %v4048_v53  ;;  %206 = vmatmul.f32.vlgmr.msra.gmra.mxu0 %v3664_v63  ;;  %226 = vmatmul.f32.vlgmr.msra.gmra.mxu1 %v3664_v63  ;;  %v4087_v53 = vld [vmem:[#allocation2 + $0x20] sm:$0xff] }
  0x65   :  { %7841 = vst [vmem:[#allocation80_spill] sm:$0xff] %v4055_v55  ;;  %246 = vmatmul.f32.vlgmr.msra.gmra.mxu2 %v3664_v63  ;;  %266 = vmatmul.f32.vlgmr.msra.gmra.mxu3 %v3664_v63  ;;  %v4077_v55 = vld [vmem:[#allocation2 + $0x48] sm:$0xff] }
  0x66   :  { %7842 = vst [vmem:[#allocation81_spill] sm:$0xff] %v4059_v57  ;;  %v4083_v57 = vld [vmem:[#allocation2 + $0x58] sm:$0xff]  ;;  %361 = vmatpush.msrb.mxu0 %v4075_v56  ;;  %381 = vmatpush.msrb.mxu1 %v4077_v55 }
  0x67   :  { %7843 = vst [vmem:[#allocation82_spill] sm:$0xff] %v4061_v58  ;;  %v4081_v58 = vld [vmem:[#allocation2 + $0x50] sm:$0xff]  ;;  %421 = vmatpush.msrb.mxu3 %v4083_v57 }
  0x68   :  { %7844 = vst [vmem:[#allocation83_spill] sm:$0xff] %v4067_v61  ;;  %v4095_v61 = vld [vmem:[#allocation2 + $0x38] sm:$0xff]  ;;  %401 = vmatpush.msrb.mxu2 %v4081_v58  ;;  %362 = vmatpush.msrb.mxu0 %v4087_v53 }
  0x69   :  { %7845 = vst [vmem:[#allocation84_spill] sm:$0xff] %v4069_v62  ;;  %382 = vmatpush.msrb.mxu1 %v4089_v52  ;;  %422 = vmatpush.msrb.mxu3 %v4095_v61  ;;  %v4283_v62 = vld [vmem:[#allocation5 + $0x68] sm:$0xff] }
  0x6a   :  { %7846 = vst [vmem:[#allocation85_spill] sm:$0xff] %v4071_v60  ;;  %v4102_v60 = vld [vmem:[#allocation2] sm:$0xff]  ;;  %402 = vmatpush.msrb.mxu2 %v4093_v51 }
  0x6b   :  { %7847 = vst [vmem:[#allocation86_spill] sm:$0xff] %v4073_v54  ;;  %v2769_v54 = vld [vmem:[%s7187_s0 + $0x8] sm:$0xff]  ;;  %363 = vmatpush.msrb.mxu0 %v4102_v60 }
  0x6c   :  { %7848 = vst [vmem:[#allocation87_spill] sm:$0xff] %v4075_v56  ;;  %v4106_v56 = vld [vmem:[#allocation2 + $0x8] sm:$0xff]  ;;  %700 = vperm.xlu0 %2787, %v2769_v54   ;;  %364 = vmatmul.f32.vlgmr.msrb.gmra.mxu0 %v3664_v63  ;;  %v4121_v54 = vld [vmem:[#allocation5 + $0x1e0] sm:$0xff] }
  0x6d   :  { %7849 = vst [vmem:[#allocation88_spill] sm:$0xff] %v4077_v55  ;;  %v4108_v55 = vld [vmem:[#allocation2 + $0x10] sm:$0xff]  ;;  %383 = vmatpush.msrb.mxu1 %v4106_v56  ;;  %514 = vmatpush.msra.mxu0 %v4121_v54 }
  0x6e   :  { %7850 = vst [vmem:[#allocation89_spill] sm:$0xff] %v4081_v58  ;;  %v4112_v58 = vld [vmem:[#allocation2 + $0x18] sm:$0xff]  ;;  %403 = vmatpush.msrb.mxu2 %v4108_v55  ;;  %384 = vmatmul.f32.vlgmr.msrb.gmra.mxu1 %v3664_v63 }
  0x6f   :  { %7851 = vst [vmem:[#allocation90_spill] sm:$0xff] %v4083_v57  ;;  %423 = vmatpush.msrb.mxu3 %v4112_v58  ;;  %404 = vmatmul.f32.vlgmr.msrb.gmra.mxu2 %v3664_v63 }
  0x70   :  { %7852 = vst [vmem:[#allocation91_spill] sm:$0xff] %v4087_v53  ;;  %424 = vmatmul.f32.vlgmr.msrb.gmra.mxu3 %v3664_v63  ;;  %v4133_v63 = vld [vmem:[#allocation5 + $0x1c0] sm:$0xff]  ;;  %v4252_v53 = vld [vmem:[#allocation5 + $0xb8] sm:$0xff] }
  0x71   :  { %7853 = vst [vmem:[#allocation92_spill] sm:$0xff] %v4089_v52  ;;  %515 = vmatpush.msra.mxu0 %v4133_v63  ;;  %v4223_v52 = vld [vmem:[#allocation5 + $0xf8] sm:$0xff] }
  0x72   :  { %7854 = vst [vmem:[#allocation93_spill] sm:$0xff] %v4093_v51  ;;  %v4205_v51 = vld [vmem:[#allocation5 + $0x108] sm:$0xff] }
  0x73   :  { %7855 = vst [vmem:[#allocation94_spill] sm:$0xff] %v4095_v61  ;;  %v2774_v61 = vld [vmem:[%s7187_s0 + $0x30] sm:$0xff] }
  0x74   :  { %7856 = vst [vmem:[#allocation95_spill] sm:$0xff] %v4102_v60  ;;  %2195 = vperm.xlu0 %2787, %v2774_v61   ;;  %v4123_v60 = vld [vmem:[#allocation5 + $0x1e8] sm:$0xff]  ;;  %v4137_v61 = vld [vmem:[#allocation5 + $0x1d0] sm:$0xff] }
  0x75   :  { %7857 = vst [vmem:[#allocation96_spill] sm:$0xff] %v4106_v56  ;;  %v4125_v56 = vld [vmem:[#allocation5 + $0x1f0] sm:$0xff]  ;;  %534 = vmatpush.msra.mxu1 %v4123_v60 }
  0x76   :  { %7858 = vst [vmem:[#allocation97_spill] sm:$0xff] %v4108_v55  ;;  %554 = vmatpush.msra.mxu2 %v4125_v56  ;;  %v4141_v55 = vld [vmem:[#allocation5 + $0x1d8] sm:$0xff] }
  0x77   :  { %7859 = vst [vmem:[#allocation98_spill] sm:$0xff] %v4112_v58  ;;  %v4129_v58 = vld [vmem:[#allocation5 + $0x1f8] sm:$0xff]  ;;  %535 = vmatpush.msra.mxu1 %v4135_v59 }
  0x78   :  { %7860 = vst [vmem:[#allocation99_spill] sm:$0xff] %v4121_v54  ;;  %574 = vmatpush.msra.mxu3 %v4129_v58  ;;  %555 = vmatpush.msra.mxu2 %v4137_v61  ;;  %v4153_v54 = vld [vmem:[#allocation5 + $0x1b8] sm:$0xff] }
  0x79   :  { %7861 = vst [vmem:[#allocation100_spill] sm:$0xff] %v4123_v60  ;;  %v4145_v60 = vld [vmem:[#allocation5 + $0x1a0] sm:$0xff] }
  0x7a   :  { %7862 = vst [vmem:[#allocation101_spill] sm:$0xff] %v4125_v56  ;;  %575 = vmatpush.msra.mxu3 %v4141_v55  ;;  %v4147_v56 = vld [vmem:[#allocation5 + $0x1a8] sm:$0xff]  ;;  %516 = vmatpush.msra.mxu0 %v4145_v60 }
  0x7b   :  { %7863 = vst [vmem:[#allocation102_spill] sm:$0xff] %v4129_v58  ;;  %v4149_v58 = vld [vmem:[#allocation5 + $0x1b0] sm:$0xff]  ;;  %536 = vmatpush.msra.mxu1 %v4147_v56 }
  0x7c   :  { %7864 = vst [vmem:[#allocation103_spill] sm:$0xff] %v4133_v63  ;;  %556 = vmatpush.msra.mxu2 %v4149_v58  ;;  %576 = vmatpush.msra.mxu3 %v4153_v54  ;;  %v4165_v63 = vld [vmem:[#allocation5 + $0x198] sm:$0xff] }
  0x7d   :  { %7865 = vst [vmem:[#allocation104_spill] sm:$0xff] %v4135_v59  ;;  %v4157_v59 = vld [vmem:[#allocation5 + $0x180] sm:$0xff] }
  0x7e   :  { %7866 = vst [vmem:[#allocation105_spill] sm:$0xff] %v4137_v61  ;;  %v4159_v61 = vld [vmem:[#allocation5 + $0x188] sm:$0xff]  ;;  %517 = vmatpush.msra.mxu0 %v4157_v59  ;;  %577 = vmatpush.msra.mxu3 %v4165_v63 }
  0x7f   :  { %7867 = vst [vmem:[#allocation106_spill] sm:$0xff] %v4141_v55  ;;  %v4161_v55 = vld [vmem:[#allocation5 + $0x190] sm:$0xff]  ;;  %537 = vmatpush.msra.mxu1 %v4159_v61 }
  0x80   :  { %7868 = vst [vmem:[#allocation107_spill] sm:$0xff] %v4145_v60  ;;  %557 = vmatpush.msra.mxu2 %v4161_v55  ;;  %v4177_v60 = vld [vmem:[#allocation5 + $0x178] sm:$0xff] }
  0x81   :  { %7869 = vst [vmem:[#allocation108_spill] sm:$0xff] %v4147_v56  ;;  %v4169_v56 = vld [vmem:[#allocation5 + $0x160] sm:$0xff]  ;;  %578 = vmatpush.msra.mxu3 %v4177_v60 }
  0x82   :  { %7870 = vst [vmem:[#allocation109_spill] sm:$0xff] %v4149_v58  ;;  %v4171_v58 = vld [vmem:[#allocation5 + $0x168] sm:$0xff]  ;;  %518 = vmatpush.msra.mxu0 %v4169_v56 }
  0x83   :  { %7871 = vst [vmem:[#allocation110_spill] sm:$0xff] %v4153_v54  ;;  %v4173_v54 = vld [vmem:[#allocation5 + $0x170] sm:$0xff]  ;;  %538 = vmatpush.msra.mxu1 %v4171_v58 }
  0x84   :  { %7872 = vst [vmem:[#allocation111_spill] sm:$0xff] %v4157_v59  ;;  %558 = vmatpush.msra.mxu2 %v4173_v54  ;;  %v4188_v59 = vld [vmem:[#allocation5 + $0x158] sm:$0xff] }
  0x85   :  { %7873 = vst [vmem:[#allocation112_spill] sm:$0xff] %v4159_v61  ;;  %v4181_v61 = vld [vmem:[#allocation5 + $0x140] sm:$0xff]  ;;  %579 = vmatpush.msra.mxu3 %v4188_v59 }
  0x86   :  { %7874 = vst [vmem:[#allocation113_spill] sm:$0xff] %v4161_v55  ;;  %v4183_v55 = vld [vmem:[#allocation5 + $0x148] sm:$0xff]  ;;  %519 = vmatpush.msra.mxu0 %v4181_v61 }
  0x87   :  { %7875 = vst [vmem:[#allocation114_spill] sm:$0xff] %v4165_v63  ;;  %v4185_v63 = vld [vmem:[#allocation5 + $0x150] sm:$0xff]  ;;  %539 = vmatpush.msra.mxu1 %v4183_v55 }
  0x88   :  { %7876 = vst [vmem:[#allocation115_spill] sm:$0xff] %v4169_v56  ;;  %559 = vmatpush.msra.mxu2 %v4185_v63  ;;  %v4194_v56 = vld [vmem:[#allocation5 + $0x128] sm:$0xff] }
  0x89   :  { %7877 = vst [vmem:[#allocation116_spill] sm:$0xff] %v4171_v58  ;;  %v4192_v58 = vld [vmem:[#allocation5 + $0x120] sm:$0xff]  ;;  %540 = vmatpush.msra.mxu1 %v4194_v56 }
  0x8a   :  { %7878 = vst [vmem:[#allocation117_spill] sm:$0xff] %v4173_v54  ;;  %v4196_v54 = vld [vmem:[#allocation5 + $0x130] sm:$0xff]  ;;  %520 = vmatpush.msra.mxu0 %v4192_v58 }
  0x8b   :  { %7879 = vst [vmem:[#allocation118_spill] sm:$0xff] %v4177_v60  ;;  %v4199_v60 = vld [vmem:[#allocation5 + $0x138] sm:$0xff]  ;;  %560 = vmatpush.msra.mxu2 %v4196_v54  ;;  %541 = vmatpush.msra.mxu1 %v4205_v51 }
  0x8c   :  { %7880 = vst [vmem:[#allocation119_spill] sm:$0xff] %v4181_v61  ;;  %v4203_v61 = vld [vmem:[#allocation5 + $0x100] sm:$0xff]  ;;  %580 = vmatpush.msra.mxu3 %v4199_v60 }
  0x8d   :  { %7881 = vst [vmem:[#allocation120_spill] sm:$0xff] %v4183_v55  ;;  %v4207_v55 = vld [vmem:[#allocation5 + $0x110] sm:$0xff]  ;;  %521 = vmatpush.msra.mxu0 %v4203_v61 }
  0x8e   :  { %7882 = vst [vmem:[#allocation121_spill] sm:$0xff] %v4185_v63  ;;  %v4211_v63 = vld [vmem:[#allocation5 + $0x118] sm:$0xff]  ;;  %561 = vmatpush.msra.mxu2 %v4207_v55 }
  0x8f   :  { %7883 = vst [vmem:[#allocation122_spill] sm:$0xff] %v4188_v59  ;;  %v4215_v59 = vld [vmem:[#allocation5 + $0xe0] sm:$0xff]  ;;  %581 = vmatpush.msra.mxu3 %v4211_v63 }
  0x90   :  { %7884 = vst [vmem:[#allocation123_spill] sm:$0xff] %v4192_v58  ;;  %v4217_v58 = vld [vmem:[#allocation5 + $0xe8] sm:$0xff]  ;;  %522 = vmatpush.msra.mxu0 %v4215_v59 }
  0x91   :  { %7885 = vst [vmem:[#allocation124_spill] sm:$0xff] %v4194_v56  ;;  %v4219_v56 = vld [vmem:[#allocation5 + $0xf0] sm:$0xff]  ;;  %542 = vmatpush.msra.mxu1 %v4217_v58  ;;  %582 = vmatpush.msra.mxu3 %v4223_v52 }
  0x92   :  { %7886 = vst [vmem:[#allocation125_spill] sm:$0xff] %v4196_v54  ;;  %v4236_v54 = vld [vmem:[%s7188_s1] sm:$0xf]  ;;  %562 = vmatpush.msra.mxu2 %v4219_v56 }
  0x93   :  { %7887 = vst [vmem:[#allocation126_spill] sm:$0xff] %v4199_v60  ;;  %v4227_v60 = vld [vmem:[#allocation5 + $0xc0] sm:$0xff]  ;;  %v4332_v45 = vperm.slane %v4236_v54, 2 }
  0x94   :  { %7888 = vst [vmem:[#allocation127_spill] sm:$0xff] %v4203_v61  ;;  %v4229_v61 = vld [vmem:[#allocation5 + $0xc8] sm:$0xff]  ;;  %523 = vmatpush.msra.mxu0 %v4227_v60 }
  0x95   :  { %7889 = vst [vmem:[#allocation128_spill] sm:$0xff] %v4205_v51  ;;  %v4231_v51 = vld [vmem:[#allocation5 + $0xd0] sm:$0xff]  ;;  %543 = vmatpush.msra.mxu1 %v4229_v61 }
  0x96   :  { %7890 = vst [vmem:[#allocation129_spill] sm:$0xff] %v4207_v55  ;;  %v4248_v55 = vld [vmem:[#allocation5 + $0xb0] sm:$0xff]  ;;  %563 = vmatpush.msra.mxu2 %v4231_v51 }
  0x97   :  { %7891 = vst [vmem:[#allocation130_spill] sm:$0xff] %v4211_v63  ;;  %v4240_v63 = vld [vmem:[#allocation5 + $0xd8] sm:$0xff] }
  0x98   :  { %7892 = vst [vmem:[#allocation131_spill] sm:$0xff] %v4215_v59  ;;  %v4246_v59 = vld [vmem:[#allocation5 + $0xa8] sm:$0xff]  ;;  %583 = vmatpush.msra.mxu3 %v4240_v63  ;;  %564 = vmatpush.msra.mxu2 %v4248_v55 }
  0x99   :  { %7893 = vst [vmem:[#allocation132_spill] sm:$0xff] %v4217_v58  ;;  %v4244_v58 = vld [vmem:[#allocation5 + $0xa0] sm:$0xff]  ;;  %544 = vmatpush.msra.mxu1 %v4246_v59 }
  0x9a   :  { %7894 = vst [vmem:[#allocation133_spill] sm:$0xff] %v4219_v56  ;;  %524 = vmatpush.msra.mxu0 %v4244_v58  ;;  %v4263_v56 = vld [vmem:[#allocation5 + $0x90] sm:$0xff]  ;;  %584 = vmatpush.msra.mxu3 %v4252_v53 }
  0x9b   :  { %7895 = vst [vmem:[#allocation134_spill] sm:$0xff] %v4223_v52  ;;  %v4255_v52 = vperm.slane %v4236_v54, 0  ;;  %565 = vmatpush.msra.mxu2 %v4263_v56 }
  0x9c   :  { %7896 = vst [vmem:[#allocation135_spill] sm:$0xff] %v4227_v60  ;;  %v4261_v60 = vld [vmem:[#allocation5 + $0x88] sm:$0xff] }
  0x9d   :  { %7897 = vst [vmem:[#allocation136_spill] sm:$0xff] %v4229_v61  ;;  %v4259_v61 = vld [vmem:[#allocation5 + $0x80] sm:$0xff]  ;;  %545 = vmatpush.msra.mxu1 %v4261_v60  ;;  %566 = vmatpush.msra.mxu2 %v4285_v50 }
  0x9e   :  { %7898 = vst [vmem:[#allocation137_spill] sm:$0xff] %v4231_v51  ;;  %v4268_v51 = vperm.slane %v4236_v54, 1  ;;  %525 = vmatpush.msra.mxu0 %v4259_v61 }
  0x9f   :  { %7899 = vst [vmem:[#allocation138_spill] sm:$0xff] %v4240_v63  ;;  %v96_v63 = vld [vmem:[%s7190_s3] sm:$0xf]  ;;  %546 = vmatpush.msra.mxu1 %v4283_v62  ;;  %567 = vmatpush.msra.mxu2 %v4300_v48 }
  0xa0   :  { %7900 = vst [vmem:[#allocation139_spill] sm:$0xff] %v4244_v58  ;;  %v4302_v47 = vperm.slane %v96_v63, 1 }
  0xa1   :  { %7901 = vst [vmem:[#allocation140_spill] sm:$0xff] %v4246_v59  ;;  %v4275_v59 = vld [vmem:[#allocation5 + $0x98] sm:$0xff] }
  0xa2   :  { %7902 = vst [vmem:[#allocation141_spill] sm:$0xff] %v4248_v55  ;;  %585 = vmatpush.msra.mxu3 %v4275_v59  ;;  %v4291_v55 = vperm.slane %v96_v63, 0 }
  0xa3   :  { %7903 = vst [vmem:[#allocation142_spill] sm:$0xff] %v4252_v53  ;;  %v4289_v53 = vld [vmem:[#allocation5 + $0x78] sm:$0xff] }
  0xa4   :  { %7904 = vst [vmem:[#allocation143_spill] sm:$0xff] %v4255_v52  ;;  %586 = vmatpush.msra.mxu3 %v4289_v53 }
  0xa5   :  { %7905 = vst [vmem:[#allocation144_spill] sm:$0xff] %v4259_v61  ;;  %v4298_v61 = vld [vmem:[#allocation5 + $0x48] sm:$0xff] }
  0xa6   :  { %7906 = vst [vmem:[#allocation145_spill] sm:$0xff] %v4261_v60  ;;  %v4296_v60 = vld [vmem:[#allocation5 + $0x40] sm:$0xff]  ;;  %547 = vmatpush.msra.mxu1 %v4298_v61 }
  0xa7   :  { %7907 = vst [vmem:[#allocation146_spill] sm:$0xff] %v4263_v56  ;;  %v4307_v56 = vld [vmem:[#allocation5 + $0x58] sm:$0xff] }
  0xa8   :  { %7909 = vst [vmem:[#allocation148_spill] sm:$0xff] %v4268_v51  ;;  %587 = vmatpush.msra.mxu3 %v4307_v56 }
  0xa9   :  { %7910 = vst [vmem:[#allocation149_spill] sm:$0xff] %v4275_v59 }
  0xaa   :  { %7913 = vst [vmem:[#allocation152_spill] sm:$0xff] %v4283_v62  ;;  %v4313_v62 = vld [vmem:[#allocation5 + $0x28] sm:$0xff]  ;;  %588 = vmatpush.msra.mxu3 %v4318_v46 }
  0xab   :  { %7914 = vst [vmem:[#allocation153_spill] sm:$0xff] %v4285_v50  ;;  %548 = vmatpush.msra.mxu1 %v4313_v62 }
  0xac   :  { %7915 = vst [vmem:[#allocation154_spill] sm:$0xff] %v4289_v53 }
  0xad   :  { %7916 = vst [vmem:[#allocation155_spill] sm:$0xff] %v4291_v55 }
  0xae   :  { %7917 = vst [vmem:[#allocation156_spill] sm:$0xff] %v4296_v60 }
  0xaf   :  { %7918 = vst [vmem:[#allocation157_spill] sm:$0xff] %v4298_v61  ;;  %v4327_v61 = vld [vmem:[#allocation5 + $0x8] sm:$0xff] }
  0xb0   :  { %7919 = vst [vmem:[#allocation158_spill] sm:$0xff] %v4300_v48  ;;  %549 = vmatpush.msra.mxu1 %v4327_v61 }
  0xb1   :  { %7920 = vst [vmem:[#allocation159_spill] sm:$0xff] %v4302_v47 }
  0xb2   :  { %7921 = vst [vmem:[#allocation160_spill] sm:$0xff] %v4307_v56  ;;  %636 = vmatpush.msrb.mxu1 %v3730_v1 }
  0xb3   :  { %7924 = vst [vmem:[#allocation163_spill] sm:$0xff] %v4318_v46  ;;  %v4355_v46 = vperm.slane %v96_v63, 3 }
  0xb4   :  { %637 = vmatpush.msrb.mxu1 %v3740_v5 }
  0xb6   :  { %638 = vmatpush.msrb.mxu1 %v3752_v9 }
  0xb8   :  { %639 = vmatpush.msrb.mxu1 %v3762_v13 }
  0xba   :  { %640 = vmatpush.msrb.mxu1 %v3774_v17 }
  0xbc   :  { %641 = vmatpush.msrb.mxu1 %v3786_v21  ;;  %v7930_v21 = vld [vmem:[#allocation17_spill] sm:$0xff] }
  0xbe   :  { %642 = vmatpush.msrb.mxu1 %v3798_v25  ;;  %v7933_v25 = vld [vmem:[#allocation20_spill] sm:$0xff] }
  0xc0   :  { %643 = vmatpush.msrb.mxu1 %v3810_v29  ;;  %v7936_v29 = vld [vmem:[#allocation23_spill] sm:$0xff] }
  0xc2   :  { %644 = vmatpush.msrb.mxu1 %v3822_v33  ;;  %v7939_v33 = vld [vmem:[#allocation26_spill] sm:$0xff] }
  0xc4   :  { %645 = vmatpush.msrb.mxu1 %v3834_v37  ;;  %v7943_v37 = vld [vmem:[#allocation30_spill] sm:$0xff] }
  0xc6   :  { %646 = vmatpush.msrb.mxu1 %v3846_v41  ;;  %v7947_v41 = vld [vmem:[#allocation34_spill] sm:$0xff] }
  0xd3   :  { %v274_v49 = vpop.permute.xlu0 %273 }
  0xd4   :  { %v277_v59 = vmul.f32 %v274_v49, %v4268_v51  ;;  %v4320_v51 = vld [vmem:[#allocation5] sm:$0xff] }
  0xd5   :  { %7925 = vst [vmem:[#allocation164_spill] sm:$0xff] %v4320_v51 }
  0xd6   :  { %v281_v44 = vadd.f32 %v277_v59, %v4302_v47 }
  0xe1   :  { %v4265_v57 = vpop.f32.mrf.mxu0  ;;  %v4277_v58 = vpop.f32.mrf.mxu1 }
  0xe2   :  { %7908 = vst [vmem:[#allocation147_spill] sm:$0xff] %v4265_v57  ;;  %v4281_v57 = vld [vmem:[#allocation5 + $0x60] sm:$0xff] }
  0xe3   :  { %7911 = vst [vmem:[#allocation150_spill] sm:$0xff] %v4277_v58  ;;  %v276_v58 = vmul.f32 %v274_v49, %v4255_v52  ;;  %526 = vmatpush.msra.mxu0 %v4281_v57  ;;  %v4311_v52 = vld [vmem:[#allocation5 + $0x20] sm:$0xff] }
  0xe4   :  { %7912 = vst [vmem:[#allocation151_spill] sm:$0xff] %v4281_v57  ;;  %v4315_v57 = vld [vmem:[#allocation5 + $0x30] sm:$0xff] }
  0xe5   :  { %527 = vmatpush.msra.mxu0 %v4296_v60  ;;  %7922 = vst [vmem:[#allocation161_spill] sm:$0xff] %v4311_v52  ;;  %v280_v53 = vadd.f32 %v276_v58, %v4291_v55  ;;  %v4329_v60 = vld [vmem:[#allocation5 + $0x10] sm:$0xff]  ;;  %568 = vmatpush.msra.mxu2 %v4315_v57  ;;  %v4339_v58 = vld [vmem:[#allocation5 + $0x18] sm:$0xff]  ;;  %v4342_v55 = vperm.slane %v4236_v54, 3  ;;  %v278_v54 = vmul.f32 %v274_v49, %v4332_v45 }
  0xe6   :  { %7923 = vst [vmem:[#allocation162_spill] sm:$0xff] %v4315_v57  ;;  %589 = vmatpush.msra.mxu3 %v4339_v58  ;;  %v4350_v57 = vperm.slane %v96_v63, 2  ;;  %v7957_v63 = vld [vmem:[#allocation44_spill] sm:$0xff] }
  0xe7   :  { %528 = vmatpush.msra.mxu0 %v4311_v52  ;;  %7926 = vst [vmem:[#allocation165_spill] sm:$0xff] %v4329_v60  ;;  %569 = vmatpush.msra.mxu2 %v4329_v60  ;;  %v279_v60 = vmul.f32 %v274_v49, %v4342_v55  ;;  %v7952_v49 = vld [vmem:[#allocation39_spill] sm:$0xff] }
  0xe8   :  { %v4322_v50 = vpop.f32.mrf.mxu2  ;;  %v4334_v48 = vpop.f32.mrf.mxu3  ;;  %7927 = vst [vmem:[#allocation166_spill] sm:$0xff] %v4350_v57  ;;  %676 = vmatpush.msrb.mxu3 %v3736_v3 }
  0xe9   :  { %529 = vmatpush.msra.mxu0 %v4320_v51  ;;  %v365_v52 = vpop.f32.mrf.mxu0  ;;  %656 = vmatpush.msrb.mxu2 %v3732_v2  ;;  %v283_v2 = vadd.f32 %v279_v60, %v4355_v46  ;;  %v7955_v60 = vld [vmem:[#allocation42_spill] sm:$0xff] }
  0xea   :  { %v428_v56 = vadd.f32 %v365_v52, %v280_v53  ;;  %677 = vmatpush.msrb.mxu3 %v3746_v7  ;;  %v7954_v53 = vld [vmem:[#allocation41_spill] sm:$0xff] }
  0xeb   :  { %v385_v59 = vpop.f32.mrf.mxu1  ;;  %616 = vmatpush.msrb.mxu0 %v3728_v0  ;;  %657 = vmatpush.msrb.mxu2 %v3744_v6  ;;  %v282_v0 = vadd.f32 %v278_v54, %v4350_v57  ;;  %v7959_v54 = vld [vmem:[#allocation46_spill] sm:$0xff] }
  0xec   :  { %v429_v47 = vadd.f32 %v385_v59, %v281_v44  ;;  %v432_v51 = vmul.f32 0.5, %v428_v56  ;;  %678 = vmatpush.msrb.mxu3 %v3756_v11  ;;  %v7950_v44 = vld [vmem:[#allocation37_spill] sm:$0xff]  ;;  %v7956_v56 = vld [vmem:[#allocation43_spill] sm:$0xff] }
  0xed   :  { %617 = vmatpush.msrb.mxu0 %v3738_v4  ;;  %658 = vmatpush.msrb.mxu2 %v3754_v10  ;;  %v7958_v59 = vld [vmem:[#allocation45_spill] sm:$0xff] }
  0xee   :  { %v436_v52 = vmul.f32 0.5, %v429_v47  ;;  %2791 = vtanh.f32 %v432_v51  ;;  %679 = vmatpush.msrb.mxu3 %v3768_v15  ;;  %v7951_v47 = vld [vmem:[#allocation38_spill] sm:$0xff]  ;;  %v7953_v51 = vld [vmem:[#allocation40_spill] sm:$0xff] }
  0xef   :  { %618 = vmatpush.msrb.mxu0 %v3748_v8  ;;  %659 = vmatpush.msrb.mxu2 %v3766_v14 }
  0xf0   :  { %2793 = vtanh.f32 %v436_v52  ;;  %680 = vmatpush.msrb.mxu3 %v3780_v19  ;;  %v7928_v19 = vld [vmem:[#allocation15_spill] sm:$0xff] }
  0xf1   :  { %619 = vmatpush.msrb.mxu0 %v3760_v12  ;;  %660 = vmatpush.msrb.mxu2 %v3778_v18  ;;  %v7960_v52 = vld [vmem:[#allocation47_spill] sm:$0xff] }
  0xf2   :  { %v405_v1 = vpop.f32.mrf.mxu2  ;;  %681 = vmatpush.msrb.mxu3 %v3792_v23  ;;  %v7932_v23 = vld [vmem:[#allocation19_spill] sm:$0xff] }
  0xf3   :  { %v430_v3 = vadd.f32 %v405_v1, %v282_v0  ;;  %v425_v4 = vpop.f32.mrf.mxu3  ;;  %620 = vmatpush.msrb.mxu0 %v3772_v16  ;;  %661 = vmatpush.msrb.mxu2 %v3790_v22  ;;  %v7931_v22 = vld [vmem:[#allocation18_spill] sm:$0xff]  ;;  %v7961_v0 = vld [vmem:[#allocation48_spill] sm:$0xff]  ;;  %v7962_v1 = vld [vmem:[#allocation49_spill] sm:$0xff] }
  0xf4   :  { %v431_v5 = vadd.f32 %v425_v4, %v283_v2  ;;  %v2792_v6 = vpop.eup %2791  ;;  %682 = vmatpush.msrb.mxu3 %v3804_v27  ;;  %v7963_v2 = vld [vmem:[#allocation50_spill] sm:$0xff]  ;;  %v7965_v4 = vld [vmem:[#allocation52_spill] sm:$0xff] }
  0xf5   :  { %2795 = vtanh.f32 %v430_v3  ;;  %621 = vmatpush.msrb.mxu0 %v3784_v20  ;;  %v434_v9 = vmul.f32 0.5, %v2792_v6  ;;  %662 = vmatpush.msrb.mxu2 %v3802_v26  ;;  %v7929_v20 = vld [vmem:[#allocation16_spill] sm:$0xff]  ;;  %v7934_v26 = vld [vmem:[#allocation21_spill] sm:$0xff]  ;;  %v7964_v3 = vld [vmem:[#allocation51_spill] sm:$0xff] }
  0xf6   :  { %v441_v7 = vmul.f32 0.5, %v431_v5  ;;  %v2794_v8 = vpop.eup %2793  ;;  %683 = vmatpush.msrb.mxu3 %v3816_v31  ;;  %647 = vmatpush.msrb.mxu1 %v7929_v20  ;;  %v7937_v31 = vld [vmem:[#allocation24_spill] sm:$0xff]  ;;  %v7966_v5 = vld [vmem:[#allocation53_spill] sm:$0xff]  ;;  %v7967_v6 = vld [vmem:[#allocation54_spill] sm:$0xff] }
  0xf7   :  { %v438_v10 = vmul.f32 0.5, %v2794_v8  ;;  %622 = vmatpush.msrb.mxu0 %v3796_v24  ;;  %v435_v11 = vadd.f32 0.5, %v434_v9  ;;  %663 = vmatpush.msrb.mxu2 %v3814_v30  ;;  %v7969_v8 = vld [vmem:[#allocation56_spill] sm:$0xff]  ;;  %v7970_v9 = vld [vmem:[#allocation57_spill] sm:$0xff]  ;;  %v7980_v20 = vld [vmem:[#allocation67_spill] sm:$0xff] }
  0xf8   :  { %2797 = vtanh.f32 %v441_v7  ;;  %684 = vmatpush.msrb.mxu3 %v3828_v35  ;;  %648 = vmatpush.msrb.mxu1 %v7933_v25  ;;  %v7941_v35 = vld [vmem:[#allocation28_spill] sm:$0xff]  ;;  %v7968_v7 = vld [vmem:[#allocation55_spill] sm:$0xff] }
  0xf9   :  { %v439_v12 = vadd.f32 0.5, %v438_v10  ;;  %623 = vmatpush.msrb.mxu0 %v3808_v28  ;;  %664 = vmatpush.msrb.mxu2 %v3826_v34  ;;  %v7935_v28 = vld [vmem:[#allocation22_spill] sm:$0xff]  ;;  %v7940_v34 = vld [vmem:[#allocation27_spill] sm:$0xff]  ;;  %v7985_v25 = vld [vmem:[#allocation72_spill] sm:$0xff] }
  0xfa   :  { %685 = vmatpush.msrb.mxu3 %v3840_v39  ;;  %649 = vmatpush.msrb.mxu1 %v7937_v31  ;;  %v7945_v39 = vld [vmem:[#allocation32_spill] sm:$0xff]  ;;  %v7971_v10 = vld [vmem:[#allocation58_spill] sm:$0xff]  ;;  %v7990_v31 = vld [vmem:[#allocation77_spill] sm:$0xff] }
  0xfb   :  { %v2796_v13 = vpop.eup %2795  ;;  %v445_v14 = vmul.f32 0.0, %v439_v12  ;;  %624 = vmatpush.msrb.mxu0 %v3820_v32  ;;  %665 = vmatpush.msrb.mxu2 %v3838_v38  ;;  %v7938_v32 = vld [vmem:[#allocation25_spill] sm:$0xff]  ;;  %v7944_v38 = vld [vmem:[#allocation31_spill] sm:$0xff]  ;;  %v7973_v12 = vld [vmem:[#allocation60_spill] sm:$0xff] }
  0xfc   :  { %v446_v15 = vmul.f32 %v2796_v13, %v435_v11  ;;  %686 = vmatpush.msrb.mxu3 %v3852_v43  ;;  %650 = vmatpush.msrb.mxu1 %v7941_v35  ;;  %v7949_v43 = vld [vmem:[#allocation36_spill] sm:$0xff]  ;;  %v7972_v11 = vld [vmem:[#allocation59_spill] sm:$0xff]  ;;  %v7974_v13 = vld [vmem:[#allocation61_spill] sm:$0xff] }
  0xfd   :  { %625 = vmatpush.msrb.mxu0 %v3832_v36  ;;  %666 = vmatpush.msrb.mxu2 %v3850_v42  ;;  %v7942_v36 = vld [vmem:[#allocation29_spill] sm:$0xff]  ;;  %v7948_v42 = vld [vmem:[#allocation35_spill] sm:$0xff] }
  0xfe   :  { %v2798_v16 = vpop.eup %2797  ;;  %v4392_v17 = vadd.f32 %v446_v15, %v445_v14  ;;  %687 = vmatpush.msrb.mxu3 %v7931_v22  ;;  %651 = vmatpush.msrb.mxu1 %v7945_v39  ;;  %v7975_v14 = vld [vmem:[#allocation62_spill] sm:$0xff]  ;;  %v7976_v15 = vld [vmem:[#allocation63_spill] sm:$0xff]  ;;  %v7982_v22 = vld [vmem:[#allocation69_spill] sm:$0xff] }
  0xff   :  { %626 = vmatpush.msrb.mxu0 %v3844_v40  ;;  %v443_v18 = vmul.f32 0.5, %v2798_v16  ;;  %667 = vmatpush.msrb.mxu2 %v7930_v21  ;;  %v7946_v40 = vld [vmem:[#allocation33_spill] sm:$0xff]  ;;  %v7977_v16 = vld [vmem:[#allocation64_spill] sm:$0xff] }
 0x100   :  { %2799 = vtanh.f32 %v4392_v17  ;;  %688 = vmatpush.msrb.mxu3 %v7935_v28  ;;  %v7981_v21 = vld [vmem:[#allocation68_spill] sm:$0xff]  ;;  %v7988_v28 = vld [vmem:[#allocation75_spill] sm:$0xff]  ;;  %v7994_v35 = vld [vmem:[#allocation81_spill] sm:$0xff] }
 0x101   :  { %627 = vmatpush.msrb.mxu0 %v7928_v19  ;;  %v444_v24 = vadd.f32 0.5, %v443_v18  ;;  %668 = vmatpush.msrb.mxu2 %v7934_v26  ;;  %v7978_v18 = vld [vmem:[#allocation65_spill] sm:$0xff]  ;;  %v7979_v19 = vld [vmem:[#allocation66_spill] sm:$0xff] }
 0x102   :  { %689 = vmatpush.msrb.mxu3 %v7939_v33  ;;  %v7986_v26 = vld [vmem:[#allocation73_spill] sm:$0xff]  ;;  %v7992_v33 = vld [vmem:[#allocation79_spill] sm:$0xff] }
 0x103   :  { %628 = vmatpush.msrb.mxu0 %v7932_v23  ;;  %669 = vmatpush.msrb.mxu2 %v7938_v32  ;;  %v7983_v23 = vld [vmem:[#allocation70_spill] sm:$0xff]  ;;  %v7998_v39 = vld [vmem:[#allocation85_spill] sm:$0xff] }
 0x104   :  { %690 = vmatpush.msrb.mxu3 %v7943_v37  ;;  %v7991_v32 = vld [vmem:[#allocation78_spill] sm:$0xff]  ;;  %v7996_v37 = vld [vmem:[#allocation83_spill] sm:$0xff] }
 0x105   :  { %629 = vmatpush.msrb.mxu0 %v7936_v29  ;;  %670 = vmatpush.msrb.mxu2 %v7942_v36  ;;  %v7989_v29 = vld [vmem:[#allocation76_spill] sm:$0xff]  ;;  %v7995_v36 = vld [vmem:[#allocation82_spill] sm:$0xff] }
 0x106   :  { %v2800_v27 = vpop.eup %2799  ;;  %691 = vmatpush.msrb.mxu3 %v7947_v41  ;;  %v8000_v41 = vld [vmem:[#allocation87_spill] sm:$0xff] }
 0x107   :  { %v4413_v30 = vmul.f32 %v2800_v27, %v444_v24  ;;  %630 = vmatpush.msrb.mxu0 %v7940_v34  ;;  %671 = vmatpush.msrb.mxu2 %v7946_v40  ;;  %v7984_v24 = vld [vmem:[#allocation71_spill] sm:$0xff]  ;;  %v7987_v27 = vld [vmem:[#allocation74_spill] sm:$0xff]  ;;  %v7993_v34 = vld [vmem:[#allocation80_spill] sm:$0xff] }
 0x108   :  { %v7999_v40 = vld [vmem:[#allocation86_spill] sm:$0xff] }
 0x109   :  { %530 = vmatmul.f32.vlgmr.msra.gmra.mxu0 %v4413_v30  ;;  %550 = vmatmul.f32.vlgmr.msra.gmra.mxu1 %v4413_v30 }
 0x10a   :  { %570 = vmatmul.f32.vlgmr.msra.gmra.mxu2 %v4413_v30  ;;  %590 = vmatmul.f32.vlgmr.msra.gmra.mxu3 %v4413_v30 }
 0x10b   :  { %631 = vmatpush.msrb.mxu0 %v7944_v38  ;;  %731 = vmatpush.msra.mxu1 %v7949_v43  ;;  %v7997_v38 = vld [vmem:[#allocation84_spill] sm:$0xff]  ;;  %v8002_v43 = vld [vmem:[#allocation89_spill] sm:$0xff] }
 0x10c   :  { %751 = vmatpush.msra.mxu2 %v7950_v44  ;;  %771 = vmatpush.msra.mxu3 %v7951_v47  ;;  %v8003_v44 = vld [vmem:[#allocation90_spill] sm:$0xff]  ;;  %v8004_v47 = vld [vmem:[#allocation91_spill] sm:$0xff] }
 0x10d   :  { %711 = vmatpush.msra.mxu0 %v7948_v42  ;;  %732 = vmatpush.msra.mxu1 %v7953_v51  ;;  %v8001_v42 = vld [vmem:[#allocation88_spill] sm:$0xff]  ;;  %v8006_v51 = vld [vmem:[#allocation93_spill] sm:$0xff] }
 0x10e   :  { %752 = vmatpush.msra.mxu2 %v7954_v53  ;;  %772 = vmatpush.msra.mxu3 %v7955_v60  ;;  %v8007_v53 = vld [vmem:[#allocation94_spill] sm:$0xff]  ;;  %v8008_v60 = vld [vmem:[#allocation95_spill] sm:$0xff] }
 0x10f   :  { %712 = vmatpush.msra.mxu0 %v7952_v49  ;;  %733 = vmatpush.msra.mxu1 %v7957_v63  ;;  %v8005_v49 = vld [vmem:[#allocation92_spill] sm:$0xff]  ;;  %v8010_v63 = vld [vmem:[#allocation97_spill] sm:$0xff] }
 0x110   :  { %753 = vmatpush.msra.mxu2 %v7958_v59  ;;  %773 = vmatpush.msra.mxu3 %v7959_v54  ;;  %v8011_v59 = vld [vmem:[#allocation98_spill] sm:$0xff] }
 0x111   :  { %713 = vmatpush.msra.mxu0 %v7956_v56  ;;  %734 = vmatpush.msra.mxu1 %v7961_v0  ;;  %v8009_v56 = vld [vmem:[#allocation96_spill] sm:$0xff]  ;;  %v106_v54 = vld [vmem:[%s7193_s6] sm:$0xf] }
 0x112   :  { %754 = vmatpush.msra.mxu2 %v7962_v1  ;;  %774 = vmatpush.msra.mxu3 %v7963_v2  ;;  %v4499_v0 = vperm.slane %v106_v54, 1  ;;  %v8014_v1 = vld [vmem:[#allocation147_spill] sm:$0xff] }
 0x113   :  { %714 = vmatpush.msra.mxu0 %v7960_v52  ;;  %735 = vmatpush.msra.mxu1 %v7965_v4  ;;  %v4497_v52 = vperm.slane %v106_v54, 0 }
 0x114   :  { %755 = vmatpush.msra.mxu2 %v7966_v5  ;;  %775 = vmatpush.msra.mxu3 %v7967_v6  ;;  %8013 = vst [vmem:[#allocation16_spill] sm:$0xff] %v4499_v0 }
 0x115   :  { %715 = vmatpush.msra.mxu0 %v7964_v3  ;;  %736 = vmatpush.msra.mxu1 %v7969_v8  ;;  %8012 = vst [vmem:[#allocation15_spill] sm:$0xff] %v4497_v52  ;;  %v208_v2 = vadd.f32 %v8014_v1, %v4497_v52  ;;  %v8015_v3 = vld [vmem:[#allocation150_spill] sm:$0xff] }
 0x116   :  { %756 = vmatpush.msra.mxu2 %v7970_v9  ;;  %776 = vmatpush.msra.mxu3 %v7971_v10  ;;  %v228_v4 = vadd.f32 %v8015_v3, %v4499_v0  ;;  %v4505_v9 = vperm.slane %v106_v54, 2  ;;  %v4507_v10 = vperm.slane %v106_v54, 3  ;;  %v8035_v54 = vld [vmem:[#allocation117_spill] sm:$0xff]  ;;  %v8036_v1 = vld [vmem:[#allocation118_spill] sm:$0xff]  ;;  %v8038_v3 = vld [vmem:[#allocation120_spill] sm:$0xff] }
 0x117   :  { %716 = vmatpush.msra.mxu0 %v7968_v7  ;;  %737 = vmatpush.msra.mxu1 %v7973_v12 }
 0x118   :  { %757 = vmatpush.msra.mxu2 %v7974_v13  ;;  %777 = vmatpush.msra.mxu3 %v7975_v14  ;;  %8016 = vst [vmem:[#allocation17_spill] sm:$0xff] %v4507_v10  ;;  %v248_v13 = vadd.f32 %v4322_v50, %v4505_v9  ;;  %v268_v14 = vadd.f32 %v4334_v48, %v4507_v10 }
 0x119   :  { %717 = vmatpush.msra.mxu0 %v7972_v11  ;;  %738 = vmatpush.msra.mxu1 %v7977_v16 }
 0x11a   :  { %758 = vmatpush.msra.mxu2 %v7978_v18  ;;  %778 = vmatpush.msra.mxu3 %v7979_v19 }
 0x11b   :  { %718 = vmatpush.msra.mxu0 %v7976_v15  ;;  %739 = vmatpush.msra.mxu1 %v7981_v21 }
 0x11c   :  { %759 = vmatpush.msra.mxu2 %v7982_v22  ;;  %779 = vmatpush.msra.mxu3 %v7983_v23 }
 0x11d   :  { %719 = vmatpush.msra.mxu0 %v7980_v20  ;;  %740 = vmatpush.msra.mxu1 %v7985_v25 }
 0x11e   :  { %760 = vmatpush.msra.mxu2 %v7986_v26  ;;  %780 = vmatpush.msra.mxu3 %v7987_v27 }
 0x11f   :  { %720 = vmatpush.msra.mxu0 %v7984_v24  ;;  %741 = vmatpush.msra.mxu1 %v7989_v29 }
 0x120   :  { %761 = vmatpush.msra.mxu2 %v7990_v31  ;;  %781 = vmatpush.msra.mxu3 %v7991_v32 }
 0x121   :  { %721 = vmatpush.msra.mxu0 %v7988_v28  ;;  %742 = vmatpush.msra.mxu1 %v7993_v34 }
 0x122   :  { %762 = vmatpush.msra.mxu2 %v7994_v35  ;;  %782 = vmatpush.msra.mxu3 %v7995_v36  ;;  %v8017_v35 = vld [vmem:[#allocation99_spill] sm:$0xff]  ;;  %v8018_v36 = vld [vmem:[#allocation100_spill] sm:$0xff] }
 0x123   :  { %722 = vmatpush.msra.mxu0 %v7992_v33  ;;  %743 = vmatpush.msra.mxu1 %v7997_v38  ;;  %v8020_v38 = vld [vmem:[#allocation102_spill] sm:$0xff] }
 0x124   :  { %763 = vmatpush.msra.mxu2 %v7998_v39  ;;  %783 = vmatpush.msra.mxu3 %v7999_v40  ;;  %v8021_v39 = vld [vmem:[#allocation103_spill] sm:$0xff]  ;;  %v8022_v40 = vld [vmem:[#allocation104_spill] sm:$0xff] }
 0x125   :  { %723 = vmatpush.msra.mxu0 %v7996_v37  ;;  %744 = vmatpush.msra.mxu1 %v8001_v42  ;;  %v8019_v37 = vld [vmem:[#allocation101_spill] sm:$0xff]  ;;  %v8024_v42 = vld [vmem:[#allocation106_spill] sm:$0xff] }
 0x126   :  { %764 = vmatpush.msra.mxu2 %v8002_v43  ;;  %784 = vmatpush.msra.mxu3 %v8003_v44  ;;  %v8025_v43 = vld [vmem:[#allocation107_spill] sm:$0xff]  ;;  %v8026_v44 = vld [vmem:[#allocation108_spill] sm:$0xff] }
 0x127   :  { %724 = vmatpush.msra.mxu0 %v8000_v41  ;;  %745 = vmatpush.msra.mxu1 %v8005_v49  ;;  %v8023_v41 = vld [vmem:[#allocation105_spill] sm:$0xff]  ;;  %v8028_v49 = vld [vmem:[#allocation110_spill] sm:$0xff] }
 0x128   :  { %765 = vmatpush.msra.mxu2 %v8006_v51  ;;  %785 = vmatpush.msra.mxu3 %v8007_v53  ;;  %v8029_v51 = vld [vmem:[#allocation111_spill] sm:$0xff]  ;;  %v8030_v53 = vld [vmem:[#allocation112_spill] sm:$0xff] }
 0x129   :  { %725 = vmatpush.msra.mxu0 %v8004_v47  ;;  %746 = vmatpush.msra.mxu1 %v8009_v56  ;;  %v8027_v47 = vld [vmem:[#allocation109_spill] sm:$0xff]  ;;  %v8032_v56 = vld [vmem:[#allocation114_spill] sm:$0xff] }
 0x12a   :  { %766 = vmatpush.msra.mxu2 %v8010_v63  ;;  %786 = vmatpush.msra.mxu3 %v8011_v59  ;;  %v8033_v63 = vld [vmem:[#allocation115_spill] sm:$0xff]  ;;  %v8034_v59 = vld [vmem:[#allocation116_spill] sm:$0xff] }
 0x12b   :  { %726 = vmatpush.msra.mxu0 %v8008_v60  ;;  %v8031_v60 = vld [vmem:[#allocation113_spill] sm:$0xff] }
 0x186   :  { %v531_v5 = vpop.f32.mrf.mxu0  ;;  %v551_v6 = vpop.f32.mrf.mxu1 }
 0x187   :  { %v594_v7 = vadd.f32 %v531_v5, %v208_v2  ;;  %v595_v8 = vadd.f32 %v551_v6, %v228_v4  ;;  %v8037_v2 = vld [vmem:[#allocation119_spill] sm:$0xff]  ;;  %v8040_v4 = vld [vmem:[#allocation122_spill] sm:$0xff]  ;;  %v8042_v6 = vld [vmem:[#allocation124_spill] sm:$0xff] }
 0x188   :  { %v8041_v5 = vld [vmem:[#allocation123_spill] sm:$0xff] }
 0x189   :  { %v598_v11 = vmul.f32 0.5, %v594_v7  ;;  %v602_v12 = vmul.f32 0.5, %v595_v8  ;;  %v8043_v7 = vld [vmem:[#allocation125_spill] sm:$0xff]  ;;  %v8044_v8 = vld [vmem:[#allocation126_spill] sm:$0xff] }
 0x18b   :  { %2801 = vtanh.f32 %v598_v11  ;;  %v8045_v11 = vld [vmem:[#allocation127_spill] sm:$0xff] }
 0x18c   :  { %2803 = vtanh.f32 %v602_v12  ;;  %v8046_v12 = vld [vmem:[#allocation128_spill] sm:$0xff] }
 0x18d   :  { %v571_v15 = vpop.f32.mrf.mxu2  ;;  %v591_v16 = vpop.f32.mrf.mxu3 }
 0x18e   :  { %v596_v18 = vadd.f32 %v571_v15, %v248_v13  ;;  %v597_v19 = vadd.f32 %v591_v16, %v268_v14  ;;  %v8047_v13 = vld [vmem:[#allocation129_spill] sm:$0xff]  ;;  %v8048_v14 = vld [vmem:[#allocation130_spill] sm:$0xff]  ;;  %v8049_v15 = vld [vmem:[#allocation131_spill] sm:$0xff] }
 0x18f   :  { %v8050_v16 = vld [vmem:[#allocation132_spill] sm:$0xff] }
 0x190   :  { %2805 = vtanh.f32 %v596_v18  ;;  %v607_v20 = vmul.f32 0.5, %v597_v19  ;;  %v8051_v18 = vld [vmem:[#allocation133_spill] sm:$0xff]  ;;  %v8052_v19 = vld [vmem:[#allocation134_spill] sm:$0xff] }
 0x191   :  { %v2802_v21 = vpop.eup %2801 }
 0x192   :  { %v2804_v22 = vpop.eup %2803  ;;  %v600_v23 = vmul.f32 0.5, %v2802_v21  ;;  %2807 = vtanh.f32 %v607_v20  ;;  %v8053_v20 = vld [vmem:[#allocation135_spill] sm:$0xff]  ;;  %v8054_v21 = vld [vmem:[#allocation136_spill] sm:$0xff] }
 0x193   :  { %v604_v24 = vmul.f32 0.5, %v2804_v22  ;;  %v8055_v22 = vld [vmem:[#allocation137_spill] sm:$0xff] }
 0x194   :  { %v601_v25 = vadd.f32 0.5, %v600_v23  ;;  %v8056_v23 = vld [vmem:[#allocation138_spill] sm:$0xff] }
 0x195   :  { %v605_v26 = vadd.f32 0.5, %v604_v24  ;;  %v8057_v24 = vld [vmem:[#allocation139_spill] sm:$0xff] }
 0x196   :  { %v2806_v27 = vpop.eup %2805 }
 0x197   :  { %v611_v28 = vmul.f32 0.0, %v605_v26  ;;  %v612_v50 = vmul.f32 %v2806_v27, %v601_v25  ;;  %v8058_v25 = vld [vmem:[#allocation140_spill] sm:$0xff]  ;;  %v8059_v26 = vld [vmem:[#allocation141_spill] sm:$0xff]  ;;  %v8060_v27 = vld [vmem:[#allocation142_spill] sm:$0xff] }
 0x198   :  { %v2808_v29 = vpop.eup %2807 }
 0x199   :  { %v4513_v31 = vadd.f32 %v612_v50, %v611_v28  ;;  %v609_v48 = vmul.f32 0.5, %v2808_v29  ;;  %v8061_v28 = vld [vmem:[#allocation144_spill] sm:$0xff]  ;;  %v8062_v50 = vld [vmem:[#allocation145_spill] sm:$0xff]  ;;  %v8063_v29 = vld [vmem:[#allocation146_spill] sm:$0xff] }
 0x19b   :  { %2809 = vtanh.f32 %v4513_v31  ;;  %v610_v32 = vadd.f32 0.5, %v609_v48  ;;  %v8064_v48 = vld [vmem:[#allocation149_spill] sm:$0xff] }
 0x1a1   :  { %v2810_v33 = vpop.eup %2809 }
 0x1a2   :  { %v615_v34 = vmul.f32 %v2810_v33, %v610_v32  ;;  %v8065_v32 = vld [vmem:[#allocation151_spill] sm:$0xff]  ;;  %v8066_v33 = vld [vmem:[#allocation152_spill] sm:$0xff] }
 0x1a4   :  { %632 = vmatmul.f32.vlgmr.msrb.gmra.mxu0 %v615_v34  ;;  %652 = vmatmul.f32.vlgmr.msrb.gmra.mxu1 %v615_v34 }
 0x1a5   :  { %672 = vmatmul.f32.vlgmr.msrb.gmra.mxu2 %v615_v34  ;;  %692 = vmatmul.f32.vlgmr.msrb.gmra.mxu3 %v615_v34  ;;  %v8067_v34 = vld [vmem:[#allocation153_spill] sm:$0xff] }
 0x1a6   :  { %813 = vmatpush.msrb.mxu0 %v8017_v35  ;;  %833 = vmatpush.msrb.mxu1 %v8018_v36  ;;  %v8068_v35 = vld [vmem:[#allocation154_spill] sm:$0xff]  ;;  %v8069_v36 = vld [vmem:[#allocation156_spill] sm:$0xff] }
 0x1a7   :  { %853 = vmatpush.msrb.mxu2 %v8019_v37  ;;  %873 = vmatpush.msrb.mxu3 %v8020_v38  ;;  %v8070_v37 = vld [vmem:[#allocation157_spill] sm:$0xff]  ;;  %v8071_v38 = vld [vmem:[#allocation158_spill] sm:$0xff] }
 0x1a8   :  { %814 = vmatpush.msrb.mxu0 %v8021_v39  ;;  %834 = vmatpush.msrb.mxu1 %v8022_v40  ;;  %v8072_v39 = vld [vmem:[#allocation160_spill] sm:$0xff]  ;;  %v8073_v40 = vld [vmem:[#allocation161_spill] sm:$0xff] }
 0x1a9   :  { %854 = vmatpush.msrb.mxu2 %v8023_v41  ;;  %874 = vmatpush.msrb.mxu3 %v8024_v42  ;;  %v8074_v41 = vld [vmem:[#allocation162_spill] sm:$0xff]  ;;  %v8075_v42 = vld [vmem:[#allocation163_spill] sm:$0xff] }
 0x1aa   :  { %815 = vmatpush.msrb.mxu0 %v8025_v43  ;;  %835 = vmatpush.msrb.mxu1 %v8026_v44  ;;  %v8076_v43 = vld [vmem:[#allocation164_spill] sm:$0xff]  ;;  %v8077_v44 = vld [vmem:[#allocation165_spill] sm:$0xff] }
 0x1ab   :  { %855 = vmatpush.msrb.mxu2 %v8027_v47  ;;  %875 = vmatpush.msrb.mxu3 %v8028_v49  ;;  %v4584_v47 = vld [vmem:[#allocation7 + $0x1e0] sm:$0xff]  ;;  %v4587_v49 = vld [vmem:[#allocation7 + $0x1e8] sm:$0xff] }
 0x1ac   :  { %727 = vmatmul.f32.vlgmr.msra.gmra.mxu0 %v4413_v30  ;;  %747 = vmatmul.f32.vlgmr.msra.gmra.mxu1 %v4413_v30 }
 0x1ad   :  { %767 = vmatmul.f32.vlgmr.msra.gmra.mxu2 %v4413_v30  ;;  %787 = vmatmul.f32.vlgmr.msra.gmra.mxu3 %v4413_v30  ;;  %v8039_v30 = vld [vmem:[#allocation121_spill] sm:$0xff] }
 0x1ae   :  { %816 = vmatpush.msrb.mxu0 %v8029_v51  ;;  %836 = vmatpush.msrb.mxu1 %v8030_v53  ;;  %v4593_v51 = vld [vmem:[#allocation7 + $0x1f8] sm:$0xff]  ;;  %v4602_v53 = vld [vmem:[#allocation7 + $0x1d0] sm:$0xff] }
 0x1af   :  { %856 = vmatpush.msrb.mxu2 %v8031_v60  ;;  %876 = vmatpush.msrb.mxu3 %v8032_v56  ;;  %v4605_v60 = vld [vmem:[#allocation7 + $0x1d8] sm:$0xff]  ;;  %v4608_v56 = vld [vmem:[#allocation7 + $0x1a0] sm:$0xff] }
 0x1b0   :  { %817 = vmatpush.msrb.mxu0 %v8033_v63  ;;  %837 = vmatpush.msrb.mxu1 %v8034_v59  ;;  %v4611_v63 = vld [vmem:[#allocation7 + $0x1a8] sm:$0xff]  ;;  %v4614_v59 = vld [vmem:[#allocation7 + $0x1b0] sm:$0xff] }
 0x1b1   :  { %857 = vmatpush.msrb.mxu2 %v8035_v54  ;;  %877 = vmatpush.msrb.mxu3 %v8036_v1  ;;  %v4617_v54 = vld [vmem:[#allocation7 + $0x1b8] sm:$0xff]  ;;  %v4620_v1 = vld [vmem:[#allocation7 + $0x180] sm:$0xff] }
 0x1b2   :  { %818 = vmatpush.msrb.mxu0 %v8037_v2  ;;  %838 = vmatpush.msrb.mxu1 %v8038_v3  ;;  %v4623_v2 = vld [vmem:[#allocation7 + $0x188] sm:$0xff]  ;;  %v4626_v3 = vld [vmem:[#allocation7 + $0x190] sm:$0xff] }
 0x1b3   :  { %858 = vmatpush.msrb.mxu2 %v8039_v30  ;;  %878 = vmatpush.msrb.mxu3 %v8040_v4  ;;  %v4629_v30 = vld [vmem:[#allocation7 + $0x198] sm:$0xff]  ;;  %v4632_v4 = vld [vmem:[#allocation7 + $0x160] sm:$0xff] }
 0x1b4   :  { %819 = vmatpush.msrb.mxu0 %v8041_v5  ;;  %839 = vmatpush.msrb.mxu1 %v8042_v6  ;;  %v4635_v5 = vld [vmem:[#allocation7 + $0x168] sm:$0xff]  ;;  %v4638_v6 = vld [vmem:[#allocation7 + $0x170] sm:$0xff] }
 0x1b5   :  { %859 = vmatpush.msrb.mxu2 %v8043_v7  ;;  %879 = vmatpush.msrb.mxu3 %v8044_v8  ;;  %v4641_v7 = vld [vmem:[#allocation7 + $0x178] sm:$0xff]  ;;  %v4644_v8 = vld [vmem:[#allocation7 + $0x140] sm:$0xff] }
 0x1b6   :  { %820 = vmatpush.msrb.mxu0 %v8045_v11  ;;  %840 = vmatpush.msrb.mxu1 %v8046_v12  ;;  %v4647_v11 = vld [vmem:[#allocation7 + $0x148] sm:$0xff]  ;;  %v4650_v12 = vld [vmem:[#allocation7 + $0x150] sm:$0xff] }
 0x1b7   :  { %860 = vmatpush.msrb.mxu2 %v8047_v13  ;;  %880 = vmatpush.msrb.mxu3 %v8048_v14  ;;  %v4653_v13 = vld [vmem:[#allocation7 + $0x158] sm:$0xff]  ;;  %v4656_v14 = vld [vmem:[#allocation7 + $0x120] sm:$0xff] }
 0x1b8   :  { %821 = vmatpush.msrb.mxu0 %v8049_v15  ;;  %841 = vmatpush.msrb.mxu1 %v8050_v16  ;;  %v4659_v15 = vld [vmem:[#allocation7 + $0x128] sm:$0xff]  ;;  %v4662_v16 = vld [vmem:[#allocation7 + $0x130] sm:$0xff] }
 0x1b9   :  { %861 = vmatpush.msrb.mxu2 %v8051_v18  ;;  %881 = vmatpush.msrb.mxu3 %v8052_v19  ;;  %v4665_v18 = vld [vmem:[#allocation7 + $0x138] sm:$0xff]  ;;  %v4668_v19 = vld [vmem:[#allocation7 + $0x100] sm:$0xff] }
 0x1ba   :  { %822 = vmatpush.msrb.mxu0 %v8053_v20  ;;  %842 = vmatpush.msrb.mxu1 %v8054_v21  ;;  %v4671_v20 = vld [vmem:[#allocation7 + $0x108] sm:$0xff]  ;;  %v4674_v21 = vld [vmem:[#allocation7 + $0x110] sm:$0xff] }
 0x1bb   :  { %862 = vmatpush.msrb.mxu2 %v8055_v22  ;;  %882 = vmatpush.msrb.mxu3 %v8056_v23  ;;  %v4677_v22 = vld [vmem:[#allocation7 + $0x118] sm:$0xff]  ;;  %v4680_v23 = vld [vmem:[#allocation7 + $0xe0] sm:$0xff] }
 0x1bc   :  { %823 = vmatpush.msrb.mxu0 %v8057_v24  ;;  %843 = vmatpush.msrb.mxu1 %v8058_v25  ;;  %8078 = vst [vmem:[#allocation18_spill] sm:$0xff] %v4680_v23  ;;  %v4683_v24 = vld [vmem:[#allocation7 + $0xe8] sm:$0xff]  ;;  %v4686_v25 = vld [vmem:[#allocation7 + $0xf0] sm:$0xff] }
 0x1bd   :  { %863 = vmatpush.msrb.mxu2 %v8059_v26  ;;  %883 = vmatpush.msrb.mxu3 %v8060_v27  ;;  %8079 = vst [vmem:[#allocation19_spill] sm:$0xff] %v4683_v24  ;;  %v4689_v26 = vld [vmem:[#allocation7 + $0xf8] sm:$0xff]  ;;  %v4692_v27 = vld [vmem:[#allocation7 + $0xc0] sm:$0xff] }
 0x1be   :  { %824 = vmatpush.msrb.mxu0 %v8061_v28  ;;  %844 = vmatpush.msrb.mxu1 %v8062_v50  ;;  %8080 = vst [vmem:[#allocation20_spill] sm:$0xff] %v4686_v25  ;;  %v4695_v28 = vld [vmem:[#allocation7 + $0xc8] sm:$0xff]  ;;  %v4698_v50 = vld [vmem:[#allocation7 + $0xd0] sm:$0xff] }
 0x1bf   :  { %864 = vmatpush.msrb.mxu2 %v8063_v29  ;;  %884 = vmatpush.msrb.mxu3 %v8064_v48  ;;  %8081 = vst [vmem:[#allocation21_spill] sm:$0xff] %v4689_v26  ;;  %v4701_v29 = vld [vmem:[#allocation7 + $0xd8] sm:$0xff]  ;;  %v4704_v48 = vld [vmem:[#allocation7 + $0xa0] sm:$0xff] }
 0x1c0   :  { %825 = vmatpush.msrb.mxu0 %v8065_v32  ;;  %845 = vmatpush.msrb.mxu1 %v8066_v33  ;;  %8082 = vst [vmem:[#allocation22_spill] sm:$0xff] %v4692_v27  ;;  %v4707_v32 = vld [vmem:[#allocation7 + $0xa8] sm:$0xff]  ;;  %v4710_v33 = vld [vmem:[#allocation7 + $0xb0] sm:$0xff] }
 0x1c1   :  { %865 = vmatpush.msrb.mxu2 %v8067_v34  ;;  %885 = vmatpush.msrb.mxu3 %v8068_v35  ;;  %8083 = vst [vmem:[#allocation23_spill] sm:$0xff] %v4695_v28  ;;  %v4713_v34 = vld [vmem:[#allocation7 + $0xb8] sm:$0xff]  ;;  %v4716_v35 = vld [vmem:[#allocation7 + $0x80] sm:$0xff] }
 0x1c2   :  { %826 = vmatpush.msrb.mxu0 %v8069_v36  ;;  %846 = vmatpush.msrb.mxu1 %v8070_v37  ;;  %8084 = vst [vmem:[#allocation24_spill] sm:$0xff] %v4698_v50  ;;  %v4719_v36 = vld [vmem:[#allocation7 + $0x88] sm:$0xff]  ;;  %v4722_v37 = vld [vmem:[#allocation7 + $0x90] sm:$0xff] }
 0x1c3   :  { %866 = vmatpush.msrb.mxu2 %v8071_v38  ;;  %886 = vmatpush.msrb.mxu3 %v8072_v39  ;;  %8085 = vst [vmem:[#allocation25_spill] sm:$0xff] %v4701_v29  ;;  %v4725_v38 = vld [vmem:[#allocation7 + $0x98] sm:$0xff]  ;;  %v4728_v39 = vld [vmem:[#allocation7 + $0x60] sm:$0xff] }
 0x1c4   :  { %827 = vmatpush.msrb.mxu0 %v8073_v40  ;;  %847 = vmatpush.msrb.mxu1 %v4313_v62  ;;  %v4590_v62 = vld [vmem:[#allocation7 + $0x1f0] sm:$0xff]  ;;  %8086 = vst [vmem:[#allocation26_spill] sm:$0xff] %v4704_v48  ;;  %v4731_v40 = vld [vmem:[#allocation7 + $0x68] sm:$0xff] }
 0x1c5   :  { %867 = vmatpush.msrb.mxu2 %v8074_v41  ;;  %887 = vmatpush.msrb.mxu3 %v8075_v42  ;;  %8087 = vst [vmem:[#allocation27_spill] sm:$0xff] %v4707_v32  ;;  %v4734_v41 = vld [vmem:[#allocation7 + $0x70] sm:$0xff]  ;;  %v4737_v42 = vld [vmem:[#allocation7 + $0x78] sm:$0xff] }
 0x1c6   :  { %828 = vmatpush.msrb.mxu0 %v8076_v43  ;;  %848 = vmatpush.msrb.mxu1 %v4327_v61  ;;  %v4596_v61 = vld [vmem:[#allocation7 + $0x1c0] sm:$0xff]  ;;  %8088 = vst [vmem:[#allocation28_spill] sm:$0xff] %v4710_v33 }
 0x1c7   :  { %868 = vmatpush.msrb.mxu2 %v8077_v44  ;;  %888 = vmatpush.msrb.mxu3 %v4339_v58  ;;  %v4599_v58 = vld [vmem:[#allocation7 + $0x1c8] sm:$0xff]  ;;  %8089 = vst [vmem:[#allocation29_spill] sm:$0xff] %v4713_v34  ;;  %v4740_v43 = vld [vmem:[#allocation7 + $0x40] sm:$0xff] }
 0x1c8   :  { %915 = vmatpush.msra.mxu0 %v4584_v47  ;;  %935 = vmatpush.msra.mxu1 %v4587_v49  ;;  %8090 = vst [vmem:[#allocation30_spill] sm:$0xff] %v4716_v35  ;;  %v4743_v44 = vld [vmem:[#allocation7 + $0x48] sm:$0xff] }
 0x1c9   :  { %955 = vmatpush.msra.mxu2 %v4590_v62  ;;  %975 = vmatpush.msra.mxu3 %v4593_v51  ;;  %8091 = vst [vmem:[#allocation31_spill] sm:$0xff] %v4719_v36 }
 0x1ca   :  { %916 = vmatpush.msra.mxu0 %v4596_v61  ;;  %936 = vmatpush.msra.mxu1 %v4599_v58  ;;  %8092 = vst [vmem:[#allocation32_spill] sm:$0xff] %v4722_v37 }
 0x1cb   :  { %956 = vmatpush.msra.mxu2 %v4602_v53  ;;  %976 = vmatpush.msra.mxu3 %v4605_v60  ;;  %8093 = vst [vmem:[#allocation33_spill] sm:$0xff] %v4725_v38 }
 0x1cc   :  { %917 = vmatpush.msra.mxu0 %v4608_v56  ;;  %937 = vmatpush.msra.mxu1 %v4611_v63  ;;  %8094 = vst [vmem:[#allocation34_spill] sm:$0xff] %v4728_v39 }
 0x1cd   :  { %957 = vmatpush.msra.mxu2 %v4614_v59  ;;  %977 = vmatpush.msra.mxu3 %v4617_v54  ;;  %8095 = vst [vmem:[#allocation35_spill] sm:$0xff] %v4731_v40 }
 0x1ce   :  { %918 = vmatpush.msra.mxu0 %v4620_v1  ;;  %938 = vmatpush.msra.mxu1 %v4623_v2  ;;  %8096 = vst [vmem:[#allocation36_spill] sm:$0xff] %v4734_v41 }
 0x1cf   :  { %958 = vmatpush.msra.mxu2 %v4626_v3  ;;  %978 = vmatpush.msra.mxu3 %v4629_v30  ;;  %8097 = vst [vmem:[#allocation37_spill] sm:$0xff] %v4737_v42 }
 0x1d0   :  { %919 = vmatpush.msra.mxu0 %v4632_v4  ;;  %939 = vmatpush.msra.mxu1 %v4635_v5  ;;  %8098 = vst [vmem:[#allocation38_spill] sm:$0xff] %v4740_v43 }
 0x1d1   :  { %959 = vmatpush.msra.mxu2 %v4638_v6  ;;  %979 = vmatpush.msra.mxu3 %v4641_v7  ;;  %8099 = vst [vmem:[#allocation39_spill] sm:$0xff] %v4743_v44 }
 0x1d2   :  { %920 = vmatpush.msra.mxu0 %v4644_v8  ;;  %940 = vmatpush.msra.mxu1 %v4647_v11 }
 0x1d3   :  { %960 = vmatpush.msra.mxu2 %v4650_v12  ;;  %980 = vmatpush.msra.mxu3 %v4653_v13 }
 0x1d4   :  { %921 = vmatpush.msra.mxu0 %v4656_v14  ;;  %941 = vmatpush.msra.mxu1 %v4659_v15 }
 0x1d5   :  { %961 = vmatpush.msra.mxu2 %v4662_v16  ;;  %981 = vmatpush.msra.mxu3 %v4665_v18 }
 0x1d6   :  { %922 = vmatpush.msra.mxu0 %v4668_v19  ;;  %942 = vmatpush.msra.mxu1 %v4671_v20 }
 0x1d7   :  { %962 = vmatpush.msra.mxu2 %v4674_v21  ;;  %982 = vmatpush.msra.mxu3 %v4677_v22 }
 0x1d8   :  { %923 = vmatpush.msra.mxu0 %v4680_v23  ;;  %943 = vmatpush.msra.mxu1 %v4683_v24 }
 0x1d9   :  { %963 = vmatpush.msra.mxu2 %v4686_v25  ;;  %983 = vmatpush.msra.mxu3 %v4689_v26 }
 0x1da   :  { %924 = vmatpush.msra.mxu0 %v4692_v27  ;;  %944 = vmatpush.msra.mxu1 %v4695_v28 }
 0x1db   :  { %964 = vmatpush.msra.mxu2 %v4698_v50  ;;  %984 = vmatpush.msra.mxu3 %v4701_v29 }
 0x1dc   :  { %925 = vmatpush.msra.mxu0 %v4704_v48  ;;  %945 = vmatpush.msra.mxu1 %v4707_v32 }
 0x1dd   :  { %965 = vmatpush.msra.mxu2 %v4710_v33  ;;  %985 = vmatpush.msra.mxu3 %v4713_v34  ;;  %v8112_v33 = vld [vmem:[#allocation155_spill] sm:$0xff] }
 0x1de   :  { %926 = vmatpush.msra.mxu0 %v4716_v35  ;;  %946 = vmatpush.msra.mxu1 %v4719_v36 }
 0x1df   :  { %966 = vmatpush.msra.mxu2 %v4722_v37  ;;  %986 = vmatpush.msra.mxu3 %v4725_v38  ;;  %v8110_v37 = vld [vmem:[#allocation143_spill] sm:$0xff] }
 0x1e0   :  { %927 = vmatpush.msra.mxu0 %v4728_v39  ;;  %947 = vmatpush.msra.mxu1 %v4731_v40  ;;  %v4746_v39 = vld [vmem:[#allocation7 + $0x50] sm:$0xff]  ;;  %v4749_v40 = vld [vmem:[#allocation7 + $0x58] sm:$0xff] }
 0x1e1   :  { %967 = vmatpush.msra.mxu2 %v4734_v41  ;;  %987 = vmatpush.msra.mxu3 %v4737_v42  ;;  %8100 = vst [vmem:[#allocation40_spill] sm:$0xff] %v4746_v39  ;;  %v4752_v41 = vld [vmem:[#allocation7 + $0x20] sm:$0xff]  ;;  %v4755_v42 = vld [vmem:[#allocation7 + $0x28] sm:$0xff] }
 0x1e2   :  { %928 = vmatpush.msra.mxu0 %v4740_v43  ;;  %948 = vmatpush.msra.mxu1 %v4743_v44  ;;  %8101 = vst [vmem:[#allocation41_spill] sm:$0xff] %v4749_v40  ;;  %v4758_v43 = vld [vmem:[#allocation7 + $0x30] sm:$0xff]  ;;  %v4761_v44 = vld [vmem:[#allocation7 + $0x38] sm:$0xff] }
 0x1e3   :  { %968 = vmatpush.msra.mxu2 %v4746_v39  ;;  %988 = vmatpush.msra.mxu3 %v4749_v40  ;;  %8102 = vst [vmem:[#allocation42_spill] sm:$0xff] %v4752_v41  ;;  %v4764_v39 = vld [vmem:[#allocation7] sm:$0xff]  ;;  %v4767_v40 = vld [vmem:[#allocation7 + $0x8] sm:$0xff] }
 0x1e4   :  { %929 = vmatpush.msra.mxu0 %v4752_v41  ;;  %8103 = vst [vmem:[#allocation43_spill] sm:$0xff] %v4755_v42  ;;  %949 = vmatpush.msra.mxu1 %v4755_v42  ;;  %v4770_v41 = vld [vmem:[#allocation7 + $0x10] sm:$0xff]  ;;  %v4773_v42 = vld [vmem:[#allocation7 + $0x18] sm:$0xff] }
 0x1e5   :  { %8104 = vst [vmem:[#allocation44_spill] sm:$0xff] %v4758_v43  ;;  %969 = vmatpush.msra.mxu2 %v4758_v43  ;;  %989 = vmatpush.msra.mxu3 %v4761_v44 }
 0x1e6   :  { %8105 = vst [vmem:[#allocation45_spill] sm:$0xff] %v4761_v44  ;;  %930 = vmatpush.msra.mxu0 %v4764_v39  ;;  %950 = vmatpush.msra.mxu1 %v4767_v40  ;;  %v701_v44 = vpop.permute.xlu0 %700 }
 0x1e7   :  { %8106 = vst [vmem:[#allocation46_spill] sm:$0xff] %v4764_v39  ;;  %970 = vmatpush.msra.mxu2 %v4770_v41  ;;  %990 = vmatpush.msra.mxu3 %v4773_v42  ;;  %v703_v36 = vmul.f32 %v701_v44, %v8110_v37  ;;  %v8111_v39 = vld [vmem:[#allocation148_spill] sm:$0xff]  ;;  %v705_v27 = vmul.f32 %v701_v44, %v4332_v45 }
 0x1e8   :  { %8107 = vst [vmem:[#allocation47_spill] sm:$0xff] %v4767_v40  ;;  %v704_v35 = vmul.f32 %v701_v44, %v8111_v39  ;;  %v706_v26 = vmul.f32 %v701_v44, %v4342_v55 }
 0x1e9   :  { %8108 = vst [vmem:[#allocation48_spill] sm:$0xff] %v4770_v41  ;;  %v707_v32 = vadd.f32 %v703_v36, %v8112_v33  ;;  %v8113_v41 = vld [vmem:[#allocation159_spill] sm:$0xff]  ;;  %v709_v39 = vadd.f32 %v705_v27, %v4350_v57 }
 0x1ea   :  { %8109 = vst [vmem:[#allocation49_spill] sm:$0xff] %v4773_v42  ;;  %v708_v48 = vadd.f32 %v704_v35, %v8113_v41  ;;  %v710_v24 = vadd.f32 %v706_v26, %v4355_v46 }
 0x221   :  { %v4776_v43 = vpop.f32.mrf.mxu0  ;;  %v4778_v38 = vpop.f32.mrf.mxu1 }
 0x228   :  { %v4782_v34 = vpop.f32.mrf.mxu2  ;;  %v4784_v40 = vpop.f32.mrf.mxu3 }
 0x229   :  { %v728_v29 = vpop.f32.mrf.mxu0  ;;  %v748_v50 = vpop.f32.mrf.mxu1 }
 0x22a   :  { %v791_v42 = vadd.f32 %v728_v29, %v707_v32  ;;  %v792_v28 = vadd.f32 %v748_v50, %v708_v48 }
 0x22c   :  { %v795_v25 = vmul.f32 0.5, %v791_v42  ;;  %v799_v37 = vmul.f32 0.5, %v792_v28 }
 0x22e   :  { %2811 = vtanh.f32 %v795_v25 }
 0x22f   :  { %2813 = vtanh.f32 %v799_v37 }
 0x230   :  { %v768_v23 = vpop.f32.mrf.mxu2  ;;  %v788_v36 = vpop.f32.mrf.mxu3 }
 0x231   :  { %v793_v33 = vadd.f32 %v768_v23, %v709_v39  ;;  %v794_v35 = vadd.f32 %v788_v36, %v710_v24  ;;  %v4805_v39 = vld [vmem:[#allocation2 + $0x1e8] sm:$0xff]  ;;  %v4811_v36 = vld [vmem:[#allocation2 + $0x1f8] sm:$0xff] }
 0x233   :  { %2815 = vtanh.f32 %v793_v33  ;;  %v804_v41 = vmul.f32 0.5, %v794_v35  ;;  %v4814_v35 = vld [vmem:[#allocation2 + $0x1c0] sm:$0xff] }
 0x234   :  { %v2812_v29 = vpop.eup %2811 }
 0x235   :  { %v2814_v50 = vpop.eup %2813  ;;  %v797_v48 = vmul.f32 0.5, %v2812_v29  ;;  %2817 = vtanh.f32 %v804_v41  ;;  %v4808_v41 = vld [vmem:[#allocation2 + $0x1f0] sm:$0xff]  ;;  %v4817_v29 = vld [vmem:[#allocation2 + $0x1c8] sm:$0xff] }
 0x236   :  { %v801_v32 = vmul.f32 0.5, %v2814_v50  ;;  %v4820_v50 = vld [vmem:[#allocation2 + $0x1d0] sm:$0xff] }
 0x237   :  { %v798_v44 = vadd.f32 0.5, %v797_v48  ;;  %v4823_v48 = vld [vmem:[#allocation2 + $0x1d8] sm:$0xff] }
 0x238   :  { %v802_v42 = vadd.f32 0.5, %v801_v32  ;;  %v4826_v32 = vld [vmem:[#allocation2 + $0x1a0] sm:$0xff] }
 0x239   :  { %v2816_v28 = vpop.eup %2815  ;;  %8114 = vst [vmem:[#allocation50_spill] sm:$0xff] %v4826_v32 }
 0x23a   :  { %v808_v25 = vmul.f32 %v802_v42, %v4392_v17  ;;  %v809_v37 = vmul.f32 %v2816_v28, %v798_v44  ;;  %v4802_v17 = vld [vmem:[#allocation2 + $0x1e0] sm:$0xff]  ;;  %v4829_v44 = vld [vmem:[#allocation2 + $0x1a8] sm:$0xff]  ;;  %v4832_v42 = vld [vmem:[#allocation2 + $0x1b0] sm:$0xff] }
 0x23b   :  { %v2818_v27 = vpop.eup %2817  ;;  %8115 = vst [vmem:[#allocation51_spill] sm:$0xff] %v4829_v44  ;;  %v4835_v28 = vld [vmem:[#allocation2 + $0x1b8] sm:$0xff] }
 0x23c   :  { %v4793_v57 = vadd.f32 %v809_v37, %v808_v25  ;;  %v806_v23 = vmul.f32 0.5, %v2818_v27  ;;  %8116 = vst [vmem:[#allocation52_spill] sm:$0xff] %v4832_v42  ;;  %v4838_v25 = vld [vmem:[#allocation2 + $0x180] sm:$0xff]  ;;  %v4841_v37 = vld [vmem:[#allocation2 + $0x188] sm:$0xff]  ;;  %v4844_v27 = vld [vmem:[#allocation2 + $0x190] sm:$0xff] }
 0x23d   :  { %8117 = vst [vmem:[#allocation53_spill] sm:$0xff] %v4835_v28 }
 0x23e   :  { %2819 = vtanh.f32 %v4793_v57  ;;  %v807_v24 = vadd.f32 0.5, %v806_v23  ;;  %8118 = vst [vmem:[#allocation54_spill] sm:$0xff] %v4838_v25  ;;  %v4847_v23 = vld [vmem:[#allocation2 + $0x198] sm:$0xff] }
 0x23f   :  { %8119 = vst [vmem:[#allocation55_spill] sm:$0xff] %v4841_v37 }
 0x240   :  { %8120 = vst [vmem:[#allocation56_spill] sm:$0xff] %v4844_v27 }
 0x241   :  { %8121 = vst [vmem:[#allocation57_spill] sm:$0xff] %v4847_v23 }
 0x244   :  { %v2820_v26 = vpop.eup %2819 }
 0x245   :  { %v4796_v33 = vmul.f32 %v2820_v26, %v807_v24  ;;  %v4850_v24 = vld [vmem:[#allocation2 + $0x160] sm:$0xff]  ;;  %v4853_v26 = vld [vmem:[#allocation2 + $0x168] sm:$0xff] }
 0x246   :  { %8122 = vst [vmem:[#allocation58_spill] sm:$0xff] %v4850_v24 }
 0x247   :  { %829 = vmatmul.f32.vlgmr.msrb.gmra.mxu0 %v4796_v33  ;;  %849 = vmatmul.f32.vlgmr.msrb.gmra.mxu1 %v4796_v33  ;;  %8123 = vst [vmem:[#allocation59_spill] sm:$0xff] %v4853_v26 }
 0x248   :  { %869 = vmatmul.f32.vlgmr.msrb.gmra.mxu2 %v4796_v33  ;;  %889 = vmatmul.f32.vlgmr.msrb.gmra.mxu3 %v4796_v33 }
 0x249   :  { %1010 = vmatpush.msrb.mxu0 %v4802_v17  ;;  %1030 = vmatpush.msrb.mxu1 %v4805_v39 }
 0x24a   :  { %1050 = vmatpush.msrb.mxu2 %v4808_v41  ;;  %1070 = vmatpush.msrb.mxu3 %v4811_v36 }
 0x24b   :  { %1011 = vmatpush.msrb.mxu0 %v4814_v35  ;;  %1031 = vmatpush.msrb.mxu1 %v4817_v29 }
 0x24c   :  { %1051 = vmatpush.msrb.mxu2 %v4820_v50  ;;  %1071 = vmatpush.msrb.mxu3 %v4823_v48 }
 0x24d   :  { %1012 = vmatpush.msrb.mxu0 %v4826_v32  ;;  %1032 = vmatpush.msrb.mxu1 %v4829_v44 }
 0x24e   :  { %1052 = vmatpush.msrb.mxu2 %v4832_v42  ;;  %1072 = vmatpush.msrb.mxu3 %v4835_v28 }
 0x24f   :  { %1013 = vmatpush.msrb.mxu0 %v4838_v25  ;;  %1033 = vmatpush.msrb.mxu1 %v4841_v37  ;;  %v4856_v25 = vld [vmem:[#allocation2 + $0x170] sm:$0xff]  ;;  %v4859_v37 = vld [vmem:[#allocation2 + $0x178] sm:$0xff] }
 0x250   :  { %1053 = vmatpush.msrb.mxu2 %v4844_v27  ;;  %1073 = vmatpush.msrb.mxu3 %v4847_v23  ;;  %8124 = vst [vmem:[#allocation60_spill] sm:$0xff] %v4856_v25  ;;  %v4862_v27 = vld [vmem:[#allocation2 + $0x140] sm:$0xff]  ;;  %v4865_v23 = vld [vmem:[#allocation2 + $0x148] sm:$0xff] }
 0x251   :  { %1014 = vmatpush.msrb.mxu0 %v4850_v24  ;;  %1034 = vmatpush.msrb.mxu1 %v4853_v26  ;;  %8125 = vst [vmem:[#allocation61_spill] sm:$0xff] %v4859_v37  ;;  %v4868_v24 = vld [vmem:[#allocation2 + $0x150] sm:$0xff]  ;;  %v4871_v26 = vld [vmem:[#allocation2 + $0x158] sm:$0xff] }
 0x252   :  { %1054 = vmatpush.msrb.mxu2 %v4856_v25  ;;  %1074 = vmatpush.msrb.mxu3 %v4859_v37  ;;  %8126 = vst [vmem:[#allocation62_spill] sm:$0xff] %v4862_v27  ;;  %v4874_v25 = vld [vmem:[#allocation2 + $0x120] sm:$0xff]  ;;  %v4877_v37 = vld [vmem:[#allocation2 + $0x128] sm:$0xff] }
 0x253   :  { %1015 = vmatpush.msrb.mxu0 %v4862_v27  ;;  %8127 = vst [vmem:[#allocation63_spill] sm:$0xff] %v4865_v23  ;;  %1035 = vmatpush.msrb.mxu1 %v4865_v23  ;;  %v4880_v27 = vld [vmem:[#allocation2 + $0x130] sm:$0xff]  ;;  %v4883_v23 = vld [vmem:[#allocation2 + $0x138] sm:$0xff] }
 0x254   :  { %8128 = vst [vmem:[#allocation64_spill] sm:$0xff] %v4868_v24  ;;  %1055 = vmatpush.msrb.mxu2 %v4868_v24  ;;  %1075 = vmatpush.msrb.mxu3 %v4871_v26  ;;  %v4886_v24 = vld [vmem:[#allocation2 + $0x100] sm:$0xff] }
 0x255   :  { %8129 = vst [vmem:[#allocation65_spill] sm:$0xff] %v4871_v26  ;;  %1016 = vmatpush.msrb.mxu0 %v4874_v25  ;;  %1036 = vmatpush.msrb.mxu1 %v4877_v37  ;;  %v4889_v26 = vld [vmem:[#allocation2 + $0x108] sm:$0xff] }
 0x256   :  { %8130 = vst [vmem:[#allocation66_spill] sm:$0xff] %v4874_v25  ;;  %1056 = vmatpush.msrb.mxu2 %v4880_v27  ;;  %1076 = vmatpush.msrb.mxu3 %v4883_v23  ;;  %v4892_v25 = vld [vmem:[#allocation2 + $0x110] sm:$0xff] }
 0x257   :  { %8131 = vst [vmem:[#allocation67_spill] sm:$0xff] %v4877_v37  ;;  %1017 = vmatpush.msrb.mxu0 %v4886_v24  ;;  %1037 = vmatpush.msrb.mxu1 %v4889_v26  ;;  %v4895_v37 = vld [vmem:[#allocation2 + $0x118] sm:$0xff] }
 0x258   :  { %8132 = vst [vmem:[#allocation68_spill] sm:$0xff] %v4880_v27  ;;  %1057 = vmatpush.msrb.mxu2 %v4892_v25  ;;  %1077 = vmatpush.msrb.mxu3 %v4895_v37  ;;  %v4898_v27 = vld [vmem:[#allocation2 + $0xe0] sm:$0xff] }
 0x259   :  { %8133 = vst [vmem:[#allocation69_spill] sm:$0xff] %v4883_v23  ;;  %1018 = vmatpush.msrb.mxu0 %v4898_v27  ;;  %v4901_v23 = vld [vmem:[#allocation2 + $0xe8] sm:$0xff] }
 0x25a   :  { %8134 = vst [vmem:[#allocation70_spill] sm:$0xff] %v4886_v24  ;;  %1038 = vmatpush.msrb.mxu1 %v4901_v23  ;;  %v4904_v24 = vld [vmem:[#allocation2 + $0xf0] sm:$0xff] }
 0x25b   :  { %8135 = vst [vmem:[#allocation71_spill] sm:$0xff] %v4889_v26  ;;  %1058 = vmatpush.msrb.mxu2 %v4904_v24  ;;  %v4907_v26 = vld [vmem:[#allocation2 + $0xf8] sm:$0xff] }
 0x25c   :  { %8136 = vst [vmem:[#allocation72_spill] sm:$0xff] %v4892_v25  ;;  %1078 = vmatpush.msrb.mxu3 %v4907_v26  ;;  %v4910_v25 = vld [vmem:[#allocation2 + $0xc0] sm:$0xff] }
 0x25d   :  { %8137 = vst [vmem:[#allocation73_spill] sm:$0xff] %v4895_v37  ;;  %1019 = vmatpush.msrb.mxu0 %v4910_v25  ;;  %v4913_v37 = vld [vmem:[#allocation2 + $0xc8] sm:$0xff] }
 0x25e   :  { %8138 = vst [vmem:[#allocation74_spill] sm:$0xff] %v4898_v27  ;;  %1039 = vmatpush.msrb.mxu1 %v4913_v37  ;;  %v4916_v27 = vld [vmem:[#allocation2 + $0xd0] sm:$0xff] }
 0x25f   :  { %8139 = vst [vmem:[#allocation75_spill] sm:$0xff] %v4901_v23  ;;  %1059 = vmatpush.msrb.mxu2 %v4916_v27  ;;  %v4919_v23 = vld [vmem:[#allocation2 + $0xd8] sm:$0xff] }
 0x260   :  { %8140 = vst [vmem:[#allocation76_spill] sm:$0xff] %v4904_v24  ;;  %1079 = vmatpush.msrb.mxu3 %v4919_v23  ;;  %v4922_v24 = vld [vmem:[#allocation2 + $0xa0] sm:$0xff] }
 0x261   :  { %8141 = vst [vmem:[#allocation77_spill] sm:$0xff] %v4907_v26  ;;  %1020 = vmatpush.msrb.mxu0 %v4922_v24  ;;  %v4925_v26 = vld [vmem:[#allocation2 + $0xa8] sm:$0xff] }
 0x262   :  { %8142 = vst [vmem:[#allocation78_spill] sm:$0xff] %v4910_v25  ;;  %1040 = vmatpush.msrb.mxu1 %v4925_v26  ;;  %v4928_v25 = vld [vmem:[#allocation2 + $0xb0] sm:$0xff] }
 0x263   :  { %8143 = vst [vmem:[#allocation79_spill] sm:$0xff] %v4913_v37  ;;  %1060 = vmatpush.msrb.mxu2 %v4928_v25  ;;  %v4931_v37 = vld [vmem:[#allocation2 + $0xb8] sm:$0xff] }
 0x264   :  { %8144 = vst [vmem:[#allocation80_spill] sm:$0xff] %v4916_v27  ;;  %1080 = vmatpush.msrb.mxu3 %v4931_v37  ;;  %v4934_v27 = vld [vmem:[#allocation2 + $0x80] sm:$0xff] }
 0x265   :  { %8145 = vst [vmem:[#allocation81_spill] sm:$0xff] %v4919_v23  ;;  %1021 = vmatpush.msrb.mxu0 %v4934_v27  ;;  %v4937_v23 = vld [vmem:[#allocation2 + $0x88] sm:$0xff] }
 0x266   :  { %8146 = vst [vmem:[#allocation82_spill] sm:$0xff] %v4922_v24  ;;  %1041 = vmatpush.msrb.mxu1 %v4937_v23  ;;  %v4940_v24 = vld [vmem:[#allocation2 + $0x90] sm:$0xff] }
 0x267   :  { %8147 = vst [vmem:[#allocation83_spill] sm:$0xff] %v4925_v26  ;;  %1061 = vmatpush.msrb.mxu2 %v4940_v24  ;;  %v4943_v26 = vld [vmem:[#allocation2 + $0x98] sm:$0xff] }
 0x268   :  { %8148 = vst [vmem:[#allocation84_spill] sm:$0xff] %v4928_v25  ;;  %1081 = vmatpush.msrb.mxu3 %v4943_v26  ;;  %v4946_v25 = vld [vmem:[#allocation2 + $0x60] sm:$0xff] }
 0x269   :  { %8149 = vst [vmem:[#allocation85_spill] sm:$0xff] %v4931_v37  ;;  %1022 = vmatpush.msrb.mxu0 %v4946_v25  ;;  %v4949_v37 = vld [vmem:[#allocation2 + $0x68] sm:$0xff] }
 0x26a   :  { %8150 = vst [vmem:[#allocation86_spill] sm:$0xff] %v4934_v27  ;;  %1042 = vmatpush.msrb.mxu1 %v4949_v37  ;;  %v4952_v27 = vld [vmem:[#allocation2 + $0x70] sm:$0xff] }
 0x26b   :  { %8151 = vst [vmem:[#allocation87_spill] sm:$0xff] %v4937_v23  ;;  %1062 = vmatpush.msrb.mxu2 %v4952_v27  ;;  %v4955_v23 = vld [vmem:[#allocation2 + $0x78] sm:$0xff] }
 0x26c   :  { %8152 = vst [vmem:[#allocation88_spill] sm:$0xff] %v4940_v24  ;;  %1082 = vmatpush.msrb.mxu3 %v4955_v23  ;;  %v4958_v24 = vld [vmem:[#allocation2 + $0x40] sm:$0xff] }
 0x26d   :  { %8153 = vst [vmem:[#allocation89_spill] sm:$0xff] %v4943_v26  ;;  %1023 = vmatpush.msrb.mxu0 %v4958_v24  ;;  %v4961_v26 = vld [vmem:[#allocation2 + $0x48] sm:$0xff] }
 0x26e   :  { %8154 = vst [vmem:[#allocation90_spill] sm:$0xff] %v4946_v25  ;;  %1043 = vmatpush.msrb.mxu1 %v4961_v26  ;;  %v4964_v25 = vld [vmem:[#allocation2 + $0x50] sm:$0xff] }
 0x26f   :  { %8155 = vst [vmem:[#allocation91_spill] sm:$0xff] %v4949_v37  ;;  %1063 = vmatpush.msrb.mxu2 %v4964_v25  ;;  %v4967_v37 = vld [vmem:[#allocation2 + $0x58] sm:$0xff] }
 0x270   :  { %8156 = vst [vmem:[#allocation92_spill] sm:$0xff] %v4952_v27  ;;  %1083 = vmatpush.msrb.mxu3 %v4967_v37  ;;  %v4970_v27 = vld [vmem:[#allocation2 + $0x20] sm:$0xff] }
 0x271   :  { %8157 = vst [vmem:[#allocation93_spill] sm:$0xff] %v4955_v23  ;;  %1024 = vmatpush.msrb.mxu0 %v4970_v27  ;;  %v4973_v23 = vld [vmem:[#allocation2 + $0x28] sm:$0xff] }
 0x272   :  { %8158 = vst [vmem:[#allocation94_spill] sm:$0xff] %v4958_v24  ;;  %1044 = vmatpush.msrb.mxu1 %v4973_v23  ;;  %v4976_v24 = vld [vmem:[#allocation2 + $0x30] sm:$0xff] }
 0x273   :  { %8159 = vst [vmem:[#allocation95_spill] sm:$0xff] %v4961_v26  ;;  %1064 = vmatpush.msrb.mxu2 %v4976_v24  ;;  %v4979_v26 = vld [vmem:[#allocation2 + $0x38] sm:$0xff] }
 0x274   :  { %8160 = vst [vmem:[#allocation96_spill] sm:$0xff] %v4964_v25  ;;  %1084 = vmatpush.msrb.mxu3 %v4979_v26  ;;  %v4982_v25 = vld [vmem:[#allocation2] sm:$0xff] }
 0x275   :  { %8161 = vst [vmem:[#allocation97_spill] sm:$0xff] %v4967_v37  ;;  %1025 = vmatpush.msrb.mxu0 %v4982_v25  ;;  %v4985_v37 = vld [vmem:[#allocation2 + $0x8] sm:$0xff] }
 0x276   :  { %8162 = vst [vmem:[#allocation98_spill] sm:$0xff] %v4970_v27  ;;  %1045 = vmatpush.msrb.mxu1 %v4985_v37  ;;  %v4988_v27 = vld [vmem:[#allocation2 + $0x10] sm:$0xff] }
 0x277   :  { %8163 = vst [vmem:[#allocation147_spill] sm:$0xff] %v4973_v23  ;;  %1065 = vmatpush.msrb.mxu2 %v4988_v27  ;;  %v4991_v23 = vld [vmem:[#allocation2 + $0x18] sm:$0xff] }
 0x278   :  { %8164 = vst [vmem:[#allocation150_spill] sm:$0xff] %v4976_v24  ;;  %1085 = vmatpush.msrb.mxu3 %v4991_v23  ;;  %v654_v24 = vadd.f32 %v4778_v38, %v4499_v0 }
 0x279   :  { %8165 = vst [vmem:[#allocation99_spill] sm:$0xff] %v4979_v26  ;;  %v2770_v26 = vld [vmem:[%s7187_s0 + $0x10] sm:$0xff] }
 0x27a   :  { %8166 = vst [vmem:[#allocation100_spill] sm:$0xff] %v4982_v25  ;;  %999 = vperm.xlu1 %2788, %v2770_v26   ;;  %v634_v25 = vadd.f32 %v4776_v43, %v4497_v52  ;;  %v674_v26 = vadd.f32 %v4782_v34, %v4505_v9  ;;  %v694_v43 = vadd.f32 %v4784_v40, %v4507_v10 }
 0x27b   :  { %8167 = vst [vmem:[#allocation101_spill] sm:$0xff] %v4985_v37 }
 0x27c   :  { %8168 = vst [vmem:[#allocation102_spill] sm:$0xff] %v4988_v27  ;;  %v2771_v27 = vld [vmem:[%s7187_s0 + $0x18] sm:$0xff] }
 0x27d   :  { %8169 = vst [vmem:[#allocation103_spill] sm:$0xff] %v4991_v23 }
 0x282   :  { %1298 = vperm.xlu1 %2788, %v2771_v27  }
 0x2c4   :  { %v830_v37 = vpop.f32.mrf.mxu0  ;;  %v850_v28 = vpop.f32.mrf.mxu1 }
 0x2c5   :  { %v893_v42 = vadd.f32 %v830_v37, %v634_v25  ;;  %v894_v44 = vadd.f32 %v850_v28, %v654_v24 }
 0x2c7   :  { %v897_v23 = vmul.f32 0.5, %v893_v42  ;;  %v901_v32 = vmul.f32 0.5, %v894_v44  ;;  %v2775_v42 = vld [vmem:[%s7187_s0 + $0x38] sm:$0xff] }
 0x2c8   :  { %2494 = vperm.xlu1 %2788, %v2775_v42   ;;  %v5018_v42 = vld [vmem:[#allocation5 + $0x1e8] sm:$0xff] }
 0x2c9   :  { %2821 = vtanh.f32 %v897_v23 }
 0x2ca   :  { %2823 = vtanh.f32 %v901_v32 }
 0x2cb   :  { %v870_v38 = vpop.f32.mrf.mxu2  ;;  %v890_v0 = vpop.f32.mrf.mxu3 }
 0x2cc   :  { %v895_v52 = vadd.f32 %v870_v38, %v674_v26  ;;  %v896_v25 = vadd.f32 %v890_v0, %v694_v43 }
 0x2ce   :  { %2825 = vtanh.f32 %v895_v52  ;;  %v906_v28 = vmul.f32 0.5, %v896_v25 }
 0x2cf   :  { %v2822_v44 = vpop.eup %2821 }
 0x2d0   :  { %v2824_v37 = vpop.eup %2823  ;;  %v899_v27 = vmul.f32 0.5, %v2822_v44  ;;  %2827 = vtanh.f32 %v906_v28  ;;  %v5015_v28 = vld [vmem:[#allocation5 + $0x1e0] sm:$0xff] }
 0x2d1   :  { %v903_v23 = vmul.f32 0.5, %v2824_v37  ;;  %v5027_v44 = vld [vmem:[#allocation5 + $0x1c0] sm:$0xff]  ;;  %v5030_v37 = vld [vmem:[#allocation5 + $0x1c8] sm:$0xff] }
 0x2d2   :  { %v900_v34 = vadd.f32 0.5, %v899_v27  ;;  %v5033_v27 = vld [vmem:[#allocation5 + $0x1d0] sm:$0xff] }
 0x2d3   :  { %v904_v24 = vadd.f32 0.5, %v903_v23  ;;  %v5036_v23 = vld [vmem:[#allocation5 + $0x1d8] sm:$0xff] }
 0x2d4   :  { %v2826_v40 = vpop.eup %2825 }
 0x2d5   :  { %v910_v32 = vmul.f32 %v904_v24, %v4513_v31  ;;  %v911_v10 = vmul.f32 %v2826_v40, %v900_v34  ;;  %v5024_v31 = vld [vmem:[#allocation5 + $0x1f8] sm:$0xff]  ;;  %v5039_v34 = vld [vmem:[#allocation5 + $0x1a0] sm:$0xff]  ;;  %v5042_v24 = vld [vmem:[#allocation5 + $0x1a8] sm:$0xff] }
 0x2d6   :  { %v2828_v26 = vpop.eup %2827  ;;  %v5045_v40 = vld [vmem:[#allocation5 + $0x1b0] sm:$0xff] }
 0x2d7   :  { %v5012_v0 = vadd.f32 %v911_v10, %v910_v32  ;;  %v908_v52 = vmul.f32 0.5, %v2828_v26  ;;  %v5021_v10 = vld [vmem:[#allocation5 + $0x1f0] sm:$0xff]  ;;  %v5048_v32 = vld [vmem:[#allocation5 + $0x1b8] sm:$0xff]  ;;  %v5055_v26 = vld [vmem:[#allocation5 + $0x180] sm:$0xff] }
 0x2d8   :  { %8170 = vst [vmem:[#allocation104_spill] sm:$0xff] %v5055_v26 }
 0x2d9   :  { %2829 = vtanh.f32 %v5012_v0  ;;  %v909_v43 = vadd.f32 0.5, %v908_v52  ;;  %v5058_v52 = vld [vmem:[#allocation5 + $0x188] sm:$0xff] }
 0x2da   :  { %8171 = vst [vmem:[#allocation105_spill] sm:$0xff] %v5058_v52 }
 0x2df   :  { %v2830_v38 = vpop.eup %2829 }
 0x2e0   :  { %v914_v25 = vmul.f32 %v2830_v38, %v909_v43  ;;  %v5061_v43 = vld [vmem:[#allocation5 + $0x190] sm:$0xff]  ;;  %v5064_v38 = vld [vmem:[#allocation5 + $0x198] sm:$0xff] }
 0x2e1   :  { %8172 = vst [vmem:[#allocation106_spill] sm:$0xff] %v5061_v43 }
 0x2e2   :  { %931 = vmatmul.f32.vlgmr.msra.gmra.mxu0 %v914_v25  ;;  %951 = vmatmul.f32.vlgmr.msra.gmra.mxu1 %v914_v25  ;;  %8173 = vst [vmem:[#allocation107_spill] sm:$0xff] %v5064_v38 }
 0x2e3   :  { %971 = vmatmul.f32.vlgmr.msra.gmra.mxu2 %v914_v25  ;;  %991 = vmatmul.f32.vlgmr.msra.gmra.mxu3 %v914_v25  ;;  %v5067_v25 = vld [vmem:[#allocation5 + $0x160] sm:$0xff] }
 0x2e4   :  { %1112 = vmatpush.msra.mxu0 %v5015_v28  ;;  %1132 = vmatpush.msra.mxu1 %v5018_v42  ;;  %8174 = vst [vmem:[#allocation108_spill] sm:$0xff] %v5067_v25 }
 0x2e5   :  { %1152 = vmatpush.msra.mxu2 %v5021_v10  ;;  %1172 = vmatpush.msra.mxu3 %v5024_v31 }
 0x2e6   :  { %1113 = vmatpush.msra.mxu0 %v5027_v44  ;;  %1133 = vmatpush.msra.mxu1 %v5030_v37 }
 0x2e7   :  { %1153 = vmatpush.msra.mxu2 %v5033_v27  ;;  %1173 = vmatpush.msra.mxu3 %v5036_v23 }
 0x2e8   :  { %1114 = vmatpush.msra.mxu0 %v5039_v34  ;;  %1134 = vmatpush.msra.mxu1 %v5042_v24 }
 0x2e9   :  { %1154 = vmatpush.msra.mxu2 %v5045_v40  ;;  %1174 = vmatpush.msra.mxu3 %v5048_v32 }
 0x2ea   :  { %1026 = vmatmul.f32.vlgmr.msrb.gmra.mxu0 %v4796_v33  ;;  %1046 = vmatmul.f32.vlgmr.msrb.gmra.mxu1 %v4796_v33 }
 0x2eb   :  { %1066 = vmatmul.f32.vlgmr.msrb.gmra.mxu2 %v4796_v33  ;;  %1086 = vmatmul.f32.vlgmr.msrb.gmra.mxu3 %v4796_v33  ;;  %v5070_v33 = vld [vmem:[#allocation5 + $0x168] sm:$0xff] }
 0x2ec   :  { %1115 = vmatpush.msra.mxu0 %v5055_v26  ;;  %1135 = vmatpush.msra.mxu1 %v5058_v52  ;;  %8175 = vst [vmem:[#allocation109_spill] sm:$0xff] %v5070_v33  ;;  %v5073_v26 = vld [vmem:[#allocation5 + $0x170] sm:$0xff]  ;;  %v5076_v52 = vld [vmem:[#allocation5 + $0x178] sm:$0xff] }
 0x2ed   :  { %1155 = vmatpush.msra.mxu2 %v5061_v43  ;;  %1175 = vmatpush.msra.mxu3 %v5064_v38  ;;  %8176 = vst [vmem:[#allocation110_spill] sm:$0xff] %v5073_v26  ;;  %v5079_v43 = vld [vmem:[#allocation5 + $0x140] sm:$0xff]  ;;  %v5082_v38 = vld [vmem:[#allocation5 + $0x148] sm:$0xff] }
 0x2ee   :  { %1116 = vmatpush.msra.mxu0 %v5067_v25  ;;  %1136 = vmatpush.msra.mxu1 %v5070_v33  ;;  %8177 = vst [vmem:[#allocation111_spill] sm:$0xff] %v5076_v52  ;;  %v5085_v25 = vld [vmem:[#allocation5 + $0x150] sm:$0xff]  ;;  %v5088_v33 = vld [vmem:[#allocation5 + $0x158] sm:$0xff] }
 0x2ef   :  { %1156 = vmatpush.msra.mxu2 %v5073_v26  ;;  %1176 = vmatpush.msra.mxu3 %v5076_v52  ;;  %8178 = vst [vmem:[#allocation112_spill] sm:$0xff] %v5079_v43  ;;  %v5091_v26 = vld [vmem:[#allocation5 + $0x120] sm:$0xff]  ;;  %v5094_v52 = vld [vmem:[#allocation5 + $0x128] sm:$0xff] }
 0x2f0   :  { %1117 = vmatpush.msra.mxu0 %v5079_v43  ;;  %8179 = vst [vmem:[#allocation113_spill] sm:$0xff] %v5082_v38  ;;  %1137 = vmatpush.msra.mxu1 %v5082_v38  ;;  %v5097_v43 = vld [vmem:[#allocation5 + $0x130] sm:$0xff]  ;;  %v5100_v38 = vld [vmem:[#allocation5 + $0x138] sm:$0xff] }
 0x2f1   :  { %8180 = vst [vmem:[#allocation114_spill] sm:$0xff] %v5085_v25  ;;  %1157 = vmatpush.msra.mxu2 %v5085_v25  ;;  %1177 = vmatpush.msra.mxu3 %v5088_v33  ;;  %v5103_v25 = vld [vmem:[#allocation5 + $0x100] sm:$0xff] }
 0x2f2   :  { %8181 = vst [vmem:[#allocation115_spill] sm:$0xff] %v5088_v33  ;;  %1118 = vmatpush.msra.mxu0 %v5091_v26  ;;  %1138 = vmatpush.msra.mxu1 %v5094_v52  ;;  %v5106_v33 = vld [vmem:[#allocation5 + $0x108] sm:$0xff] }
 0x2f3   :  { %8182 = vst [vmem:[#allocation116_spill] sm:$0xff] %v5091_v26  ;;  %1158 = vmatpush.msra.mxu2 %v5097_v43  ;;  %1178 = vmatpush.msra.mxu3 %v5100_v38  ;;  %v5109_v26 = vld [vmem:[#allocation5 + $0x110] sm:$0xff] }
 0x2f4   :  { %8183 = vst [vmem:[#allocation117_spill] sm:$0xff] %v5094_v52  ;;  %1119 = vmatpush.msra.mxu0 %v5103_v25  ;;  %1139 = vmatpush.msra.mxu1 %v5106_v33  ;;  %v5112_v52 = vld [vmem:[#allocation5 + $0x118] sm:$0xff] }
 0x2f5   :  { %8184 = vst [vmem:[#allocation118_spill] sm:$0xff] %v5097_v43  ;;  %1159 = vmatpush.msra.mxu2 %v5109_v26  ;;  %1179 = vmatpush.msra.mxu3 %v5112_v52  ;;  %v5115_v43 = vld [vmem:[#allocation5 + $0xe0] sm:$0xff] }
 0x2f6   :  { %8185 = vst [vmem:[#allocation119_spill] sm:$0xff] %v5100_v38  ;;  %1120 = vmatpush.msra.mxu0 %v5115_v43  ;;  %v5118_v38 = vld [vmem:[#allocation5 + $0xe8] sm:$0xff] }
 0x2f7   :  { %8186 = vst [vmem:[#allocation120_spill] sm:$0xff] %v5103_v25  ;;  %1140 = vmatpush.msra.mxu1 %v5118_v38  ;;  %v5121_v25 = vld [vmem:[#allocation5 + $0xf0] sm:$0xff] }
 0x2f8   :  { %8187 = vst [vmem:[#allocation121_spill] sm:$0xff] %v5106_v33  ;;  %1160 = vmatpush.msra.mxu2 %v5121_v25  ;;  %v5124_v33 = vld [vmem:[#allocation5 + $0xf8] sm:$0xff] }
 0x2f9   :  { %8188 = vst [vmem:[#allocation122_spill] sm:$0xff] %v5109_v26  ;;  %1180 = vmatpush.msra.mxu3 %v5124_v33  ;;  %v5127_v26 = vld [vmem:[#allocation5 + $0xc0] sm:$0xff] }
 0x2fa   :  { %8189 = vst [vmem:[#allocation123_spill] sm:$0xff] %v5112_v52  ;;  %1121 = vmatpush.msra.mxu0 %v5127_v26  ;;  %v5130_v52 = vld [vmem:[#allocation5 + $0xc8] sm:$0xff] }
 0x2fb   :  { %8190 = vst [vmem:[#allocation124_spill] sm:$0xff] %v5115_v43  ;;  %1141 = vmatpush.msra.mxu1 %v5130_v52  ;;  %v5133_v43 = vld [vmem:[#allocation5 + $0xd0] sm:$0xff] }
 0x2fc   :  { %8191 = vst [vmem:[#allocation125_spill] sm:$0xff] %v5118_v38  ;;  %1161 = vmatpush.msra.mxu2 %v5133_v43  ;;  %v5136_v38 = vld [vmem:[#allocation5 + $0xd8] sm:$0xff] }
 0x2fd   :  { %8192 = vst [vmem:[#allocation126_spill] sm:$0xff] %v5121_v25  ;;  %1181 = vmatpush.msra.mxu3 %v5136_v38  ;;  %v5139_v25 = vld [vmem:[#allocation5 + $0xa0] sm:$0xff] }
 0x2fe   :  { %8193 = vst [vmem:[#allocation127_spill] sm:$0xff] %v5124_v33  ;;  %1122 = vmatpush.msra.mxu0 %v5139_v25  ;;  %v5142_v33 = vld [vmem:[#allocation5 + $0xa8] sm:$0xff] }
 0x2ff   :  { %8194 = vst [vmem:[#allocation128_spill] sm:$0xff] %v5127_v26  ;;  %1142 = vmatpush.msra.mxu1 %v5142_v33  ;;  %v5145_v26 = vld [vmem:[#allocation5 + $0xb0] sm:$0xff] }
 0x300   :  { %8195 = vst [vmem:[#allocation129_spill] sm:$0xff] %v5130_v52  ;;  %1162 = vmatpush.msra.mxu2 %v5145_v26  ;;  %v5148_v52 = vld [vmem:[#allocation5 + $0xb8] sm:$0xff] }
 0x301   :  { %8196 = vst [vmem:[#allocation130_spill] sm:$0xff] %v5133_v43  ;;  %1182 = vmatpush.msra.mxu3 %v5148_v52  ;;  %v5151_v43 = vld [vmem:[#allocation5 + $0x80] sm:$0xff] }
 0x302   :  { %8197 = vst [vmem:[#allocation131_spill] sm:$0xff] %v5136_v38  ;;  %1123 = vmatpush.msra.mxu0 %v5151_v43  ;;  %v5154_v38 = vld [vmem:[#allocation5 + $0x88] sm:$0xff] }
 0x303   :  { %8198 = vst [vmem:[#allocation132_spill] sm:$0xff] %v5139_v25  ;;  %1143 = vmatpush.msra.mxu1 %v5154_v38  ;;  %v5157_v25 = vld [vmem:[#allocation5 + $0x90] sm:$0xff] }
 0x304   :  { %8199 = vst [vmem:[#allocation133_spill] sm:$0xff] %v5142_v33  ;;  %1163 = vmatpush.msra.mxu2 %v5157_v25  ;;  %v5160_v33 = vld [vmem:[#allocation5 + $0x98] sm:$0xff] }
 0x305   :  { %8200 = vst [vmem:[#allocation134_spill] sm:$0xff] %v5145_v26  ;;  %1183 = vmatpush.msra.mxu3 %v5160_v33  ;;  %v5163_v26 = vld [vmem:[#allocation5 + $0x60] sm:$0xff] }
 0x306   :  { %8201 = vst [vmem:[#allocation135_spill] sm:$0xff] %v5148_v52  ;;  %1124 = vmatpush.msra.mxu0 %v5163_v26  ;;  %v5166_v52 = vld [vmem:[#allocation5 + $0x68] sm:$0xff] }
 0x307   :  { %8202 = vst [vmem:[#allocation136_spill] sm:$0xff] %v5151_v43  ;;  %1144 = vmatpush.msra.mxu1 %v5166_v52  ;;  %v5169_v43 = vld [vmem:[#allocation5 + $0x70] sm:$0xff] }
 0x308   :  { %8203 = vst [vmem:[#allocation137_spill] sm:$0xff] %v5154_v38  ;;  %1164 = vmatpush.msra.mxu2 %v5169_v43  ;;  %v5172_v38 = vld [vmem:[#allocation5 + $0x78] sm:$0xff] }
 0x309   :  { %8204 = vst [vmem:[#allocation138_spill] sm:$0xff] %v5157_v25  ;;  %1184 = vmatpush.msra.mxu3 %v5172_v38  ;;  %v5175_v25 = vld [vmem:[#allocation5 + $0x40] sm:$0xff] }
 0x30a   :  { %8205 = vst [vmem:[#allocation139_spill] sm:$0xff] %v5160_v33  ;;  %1125 = vmatpush.msra.mxu0 %v5175_v25  ;;  %v5178_v33 = vld [vmem:[#allocation5 + $0x48] sm:$0xff] }
 0x30b   :  { %8206 = vst [vmem:[#allocation140_spill] sm:$0xff] %v5163_v26  ;;  %1145 = vmatpush.msra.mxu1 %v5178_v33  ;;  %v5181_v26 = vld [vmem:[#allocation5 + $0x50] sm:$0xff] }
 0x30c   :  { %8207 = vst [vmem:[#allocation141_spill] sm:$0xff] %v5166_v52  ;;  %1165 = vmatpush.msra.mxu2 %v5181_v26  ;;  %v5184_v52 = vld [vmem:[#allocation5 + $0x58] sm:$0xff] }
 0x30d   :  { %8208 = vst [vmem:[#allocation142_spill] sm:$0xff] %v5169_v43  ;;  %1185 = vmatpush.msra.mxu3 %v5184_v52  ;;  %v5187_v43 = vld [vmem:[#allocation5 + $0x20] sm:$0xff] }
 0x30e   :  { %8209 = vst [vmem:[#allocation144_spill] sm:$0xff] %v5172_v38  ;;  %1126 = vmatpush.msra.mxu0 %v5187_v43  ;;  %v5190_v38 = vld [vmem:[#allocation5 + $0x28] sm:$0xff] }
 0x30f   :  { %8210 = vst [vmem:[#allocation145_spill] sm:$0xff] %v5175_v25  ;;  %1146 = vmatpush.msra.mxu1 %v5190_v38  ;;  %v5193_v25 = vld [vmem:[#allocation5 + $0x30] sm:$0xff] }
 0x310   :  { %8211 = vst [vmem:[#allocation146_spill] sm:$0xff] %v5178_v33  ;;  %1166 = vmatpush.msra.mxu2 %v5193_v25  ;;  %v5196_v33 = vld [vmem:[#allocation5 + $0x38] sm:$0xff] }
 0x311   :  { %8212 = vst [vmem:[#allocation149_spill] sm:$0xff] %v5181_v26  ;;  %1186 = vmatpush.msra.mxu3 %v5196_v33  ;;  %v5199_v26 = vld [vmem:[#allocation5] sm:$0xff] }
 0x312   :  { %8213 = vst [vmem:[#allocation151_spill] sm:$0xff] %v5184_v52  ;;  %1127 = vmatpush.msra.mxu0 %v5199_v26  ;;  %v5202_v52 = vld [vmem:[#allocation5 + $0x8] sm:$0xff] }
 0x313   :  { %8214 = vst [vmem:[#allocation152_spill] sm:$0xff] %v5187_v43  ;;  %1147 = vmatpush.msra.mxu1 %v5202_v52  ;;  %v5205_v43 = vld [vmem:[#allocation5 + $0x10] sm:$0xff] }
 0x314   :  { %8215 = vst [vmem:[#allocation153_spill] sm:$0xff] %v5190_v38  ;;  %1167 = vmatpush.msra.mxu2 %v5205_v43  ;;  %v5208_v38 = vld [vmem:[#allocation5 + $0x18] sm:$0xff]  ;;  %1214 = vmatpush.msrb.mxu0 %v4584_v47  ;;  %v8216_v47 = vld [vmem:[#allocation18_spill] sm:$0xff] }
 0x315   :  { %1187 = vmatpush.msra.mxu3 %v5208_v38  ;;  %1234 = vmatpush.msrb.mxu1 %v4587_v49  ;;  %v8217_v49 = vld [vmem:[#allocation19_spill] sm:$0xff] }
 0x316   :  { %1254 = vmatpush.msrb.mxu2 %v4590_v62  ;;  %1215 = vmatpush.msrb.mxu0 %v4596_v61  ;;  %v8218_v62 = vld [vmem:[#allocation20_spill] sm:$0xff]  ;;  %v8220_v61 = vld [vmem:[#allocation22_spill] sm:$0xff] }
 0x317   :  { %1274 = vmatpush.msrb.mxu3 %v4593_v51  ;;  %1235 = vmatpush.msrb.mxu1 %v4599_v58  ;;  %v8219_v51 = vld [vmem:[#allocation21_spill] sm:$0xff]  ;;  %v8221_v58 = vld [vmem:[#allocation23_spill] sm:$0xff] }
 0x318   :  { %1255 = vmatpush.msrb.mxu2 %v4602_v53  ;;  %1216 = vmatpush.msrb.mxu0 %v4608_v56  ;;  %v8222_v53 = vld [vmem:[#allocation24_spill] sm:$0xff]  ;;  %v8224_v56 = vld [vmem:[#allocation26_spill] sm:$0xff] }
 0x319   :  { %1275 = vmatpush.msrb.mxu3 %v4605_v60  ;;  %1236 = vmatpush.msrb.mxu1 %v4611_v63  ;;  %v8223_v60 = vld [vmem:[#allocation25_spill] sm:$0xff]  ;;  %v8225_v63 = vld [vmem:[#allocation27_spill] sm:$0xff] }
 0x31a   :  { %1256 = vmatpush.msrb.mxu2 %v4614_v59  ;;  %1217 = vmatpush.msrb.mxu0 %v4620_v1  ;;  %v8226_v59 = vld [vmem:[#allocation28_spill] sm:$0xff]  ;;  %v8228_v1 = vld [vmem:[#allocation30_spill] sm:$0xff] }
 0x31b   :  { %1276 = vmatpush.msrb.mxu3 %v4617_v54  ;;  %1237 = vmatpush.msrb.mxu1 %v4623_v2  ;;  %v8227_v54 = vld [vmem:[#allocation29_spill] sm:$0xff]  ;;  %v8229_v2 = vld [vmem:[#allocation31_spill] sm:$0xff] }
 0x31c   :  { %1257 = vmatpush.msrb.mxu2 %v4626_v3  ;;  %1218 = vmatpush.msrb.mxu0 %v4632_v4  ;;  %v8230_v3 = vld [vmem:[#allocation32_spill] sm:$0xff]  ;;  %v8232_v4 = vld [vmem:[#allocation34_spill] sm:$0xff] }
 0x31d   :  { %1277 = vmatpush.msrb.mxu3 %v4629_v30  ;;  %1238 = vmatpush.msrb.mxu1 %v4635_v5  ;;  %v8231_v30 = vld [vmem:[#allocation33_spill] sm:$0xff]  ;;  %v8233_v5 = vld [vmem:[#allocation35_spill] sm:$0xff] }
 0x31e   :  { %1258 = vmatpush.msrb.mxu2 %v4638_v6  ;;  %1219 = vmatpush.msrb.mxu0 %v4644_v8  ;;  %v8234_v6 = vld [vmem:[#allocation36_spill] sm:$0xff]  ;;  %v8236_v8 = vld [vmem:[#allocation38_spill] sm:$0xff] }
 0x31f   :  { %1278 = vmatpush.msrb.mxu3 %v4641_v7  ;;  %1239 = vmatpush.msrb.mxu1 %v4647_v11  ;;  %v8235_v7 = vld [vmem:[#allocation37_spill] sm:$0xff]  ;;  %v8237_v11 = vld [vmem:[#allocation39_spill] sm:$0xff] }
 0x320   :  { %1259 = vmatpush.msrb.mxu2 %v4650_v12  ;;  %1220 = vmatpush.msrb.mxu0 %v4656_v14  ;;  %v8238_v12 = vld [vmem:[#allocation40_spill] sm:$0xff]  ;;  %v8240_v14 = vld [vmem:[#allocation42_spill] sm:$0xff] }
 0x321   :  { %1279 = vmatpush.msrb.mxu3 %v4653_v13  ;;  %1240 = vmatpush.msrb.mxu1 %v4659_v15  ;;  %v8239_v13 = vld [vmem:[#allocation41_spill] sm:$0xff]  ;;  %v8241_v15 = vld [vmem:[#allocation43_spill] sm:$0xff] }
 0x322   :  { %1260 = vmatpush.msrb.mxu2 %v4662_v16  ;;  %1221 = vmatpush.msrb.mxu0 %v4668_v19  ;;  %v8242_v16 = vld [vmem:[#allocation44_spill] sm:$0xff]  ;;  %v8244_v19 = vld [vmem:[#allocation46_spill] sm:$0xff] }
 0x323   :  { %1280 = vmatpush.msrb.mxu3 %v4665_v18  ;;  %1241 = vmatpush.msrb.mxu1 %v4671_v20  ;;  %v8243_v18 = vld [vmem:[#allocation45_spill] sm:$0xff]  ;;  %v8245_v20 = vld [vmem:[#allocation47_spill] sm:$0xff] }
 0x324   :  { %1261 = vmatpush.msrb.mxu2 %v4674_v21  ;;  %1222 = vmatpush.msrb.mxu0 %v8216_v47  ;;  %v8246_v21 = vld [vmem:[#allocation48_spill] sm:$0xff]  ;;  %v1000_v47 = vpop.permute.xlu1 %999 }
 0x325   :  { %1281 = vmatpush.msrb.mxu3 %v4677_v22  ;;  %1242 = vmatpush.msrb.mxu1 %v8217_v49  ;;  %v8247_v22 = vld [vmem:[#allocation49_spill] sm:$0xff] }
 0x326   :  { %1262 = vmatpush.msrb.mxu2 %v8218_v62  ;;  %1223 = vmatpush.msrb.mxu0 %v8220_v61 }
 0x327   :  { %1282 = vmatpush.msrb.mxu3 %v8219_v51  ;;  %1243 = vmatpush.msrb.mxu1 %v8221_v58  ;;  %v8248_v51 = vld [vmem:[#allocation143_spill] sm:$0xff]  ;;  %v8249_v58 = vld [vmem:[#allocation148_spill] sm:$0xff] }
 0x328   :  { %1263 = vmatpush.msrb.mxu2 %v8222_v53  ;;  %1224 = vmatpush.msrb.mxu0 %v8224_v56  ;;  %v1002_v61 = vmul.f32 %v1000_v47, %v8248_v51  ;;  %v1003_v53 = vmul.f32 %v1000_v47, %v8249_v58 }
 0x329   :  { %1283 = vmatpush.msrb.mxu3 %v8223_v60  ;;  %1244 = vmatpush.msrb.mxu1 %v8225_v63  ;;  %v8250_v60 = vld [vmem:[#allocation155_spill] sm:$0xff] }
 0x32a   :  { %1264 = vmatpush.msrb.mxu2 %v8226_v59  ;;  %1225 = vmatpush.msrb.mxu0 %v8228_v1  ;;  %v1006_v56 = vadd.f32 %v1002_v61, %v8250_v60  ;;  %v8251_v63 = vld [vmem:[#allocation159_spill] sm:$0xff] }
 0x32b   :  { %1284 = vmatpush.msrb.mxu3 %v8227_v54  ;;  %1245 = vmatpush.msrb.mxu1 %v8229_v2  ;;  %v1007_v59 = vadd.f32 %v1003_v53, %v8251_v63 }
 0x32c   :  { %1265 = vmatpush.msrb.mxu2 %v8230_v3  ;;  %1226 = vmatpush.msrb.mxu0 %v8232_v4 }
 0x32d   :  { %1285 = vmatpush.msrb.mxu3 %v8231_v30  ;;  %1246 = vmatpush.msrb.mxu1 %v8233_v5  ;;  %v1004_v5 = vmul.f32 %v1000_v47, %v4332_v45 }
 0x32e   :  { %1266 = vmatpush.msrb.mxu2 %v8234_v6  ;;  %1227 = vmatpush.msrb.mxu0 %v8236_v8  ;;  %v1005_v6 = vmul.f32 %v1000_v47, %v4342_v55 }
 0x32f   :  { %1286 = vmatpush.msrb.mxu3 %v8235_v7  ;;  %1247 = vmatpush.msrb.mxu1 %v8237_v11  ;;  %v8252_v11 = vld [vmem:[#allocation166_spill] sm:$0xff] }
 0x330   :  { %1267 = vmatpush.msrb.mxu2 %v8238_v12  ;;  %1228 = vmatpush.msrb.mxu0 %v8240_v14  ;;  %v1008_v12 = vadd.f32 %v1004_v5, %v8252_v11 }
 0x331   :  { %1287 = vmatpush.msrb.mxu3 %v8239_v13  ;;  %1248 = vmatpush.msrb.mxu1 %v8241_v15  ;;  %v1009_v13 = vadd.f32 %v1005_v6, %v4355_v46 }
 0x332   :  { %1268 = vmatpush.msrb.mxu2 %v8242_v16  ;;  %1229 = vmatpush.msrb.mxu0 %v8244_v19 }
 0x333   :  { %1288 = vmatpush.msrb.mxu3 %v8243_v18  ;;  %1249 = vmatpush.msrb.mxu1 %v8245_v20 }
 0x334   :  { %1269 = vmatpush.msrb.mxu2 %v8246_v21 }
 0x335   :  { %1289 = vmatpush.msrb.mxu3 %v8247_v22 }
 0x35f   :  { %v5275_v49 = vpop.f32.mrf.mxu0  ;;  %v5277_v62 = vpop.f32.mrf.mxu1 }
 0x366   :  { %v5283_v54 = vpop.f32.mrf.mxu2  ;;  %v5285_v1 = vpop.f32.mrf.mxu3 }
 0x367   :  { %v1027_v2 = vpop.f32.mrf.mxu0  ;;  %v1047_v3 = vpop.f32.mrf.mxu1 }
 0x368   :  { %v1090_v30 = vadd.f32 %v1027_v2, %v1006_v56  ;;  %v1091_v4 = vadd.f32 %v1047_v3, %v1007_v59 }
 0x36a   :  { %v1094_v7 = vmul.f32 0.5, %v1090_v30  ;;  %v1098_v8 = vmul.f32 0.5, %v1091_v4 }
 0x36c   :  { %2831 = vtanh.f32 %v1094_v7 }
 0x36d   :  { %2833 = vtanh.f32 %v1098_v8  ;;  %v8254_v8 = vld [vmem:[#allocation51_spill] sm:$0xff] }
 0x36e   :  { %v1067_v14 = vpop.f32.mrf.mxu2  ;;  %v1087_v15 = vpop.f32.mrf.mxu3 }
 0x36f   :  { %v1092_v16 = vadd.f32 %v1067_v14, %v1008_v12  ;;  %v1093_v18 = vadd.f32 %v1087_v15, %v1009_v13  ;;  %v8255_v12 = vld [vmem:[#allocation52_spill] sm:$0xff]  ;;  %v8264_v13 = vld [vmem:[#allocation61_spill] sm:$0xff]  ;;  %v8265_v14 = vld [vmem:[#allocation62_spill] sm:$0xff] }
 0x370   :  { %v8266_v15 = vld [vmem:[#allocation63_spill] sm:$0xff] }
 0x371   :  { %2835 = vtanh.f32 %v1092_v16  ;;  %v1103_v19 = vmul.f32 0.5, %v1093_v18  ;;  %v8267_v16 = vld [vmem:[#allocation64_spill] sm:$0xff]  ;;  %v8268_v18 = vld [vmem:[#allocation65_spill] sm:$0xff] }
 0x372   :  { %v2832_v20 = vpop.eup %2831 }
 0x373   :  { %v2834_v21 = vpop.eup %2833  ;;  %v1096_v22 = vmul.f32 0.5, %v2832_v20  ;;  %2837 = vtanh.f32 %v1103_v19  ;;  %v8269_v19 = vld [vmem:[#allocation66_spill] sm:$0xff]  ;;  %v8270_v20 = vld [vmem:[#allocation67_spill] sm:$0xff] }
 0x374   :  { %v1100_v61 = vmul.f32 0.5, %v2834_v21  ;;  %v8271_v21 = vld [vmem:[#allocation68_spill] sm:$0xff] }
 0x375   :  { %v1097_v47 = vadd.f32 0.5, %v1096_v22  ;;  %v8272_v22 = vld [vmem:[#allocation69_spill] sm:$0xff] }
 0x376   :  { %v1101_v53 = vadd.f32 0.5, %v1100_v61  ;;  %v8273_v61 = vld [vmem:[#allocation70_spill] sm:$0xff] }
 0x377   :  { %v2836_v56 = vpop.eup %2835 }
 0x378   :  { %v1107_v59 = vmul.f32 %v1101_v53, %v4793_v57  ;;  %v1108_v2 = vmul.f32 %v2836_v56, %v1097_v47  ;;  %v8253_v57 = vld [vmem:[#allocation50_spill] sm:$0xff]  ;;  %v8274_v47 = vld [vmem:[#allocation71_spill] sm:$0xff]  ;;  %v8275_v53 = vld [vmem:[#allocation72_spill] sm:$0xff] }
 0x379   :  { %v2838_v3 = vpop.eup %2837  ;;  %v8276_v56 = vld [vmem:[#allocation73_spill] sm:$0xff] }
 0x37a   :  { %v5292_v30 = vadd.f32 %v1108_v2, %v1107_v59  ;;  %v1105_v4 = vmul.f32 0.5, %v2838_v3  ;;  %v8277_v59 = vld [vmem:[#allocation74_spill] sm:$0xff]  ;;  %v8278_v2 = vld [vmem:[#allocation75_spill] sm:$0xff]  ;;  %v8279_v3 = vld [vmem:[#allocation76_spill] sm:$0xff] }
 0x37c   :  { %2839 = vtanh.f32 %v5292_v30  ;;  %v1106_v5 = vadd.f32 0.5, %v1105_v4  ;;  %v8280_v4 = vld [vmem:[#allocation77_spill] sm:$0xff] }
 0x382   :  { %v2840_v6 = vpop.eup %2839 }
 0x383   :  { %v5295_v7 = vmul.f32 %v2840_v6, %v1106_v5  ;;  %v8281_v5 = vld [vmem:[#allocation78_spill] sm:$0xff]  ;;  %v8282_v6 = vld [vmem:[#allocation79_spill] sm:$0xff] }
 0x385   :  { %1128 = vmatmul.f32.vlgmr.msra.gmra.mxu0 %v5295_v7  ;;  %1148 = vmatmul.f32.vlgmr.msra.gmra.mxu1 %v5295_v7 }
 0x386   :  { %1168 = vmatmul.f32.vlgmr.msra.gmra.mxu2 %v5295_v7  ;;  %1188 = vmatmul.f32.vlgmr.msra.gmra.mxu3 %v5295_v7 }
 0x387   :  { %1309 = vmatpush.msra.mxu0 %v4802_v17  ;;  %1329 = vmatpush.msra.mxu1 %v4805_v39  ;;  %v8256_v17 = vld [vmem:[#allocation53_spill] sm:$0xff]  ;;  %v8257_v39 = vld [vmem:[#allocation54_spill] sm:$0xff] }
 0x388   :  { %1349 = vmatpush.msra.mxu2 %v4808_v41  ;;  %1369 = vmatpush.msra.mxu3 %v4811_v36  ;;  %v8258_v41 = vld [vmem:[#allocation55_spill] sm:$0xff]  ;;  %v8259_v36 = vld [vmem:[#allocation56_spill] sm:$0xff] }
 0x389   :  { %1310 = vmatpush.msra.mxu0 %v4814_v35  ;;  %1330 = vmatpush.msra.mxu1 %v4817_v29  ;;  %v8260_v35 = vld [vmem:[#allocation57_spill] sm:$0xff]  ;;  %v8261_v29 = vld [vmem:[#allocation58_spill] sm:$0xff] }
 0x38a   :  { %1350 = vmatpush.msra.mxu2 %v4820_v50  ;;  %1370 = vmatpush.msra.mxu3 %v4823_v48  ;;  %v8262_v50 = vld [vmem:[#allocation59_spill] sm:$0xff]  ;;  %v8263_v48 = vld [vmem:[#allocation60_spill] sm:$0xff] }
 0x38b   :  { %1311 = vmatpush.msra.mxu0 %v8253_v57  ;;  %1331 = vmatpush.msra.mxu1 %v8254_v8  ;;  %v8283_v57 = vld [vmem:[#allocation80_spill] sm:$0xff]  ;;  %v8284_v8 = vld [vmem:[#allocation81_spill] sm:$0xff] }
 0x38c   :  { %1351 = vmatpush.msra.mxu2 %v8255_v12  ;;  %1371 = vmatpush.msra.mxu3 %v8256_v17  ;;  %v8285_v12 = vld [vmem:[#allocation82_spill] sm:$0xff]  ;;  %v8286_v17 = vld [vmem:[#allocation83_spill] sm:$0xff] }
 0x38d   :  { %1312 = vmatpush.msra.mxu0 %v8257_v39  ;;  %1332 = vmatpush.msra.mxu1 %v8258_v41  ;;  %v8287_v39 = vld [vmem:[#allocation84_spill] sm:$0xff]  ;;  %v8288_v41 = vld [vmem:[#allocation85_spill] sm:$0xff] }
 0x38e   :  { %1352 = vmatpush.msra.mxu2 %v8259_v36  ;;  %1372 = vmatpush.msra.mxu3 %v8260_v35  ;;  %v8289_v36 = vld [vmem:[#allocation86_spill] sm:$0xff]  ;;  %v8290_v35 = vld [vmem:[#allocation87_spill] sm:$0xff] }
 0x38f   :  { %1313 = vmatpush.msra.mxu0 %v8261_v29  ;;  %1333 = vmatpush.msra.mxu1 %v8262_v50  ;;  %v8291_v29 = vld [vmem:[#allocation88_spill] sm:$0xff]  ;;  %v8292_v50 = vld [vmem:[#allocation89_spill] sm:$0xff] }
 0x390   :  { %1353 = vmatpush.msra.mxu2 %v8263_v48  ;;  %1373 = vmatpush.msra.mxu3 %v8264_v13  ;;  %v8293_v48 = vld [vmem:[#allocation90_spill] sm:$0xff]  ;;  %v8294_v13 = vld [vmem:[#allocation91_spill] sm:$0xff] }
 0x391   :  { %1314 = vmatpush.msra.mxu0 %v8265_v14  ;;  %1334 = vmatpush.msra.mxu1 %v8266_v15  ;;  %v8295_v14 = vld [vmem:[#allocation92_spill] sm:$0xff]  ;;  %v8296_v15 = vld [vmem:[#allocation93_spill] sm:$0xff] }
 0x392   :  { %1354 = vmatpush.msra.mxu2 %v8267_v16  ;;  %1374 = vmatpush.msra.mxu3 %v8268_v18  ;;  %v8297_v16 = vld [vmem:[#allocation94_spill] sm:$0xff]  ;;  %v8298_v18 = vld [vmem:[#allocation95_spill] sm:$0xff] }
 0x393   :  { %1315 = vmatpush.msra.mxu0 %v8269_v19  ;;  %1335 = vmatpush.msra.mxu1 %v8270_v20  ;;  %v8299_v19 = vld [vmem:[#allocation96_spill] sm:$0xff]  ;;  %v8300_v20 = vld [vmem:[#allocation97_spill] sm:$0xff] }
 0x394   :  { %1355 = vmatpush.msra.mxu2 %v8271_v21  ;;  %1375 = vmatpush.msra.mxu3 %v8272_v22  ;;  %v8301_v21 = vld [vmem:[#allocation98_spill] sm:$0xff]  ;;  %v8302_v22 = vld [vmem:[#allocation147_spill] sm:$0xff] }
 0x395   :  { %1316 = vmatpush.msra.mxu0 %v8273_v61  ;;  %1336 = vmatpush.msra.mxu1 %v8274_v47  ;;  %v8303_v61 = vld [vmem:[#allocation150_spill] sm:$0xff]  ;;  %v8304_v47 = vld [vmem:[#allocation99_spill] sm:$0xff] }
 0x396   :  { %1356 = vmatpush.msra.mxu2 %v8275_v53  ;;  %1376 = vmatpush.msra.mxu3 %v8276_v56  ;;  %v8305_v53 = vld [vmem:[#allocation100_spill] sm:$0xff]  ;;  %v8306_v56 = vld [vmem:[#allocation101_spill] sm:$0xff] }
 0x397   :  { %1317 = vmatpush.msra.mxu0 %v8277_v59  ;;  %1337 = vmatpush.msra.mxu1 %v8278_v2  ;;  %v8307_v59 = vld [vmem:[#allocation102_spill] sm:$0xff]  ;;  %v8308_v2 = vld [vmem:[#allocation103_spill] sm:$0xff] }
 0x398   :  { %1357 = vmatpush.msra.mxu2 %v8279_v3  ;;  %1377 = vmatpush.msra.mxu3 %v8280_v4  ;;  %v8309_v3 = vld [vmem:[#allocation15_spill] sm:$0xff] }
 0x399   :  { %1318 = vmatpush.msra.mxu0 %v8281_v5  ;;  %1338 = vmatpush.msra.mxu1 %v8282_v6  ;;  %v933_v4 = vadd.f32 %v5275_v49, %v8309_v3  ;;  %v8310_v5 = vld [vmem:[#allocation16_spill] sm:$0xff] }
 0x39a   :  { %1358 = vmatpush.msra.mxu2 %v8283_v57  ;;  %1378 = vmatpush.msra.mxu3 %v8284_v8  ;;  %v953_v6 = vadd.f32 %v5277_v62, %v8310_v5 }
 0x39b   :  { %1319 = vmatpush.msra.mxu0 %v8285_v12  ;;  %1339 = vmatpush.msra.mxu1 %v8286_v17 }
 0x39c   :  { %1359 = vmatpush.msra.mxu2 %v8287_v39  ;;  %1379 = vmatpush.msra.mxu3 %v8288_v41 }
 0x39d   :  { %1320 = vmatpush.msra.mxu0 %v8289_v36  ;;  %1340 = vmatpush.msra.mxu1 %v8290_v35  ;;  %v973_v36 = vadd.f32 %v5283_v54, %v4505_v9  ;;  %v8311_v35 = vld [vmem:[#allocation17_spill] sm:$0xff] }
 0x39e   :  { %1360 = vmatpush.msra.mxu2 %v8291_v29  ;;  %1380 = vmatpush.msra.mxu3 %v8292_v50  ;;  %v993_v29 = vadd.f32 %v5285_v1, %v8311_v35 }
 0x39f   :  { %1321 = vmatpush.msra.mxu0 %v8293_v48  ;;  %1341 = vmatpush.msra.mxu1 %v8294_v13 }
 0x3a0   :  { %1361 = vmatpush.msra.mxu2 %v8295_v14  ;;  %1381 = vmatpush.msra.mxu3 %v8296_v15 }
 0x3a1   :  { %1322 = vmatpush.msra.mxu0 %v8297_v16  ;;  %1342 = vmatpush.msra.mxu1 %v8298_v18 }
 0x3a2   :  { %1362 = vmatpush.msra.mxu2 %v8299_v19  ;;  %1382 = vmatpush.msra.mxu3 %v8300_v20 }
 0x3a3   :  { %1323 = vmatpush.msra.mxu0 %v8301_v21  ;;  %1343 = vmatpush.msra.mxu1 %v8302_v22 }
 0x3a4   :  { %1363 = vmatpush.msra.mxu2 %v8303_v61  ;;  %1383 = vmatpush.msra.mxu3 %v8304_v47 }
 0x3a5   :  { %1324 = vmatpush.msra.mxu0 %v8305_v53  ;;  %1344 = vmatpush.msra.mxu1 %v8306_v56 }
 0x3a6   :  { %1364 = vmatpush.msra.mxu2 %v8307_v59  ;;  %1384 = vmatpush.msra.mxu3 %v8308_v2  ;;  %v8326_v2 = vld [vmem:[#allocation118_spill] sm:$0xff] }
 0x402   :  { %v1129_v57 = vpop.f32.mrf.mxu0  ;;  %v1149_v8 = vpop.f32.mrf.mxu1 }
 0x403   :  { %v1192_v12 = vadd.f32 %v1129_v57, %v933_v4  ;;  %v1193_v17 = vadd.f32 %v1149_v8, %v953_v6  ;;  %v8327_v4 = vld [vmem:[#allocation119_spill] sm:$0xff]  ;;  %v8328_v6 = vld [vmem:[#allocation120_spill] sm:$0xff]  ;;  %v8329_v57 = vld [vmem:[#allocation121_spill] sm:$0xff] }
 0x404   :  { %v8330_v8 = vld [vmem:[#allocation122_spill] sm:$0xff] }
 0x405   :  { %v1196_v39 = vmul.f32 0.5, %v1192_v12  ;;  %v1200_v41 = vmul.f32 0.5, %v1193_v17  ;;  %v8331_v12 = vld [vmem:[#allocation123_spill] sm:$0xff]  ;;  %v8332_v17 = vld [vmem:[#allocation124_spill] sm:$0xff] }
 0x407   :  { %2841 = vtanh.f32 %v1196_v39  ;;  %v8333_v39 = vld [vmem:[#allocation125_spill] sm:$0xff] }
 0x408   :  { %2843 = vtanh.f32 %v1200_v41  ;;  %v8334_v41 = vld [vmem:[#allocation126_spill] sm:$0xff] }
 0x409   :  { %v1169_v50 = vpop.f32.mrf.mxu2  ;;  %v1189_v48 = vpop.f32.mrf.mxu3 }
 0x40a   :  { %v1194_v49 = vadd.f32 %v1169_v50, %v973_v36  ;;  %v1195_v13 = vadd.f32 %v1189_v48, %v993_v29  ;;  %v8335_v36 = vld [vmem:[#allocation127_spill] sm:$0xff]  ;;  %v8336_v29 = vld [vmem:[#allocation128_spill] sm:$0xff]  ;;  %v8337_v50 = vld [vmem:[#allocation129_spill] sm:$0xff] }
 0x40b   :  { %v8338_v48 = vld [vmem:[#allocation130_spill] sm:$0xff] }
 0x40c   :  { %2845 = vtanh.f32 %v1194_v49  ;;  %v1205_v62 = vmul.f32 0.5, %v1195_v13  ;;  %v8339_v49 = vld [vmem:[#allocation131_spill] sm:$0xff]  ;;  %v8340_v13 = vld [vmem:[#allocation132_spill] sm:$0xff] }
 0x40d   :  { %v2842_v14 = vpop.eup %2841 }
 0x40e   :  { %v2844_v15 = vpop.eup %2843  ;;  %v1198_v16 = vmul.f32 0.5, %v2842_v14  ;;  %2847 = vtanh.f32 %v1205_v62  ;;  %v8341_v62 = vld [vmem:[#allocation133_spill] sm:$0xff]  ;;  %v8342_v14 = vld [vmem:[#allocation134_spill] sm:$0xff] }
 0x40f   :  { %v1202_v18 = vmul.f32 0.5, %v2844_v15  ;;  %v8343_v15 = vld [vmem:[#allocation135_spill] sm:$0xff] }
 0x410   :  { %v1199_v19 = vadd.f32 0.5, %v1198_v16  ;;  %v8344_v16 = vld [vmem:[#allocation136_spill] sm:$0xff] }
 0x411   :  { %v1203_v20 = vadd.f32 0.5, %v1202_v18  ;;  %v8345_v18 = vld [vmem:[#allocation137_spill] sm:$0xff] }
 0x412   :  { %v2846_v21 = vpop.eup %2845 }
 0x413   :  { %v1209_v54 = vmul.f32 %v1203_v20, %v5012_v0  ;;  %v1210_v22 = vmul.f32 %v2846_v21, %v1199_v19  ;;  %v8312_v0 = vld [vmem:[#allocation104_spill] sm:$0xff]  ;;  %v8346_v19 = vld [vmem:[#allocation138_spill] sm:$0xff]  ;;  %v8347_v20 = vld [vmem:[#allocation139_spill] sm:$0xff] }
 0x414   :  { %v2848_v61 = vpop.eup %2847  ;;  %v8348_v21 = vld [vmem:[#allocation140_spill] sm:$0xff] }
 0x415   :  { %v5374_v1 = vadd.f32 %v1210_v22, %v1209_v54  ;;  %v1207_v47 = vmul.f32 0.5, %v2848_v61  ;;  %v8349_v54 = vld [vmem:[#allocation141_spill] sm:$0xff]  ;;  %v8350_v22 = vld [vmem:[#allocation142_spill] sm:$0xff]  ;;  %v8351_v61 = vld [vmem:[#allocation144_spill] sm:$0xff] }
 0x417   :  { %2849 = vtanh.f32 %v5374_v1  ;;  %v1208_v53 = vadd.f32 0.5, %v1207_v47  ;;  %v8352_v47 = vld [vmem:[#allocation145_spill] sm:$0xff] }
 0x41d   :  { %v2850_v56 = vpop.eup %2849 }
 0x41e   :  { %v1213_v59 = vmul.f32 %v2850_v56, %v1208_v53  ;;  %v8353_v53 = vld [vmem:[#allocation146_spill] sm:$0xff]  ;;  %v8354_v56 = vld [vmem:[#allocation149_spill] sm:$0xff] }
 0x420   :  { %1230 = vmatmul.f32.vlgmr.msrb.gmra.mxu0 %v1213_v59  ;;  %1250 = vmatmul.f32.vlgmr.msrb.gmra.mxu1 %v1213_v59 }
 0x421   :  { %1270 = vmatmul.f32.vlgmr.msrb.gmra.mxu2 %v1213_v59  ;;  %1290 = vmatmul.f32.vlgmr.msrb.gmra.mxu3 %v1213_v59  ;;  %v8355_v59 = vld [vmem:[#allocation151_spill] sm:$0xff] }
 0x422   :  { %1411 = vmatpush.msrb.mxu0 %v5015_v28  ;;  %1431 = vmatpush.msrb.mxu1 %v5018_v42  ;;  %v8313_v28 = vld [vmem:[#allocation105_spill] sm:$0xff]  ;;  %v8314_v42 = vld [vmem:[#allocation106_spill] sm:$0xff] }
 0x423   :  { %1451 = vmatpush.msrb.mxu2 %v5021_v10  ;;  %1471 = vmatpush.msrb.mxu3 %v5024_v31  ;;  %v8315_v10 = vld [vmem:[#allocation107_spill] sm:$0xff]  ;;  %v8316_v31 = vld [vmem:[#allocation108_spill] sm:$0xff] }
 0x424   :  { %1412 = vmatpush.msrb.mxu0 %v5027_v44  ;;  %1432 = vmatpush.msrb.mxu1 %v5030_v37  ;;  %v8317_v44 = vld [vmem:[#allocation109_spill] sm:$0xff]  ;;  %v8318_v37 = vld [vmem:[#allocation110_spill] sm:$0xff] }
 0x425   :  { %1452 = vmatpush.msrb.mxu2 %v5033_v27  ;;  %1472 = vmatpush.msrb.mxu3 %v5036_v23  ;;  %v8319_v27 = vld [vmem:[#allocation111_spill] sm:$0xff]  ;;  %v8320_v23 = vld [vmem:[#allocation112_spill] sm:$0xff] }
 0x426   :  { %1413 = vmatpush.msrb.mxu0 %v5039_v34  ;;  %1433 = vmatpush.msrb.mxu1 %v5042_v24  ;;  %v8321_v34 = vld [vmem:[#allocation113_spill] sm:$0xff]  ;;  %v8322_v24 = vld [vmem:[#allocation114_spill] sm:$0xff] }
 0x427   :  { %1453 = vmatpush.msrb.mxu2 %v5045_v40  ;;  %1473 = vmatpush.msrb.mxu3 %v5048_v32  ;;  %v8323_v40 = vld [vmem:[#allocation115_spill] sm:$0xff]  ;;  %v8324_v32 = vld [vmem:[#allocation116_spill] sm:$0xff] }
 0x428   :  { %1325 = vmatmul.f32.vlgmr.msra.gmra.mxu0 %v5295_v7  ;;  %1345 = vmatmul.f32.vlgmr.msra.gmra.mxu1 %v5295_v7 }
 0x429   :  { %1365 = vmatmul.f32.vlgmr.msra.gmra.mxu2 %v5295_v7  ;;  %1385 = vmatmul.f32.vlgmr.msra.gmra.mxu3 %v5295_v7  ;;  %v8325_v7 = vld [vmem:[#allocation117_spill] sm:$0xff] }
 0x42a   :  { %1414 = vmatpush.msrb.mxu0 %v8312_v0  ;;  %1434 = vmatpush.msrb.mxu1 %v8313_v28  ;;  %v8356_v0 = vld [vmem:[#allocation152_spill] sm:$0xff]  ;;  %v8357_v28 = vld [vmem:[#allocation153_spill] sm:$0xff] }
 0x42b   :  { %1454 = vmatpush.msrb.mxu2 %v8314_v42  ;;  %1474 = vmatpush.msrb.mxu3 %v8315_v10  ;;  %v5445_v42 = vld [vmem:[#allocation7 + $0x1e0] sm:$0xff]  ;;  %v5448_v10 = vld [vmem:[#allocation7 + $0x1e8] sm:$0xff] }
 0x42c   :  { %1415 = vmatpush.msrb.mxu0 %v8316_v31  ;;  %1435 = vmatpush.msrb.mxu1 %v8317_v44  ;;  %v5451_v31 = vld [vmem:[#allocation7 + $0x1f0] sm:$0xff]  ;;  %v5472_v44 = vld [vmem:[#allocation7 + $0x1a8] sm:$0xff] }
 0x42d   :  { %1455 = vmatpush.msrb.mxu2 %v8318_v37  ;;  %1475 = vmatpush.msrb.mxu3 %v8319_v27  ;;  %v5475_v37 = vld [vmem:[#allocation7 + $0x1b0] sm:$0xff]  ;;  %v5478_v27 = vld [vmem:[#allocation7 + $0x1b8] sm:$0xff] }
 0x42e   :  { %1416 = vmatpush.msrb.mxu0 %v8320_v23  ;;  %1436 = vmatpush.msrb.mxu1 %v8321_v34  ;;  %v5481_v23 = vld [vmem:[#allocation7 + $0x180] sm:$0xff]  ;;  %v5484_v34 = vld [vmem:[#allocation7 + $0x188] sm:$0xff] }
 0x42f   :  { %1456 = vmatpush.msrb.mxu2 %v8322_v24  ;;  %1476 = vmatpush.msrb.mxu3 %v8323_v40  ;;  %v5487_v24 = vld [vmem:[#allocation7 + $0x190] sm:$0xff]  ;;  %v5490_v40 = vld [vmem:[#allocation7 + $0x198] sm:$0xff] }
 0x430   :  { %1417 = vmatpush.msrb.mxu0 %v8324_v32  ;;  %1437 = vmatpush.msrb.mxu1 %v8325_v7  ;;  %v5493_v32 = vld [vmem:[#allocation7 + $0x160] sm:$0xff]  ;;  %v5496_v7 = vld [vmem:[#allocation7 + $0x168] sm:$0xff] }
 0x431   :  { %1457 = vmatpush.msrb.mxu2 %v8326_v2  ;;  %1477 = vmatpush.msrb.mxu3 %v8327_v4  ;;  %v5499_v2 = vld [vmem:[#allocation7 + $0x170] sm:$0xff]  ;;  %v5502_v4 = vld [vmem:[#allocation7 + $0x178] sm:$0xff] }
 0x432   :  { %1418 = vmatpush.msrb.mxu0 %v8328_v6  ;;  %1438 = vmatpush.msrb.mxu1 %v8329_v57  ;;  %v5505_v6 = vld [vmem:[#allocation7 + $0x140] sm:$0xff]  ;;  %v5508_v57 = vld [vmem:[#allocation7 + $0x148] sm:$0xff] }
 0x433   :  { %1458 = vmatpush.msrb.mxu2 %v8330_v8  ;;  %1478 = vmatpush.msrb.mxu3 %v8331_v12  ;;  %v5511_v8 = vld [vmem:[#allocation7 + $0x150] sm:$0xff]  ;;  %v5514_v12 = vld [vmem:[#allocation7 + $0x158] sm:$0xff] }
 0x434   :  { %1419 = vmatpush.msrb.mxu0 %v8332_v17  ;;  %1439 = vmatpush.msrb.mxu1 %v8333_v39  ;;  %v5517_v17 = vld [vmem:[#allocation7 + $0x120] sm:$0xff]  ;;  %v5520_v39 = vld [vmem:[#allocation7 + $0x128] sm:$0xff] }
 0x435   :  { %1459 = vmatpush.msrb.mxu2 %v8334_v41  ;;  %1479 = vmatpush.msrb.mxu3 %v8335_v36  ;;  %v5523_v41 = vld [vmem:[#allocation7 + $0x130] sm:$0xff]  ;;  %v5526_v36 = vld [vmem:[#allocation7 + $0x138] sm:$0xff] }
 0x436   :  { %1420 = vmatpush.msrb.mxu0 %v8336_v29  ;;  %1440 = vmatpush.msrb.mxu1 %v8337_v50  ;;  %v5529_v29 = vld [vmem:[#allocation7 + $0x100] sm:$0xff]  ;;  %v5532_v50 = vld [vmem:[#allocation7 + $0x108] sm:$0xff] }
 0x437   :  { %1460 = vmatpush.msrb.mxu2 %v8338_v48  ;;  %1480 = vmatpush.msrb.mxu3 %v8339_v49  ;;  %v5535_v48 = vld [vmem:[#allocation7 + $0x110] sm:$0xff]  ;;  %v5538_v49 = vld [vmem:[#allocation7 + $0x118] sm:$0xff] }
 0x438   :  { %1421 = vmatpush.msrb.mxu0 %v8340_v13  ;;  %1441 = vmatpush.msrb.mxu1 %v8341_v62  ;;  %v5541_v13 = vld [vmem:[#allocation7 + $0xe0] sm:$0xff]  ;;  %v5544_v62 = vld [vmem:[#allocation7 + $0xe8] sm:$0xff] }
 0x439   :  { %1461 = vmatpush.msrb.mxu2 %v8342_v14  ;;  %1481 = vmatpush.msrb.mxu3 %v8343_v15  ;;  %8358 = vst [vmem:[#allocation154_spill] sm:$0xff] %v5541_v13  ;;  %v5547_v14 = vld [vmem:[#allocation7 + $0xf0] sm:$0xff]  ;;  %v5550_v15 = vld [vmem:[#allocation7 + $0xf8] sm:$0xff] }
 0x43a   :  { %1422 = vmatpush.msrb.mxu0 %v8344_v16  ;;  %1442 = vmatpush.msrb.mxu1 %v8345_v18  ;;  %8359 = vst [vmem:[#allocation156_spill] sm:$0xff] %v5544_v62  ;;  %v5553_v16 = vld [vmem:[#allocation7 + $0xc0] sm:$0xff]  ;;  %v5556_v18 = vld [vmem:[#allocation7 + $0xc8] sm:$0xff] }
 0x43b   :  { %1462 = vmatpush.msrb.mxu2 %v8346_v19  ;;  %1482 = vmatpush.msrb.mxu3 %v8347_v20  ;;  %8360 = vst [vmem:[#allocation157_spill] sm:$0xff] %v5547_v14  ;;  %v5559_v19 = vld [vmem:[#allocation7 + $0xd0] sm:$0xff]  ;;  %v5562_v20 = vld [vmem:[#allocation7 + $0xd8] sm:$0xff] }
 0x43c   :  { %1423 = vmatpush.msrb.mxu0 %v8348_v21  ;;  %1443 = vmatpush.msrb.mxu1 %v8349_v54  ;;  %8361 = vst [vmem:[#allocation158_spill] sm:$0xff] %v5550_v15  ;;  %v5565_v21 = vld [vmem:[#allocation7 + $0xa0] sm:$0xff]  ;;  %v5568_v54 = vld [vmem:[#allocation7 + $0xa8] sm:$0xff] }
 0x43d   :  { %1463 = vmatpush.msrb.mxu2 %v8350_v22  ;;  %1483 = vmatpush.msrb.mxu3 %v8351_v61  ;;  %8362 = vst [vmem:[#allocation160_spill] sm:$0xff] %v5553_v16  ;;  %v5571_v22 = vld [vmem:[#allocation7 + $0xb0] sm:$0xff]  ;;  %v5574_v61 = vld [vmem:[#allocation7 + $0xb8] sm:$0xff] }
 0x43e   :  { %1424 = vmatpush.msrb.mxu0 %v8352_v47  ;;  %1444 = vmatpush.msrb.mxu1 %v8353_v53  ;;  %8363 = vst [vmem:[#allocation161_spill] sm:$0xff] %v5556_v18  ;;  %v5577_v47 = vld [vmem:[#allocation7 + $0x80] sm:$0xff]  ;;  %v5580_v53 = vld [vmem:[#allocation7 + $0x88] sm:$0xff] }
 0x43f   :  { %1464 = vmatpush.msrb.mxu2 %v8354_v56  ;;  %1484 = vmatpush.msrb.mxu3 %v8355_v59  ;;  %8364 = vst [vmem:[#allocation162_spill] sm:$0xff] %v5559_v19  ;;  %v5583_v56 = vld [vmem:[#allocation7 + $0x90] sm:$0xff]  ;;  %v5586_v59 = vld [vmem:[#allocation7 + $0x98] sm:$0xff] }
 0x440   :  { %1425 = vmatpush.msrb.mxu0 %v8356_v0  ;;  %1445 = vmatpush.msrb.mxu1 %v8357_v28  ;;  %8365 = vst [vmem:[#allocation163_spill] sm:$0xff] %v5562_v20  ;;  %v5589_v0 = vld [vmem:[#allocation7 + $0x60] sm:$0xff]  ;;  %v5592_v28 = vld [vmem:[#allocation7 + $0x68] sm:$0xff] }
 0x441   :  { %1465 = vmatpush.msrb.mxu2 %v5193_v25  ;;  %1485 = vmatpush.msrb.mxu3 %v5196_v33  ;;  %v5454_v25 = vld [vmem:[#allocation7 + $0x1f8] sm:$0xff]  ;;  %v5469_v33 = vld [vmem:[#allocation7 + $0x1a0] sm:$0xff]  ;;  %8366 = vst [vmem:[#allocation164_spill] sm:$0xff] %v5565_v21 }
 0x442   :  { %1426 = vmatpush.msrb.mxu0 %v5199_v26  ;;  %1446 = vmatpush.msrb.mxu1 %v5202_v52  ;;  %v5457_v26 = vld [vmem:[#allocation7 + $0x1c0] sm:$0xff]  ;;  %v5460_v52 = vld [vmem:[#allocation7 + $0x1c8] sm:$0xff]  ;;  %8367 = vst [vmem:[#allocation165_spill] sm:$0xff] %v5568_v54 }
 0x443   :  { %1466 = vmatpush.msrb.mxu2 %v5205_v43  ;;  %1486 = vmatpush.msrb.mxu3 %v5208_v38  ;;  %v5463_v43 = vld [vmem:[#allocation7 + $0x1d0] sm:$0xff]  ;;  %v5466_v38 = vld [vmem:[#allocation7 + $0x1d8] sm:$0xff]  ;;  %8368 = vst [vmem:[#allocation18_spill] sm:$0xff] %v5571_v22 }
 0x444   :  { %1513 = vmatpush.msra.mxu0 %v5445_v42  ;;  %1533 = vmatpush.msra.mxu1 %v5448_v10  ;;  %8369 = vst [vmem:[#allocation19_spill] sm:$0xff] %v5574_v61 }
 0x445   :  { %1553 = vmatpush.msra.mxu2 %v5451_v31  ;;  %1573 = vmatpush.msra.mxu3 %v5454_v25  ;;  %8370 = vst [vmem:[#allocation20_spill] sm:$0xff] %v5577_v47 }
 0x446   :  { %1514 = vmatpush.msra.mxu0 %v5457_v26  ;;  %1534 = vmatpush.msra.mxu1 %v5460_v52  ;;  %8371 = vst [vmem:[#allocation21_spill] sm:$0xff] %v5580_v53 }
 0x447   :  { %1554 = vmatpush.msra.mxu2 %v5463_v43  ;;  %1574 = vmatpush.msra.mxu3 %v5466_v38  ;;  %8372 = vst [vmem:[#allocation22_spill] sm:$0xff] %v5583_v56 }
 0x448   :  { %1515 = vmatpush.msra.mxu0 %v5469_v33  ;;  %1535 = vmatpush.msra.mxu1 %v5472_v44  ;;  %8373 = vst [vmem:[#allocation23_spill] sm:$0xff] %v5586_v59 }
 0x449   :  { %1555 = vmatpush.msra.mxu2 %v5475_v37  ;;  %1575 = vmatpush.msra.mxu3 %v5478_v27  ;;  %8374 = vst [vmem:[#allocation24_spill] sm:$0xff] %v5589_v0 }
 0x44a   :  { %1516 = vmatpush.msra.mxu0 %v5481_v23  ;;  %1536 = vmatpush.msra.mxu1 %v5484_v34  ;;  %8375 = vst [vmem:[#allocation25_spill] sm:$0xff] %v5592_v28 }
 0x44b   :  { %1556 = vmatpush.msra.mxu2 %v5487_v24  ;;  %1576 = vmatpush.msra.mxu3 %v5490_v40 }
 0x44c   :  { %1517 = vmatpush.msra.mxu0 %v5493_v32  ;;  %1537 = vmatpush.msra.mxu1 %v5496_v7 }
 0x44d   :  { %1557 = vmatpush.msra.mxu2 %v5499_v2  ;;  %1577 = vmatpush.msra.mxu3 %v5502_v4 }
 0x44e   :  { %1518 = vmatpush.msra.mxu0 %v5505_v6  ;;  %1538 = vmatpush.msra.mxu1 %v5508_v57 }
 0x44f   :  { %1558 = vmatpush.msra.mxu2 %v5511_v8  ;;  %1578 = vmatpush.msra.mxu3 %v5514_v12 }
 0x450   :  { %1519 = vmatpush.msra.mxu0 %v5517_v17  ;;  %1539 = vmatpush.msra.mxu1 %v5520_v39 }
 0x451   :  { %1559 = vmatpush.msra.mxu2 %v5523_v41  ;;  %1579 = vmatpush.msra.mxu3 %v5526_v36 }
 0x452   :  { %1520 = vmatpush.msra.mxu0 %v5529_v29  ;;  %1540 = vmatpush.msra.mxu1 %v5532_v50 }
 0x453   :  { %1560 = vmatpush.msra.mxu2 %v5535_v48  ;;  %1580 = vmatpush.msra.mxu3 %v5538_v49 }
 0x454   :  { %1521 = vmatpush.msra.mxu0 %v5541_v13  ;;  %1541 = vmatpush.msra.mxu1 %v5544_v62 }
 0x455   :  { %1561 = vmatpush.msra.mxu2 %v5547_v14  ;;  %1581 = vmatpush.msra.mxu3 %v5550_v15 }
 0x456   :  { %1522 = vmatpush.msra.mxu0 %v5553_v16  ;;  %1542 = vmatpush.msra.mxu1 %v5556_v18 }
 0x457   :  { %1562 = vmatpush.msra.mxu2 %v5559_v19  ;;  %1582 = vmatpush.msra.mxu3 %v5562_v20 }
 0x458   :  { %1523 = vmatpush.msra.mxu0 %v5565_v21  ;;  %1543 = vmatpush.msra.mxu1 %v5568_v54 }
 0x459   :  { %1563 = vmatpush.msra.mxu2 %v5571_v22  ;;  %1583 = vmatpush.msra.mxu3 %v5574_v61 }
 0x45a   :  { %1524 = vmatpush.msra.mxu0 %v5577_v47  ;;  %1544 = vmatpush.msra.mxu1 %v5580_v53  ;;  %v5595_v47 = vld [vmem:[#allocation7 + $0x70] sm:$0xff]  ;;  %v5598_v53 = vld [vmem:[#allocation7 + $0x78] sm:$0xff] }
 0x45b   :  { %1564 = vmatpush.msra.mxu2 %v5583_v56  ;;  %1584 = vmatpush.msra.mxu3 %v5586_v59  ;;  %8376 = vst [vmem:[#allocation26_spill] sm:$0xff] %v5595_v47  ;;  %v5601_v56 = vld [vmem:[#allocation7 + $0x40] sm:$0xff]  ;;  %v5604_v59 = vld [vmem:[#allocation7 + $0x48] sm:$0xff] }
 0x45c   :  { %1525 = vmatpush.msra.mxu0 %v5589_v0  ;;  %1545 = vmatpush.msra.mxu1 %v5592_v28  ;;  %8377 = vst [vmem:[#allocation27_spill] sm:$0xff] %v5598_v53  ;;  %v5607_v0 = vld [vmem:[#allocation7 + $0x50] sm:$0xff]  ;;  %v5610_v28 = vld [vmem:[#allocation7 + $0x58] sm:$0xff] }
 0x45d   :  { %1565 = vmatpush.msra.mxu2 %v5595_v47  ;;  %1585 = vmatpush.msra.mxu3 %v5598_v53  ;;  %8378 = vst [vmem:[#allocation28_spill] sm:$0xff] %v5601_v56  ;;  %v5613_v47 = vld [vmem:[#allocation7 + $0x20] sm:$0xff]  ;;  %v5616_v53 = vld [vmem:[#allocation7 + $0x28] sm:$0xff] }
 0x45e   :  { %1526 = vmatpush.msra.mxu0 %v5601_v56  ;;  %8379 = vst [vmem:[#allocation29_spill] sm:$0xff] %v5604_v59  ;;  %1546 = vmatpush.msra.mxu1 %v5604_v59  ;;  %v5619_v56 = vld [vmem:[#allocation7 + $0x30] sm:$0xff]  ;;  %v5622_v59 = vld [vmem:[#allocation7 + $0x38] sm:$0xff] }
 0x45f   :  { %8380 = vst [vmem:[#allocation30_spill] sm:$0xff] %v5607_v0  ;;  %1566 = vmatpush.msra.mxu2 %v5607_v0  ;;  %1586 = vmatpush.msra.mxu3 %v5610_v28  ;;  %v5625_v0 = vld [vmem:[#allocation7] sm:$0xff] }
 0x460   :  { %8381 = vst [vmem:[#allocation31_spill] sm:$0xff] %v5610_v28  ;;  %1527 = vmatpush.msra.mxu0 %v5613_v47  ;;  %1547 = vmatpush.msra.mxu1 %v5616_v53  ;;  %v5628_v28 = vld [vmem:[#allocation7 + $0x8] sm:$0xff] }
 0x461   :  { %8382 = vst [vmem:[#allocation32_spill] sm:$0xff] %v5613_v47  ;;  %1567 = vmatpush.msra.mxu2 %v5619_v56  ;;  %1587 = vmatpush.msra.mxu3 %v5622_v59  ;;  %v5631_v47 = vld [vmem:[#allocation7 + $0x10] sm:$0xff] }
 0x462   :  { %8383 = vst [vmem:[#allocation33_spill] sm:$0xff] %v5616_v53  ;;  %1528 = vmatpush.msra.mxu0 %v5625_v0  ;;  %1548 = vmatpush.msra.mxu1 %v5628_v28  ;;  %v5634_v53 = vld [vmem:[#allocation7 + $0x18] sm:$0xff] }
 0x463   :  { %8384 = vst [vmem:[#allocation34_spill] sm:$0xff] %v5619_v56  ;;  %1568 = vmatpush.msra.mxu2 %v5631_v47  ;;  %1588 = vmatpush.msra.mxu3 %v5634_v53 }
 0x464   :  { %8385 = vst [vmem:[#allocation35_spill] sm:$0xff] %v5622_v59  ;;  %v1299_v59 = vpop.permute.xlu1 %1298 }
 0x465   :  { %8386 = vst [vmem:[#allocation36_spill] sm:$0xff] %v5625_v0  ;;  %v1301_v22 = vmul.f32 %v1299_v59, %v8248_v51  ;;  %v1302_v0 = vmul.f32 %v1299_v59, %v8249_v58  ;;  %v1303_v16 = vmul.f32 %v1299_v59, %v4332_v45  ;;  %v1304_v15 = vmul.f32 %v1299_v59, %v4342_v55 }
 0x466   :  { %8387 = vst [vmem:[#allocation37_spill] sm:$0xff] %v5628_v28 }
 0x467   :  { %8388 = vst [vmem:[#allocation38_spill] sm:$0xff] %v5631_v47  ;;  %v1305_v21 = vadd.f32 %v1301_v22, %v8250_v60  ;;  %v1306_v47 = vadd.f32 %v1302_v0, %v8251_v63  ;;  %v1307_v58 = vadd.f32 %v1303_v16, %v8252_v11  ;;  %v1308_v62 = vadd.f32 %v1304_v15, %v4355_v46  ;;  %v5669_v15 = vld [vmem:[#allocation2 + $0x1f0] sm:$0xff] }
 0x468   :  { %8389 = vst [vmem:[#allocation39_spill] sm:$0xff] %v5634_v53 }
 0x49d   :  { %v5637_v56 = vpop.f32.mrf.mxu0  ;;  %v5639_v61 = vpop.f32.mrf.mxu1 }
 0x4a4   :  { %v5643_v54 = vpop.f32.mrf.mxu2  ;;  %v5645_v28 = vpop.f32.mrf.mxu3 }
 0x4a5   :  { %v1326_v20 = vpop.f32.mrf.mxu0  ;;  %v1346_v19 = vpop.f32.mrf.mxu1 }
 0x4a6   :  { %v1389_v53 = vadd.f32 %v1326_v20, %v1305_v21  ;;  %v1390_v18 = vadd.f32 %v1346_v19, %v1306_v47 }
 0x4a8   :  { %v1393_v14 = vmul.f32 0.5, %v1389_v53  ;;  %v1397_v51 = vmul.f32 0.5, %v1390_v18 }
 0x4aa   :  { %2851 = vtanh.f32 %v1393_v14 }
 0x4ab   :  { %2853 = vtanh.f32 %v1397_v51 }
 0x4ac   :  { %v1366_v13 = vpop.f32.mrf.mxu2  ;;  %v1386_v22 = vpop.f32.mrf.mxu3 }
 0x4ad   :  { %v1391_v60 = vadd.f32 %v1366_v13, %v1307_v58  ;;  %v1392_v0 = vadd.f32 %v1386_v22, %v1308_v62  ;;  %v5672_v22 = vld [vmem:[#allocation2 + $0x1f8] sm:$0xff] }
 0x4af   :  { %2855 = vtanh.f32 %v1391_v60  ;;  %v1402_v63 = vmul.f32 0.5, %v1392_v0  ;;  %v5675_v0 = vld [vmem:[#allocation2 + $0x1c0] sm:$0xff] }
 0x4b0   :  { %v2852_v20 = vpop.eup %2851 }
 0x4b1   :  { %v2854_v19 = vpop.eup %2853  ;;  %v1395_v21 = vmul.f32 0.5, %v2852_v20  ;;  %2857 = vtanh.f32 %v1402_v63  ;;  %v5663_v63 = vld [vmem:[#allocation2 + $0x1e0] sm:$0xff]  ;;  %v5678_v20 = vld [vmem:[#allocation2 + $0x1c8] sm:$0xff] }
 0x4b2   :  { %v1399_v47 = vmul.f32 0.5, %v2854_v19  ;;  %v5681_v19 = vld [vmem:[#allocation2 + $0x1d0] sm:$0xff] }
 0x4b3   :  { %v1396_v59 = vadd.f32 0.5, %v1395_v21  ;;  %8390 = vst [vmem:[#allocation40_spill] sm:$0xff] %v5681_v19  ;;  %v5684_v21 = vld [vmem:[#allocation2 + $0x1d8] sm:$0xff] }
 0x4b4   :  { %v1400_v53 = vadd.f32 0.5, %v1399_v47  ;;  %8391 = vst [vmem:[#allocation41_spill] sm:$0xff] %v5684_v21  ;;  %v5687_v47 = vld [vmem:[#allocation2 + $0x1a0] sm:$0xff] }
 0x4b5   :  { %v2856_v18 = vpop.eup %2855  ;;  %8392 = vst [vmem:[#allocation42_spill] sm:$0xff] %v5687_v47 }
 0x4b6   :  { %v1406_v51 = vmul.f32 %v1400_v53, %v5292_v30  ;;  %v1407_v14 = vmul.f32 %v2856_v18, %v1396_v59  ;;  %v5666_v30 = vld [vmem:[#allocation2 + $0x1e8] sm:$0xff]  ;;  %v5693_v53 = vld [vmem:[#allocation2 + $0x1b0] sm:$0xff]  ;;  %v5696_v18 = vld [vmem:[#allocation2 + $0x1b8] sm:$0xff] }
 0x4b7   :  { %v2858_v16 = vpop.eup %2857  ;;  %v5690_v59 = vld [vmem:[#allocation2 + $0x1a8] sm:$0xff]  ;;  %8394 = vst [vmem:[#allocation44_spill] sm:$0xff] %v5693_v53 }
 0x4b8   :  { %v5654_v11 = vadd.f32 %v1407_v14, %v1406_v51  ;;  %v1404_v58 = vmul.f32 0.5, %v2858_v16  ;;  %8393 = vst [vmem:[#allocation43_spill] sm:$0xff] %v5690_v59  ;;  %v5699_v51 = vld [vmem:[#allocation2 + $0x180] sm:$0xff]  ;;  %v5702_v14 = vld [vmem:[#allocation2 + $0x188] sm:$0xff]  ;;  %v5705_v16 = vld [vmem:[#allocation2 + $0x190] sm:$0xff] }
 0x4b9   :  { %8395 = vst [vmem:[#allocation45_spill] sm:$0xff] %v5696_v18 }
 0x4ba   :  { %2859 = vtanh.f32 %v5654_v11  ;;  %v1405_v13 = vadd.f32 0.5, %v1404_v58  ;;  %8396 = vst [vmem:[#allocation46_spill] sm:$0xff] %v5699_v51  ;;  %v5708_v58 = vld [vmem:[#allocation2 + $0x198] sm:$0xff] }
 0x4bb   :  { %8397 = vst [vmem:[#allocation47_spill] sm:$0xff] %v5702_v14 }
 0x4bc   :  { %8398 = vst [vmem:[#allocation48_spill] sm:$0xff] %v5705_v16 }
 0x4bd   :  { %8399 = vst [vmem:[#allocation49_spill] sm:$0xff] %v5708_v58 }
 0x4c0   :  { %v2860_v60 = vpop.eup %2859 }
 0x4c1   :  { %v5657_v62 = vmul.f32 %v2860_v60, %v1405_v13  ;;  %v5711_v13 = vld [vmem:[#allocation2 + $0x160] sm:$0xff]  ;;  %v5714_v60 = vld [vmem:[#allocation2 + $0x168] sm:$0xff] }
 0x4c2   :  { %8400 = vst [vmem:[#allocation50_spill] sm:$0xff] %v5711_v13 }
 0x4c3   :  { %1427 = vmatmul.f32.vlgmr.msrb.gmra.mxu0 %v5657_v62  ;;  %1447 = vmatmul.f32.vlgmr.msrb.gmra.mxu1 %v5657_v62  ;;  %8401 = vst [vmem:[#allocation51_spill] sm:$0xff] %v5714_v60 }
 0x4c4   :  { %1467 = vmatmul.f32.vlgmr.msrb.gmra.mxu2 %v5657_v62  ;;  %1487 = vmatmul.f32.vlgmr.msrb.gmra.mxu3 %v5657_v62 }
 0x4c5   :  { %1608 = vmatpush.msrb.mxu0 %v5663_v63  ;;  %1628 = vmatpush.msrb.mxu1 %v5666_v30 }
 0x4c6   :  { %1648 = vmatpush.msrb.mxu2 %v5669_v15  ;;  %1668 = vmatpush.msrb.mxu3 %v5672_v22 }
 0x4c7   :  { %1609 = vmatpush.msrb.mxu0 %v5675_v0  ;;  %1629 = vmatpush.msrb.mxu1 %v5678_v20 }
 0x4c8   :  { %1649 = vmatpush.msrb.mxu2 %v5681_v19  ;;  %1669 = vmatpush.msrb.mxu3 %v5684_v21  ;;  %v1292_v21 = vadd.f32 %v5645_v28, %v8311_v35 }
 0x4c9   :  { %1610 = vmatpush.msrb.mxu0 %v5687_v47  ;;  %1630 = vmatpush.msrb.mxu1 %v5690_v59 }
 0x4ca   :  { %1650 = vmatpush.msrb.mxu2 %v5693_v53  ;;  %1670 = vmatpush.msrb.mxu3 %v5696_v18 }
 0x4cb   :  { %1611 = vmatpush.msrb.mxu0 %v5699_v51  ;;  %1631 = vmatpush.msrb.mxu1 %v5702_v14  ;;  %v5717_v51 = vld [vmem:[#allocation2 + $0x170] sm:$0xff]  ;;  %v5720_v14 = vld [vmem:[#allocation2 + $0x178] sm:$0xff] }
 0x4cc   :  { %1651 = vmatpush.msrb.mxu2 %v5705_v16  ;;  %1671 = vmatpush.msrb.mxu3 %v5708_v58  ;;  %8402 = vst [vmem:[#allocation52_spill] sm:$0xff] %v5717_v51  ;;  %v5723_v16 = vld [vmem:[#allocation2 + $0x140] sm:$0xff]  ;;  %v5726_v58 = vld [vmem:[#allocation2 + $0x148] sm:$0xff] }
 0x4cd   :  { %1612 = vmatpush.msrb.mxu0 %v5711_v13  ;;  %1632 = vmatpush.msrb.mxu1 %v5714_v60  ;;  %8403 = vst [vmem:[#allocation53_spill] sm:$0xff] %v5720_v14  ;;  %v5729_v13 = vld [vmem:[#allocation2 + $0x150] sm:$0xff]  ;;  %v5732_v60 = vld [vmem:[#allocation2 + $0x158] sm:$0xff] }
 0x4ce   :  { %1652 = vmatpush.msrb.mxu2 %v5717_v51  ;;  %1672 = vmatpush.msrb.mxu3 %v5720_v14  ;;  %8404 = vst [vmem:[#allocation54_spill] sm:$0xff] %v5723_v16  ;;  %v5735_v51 = vld [vmem:[#allocation2 + $0x120] sm:$0xff]  ;;  %v5738_v14 = vld [vmem:[#allocation2 + $0x128] sm:$0xff] }
 0x4cf   :  { %1613 = vmatpush.msrb.mxu0 %v5723_v16  ;;  %8405 = vst [vmem:[#allocation55_spill] sm:$0xff] %v5726_v58  ;;  %1633 = vmatpush.msrb.mxu1 %v5726_v58  ;;  %v5741_v16 = vld [vmem:[#allocation2 + $0x130] sm:$0xff]  ;;  %v5744_v58 = vld [vmem:[#allocation2 + $0x138] sm:$0xff] }
 0x4d0   :  { %8406 = vst [vmem:[#allocation56_spill] sm:$0xff] %v5729_v13  ;;  %1653 = vmatpush.msrb.mxu2 %v5729_v13  ;;  %1673 = vmatpush.msrb.mxu3 %v5732_v60  ;;  %v5747_v13 = vld [vmem:[#allocation2 + $0x100] sm:$0xff] }
 0x4d1   :  { %8407 = vst [vmem:[#allocation57_spill] sm:$0xff] %v5732_v60  ;;  %1614 = vmatpush.msrb.mxu0 %v5735_v51  ;;  %1634 = vmatpush.msrb.mxu1 %v5738_v14  ;;  %v5750_v60 = vld [vmem:[#allocation2 + $0x108] sm:$0xff] }
 0x4d2   :  { %8408 = vst [vmem:[#allocation58_spill] sm:$0xff] %v5735_v51  ;;  %1654 = vmatpush.msrb.mxu2 %v5741_v16  ;;  %1674 = vmatpush.msrb.mxu3 %v5744_v58  ;;  %v5753_v51 = vld [vmem:[#allocation2 + $0x110] sm:$0xff] }
 0x4d3   :  { %8409 = vst [vmem:[#allocation59_spill] sm:$0xff] %v5738_v14  ;;  %1615 = vmatpush.msrb.mxu0 %v5747_v13  ;;  %1635 = vmatpush.msrb.mxu1 %v5750_v60  ;;  %v5756_v14 = vld [vmem:[#allocation2 + $0x118] sm:$0xff] }
 0x4d4   :  { %8410 = vst [vmem:[#allocation60_spill] sm:$0xff] %v5741_v16  ;;  %1655 = vmatpush.msrb.mxu2 %v5753_v51  ;;  %1675 = vmatpush.msrb.mxu3 %v5756_v14  ;;  %v5759_v16 = vld [vmem:[#allocation2 + $0xe0] sm:$0xff] }
 0x4d5   :  { %8411 = vst [vmem:[#allocation61_spill] sm:$0xff] %v5744_v58  ;;  %1616 = vmatpush.msrb.mxu0 %v5759_v16  ;;  %v5762_v58 = vld [vmem:[#allocation2 + $0xe8] sm:$0xff] }
 0x4d6   :  { %8412 = vst [vmem:[#allocation62_spill] sm:$0xff] %v5747_v13  ;;  %1636 = vmatpush.msrb.mxu1 %v5762_v58  ;;  %v5765_v13 = vld [vmem:[#allocation2 + $0xf0] sm:$0xff] }
 0x4d7   :  { %8413 = vst [vmem:[#allocation63_spill] sm:$0xff] %v5750_v60  ;;  %1656 = vmatpush.msrb.mxu2 %v5765_v13  ;;  %v5768_v60 = vld [vmem:[#allocation2 + $0xf8] sm:$0xff] }
 0x4d8   :  { %8414 = vst [vmem:[#allocation64_spill] sm:$0xff] %v5753_v51  ;;  %1676 = vmatpush.msrb.mxu3 %v5768_v60  ;;  %v5771_v51 = vld [vmem:[#allocation2 + $0xc0] sm:$0xff] }
 0x4d9   :  { %8415 = vst [vmem:[#allocation65_spill] sm:$0xff] %v5756_v14  ;;  %1617 = vmatpush.msrb.mxu0 %v5771_v51  ;;  %v5774_v14 = vld [vmem:[#allocation2 + $0xc8] sm:$0xff] }
 0x4da   :  { %8416 = vst [vmem:[#allocation66_spill] sm:$0xff] %v5759_v16  ;;  %1637 = vmatpush.msrb.mxu1 %v5774_v14  ;;  %v5777_v16 = vld [vmem:[#allocation2 + $0xd0] sm:$0xff] }
 0x4db   :  { %8417 = vst [vmem:[#allocation67_spill] sm:$0xff] %v5762_v58  ;;  %1657 = vmatpush.msrb.mxu2 %v5777_v16  ;;  %v5780_v58 = vld [vmem:[#allocation2 + $0xd8] sm:$0xff] }
 0x4dc   :  { %8418 = vst [vmem:[#allocation68_spill] sm:$0xff] %v5765_v13  ;;  %1677 = vmatpush.msrb.mxu3 %v5780_v58  ;;  %v5783_v13 = vld [vmem:[#allocation2 + $0xa0] sm:$0xff] }
 0x4dd   :  { %8419 = vst [vmem:[#allocation69_spill] sm:$0xff] %v5768_v60  ;;  %1618 = vmatpush.msrb.mxu0 %v5783_v13  ;;  %v5786_v60 = vld [vmem:[#allocation2 + $0xa8] sm:$0xff] }
 0x4de   :  { %8420 = vst [vmem:[#allocation70_spill] sm:$0xff] %v5771_v51  ;;  %1638 = vmatpush.msrb.mxu1 %v5786_v60  ;;  %v5789_v51 = vld [vmem:[#allocation2 + $0xb0] sm:$0xff] }
 0x4df   :  { %8421 = vst [vmem:[#allocation71_spill] sm:$0xff] %v5774_v14  ;;  %1658 = vmatpush.msrb.mxu2 %v5789_v51  ;;  %v5792_v14 = vld [vmem:[#allocation2 + $0xb8] sm:$0xff] }
 0x4e0   :  { %8422 = vst [vmem:[#allocation72_spill] sm:$0xff] %v5777_v16  ;;  %1678 = vmatpush.msrb.mxu3 %v5792_v14  ;;  %v5795_v16 = vld [vmem:[#allocation2 + $0x80] sm:$0xff] }
 0x4e1   :  { %8423 = vst [vmem:[#allocation73_spill] sm:$0xff] %v5780_v58  ;;  %1619 = vmatpush.msrb.mxu0 %v5795_v16  ;;  %v5798_v58 = vld [vmem:[#allocation2 + $0x88] sm:$0xff] }
 0x4e2   :  { %8424 = vst [vmem:[#allocation74_spill] sm:$0xff] %v5783_v13  ;;  %1639 = vmatpush.msrb.mxu1 %v5798_v58  ;;  %v5801_v13 = vld [vmem:[#allocation2 + $0x90] sm:$0xff] }
 0x4e3   :  { %8425 = vst [vmem:[#allocation75_spill] sm:$0xff] %v5786_v60  ;;  %1659 = vmatpush.msrb.mxu2 %v5801_v13  ;;  %v5804_v60 = vld [vmem:[#allocation2 + $0x98] sm:$0xff] }
 0x4e4   :  { %8426 = vst [vmem:[#allocation76_spill] sm:$0xff] %v5789_v51  ;;  %1679 = vmatpush.msrb.mxu3 %v5804_v60  ;;  %v5807_v51 = vld [vmem:[#allocation2 + $0x60] sm:$0xff] }
 0x4e5   :  { %8427 = vst [vmem:[#allocation77_spill] sm:$0xff] %v5792_v14  ;;  %1620 = vmatpush.msrb.mxu0 %v5807_v51  ;;  %v5810_v14 = vld [vmem:[#allocation2 + $0x68] sm:$0xff] }
 0x4e6   :  { %8428 = vst [vmem:[#allocation78_spill] sm:$0xff] %v5795_v16  ;;  %1640 = vmatpush.msrb.mxu1 %v5810_v14  ;;  %v5813_v16 = vld [vmem:[#allocation2 + $0x70] sm:$0xff] }
 0x4e7   :  { %8429 = vst [vmem:[#allocation79_spill] sm:$0xff] %v5798_v58  ;;  %1660 = vmatpush.msrb.mxu2 %v5813_v16  ;;  %v5816_v58 = vld [vmem:[#allocation2 + $0x78] sm:$0xff] }
 0x4e8   :  { %8430 = vst [vmem:[#allocation80_spill] sm:$0xff] %v5801_v13  ;;  %1680 = vmatpush.msrb.mxu3 %v5816_v58  ;;  %v5819_v13 = vld [vmem:[#allocation2 + $0x40] sm:$0xff] }
 0x4e9   :  { %8431 = vst [vmem:[#allocation81_spill] sm:$0xff] %v5804_v60  ;;  %1621 = vmatpush.msrb.mxu0 %v5819_v13  ;;  %v5822_v60 = vld [vmem:[#allocation2 + $0x48] sm:$0xff] }
 0x4ea   :  { %8432 = vst [vmem:[#allocation82_spill] sm:$0xff] %v5807_v51  ;;  %1641 = vmatpush.msrb.mxu1 %v5822_v60  ;;  %v5825_v51 = vld [vmem:[#allocation2 + $0x50] sm:$0xff] }
 0x4eb   :  { %8433 = vst [vmem:[#allocation83_spill] sm:$0xff] %v5810_v14  ;;  %1661 = vmatpush.msrb.mxu2 %v5825_v51  ;;  %v5828_v14 = vld [vmem:[#allocation2 + $0x58] sm:$0xff] }
 0x4ec   :  { %8434 = vst [vmem:[#allocation84_spill] sm:$0xff] %v5813_v16  ;;  %1681 = vmatpush.msrb.mxu3 %v5828_v14  ;;  %v5831_v16 = vld [vmem:[#allocation2 + $0x20] sm:$0xff] }
 0x4ed   :  { %8435 = vst [vmem:[#allocation85_spill] sm:$0xff] %v5816_v58  ;;  %1622 = vmatpush.msrb.mxu0 %v5831_v16  ;;  %v5834_v58 = vld [vmem:[#allocation2 + $0x28] sm:$0xff] }
 0x4ee   :  { %8436 = vst [vmem:[#allocation86_spill] sm:$0xff] %v5819_v13  ;;  %1642 = vmatpush.msrb.mxu1 %v5834_v58  ;;  %v5837_v13 = vld [vmem:[#allocation2 + $0x30] sm:$0xff] }
 0x4ef   :  { %8437 = vst [vmem:[#allocation87_spill] sm:$0xff] %v5822_v60  ;;  %1662 = vmatpush.msrb.mxu2 %v5837_v13  ;;  %v5840_v60 = vld [vmem:[#allocation2 + $0x38] sm:$0xff] }
 0x4f0   :  { %8438 = vst [vmem:[#allocation88_spill] sm:$0xff] %v5825_v51  ;;  %1682 = vmatpush.msrb.mxu3 %v5840_v60  ;;  %v5843_v51 = vld [vmem:[#allocation2] sm:$0xff] }
 0x4f1   :  { %8439 = vst [vmem:[#allocation89_spill] sm:$0xff] %v5828_v14  ;;  %1623 = vmatpush.msrb.mxu0 %v5843_v51  ;;  %v5846_v14 = vld [vmem:[#allocation2 + $0x8] sm:$0xff] }
 0x4f2   :  { %8440 = vst [vmem:[#allocation90_spill] sm:$0xff] %v5831_v16  ;;  %1643 = vmatpush.msrb.mxu1 %v5846_v14  ;;  %v5849_v16 = vld [vmem:[#allocation2 + $0x10] sm:$0xff] }
 0x4f3   :  { %8441 = vst [vmem:[#allocation91_spill] sm:$0xff] %v5834_v58  ;;  %1663 = vmatpush.msrb.mxu2 %v5849_v16  ;;  %v5852_v58 = vld [vmem:[#allocation2 + $0x18] sm:$0xff] }
 0x4f4   :  { %8442 = vst [vmem:[#allocation92_spill] sm:$0xff] %v5837_v13  ;;  %1683 = vmatpush.msrb.mxu3 %v5852_v58  ;;  %v1232_v13 = vadd.f32 %v5637_v56, %v8309_v3 }
 0x4f5   :  { %8443 = vst [vmem:[#allocation93_spill] sm:$0xff] %v5840_v60  ;;  %v1252_v60 = vadd.f32 %v5639_v61, %v8310_v5  ;;  %v2772_v61 = vld [vmem:[%s7187_s0 + $0x20] sm:$0xff] }
 0x4f6   :  { %8444 = vst [vmem:[#allocation94_spill] sm:$0xff] %v5843_v51  ;;  %1597 = vperm.xlu2 %2789, %v2772_v61  }
 0x4f7   :  { %8445 = vst [vmem:[#allocation95_spill] sm:$0xff] %v5846_v14 }
 0x4f8   :  { %8446 = vst [vmem:[#allocation96_spill] sm:$0xff] %v5849_v16  ;;  %v1272_v16 = vadd.f32 %v5643_v54, %v4505_v9  ;;  %v2773_v54 = vld [vmem:[%s7187_s0 + $0x28] sm:$0xff] }
 0x4f9   :  { %8447 = vst [vmem:[#allocation97_spill] sm:$0xff] %v5852_v58 }
 0x4fe   :  { %1896 = vperm.xlu2 %2789, %v2773_v54   ;;  %v5891_v54 = vld [vmem:[#allocation5 + $0x1d0] sm:$0xff] }
 0x540   :  { %v1428_v18 = vpop.f32.mrf.mxu0  ;;  %v1448_v51 = vpop.f32.mrf.mxu1 }
 0x541   :  { %v1491_v53 = vadd.f32 %v1428_v18, %v1232_v13  ;;  %v1492_v59 = vadd.f32 %v1448_v51, %v1252_v60 }
 0x543   :  { %v1495_v47 = vmul.f32 0.5, %v1491_v53  ;;  %v1499_v14 = vmul.f32 0.5, %v1492_v59 }
 0x545   :  { %2861 = vtanh.f32 %v1495_v47 }
 0x546   :  { %2863 = vtanh.f32 %v1499_v14 }
 0x547   :  { %v1468_v58 = vpop.f32.mrf.mxu2  ;;  %v1488_v19 = vpop.f32.mrf.mxu3 }
 0x548   :  { %v1493_v56 = vadd.f32 %v1468_v58, %v1272_v16  ;;  %v1494_v5 = vadd.f32 %v1488_v19, %v1292_v21 }
 0x54a   :  { %2865 = vtanh.f32 %v1493_v56  ;;  %v1504_v53 = vmul.f32 0.5, %v1494_v5 }
 0x54b   :  { %v2862_v59 = vpop.eup %2861 }
 0x54c   :  { %v2864_v47 = vpop.eup %2863  ;;  %v1497_v18 = vmul.f32 0.5, %v2862_v59  ;;  %2867 = vtanh.f32 %v1504_v53  ;;  %v5873_v53 = vld [vmem:[#allocation5 + $0x1e0] sm:$0xff]  ;;  %v5876_v59 = vld [vmem:[#allocation5 + $0x1e8] sm:$0xff] }
 0x54d   :  { %v1501_v51 = vmul.f32 0.5, %v2864_v47  ;;  %v5882_v47 = vld [vmem:[#allocation5 + $0x1f8] sm:$0xff] }
 0x54e   :  { %v1498_v28 = vadd.f32 0.5, %v1497_v18  ;;  %v5885_v18 = vld [vmem:[#allocation5 + $0x1c0] sm:$0xff] }
 0x54f   :  { %v1502_v14 = vadd.f32 0.5, %v1501_v51  ;;  %v5888_v51 = vld [vmem:[#allocation5 + $0x1c8] sm:$0xff] }
 0x550   :  { %v2866_v13 = vpop.eup %2865 }
 0x551   :  { %v1508_v60 = vmul.f32 %v1502_v14, %v5374_v1  ;;  %v1509_v16 = vmul.f32 %v2866_v13, %v1498_v28  ;;  %v5879_v1 = vld [vmem:[#allocation5 + $0x1f0] sm:$0xff]  ;;  %v5894_v28 = vld [vmem:[#allocation5 + $0x1d8] sm:$0xff]  ;;  %v5897_v14 = vld [vmem:[#allocation5 + $0x1a0] sm:$0xff] }
 0x552   :  { %v2868_v19 = vpop.eup %2867  ;;  %v5900_v13 = vld [vmem:[#allocation5 + $0x1a8] sm:$0xff] }
 0x553   :  { %v5870_v21 = vadd.f32 %v1509_v16, %v1508_v60  ;;  %v1506_v5 = vmul.f32 0.5, %v2868_v19  ;;  %v5903_v60 = vld [vmem:[#allocation5 + $0x1b0] sm:$0xff]  ;;  %v5906_v16 = vld [vmem:[#allocation5 + $0x1b8] sm:$0xff]  ;;  %v5913_v19 = vld [vmem:[#allocation5 + $0x180] sm:$0xff] }
 0x554   :  { %8448 = vst [vmem:[#allocation98_spill] sm:$0xff] %v5913_v19 }
 0x555   :  { %2869 = vtanh.f32 %v5870_v21  ;;  %v1507_v58 = vadd.f32 0.5, %v1506_v5  ;;  %v5916_v5 = vld [vmem:[#allocation5 + $0x188] sm:$0xff] }
 0x556   :  { %8449 = vst [vmem:[#allocation147_spill] sm:$0xff] %v5916_v5 }
 0x55b   :  { %v2870_v61 = vpop.eup %2869 }
 0x55c   :  { %v1512_v56 = vmul.f32 %v2870_v61, %v1507_v58  ;;  %v5919_v58 = vld [vmem:[#allocation5 + $0x190] sm:$0xff]  ;;  %v5922_v61 = vld [vmem:[#allocation5 + $0x198] sm:$0xff] }
 0x55d   :  { %8450 = vst [vmem:[#allocation150_spill] sm:$0xff] %v5919_v58 }
 0x55e   :  { %1529 = vmatmul.f32.vlgmr.msra.gmra.mxu0 %v1512_v56  ;;  %1549 = vmatmul.f32.vlgmr.msra.gmra.mxu1 %v1512_v56  ;;  %8451 = vst [vmem:[#allocation99_spill] sm:$0xff] %v5922_v61 }
 0x55f   :  { %1569 = vmatmul.f32.vlgmr.msra.gmra.mxu2 %v1512_v56  ;;  %1589 = vmatmul.f32.vlgmr.msra.gmra.mxu3 %v1512_v56  ;;  %v5925_v56 = vld [vmem:[#allocation5 + $0x160] sm:$0xff] }
 0x560   :  { %1710 = vmatpush.msra.mxu0 %v5873_v53  ;;  %1730 = vmatpush.msra.mxu1 %v5876_v59  ;;  %8452 = vst [vmem:[#allocation100_spill] sm:$0xff] %v5925_v56 }
 0x561   :  { %1750 = vmatpush.msra.mxu2 %v5879_v1  ;;  %1770 = vmatpush.msra.mxu3 %v5882_v47 }
 0x562   :  { %1711 = vmatpush.msra.mxu0 %v5885_v18  ;;  %1731 = vmatpush.msra.mxu1 %v5888_v51 }
 0x563   :  { %1751 = vmatpush.msra.mxu2 %v5891_v54  ;;  %1771 = vmatpush.msra.mxu3 %v5894_v28 }
 0x564   :  { %1712 = vmatpush.msra.mxu0 %v5897_v14  ;;  %1732 = vmatpush.msra.mxu1 %v5900_v13 }
 0x565   :  { %1752 = vmatpush.msra.mxu2 %v5903_v60  ;;  %1772 = vmatpush.msra.mxu3 %v5906_v16 }
 0x566   :  { %1624 = vmatmul.f32.vlgmr.msrb.gmra.mxu0 %v5657_v62  ;;  %1644 = vmatmul.f32.vlgmr.msrb.gmra.mxu1 %v5657_v62 }
 0x567   :  { %1664 = vmatmul.f32.vlgmr.msrb.gmra.mxu2 %v5657_v62  ;;  %1684 = vmatmul.f32.vlgmr.msrb.gmra.mxu3 %v5657_v62  ;;  %v5928_v62 = vld [vmem:[#allocation5 + $0x168] sm:$0xff] }
 0x568   :  { %1713 = vmatpush.msra.mxu0 %v5913_v19  ;;  %1733 = vmatpush.msra.mxu1 %v5916_v5  ;;  %8453 = vst [vmem:[#allocation101_spill] sm:$0xff] %v5928_v62  ;;  %v5931_v19 = vld [vmem:[#allocation5 + $0x170] sm:$0xff]  ;;  %v5934_v5 = vld [vmem:[#allocation5 + $0x178] sm:$0xff] }
 0x569   :  { %1753 = vmatpush.msra.mxu2 %v5919_v58  ;;  %1773 = vmatpush.msra.mxu3 %v5922_v61  ;;  %8454 = vst [vmem:[#allocation102_spill] sm:$0xff] %v5931_v19  ;;  %v5937_v58 = vld [vmem:[#allocation5 + $0x140] sm:$0xff]  ;;  %v5940_v61 = vld [vmem:[#allocation5 + $0x148] sm:$0xff] }
 0x56a   :  { %1714 = vmatpush.msra.mxu0 %v5925_v56  ;;  %1734 = vmatpush.msra.mxu1 %v5928_v62  ;;  %8455 = vst [vmem:[#allocation103_spill] sm:$0xff] %v5934_v5  ;;  %v5943_v56 = vld [vmem:[#allocation5 + $0x150] sm:$0xff]  ;;  %v5946_v62 = vld [vmem:[#allocation5 + $0x158] sm:$0xff] }
 0x56b   :  { %1754 = vmatpush.msra.mxu2 %v5931_v19  ;;  %1774 = vmatpush.msra.mxu3 %v5934_v5  ;;  %8456 = vst [vmem:[#allocation17_spill] sm:$0xff] %v5937_v58  ;;  %v5949_v19 = vld [vmem:[#allocation5 + $0x120] sm:$0xff]  ;;  %v5952_v5 = vld [vmem:[#allocation5 + $0x128] sm:$0xff] }
 0x56c   :  { %1715 = vmatpush.msra.mxu0 %v5937_v58  ;;  %8457 = vst [vmem:[#allocation104_spill] sm:$0xff] %v5940_v61  ;;  %1735 = vmatpush.msra.mxu1 %v5940_v61  ;;  %v5955_v58 = vld [vmem:[#allocation5 + $0x130] sm:$0xff]  ;;  %v5958_v61 = vld [vmem:[#allocation5 + $0x138] sm:$0xff] }
 0x56d   :  { %8458 = vst [vmem:[#allocation105_spill] sm:$0xff] %v5943_v56  ;;  %1755 = vmatpush.msra.mxu2 %v5943_v56  ;;  %1775 = vmatpush.msra.mxu3 %v5946_v62  ;;  %v5961_v56 = vld [vmem:[#allocation5 + $0x100] sm:$0xff] }
 0x56e   :  { %8459 = vst [vmem:[#allocation106_spill] sm:$0xff] %v5946_v62  ;;  %1716 = vmatpush.msra.mxu0 %v5949_v19  ;;  %1736 = vmatpush.msra.mxu1 %v5952_v5  ;;  %v5964_v62 = vld [vmem:[#allocation5 + $0x108] sm:$0xff] }
 0x56f   :  { %8460 = vst [vmem:[#allocation107_spill] sm:$0xff] %v5949_v19  ;;  %1756 = vmatpush.msra.mxu2 %v5955_v58  ;;  %1776 = vmatpush.msra.mxu3 %v5958_v61  ;;  %v5967_v19 = vld [vmem:[#allocation5 + $0x110] sm:$0xff] }
 0x570   :  { %8461 = vst [vmem:[#allocation108_spill] sm:$0xff] %v5952_v5  ;;  %1717 = vmatpush.msra.mxu0 %v5961_v56  ;;  %1737 = vmatpush.msra.mxu1 %v5964_v62  ;;  %v5970_v5 = vld [vmem:[#allocation5 + $0x118] sm:$0xff] }
 0x571   :  { %8462 = vst [vmem:[#allocation109_spill] sm:$0xff] %v5955_v58  ;;  %1757 = vmatpush.msra.mxu2 %v5967_v19  ;;  %1777 = vmatpush.msra.mxu3 %v5970_v5  ;;  %v5973_v58 = vld [vmem:[#allocation5 + $0xe0] sm:$0xff] }
 0x572   :  { %8463 = vst [vmem:[#allocation110_spill] sm:$0xff] %v5958_v61  ;;  %1718 = vmatpush.msra.mxu0 %v5973_v58  ;;  %v5976_v61 = vld [vmem:[#allocation5 + $0xe8] sm:$0xff] }
 0x573   :  { %8464 = vst [vmem:[#allocation111_spill] sm:$0xff] %v5961_v56  ;;  %1738 = vmatpush.msra.mxu1 %v5976_v61  ;;  %v5979_v56 = vld [vmem:[#allocation5 + $0xf0] sm:$0xff] }
 0x574   :  { %8465 = vst [vmem:[#allocation112_spill] sm:$0xff] %v5964_v62  ;;  %1758 = vmatpush.msra.mxu2 %v5979_v56  ;;  %v5982_v62 = vld [vmem:[#allocation5 + $0xf8] sm:$0xff] }
 0x575   :  { %8466 = vst [vmem:[#allocation113_spill] sm:$0xff] %v5967_v19  ;;  %1778 = vmatpush.msra.mxu3 %v5982_v62  ;;  %v5985_v19 = vld [vmem:[#allocation5 + $0xc0] sm:$0xff] }
 0x576   :  { %8467 = vst [vmem:[#allocation114_spill] sm:$0xff] %v5970_v5  ;;  %1719 = vmatpush.msra.mxu0 %v5985_v19  ;;  %v5988_v5 = vld [vmem:[#allocation5 + $0xc8] sm:$0xff] }
 0x577   :  { %8468 = vst [vmem:[#allocation115_spill] sm:$0xff] %v5973_v58  ;;  %1739 = vmatpush.msra.mxu1 %v5988_v5  ;;  %v5991_v58 = vld [vmem:[#allocation5 + $0xd0] sm:$0xff] }
 0x578   :  { %8469 = vst [vmem:[#allocation116_spill] sm:$0xff] %v5976_v61  ;;  %1759 = vmatpush.msra.mxu2 %v5991_v58  ;;  %v5994_v61 = vld [vmem:[#allocation5 + $0xd8] sm:$0xff] }
 0x579   :  { %8470 = vst [vmem:[#allocation117_spill] sm:$0xff] %v5979_v56  ;;  %1779 = vmatpush.msra.mxu3 %v5994_v61  ;;  %v5997_v56 = vld [vmem:[#allocation5 + $0xa0] sm:$0xff] }
 0x57a   :  { %8471 = vst [vmem:[#allocation118_spill] sm:$0xff] %v5982_v62  ;;  %1720 = vmatpush.msra.mxu0 %v5997_v56  ;;  %v6000_v62 = vld [vmem:[#allocation5 + $0xa8] sm:$0xff] }
 0x57b   :  { %8472 = vst [vmem:[#allocation119_spill] sm:$0xff] %v5985_v19  ;;  %1740 = vmatpush.msra.mxu1 %v6000_v62  ;;  %v6003_v19 = vld [vmem:[#allocation5 + $0xb0] sm:$0xff] }
 0x57c   :  { %8473 = vst [vmem:[#allocation120_spill] sm:$0xff] %v5988_v5  ;;  %1760 = vmatpush.msra.mxu2 %v6003_v19  ;;  %v6006_v5 = vld [vmem:[#allocation5 + $0xb8] sm:$0xff] }
 0x57d   :  { %8474 = vst [vmem:[#allocation121_spill] sm:$0xff] %v5991_v58  ;;  %1780 = vmatpush.msra.mxu3 %v6006_v5  ;;  %v6009_v58 = vld [vmem:[#allocation5 + $0x80] sm:$0xff] }
 0x57e   :  { %8475 = vst [vmem:[#allocation122_spill] sm:$0xff] %v5994_v61  ;;  %1721 = vmatpush.msra.mxu0 %v6009_v58  ;;  %v6012_v61 = vld [vmem:[#allocation5 + $0x88] sm:$0xff] }
 0x57f   :  { %8476 = vst [vmem:[#allocation123_spill] sm:$0xff] %v5997_v56  ;;  %1741 = vmatpush.msra.mxu1 %v6012_v61  ;;  %v6015_v56 = vld [vmem:[#allocation5 + $0x90] sm:$0xff] }
 0x580   :  { %8477 = vst [vmem:[#allocation124_spill] sm:$0xff] %v6000_v62  ;;  %1761 = vmatpush.msra.mxu2 %v6015_v56  ;;  %v6018_v62 = vld [vmem:[#allocation5 + $0x98] sm:$0xff] }
 0x581   :  { %8478 = vst [vmem:[#allocation125_spill] sm:$0xff] %v6003_v19  ;;  %1781 = vmatpush.msra.mxu3 %v6018_v62  ;;  %v6021_v19 = vld [vmem:[#allocation5 + $0x60] sm:$0xff] }
 0x582   :  { %8479 = vst [vmem:[#allocation126_spill] sm:$0xff] %v6006_v5  ;;  %1722 = vmatpush.msra.mxu0 %v6021_v19  ;;  %v6024_v5 = vld [vmem:[#allocation5 + $0x68] sm:$0xff] }
 0x583   :  { %8480 = vst [vmem:[#allocation127_spill] sm:$0xff] %v6009_v58  ;;  %1742 = vmatpush.msra.mxu1 %v6024_v5  ;;  %v6027_v58 = vld [vmem:[#allocation5 + $0x70] sm:$0xff] }
 0x584   :  { %8481 = vst [vmem:[#allocation128_spill] sm:$0xff] %v6012_v61  ;;  %1762 = vmatpush.msra.mxu2 %v6027_v58  ;;  %v6030_v61 = vld [vmem:[#allocation5 + $0x78] sm:$0xff] }
 0x585   :  { %8482 = vst [vmem:[#allocation129_spill] sm:$0xff] %v6015_v56  ;;  %1782 = vmatpush.msra.mxu3 %v6030_v61  ;;  %v6033_v56 = vld [vmem:[#allocation5 + $0x40] sm:$0xff] }
 0x586   :  { %8483 = vst [vmem:[#allocation130_spill] sm:$0xff] %v6018_v62  ;;  %1723 = vmatpush.msra.mxu0 %v6033_v56  ;;  %v6036_v62 = vld [vmem:[#allocation5 + $0x48] sm:$0xff] }
 0x587   :  { %8484 = vst [vmem:[#allocation131_spill] sm:$0xff] %v6021_v19  ;;  %1743 = vmatpush.msra.mxu1 %v6036_v62  ;;  %v6039_v19 = vld [vmem:[#allocation5 + $0x50] sm:$0xff] }
 0x588   :  { %8485 = vst [vmem:[#allocation132_spill] sm:$0xff] %v6024_v5  ;;  %1763 = vmatpush.msra.mxu2 %v6039_v19  ;;  %v6042_v5 = vld [vmem:[#allocation5 + $0x58] sm:$0xff] }
 0x589   :  { %8486 = vst [vmem:[#allocation133_spill] sm:$0xff] %v6027_v58  ;;  %1783 = vmatpush.msra.mxu3 %v6042_v5  ;;  %v6045_v58 = vld [vmem:[#allocation5 + $0x20] sm:$0xff] }
 0x58a   :  { %8487 = vst [vmem:[#allocation134_spill] sm:$0xff] %v6030_v61  ;;  %1724 = vmatpush.msra.mxu0 %v6045_v58  ;;  %v6048_v61 = vld [vmem:[#allocation5 + $0x28] sm:$0xff] }
 0x58b   :  { %8488 = vst [vmem:[#allocation135_spill] sm:$0xff] %v6033_v56  ;;  %1744 = vmatpush.msra.mxu1 %v6048_v61  ;;  %v6051_v56 = vld [vmem:[#allocation5 + $0x30] sm:$0xff] }
 0x58c   :  { %8489 = vst [vmem:[#allocation136_spill] sm:$0xff] %v6036_v62  ;;  %1764 = vmatpush.msra.mxu2 %v6051_v56  ;;  %v6054_v62 = vld [vmem:[#allocation5 + $0x38] sm:$0xff] }
 0x58d   :  { %8490 = vst [vmem:[#allocation137_spill] sm:$0xff] %v6039_v19  ;;  %1784 = vmatpush.msra.mxu3 %v6054_v62  ;;  %v6057_v19 = vld [vmem:[#allocation5] sm:$0xff] }
 0x58e   :  { %8491 = vst [vmem:[#allocation138_spill] sm:$0xff] %v6042_v5  ;;  %1725 = vmatpush.msra.mxu0 %v6057_v19  ;;  %v6060_v5 = vld [vmem:[#allocation5 + $0x8] sm:$0xff] }
 0x58f   :  { %8492 = vst [vmem:[#allocation139_spill] sm:$0xff] %v6045_v58  ;;  %1745 = vmatpush.msra.mxu1 %v6060_v5  ;;  %v6063_v58 = vld [vmem:[#allocation5 + $0x10] sm:$0xff] }
 0x590   :  { %8493 = vst [vmem:[#allocation140_spill] sm:$0xff] %v6048_v61  ;;  %1765 = vmatpush.msra.mxu2 %v6063_v58  ;;  %v6066_v61 = vld [vmem:[#allocation5 + $0x18] sm:$0xff]  ;;  %1812 = vmatpush.msrb.mxu0 %v5445_v42  ;;  %v8494_v42 = vld [vmem:[#allocation154_spill] sm:$0xff] }
 0x591   :  { %1785 = vmatpush.msra.mxu3 %v6066_v61  ;;  %1832 = vmatpush.msrb.mxu1 %v5448_v10  ;;  %v8495_v10 = vld [vmem:[#allocation156_spill] sm:$0xff] }
 0x592   :  { %1852 = vmatpush.msrb.mxu2 %v5451_v31  ;;  %1813 = vmatpush.msrb.mxu0 %v5457_v26  ;;  %v8496_v31 = vld [vmem:[#allocation157_spill] sm:$0xff]  ;;  %v8498_v26 = vld [vmem:[#allocation160_spill] sm:$0xff] }
 0x593   :  { %1872 = vmatpush.msrb.mxu3 %v5454_v25  ;;  %1833 = vmatpush.msrb.mxu1 %v5460_v52  ;;  %v8497_v25 = vld [vmem:[#allocation158_spill] sm:$0xff]  ;;  %v8499_v52 = vld [vmem:[#allocation161_spill] sm:$0xff] }
 0x594   :  { %1853 = vmatpush.msrb.mxu2 %v5463_v43  ;;  %1814 = vmatpush.msrb.mxu0 %v5469_v33  ;;  %v8500_v43 = vld [vmem:[#allocation162_spill] sm:$0xff]  ;;  %v8502_v33 = vld [vmem:[#allocation164_spill] sm:$0xff] }
 0x595   :  { %1873 = vmatpush.msrb.mxu3 %v5466_v38  ;;  %1834 = vmatpush.msrb.mxu1 %v5472_v44  ;;  %v8501_v38 = vld [vmem:[#allocation163_spill] sm:$0xff]  ;;  %v8503_v44 = vld [vmem:[#allocation165_spill] sm:$0xff] }
 0x596   :  { %1854 = vmatpush.msrb.mxu2 %v5475_v37  ;;  %1815 = vmatpush.msrb.mxu0 %v5481_v23  ;;  %v8504_v37 = vld [vmem:[#allocation18_spill] sm:$0xff]  ;;  %v8506_v23 = vld [vmem:[#allocation20_spill] sm:$0xff] }
 0x597   :  { %1874 = vmatpush.msrb.mxu3 %v5478_v27  ;;  %1835 = vmatpush.msrb.mxu1 %v5484_v34  ;;  %v8505_v27 = vld [vmem:[#allocation19_spill] sm:$0xff]  ;;  %v8507_v34 = vld [vmem:[#allocation21_spill] sm:$0xff] }
 0x598   :  { %1855 = vmatpush.msrb.mxu2 %v5487_v24  ;;  %1816 = vmatpush.msrb.mxu0 %v5493_v32  ;;  %v8508_v24 = vld [vmem:[#allocation22_spill] sm:$0xff]  ;;  %v8510_v32 = vld [vmem:[#allocation24_spill] sm:$0xff] }
 0x599   :  { %1875 = vmatpush.msrb.mxu3 %v5490_v40  ;;  %1836 = vmatpush.msrb.mxu1 %v5496_v7  ;;  %v8509_v40 = vld [vmem:[#allocation23_spill] sm:$0xff]  ;;  %v8511_v7 = vld [vmem:[#allocation25_spill] sm:$0xff] }
 0x59a   :  { %1856 = vmatpush.msrb.mxu2 %v5499_v2  ;;  %1817 = vmatpush.msrb.mxu0 %v5505_v6  ;;  %v8512_v2 = vld [vmem:[#allocation26_spill] sm:$0xff]  ;;  %v8514_v6 = vld [vmem:[#allocation28_spill] sm:$0xff] }
 0x59b   :  { %1876 = vmatpush.msrb.mxu3 %v5502_v4  ;;  %1837 = vmatpush.msrb.mxu1 %v5508_v57  ;;  %v8513_v4 = vld [vmem:[#allocation27_spill] sm:$0xff]  ;;  %v8515_v57 = vld [vmem:[#allocation29_spill] sm:$0xff] }
 0x59c   :  { %1857 = vmatpush.msrb.mxu2 %v5511_v8  ;;  %1818 = vmatpush.msrb.mxu0 %v5517_v17  ;;  %v8516_v8 = vld [vmem:[#allocation30_spill] sm:$0xff]  ;;  %v8518_v17 = vld [vmem:[#allocation32_spill] sm:$0xff] }
 0x59d   :  { %1877 = vmatpush.msrb.mxu3 %v5514_v12  ;;  %1838 = vmatpush.msrb.mxu1 %v5520_v39  ;;  %v8517_v12 = vld [vmem:[#allocation31_spill] sm:$0xff]  ;;  %v8519_v39 = vld [vmem:[#allocation33_spill] sm:$0xff] }
 0x59e   :  { %1858 = vmatpush.msrb.mxu2 %v5523_v41  ;;  %1819 = vmatpush.msrb.mxu0 %v5529_v29  ;;  %v8520_v41 = vld [vmem:[#allocation34_spill] sm:$0xff]  ;;  %v8522_v29 = vld [vmem:[#allocation36_spill] sm:$0xff] }
 0x59f   :  { %1878 = vmatpush.msrb.mxu3 %v5526_v36  ;;  %1839 = vmatpush.msrb.mxu1 %v5532_v50  ;;  %v8521_v36 = vld [vmem:[#allocation35_spill] sm:$0xff]  ;;  %v8523_v50 = vld [vmem:[#allocation37_spill] sm:$0xff] }
 0x5a0   :  { %1859 = vmatpush.msrb.mxu2 %v5535_v48  ;;  %1820 = vmatpush.msrb.mxu0 %v8494_v42  ;;  %v8524_v48 = vld [vmem:[#allocation38_spill] sm:$0xff]  ;;  %v1598_v42 = vpop.permute.xlu2 %1597 }
 0x5a1   :  { %1879 = vmatpush.msrb.mxu3 %v5538_v49  ;;  %1840 = vmatpush.msrb.mxu1 %v8495_v10  ;;  %v8525_v49 = vld [vmem:[#allocation39_spill] sm:$0xff] }
 0x5a2   :  { %1860 = vmatpush.msrb.mxu2 %v8496_v31  ;;  %1821 = vmatpush.msrb.mxu0 %v8498_v26 }
 0x5a3   :  { %1880 = vmatpush.msrb.mxu3 %v8497_v25  ;;  %1841 = vmatpush.msrb.mxu1 %v8499_v52  ;;  %v8526_v25 = vld [vmem:[#allocation143_spill] sm:$0xff]  ;;  %v8527_v52 = vld [vmem:[#allocation148_spill] sm:$0xff] }
 0x5a4   :  { %1861 = vmatpush.msrb.mxu2 %v8500_v43  ;;  %1822 = vmatpush.msrb.mxu0 %v8502_v33  ;;  %v1600_v26 = vmul.f32 %v1598_v42, %v8526_v25  ;;  %v1601_v43 = vmul.f32 %v1598_v42, %v8527_v52 }
 0x5a5   :  { %1881 = vmatpush.msrb.mxu3 %v8501_v38  ;;  %1842 = vmatpush.msrb.mxu1 %v8503_v44  ;;  %v8528_v38 = vld [vmem:[#allocation155_spill] sm:$0xff] }
 0x5a6   :  { %1862 = vmatpush.msrb.mxu2 %v8504_v37  ;;  %1823 = vmatpush.msrb.mxu0 %v8506_v23  ;;  %v1604_v33 = vadd.f32 %v1600_v26, %v8528_v38  ;;  %v8529_v44 = vld [vmem:[#allocation159_spill] sm:$0xff] }
 0x5a7   :  { %1882 = vmatpush.msrb.mxu3 %v8505_v27  ;;  %1843 = vmatpush.msrb.mxu1 %v8507_v34  ;;  %v1605_v37 = vadd.f32 %v1601_v43, %v8529_v44 }
 0x5a8   :  { %1863 = vmatpush.msrb.mxu2 %v8508_v24  ;;  %1824 = vmatpush.msrb.mxu0 %v8510_v32 }
 0x5a9   :  { %1883 = vmatpush.msrb.mxu3 %v8509_v40  ;;  %1844 = vmatpush.msrb.mxu1 %v8511_v7  ;;  %v1602_v7 = vmul.f32 %v1598_v42, %v4332_v45 }
 0x5aa   :  { %1864 = vmatpush.msrb.mxu2 %v8512_v2  ;;  %1825 = vmatpush.msrb.mxu0 %v8514_v6  ;;  %v1603_v2 = vmul.f32 %v1598_v42, %v4342_v55 }
 0x5ab   :  { %1884 = vmatpush.msrb.mxu3 %v8513_v4  ;;  %1845 = vmatpush.msrb.mxu1 %v8515_v57  ;;  %v8530_v57 = vld [vmem:[#allocation166_spill] sm:$0xff] }
 0x5ac   :  { %1865 = vmatpush.msrb.mxu2 %v8516_v8  ;;  %1826 = vmatpush.msrb.mxu0 %v8518_v17  ;;  %v1606_v8 = vadd.f32 %v1602_v7, %v8530_v57 }
 0x5ad   :  { %1885 = vmatpush.msrb.mxu3 %v8517_v12  ;;  %1846 = vmatpush.msrb.mxu1 %v8519_v39  ;;  %v1607_v12 = vadd.f32 %v1603_v2, %v4355_v46 }
 0x5ae   :  { %1866 = vmatpush.msrb.mxu2 %v8520_v41  ;;  %1827 = vmatpush.msrb.mxu0 %v8522_v29 }
 0x5af   :  { %1886 = vmatpush.msrb.mxu3 %v8521_v36  ;;  %1847 = vmatpush.msrb.mxu1 %v8523_v50 }
 0x5b0   :  { %1867 = vmatpush.msrb.mxu2 %v8524_v48 }
 0x5b1   :  { %1887 = vmatpush.msrb.mxu3 %v8525_v49 }
 0x5db   :  { %v6133_v10 = vpop.f32.mrf.mxu0  ;;  %v6135_v31 = vpop.f32.mrf.mxu1 }
 0x5e2   :  { %v6141_v27 = vpop.f32.mrf.mxu2  ;;  %v6143_v23 = vpop.f32.mrf.mxu3 }
 0x5e3   :  { %v1625_v34 = vpop.f32.mrf.mxu0  ;;  %v1645_v24 = vpop.f32.mrf.mxu1 }
 0x5e4   :  { %v1688_v40 = vadd.f32 %v1625_v34, %v1604_v33  ;;  %v1689_v32 = vadd.f32 %v1645_v24, %v1605_v37 }
 0x5e6   :  { %v1692_v4 = vmul.f32 0.5, %v1688_v40  ;;  %v1696_v6 = vmul.f32 0.5, %v1689_v32 }
 0x5e8   :  { %2871 = vtanh.f32 %v1692_v4 }
 0x5e9   :  { %2873 = vtanh.f32 %v1696_v6  ;;  %v8532_v6 = vld [vmem:[#allocation41_spill] sm:$0xff] }
 0x5ea   :  { %v1665_v17 = vpop.f32.mrf.mxu2  ;;  %v1685_v39 = vpop.f32.mrf.mxu3 }
 0x5eb   :  { %v1690_v41 = vadd.f32 %v1665_v17, %v1606_v8  ;;  %v1691_v36 = vadd.f32 %v1685_v39, %v1607_v12  ;;  %v8533_v8 = vld [vmem:[#allocation42_spill] sm:$0xff]  ;;  %v8534_v12 = vld [vmem:[#allocation43_spill] sm:$0xff]  ;;  %v8535_v17 = vld [vmem:[#allocation44_spill] sm:$0xff] }
 0x5ec   :  { %v8542_v39 = vld [vmem:[#allocation51_spill] sm:$0xff] }
 0x5ed   :  { %2875 = vtanh.f32 %v1690_v41  ;;  %v1701_v29 = vmul.f32 0.5, %v1691_v36  ;;  %v8543_v41 = vld [vmem:[#allocation52_spill] sm:$0xff]  ;;  %v8544_v36 = vld [vmem:[#allocation53_spill] sm:$0xff] }
 0x5ee   :  { %v2872_v50 = vpop.eup %2871 }
 0x5ef   :  { %v2874_v48 = vpop.eup %2873  ;;  %v1694_v49 = vmul.f32 0.5, %v2872_v50  ;;  %2877 = vtanh.f32 %v1701_v29  ;;  %v8545_v29 = vld [vmem:[#allocation54_spill] sm:$0xff]  ;;  %v8546_v50 = vld [vmem:[#allocation55_spill] sm:$0xff] }
 0x5f0   :  { %v1698_v26 = vmul.f32 0.5, %v2874_v48  ;;  %v8547_v48 = vld [vmem:[#allocation56_spill] sm:$0xff] }
 0x5f1   :  { %v1695_v42 = vadd.f32 0.5, %v1694_v49  ;;  %v8548_v49 = vld [vmem:[#allocation57_spill] sm:$0xff] }
 0x5f2   :  { %v1699_v43 = vadd.f32 0.5, %v1698_v26  ;;  %v8549_v26 = vld [vmem:[#allocation58_spill] sm:$0xff] }
 0x5f3   :  { %v2876_v33 = vpop.eup %2875 }
 0x5f4   :  { %v1705_v37 = vmul.f32 %v1699_v43, %v5654_v11  ;;  %v1706_v34 = vmul.f32 %v2876_v33, %v1695_v42  ;;  %v8531_v11 = vld [vmem:[#allocation40_spill] sm:$0xff]  ;;  %v8550_v42 = vld [vmem:[#allocation59_spill] sm:$0xff]  ;;  %v8552_v33 = vld [vmem:[#allocation61_spill] sm:$0xff] }
 0x5f5   :  { %v2878_v24 = vpop.eup %2877  ;;  %v8551_v43 = vld [vmem:[#allocation60_spill] sm:$0xff] }
 0x5f6   :  { %v6150_v40 = vadd.f32 %v1706_v34, %v1705_v37  ;;  %v1703_v32 = vmul.f32 0.5, %v2878_v24  ;;  %v8553_v37 = vld [vmem:[#allocation62_spill] sm:$0xff]  ;;  %v8554_v34 = vld [vmem:[#allocation63_spill] sm:$0xff]  ;;  %v8555_v24 = vld [vmem:[#allocation64_spill] sm:$0xff] }
 0x5f8   :  { %2879 = vtanh.f32 %v6150_v40  ;;  %v1704_v7 = vadd.f32 0.5, %v1703_v32  ;;  %v8556_v32 = vld [vmem:[#allocation65_spill] sm:$0xff] }
 0x5fe   :  { %v2880_v2 = vpop.eup %2879 }
 0x5ff   :  { %v6153_v4 = vmul.f32 %v2880_v2, %v1704_v7  ;;  %v8557_v7 = vld [vmem:[#allocation66_spill] sm:$0xff]  ;;  %v8558_v2 = vld [vmem:[#allocation67_spill] sm:$0xff] }
 0x601   :  { %1726 = vmatmul.f32.vlgmr.msra.gmra.mxu0 %v6153_v4  ;;  %1746 = vmatmul.f32.vlgmr.msra.gmra.mxu1 %v6153_v4 }
 0x602   :  { %1766 = vmatmul.f32.vlgmr.msra.gmra.mxu2 %v6153_v4  ;;  %1786 = vmatmul.f32.vlgmr.msra.gmra.mxu3 %v6153_v4 }
 0x603   :  { %1907 = vmatpush.msra.mxu0 %v5663_v63  ;;  %1927 = vmatpush.msra.mxu1 %v5666_v30  ;;  %v8536_v63 = vld [vmem:[#allocation45_spill] sm:$0xff]  ;;  %v8537_v30 = vld [vmem:[#allocation46_spill] sm:$0xff] }
 0x604   :  { %1947 = vmatpush.msra.mxu2 %v5669_v15  ;;  %1967 = vmatpush.msra.mxu3 %v5672_v22  ;;  %v8538_v15 = vld [vmem:[#allocation47_spill] sm:$0xff]  ;;  %v8539_v22 = vld [vmem:[#allocation48_spill] sm:$0xff] }
 0x605   :  { %1908 = vmatpush.msra.mxu0 %v5675_v0  ;;  %1928 = vmatpush.msra.mxu1 %v5678_v20  ;;  %v8540_v0 = vld [vmem:[#allocation49_spill] sm:$0xff]  ;;  %v8541_v20 = vld [vmem:[#allocation50_spill] sm:$0xff] }
 0x606   :  { %1948 = vmatpush.msra.mxu2 %v8531_v11  ;;  %1968 = vmatpush.msra.mxu3 %v8532_v6  ;;  %v8559_v11 = vld [vmem:[#allocation68_spill] sm:$0xff]  ;;  %v8560_v6 = vld [vmem:[#allocation69_spill] sm:$0xff] }
 0x607   :  { %1909 = vmatpush.msra.mxu0 %v8533_v8  ;;  %1929 = vmatpush.msra.mxu1 %v8534_v12  ;;  %v8561_v8 = vld [vmem:[#allocation70_spill] sm:$0xff]  ;;  %v8562_v12 = vld [vmem:[#allocation71_spill] sm:$0xff] }
 0x608   :  { %1949 = vmatpush.msra.mxu2 %v8535_v17  ;;  %1969 = vmatpush.msra.mxu3 %v8536_v63  ;;  %v8563_v17 = vld [vmem:[#allocation72_spill] sm:$0xff]  ;;  %v8564_v63 = vld [vmem:[#allocation73_spill] sm:$0xff] }
 0x609   :  { %1910 = vmatpush.msra.mxu0 %v8537_v30  ;;  %1930 = vmatpush.msra.mxu1 %v8538_v15  ;;  %v8565_v30 = vld [vmem:[#allocation74_spill] sm:$0xff]  ;;  %v8566_v15 = vld [vmem:[#allocation75_spill] sm:$0xff] }
 0x60a   :  { %1950 = vmatpush.msra.mxu2 %v8539_v22  ;;  %1970 = vmatpush.msra.mxu3 %v8540_v0  ;;  %v8567_v22 = vld [vmem:[#allocation76_spill] sm:$0xff]  ;;  %v8568_v0 = vld [vmem:[#allocation77_spill] sm:$0xff] }
 0x60b   :  { %1911 = vmatpush.msra.mxu0 %v8541_v20  ;;  %1931 = vmatpush.msra.mxu1 %v8542_v39  ;;  %v8569_v20 = vld [vmem:[#allocation78_spill] sm:$0xff]  ;;  %v8570_v39 = vld [vmem:[#allocation79_spill] sm:$0xff] }
 0x60c   :  { %1951 = vmatpush.msra.mxu2 %v8543_v41  ;;  %1971 = vmatpush.msra.mxu3 %v8544_v36  ;;  %v8571_v41 = vld [vmem:[#allocation80_spill] sm:$0xff]  ;;  %v8572_v36 = vld [vmem:[#allocation81_spill] sm:$0xff] }
 0x60d   :  { %1912 = vmatpush.msra.mxu0 %v8545_v29  ;;  %1932 = vmatpush.msra.mxu1 %v8546_v50  ;;  %v8573_v29 = vld [vmem:[#allocation82_spill] sm:$0xff]  ;;  %v8574_v50 = vld [vmem:[#allocation83_spill] sm:$0xff] }
 0x60e   :  { %1952 = vmatpush.msra.mxu2 %v8547_v48  ;;  %1972 = vmatpush.msra.mxu3 %v8548_v49  ;;  %v8575_v48 = vld [vmem:[#allocation84_spill] sm:$0xff]  ;;  %v8576_v49 = vld [vmem:[#allocation85_spill] sm:$0xff] }
 0x60f   :  { %1913 = vmatpush.msra.mxu0 %v8549_v26  ;;  %1933 = vmatpush.msra.mxu1 %v8550_v42  ;;  %v8577_v26 = vld [vmem:[#allocation86_spill] sm:$0xff]  ;;  %v8578_v42 = vld [vmem:[#allocation87_spill] sm:$0xff] }
 0x610   :  { %1953 = vmatpush.msra.mxu2 %v8551_v43  ;;  %1973 = vmatpush.msra.mxu3 %v8552_v33  ;;  %v8579_v43 = vld [vmem:[#allocation88_spill] sm:$0xff]  ;;  %v8580_v33 = vld [vmem:[#allocation89_spill] sm:$0xff] }
 0x611   :  { %1914 = vmatpush.msra.mxu0 %v8553_v37  ;;  %1934 = vmatpush.msra.mxu1 %v8554_v34  ;;  %v8581_v37 = vld [vmem:[#allocation90_spill] sm:$0xff]  ;;  %v8582_v34 = vld [vmem:[#allocation91_spill] sm:$0xff] }
 0x612   :  { %1954 = vmatpush.msra.mxu2 %v8555_v24  ;;  %1974 = vmatpush.msra.mxu3 %v8556_v32  ;;  %v8583_v24 = vld [vmem:[#allocation92_spill] sm:$0xff]  ;;  %v8584_v32 = vld [vmem:[#allocation93_spill] sm:$0xff] }
 0x613   :  { %1915 = vmatpush.msra.mxu0 %v8557_v7  ;;  %1935 = vmatpush.msra.mxu1 %v8558_v2  ;;  %v8585_v7 = vld [vmem:[#allocation94_spill] sm:$0xff]  ;;  %v8586_v2 = vld [vmem:[#allocation95_spill] sm:$0xff] }
 0x614   :  { %1955 = vmatpush.msra.mxu2 %v8559_v11  ;;  %1975 = vmatpush.msra.mxu3 %v8560_v6  ;;  %v8587_v11 = vld [vmem:[#allocation96_spill] sm:$0xff]  ;;  %v8588_v6 = vld [vmem:[#allocation97_spill] sm:$0xff] }
 0x615   :  { %1916 = vmatpush.msra.mxu0 %v8561_v8  ;;  %1936 = vmatpush.msra.mxu1 %v8562_v12  ;;  %v1531_v8 = vadd.f32 %v6133_v10, %v8309_v3  ;;  %v8589_v12 = vld [vmem:[#allocation16_spill] sm:$0xff] }
 0x616   :  { %1956 = vmatpush.msra.mxu2 %v8563_v17  ;;  %1976 = vmatpush.msra.mxu3 %v8564_v63  ;;  %v1551_v17 = vadd.f32 %v6135_v31, %v8589_v12 }
 0x617   :  { %1917 = vmatpush.msra.mxu0 %v8565_v30  ;;  %1937 = vmatpush.msra.mxu1 %v8566_v15 }
 0x618   :  { %1957 = vmatpush.msra.mxu2 %v8567_v22  ;;  %1977 = vmatpush.msra.mxu3 %v8568_v0 }
 0x619   :  { %1918 = vmatpush.msra.mxu0 %v8569_v20  ;;  %1938 = vmatpush.msra.mxu1 %v8570_v39  ;;  %v1571_v39 = vadd.f32 %v6141_v27, %v4505_v9 }
 0x61a   :  { %1958 = vmatpush.msra.mxu2 %v8571_v41  ;;  %1978 = vmatpush.msra.mxu3 %v8572_v36  ;;  %v1591_v41 = vadd.f32 %v6143_v23, %v8311_v35 }
 0x61b   :  { %1919 = vmatpush.msra.mxu0 %v8573_v29  ;;  %1939 = vmatpush.msra.mxu1 %v8574_v50 }
 0x61c   :  { %1959 = vmatpush.msra.mxu2 %v8575_v48  ;;  %1979 = vmatpush.msra.mxu3 %v8576_v49 }
 0x61d   :  { %1920 = vmatpush.msra.mxu0 %v8577_v26  ;;  %1940 = vmatpush.msra.mxu1 %v8578_v42 }
 0x61e   :  { %1960 = vmatpush.msra.mxu2 %v8579_v43  ;;  %1980 = vmatpush.msra.mxu3 %v8580_v33 }
 0x61f   :  { %1921 = vmatpush.msra.mxu0 %v8581_v37  ;;  %1941 = vmatpush.msra.mxu1 %v8582_v34 }
 0x620   :  { %1961 = vmatpush.msra.mxu2 %v8583_v24  ;;  %1981 = vmatpush.msra.mxu3 %v8584_v32 }
 0x621   :  { %1922 = vmatpush.msra.mxu0 %v8585_v7  ;;  %1942 = vmatpush.msra.mxu1 %v8586_v2 }
 0x622   :  { %1962 = vmatpush.msra.mxu2 %v8587_v11  ;;  %1982 = vmatpush.msra.mxu3 %v8588_v6  ;;  %v8604_v6 = vld [vmem:[#allocation109_spill] sm:$0xff] }
 0x67e   :  { %v1727_v63 = vpop.f32.mrf.mxu0  ;;  %v1747_v30 = vpop.f32.mrf.mxu1 }
 0x67f   :  { %v1790_v15 = vadd.f32 %v1727_v63, %v1531_v8  ;;  %v1791_v22 = vadd.f32 %v1747_v30, %v1551_v17  ;;  %v8605_v8 = vld [vmem:[#allocation110_spill] sm:$0xff]  ;;  %v8606_v17 = vld [vmem:[#allocation111_spill] sm:$0xff]  ;;  %v8607_v63 = vld [vmem:[#allocation112_spill] sm:$0xff] }
 0x680   :  { %v8608_v30 = vld [vmem:[#allocation113_spill] sm:$0xff] }
 0x681   :  { %v1794_v0 = vmul.f32 0.5, %v1790_v15  ;;  %v1798_v20 = vmul.f32 0.5, %v1791_v22  ;;  %v8609_v15 = vld [vmem:[#allocation114_spill] sm:$0xff]  ;;  %v8610_v22 = vld [vmem:[#allocation115_spill] sm:$0xff] }
 0x683   :  { %2881 = vtanh.f32 %v1794_v0  ;;  %v8611_v0 = vld [vmem:[#allocation116_spill] sm:$0xff] }
 0x684   :  { %2883 = vtanh.f32 %v1798_v20  ;;  %v8612_v20 = vld [vmem:[#allocation117_spill] sm:$0xff] }
 0x685   :  { %v1767_v36 = vpop.f32.mrf.mxu2  ;;  %v1787_v29 = vpop.f32.mrf.mxu3 }
 0x686   :  { %v1792_v10 = vadd.f32 %v1767_v36, %v1571_v39  ;;  %v1793_v50 = vadd.f32 %v1787_v29, %v1591_v41  ;;  %v8613_v39 = vld [vmem:[#allocation118_spill] sm:$0xff]  ;;  %v8614_v41 = vld [vmem:[#allocation119_spill] sm:$0xff]  ;;  %v8615_v36 = vld [vmem:[#allocation120_spill] sm:$0xff] }
 0x687   :  { %v8616_v29 = vld [vmem:[#allocation121_spill] sm:$0xff] }
 0x688   :  { %2885 = vtanh.f32 %v1792_v10  ;;  %v1803_v31 = vmul.f32 0.5, %v1793_v50  ;;  %v8617_v10 = vld [vmem:[#allocation122_spill] sm:$0xff]  ;;  %v8618_v50 = vld [vmem:[#allocation123_spill] sm:$0xff] }
 0x689   :  { %v2882_v48 = vpop.eup %2881 }
 0x68a   :  { %v2884_v49 = vpop.eup %2883  ;;  %v1796_v26 = vmul.f32 0.5, %v2882_v48  ;;  %2887 = vtanh.f32 %v1803_v31  ;;  %v8619_v31 = vld [vmem:[#allocation124_spill] sm:$0xff]  ;;  %v8620_v48 = vld [vmem:[#allocation125_spill] sm:$0xff] }
 0x68b   :  { %v1800_v42 = vmul.f32 0.5, %v2884_v49  ;;  %v8621_v49 = vld [vmem:[#allocation126_spill] sm:$0xff] }
 0x68c   :  { %v1797_v43 = vadd.f32 0.5, %v1796_v26  ;;  %v8622_v26 = vld [vmem:[#allocation127_spill] sm:$0xff] }
 0x68d   :  { %v1801_v33 = vadd.f32 0.5, %v1800_v42  ;;  %v8623_v42 = vld [vmem:[#allocation128_spill] sm:$0xff] }
 0x68e   :  { %v2886_v37 = vpop.eup %2885 }
 0x68f   :  { %v1807_v27 = vmul.f32 %v1801_v33, %v5870_v21  ;;  %v1808_v34 = vmul.f32 %v2886_v37, %v1797_v43  ;;  %v8590_v21 = vld [vmem:[#allocation98_spill] sm:$0xff]  ;;  %v8624_v43 = vld [vmem:[#allocation129_spill] sm:$0xff]  ;;  %v8626_v37 = vld [vmem:[#allocation131_spill] sm:$0xff] }
 0x690   :  { %v2888_v24 = vpop.eup %2887  ;;  %v8625_v33 = vld [vmem:[#allocation130_spill] sm:$0xff] }
 0x691   :  { %v6232_v23 = vadd.f32 %v1808_v34, %v1807_v27  ;;  %v1805_v32 = vmul.f32 0.5, %v2888_v24  ;;  %v8627_v27 = vld [vmem:[#allocation132_spill] sm:$0xff]  ;;  %v8628_v34 = vld [vmem:[#allocation133_spill] sm:$0xff]  ;;  %v8629_v24 = vld [vmem:[#allocation134_spill] sm:$0xff] }
 0x693   :  { %2889 = vtanh.f32 %v6232_v23  ;;  %v1806_v7 = vadd.f32 0.5, %v1805_v32  ;;  %v8630_v32 = vld [vmem:[#allocation135_spill] sm:$0xff] }
 0x699   :  { %v2890_v2 = vpop.eup %2889 }
 0x69a   :  { %v1811_v11 = vmul.f32 %v2890_v2, %v1806_v7  ;;  %v8631_v7 = vld [vmem:[#allocation136_spill] sm:$0xff]  ;;  %v8632_v2 = vld [vmem:[#allocation137_spill] sm:$0xff] }
 0x69c   :  { %1828 = vmatmul.f32.vlgmr.msrb.gmra.mxu0 %v1811_v11  ;;  %1848 = vmatmul.f32.vlgmr.msrb.gmra.mxu1 %v1811_v11 }
 0x69d   :  { %1868 = vmatmul.f32.vlgmr.msrb.gmra.mxu2 %v1811_v11  ;;  %1888 = vmatmul.f32.vlgmr.msrb.gmra.mxu3 %v1811_v11  ;;  %v8633_v11 = vld [vmem:[#allocation138_spill] sm:$0xff] }
 0x69e   :  { %2009 = vmatpush.msrb.mxu0 %v5873_v53  ;;  %2029 = vmatpush.msrb.mxu1 %v5876_v59  ;;  %v8591_v53 = vld [vmem:[#allocation147_spill] sm:$0xff]  ;;  %v8592_v59 = vld [vmem:[#allocation150_spill] sm:$0xff] }
 0x69f   :  { %2049 = vmatpush.msrb.mxu2 %v5879_v1  ;;  %2069 = vmatpush.msrb.mxu3 %v5882_v47  ;;  %v8593_v1 = vld [vmem:[#allocation99_spill] sm:$0xff]  ;;  %v8594_v47 = vld [vmem:[#allocation100_spill] sm:$0xff] }
 0x6a0   :  { %2010 = vmatpush.msrb.mxu0 %v5885_v18  ;;  %2030 = vmatpush.msrb.mxu1 %v5888_v51  ;;  %v8595_v18 = vld [vmem:[#allocation101_spill] sm:$0xff]  ;;  %v8596_v51 = vld [vmem:[#allocation102_spill] sm:$0xff] }
 0x6a1   :  { %2050 = vmatpush.msrb.mxu2 %v5891_v54  ;;  %2070 = vmatpush.msrb.mxu3 %v5894_v28  ;;  %v8597_v54 = vld [vmem:[#allocation103_spill] sm:$0xff]  ;;  %v8598_v28 = vld [vmem:[#allocation17_spill] sm:$0xff] }
 0x6a2   :  { %2011 = vmatpush.msrb.mxu0 %v5897_v14  ;;  %2031 = vmatpush.msrb.mxu1 %v5900_v13  ;;  %v8599_v14 = vld [vmem:[#allocation104_spill] sm:$0xff]  ;;  %v8600_v13 = vld [vmem:[#allocation105_spill] sm:$0xff] }
 0x6a3   :  { %2051 = vmatpush.msrb.mxu2 %v5903_v60  ;;  %2071 = vmatpush.msrb.mxu3 %v5906_v16  ;;  %v8601_v60 = vld [vmem:[#allocation106_spill] sm:$0xff]  ;;  %v8602_v16 = vld [vmem:[#allocation107_spill] sm:$0xff] }
 0x6a4   :  { %1923 = vmatmul.f32.vlgmr.msra.gmra.mxu0 %v6153_v4  ;;  %1943 = vmatmul.f32.vlgmr.msra.gmra.mxu1 %v6153_v4 }
 0x6a5   :  { %1963 = vmatmul.f32.vlgmr.msra.gmra.mxu2 %v6153_v4  ;;  %1983 = vmatmul.f32.vlgmr.msra.gmra.mxu3 %v6153_v4  ;;  %v8603_v4 = vld [vmem:[#allocation108_spill] sm:$0xff] }
 0x6a6   :  { %2012 = vmatpush.msrb.mxu0 %v8590_v21  ;;  %2032 = vmatpush.msrb.mxu1 %v8591_v53  ;;  %v8634_v21 = vld [vmem:[#allocation139_spill] sm:$0xff]  ;;  %v8635_v53 = vld [vmem:[#allocation140_spill] sm:$0xff] }
 0x6a7   :  { %2052 = vmatpush.msrb.mxu2 %v8592_v59  ;;  %2072 = vmatpush.msrb.mxu3 %v8593_v1  ;;  %v6303_v59 = vld [vmem:[#allocation7 + $0x1e0] sm:$0xff]  ;;  %v6306_v1 = vld [vmem:[#allocation7 + $0x1e8] sm:$0xff] }
 0x6a8   :  { %2013 = vmatpush.msrb.mxu0 %v8594_v47  ;;  %2033 = vmatpush.msrb.mxu1 %v8595_v18  ;;  %v6309_v47 = vld [vmem:[#allocation7 + $0x1f0] sm:$0xff]  ;;  %v6330_v18 = vld [vmem:[#allocation7 + $0x1a8] sm:$0xff] }
 0x6a9   :  { %2053 = vmatpush.msrb.mxu2 %v8596_v51  ;;  %2073 = vmatpush.msrb.mxu3 %v8597_v54  ;;  %v6333_v51 = vld [vmem:[#allocation7 + $0x1b0] sm:$0xff]  ;;  %v6336_v54 = vld [vmem:[#allocation7 + $0x1b8] sm:$0xff] }
 0x6aa   :  { %2014 = vmatpush.msrb.mxu0 %v8598_v28  ;;  %2034 = vmatpush.msrb.mxu1 %v8599_v14  ;;  %v6339_v28 = vld [vmem:[#allocation7 + $0x180] sm:$0xff]  ;;  %v6342_v14 = vld [vmem:[#allocation7 + $0x188] sm:$0xff] }
 0x6ab   :  { %2054 = vmatpush.msrb.mxu2 %v8600_v13  ;;  %2074 = vmatpush.msrb.mxu3 %v8601_v60  ;;  %v6345_v13 = vld [vmem:[#allocation7 + $0x190] sm:$0xff]  ;;  %v6348_v60 = vld [vmem:[#allocation7 + $0x198] sm:$0xff] }
 0x6ac   :  { %2015 = vmatpush.msrb.mxu0 %v8602_v16  ;;  %2035 = vmatpush.msrb.mxu1 %v8603_v4  ;;  %v6351_v16 = vld [vmem:[#allocation7 + $0x160] sm:$0xff]  ;;  %v6354_v4 = vld [vmem:[#allocation7 + $0x168] sm:$0xff] }
 0x6ad   :  { %2055 = vmatpush.msrb.mxu2 %v8604_v6  ;;  %2075 = vmatpush.msrb.mxu3 %v8605_v8  ;;  %v6357_v6 = vld [vmem:[#allocation7 + $0x170] sm:$0xff]  ;;  %v6360_v8 = vld [vmem:[#allocation7 + $0x178] sm:$0xff] }
 0x6ae   :  { %2016 = vmatpush.msrb.mxu0 %v8606_v17  ;;  %2036 = vmatpush.msrb.mxu1 %v8607_v63  ;;  %v6363_v17 = vld [vmem:[#allocation7 + $0x140] sm:$0xff]  ;;  %v6366_v63 = vld [vmem:[#allocation7 + $0x148] sm:$0xff] }
 0x6af   :  { %2056 = vmatpush.msrb.mxu2 %v8608_v30  ;;  %2076 = vmatpush.msrb.mxu3 %v8609_v15  ;;  %v6369_v30 = vld [vmem:[#allocation7 + $0x150] sm:$0xff]  ;;  %v6372_v15 = vld [vmem:[#allocation7 + $0x158] sm:$0xff] }
 0x6b0   :  { %2017 = vmatpush.msrb.mxu0 %v8610_v22  ;;  %2037 = vmatpush.msrb.mxu1 %v8611_v0  ;;  %v6375_v22 = vld [vmem:[#allocation7 + $0x120] sm:$0xff]  ;;  %v6378_v0 = vld [vmem:[#allocation7 + $0x128] sm:$0xff] }
 0x6b1   :  { %2057 = vmatpush.msrb.mxu2 %v8612_v20  ;;  %2077 = vmatpush.msrb.mxu3 %v8613_v39  ;;  %v6381_v20 = vld [vmem:[#allocation7 + $0x130] sm:$0xff]  ;;  %v6384_v39 = vld [vmem:[#allocation7 + $0x138] sm:$0xff] }
 0x6b2   :  { %2018 = vmatpush.msrb.mxu0 %v8614_v41  ;;  %2038 = vmatpush.msrb.mxu1 %v8615_v36  ;;  %v6387_v41 = vld [vmem:[#allocation7 + $0x100] sm:$0xff]  ;;  %v6390_v36 = vld [vmem:[#allocation7 + $0x108] sm:$0xff] }
 0x6b3   :  { %2058 = vmatpush.msrb.mxu2 %v8616_v29  ;;  %2078 = vmatpush.msrb.mxu3 %v8617_v10  ;;  %v6393_v29 = vld [vmem:[#allocation7 + $0x110] sm:$0xff]  ;;  %v6396_v10 = vld [vmem:[#allocation7 + $0x118] sm:$0xff] }
 0x6b4   :  { %2019 = vmatpush.msrb.mxu0 %v8618_v50  ;;  %2039 = vmatpush.msrb.mxu1 %v8619_v31  ;;  %v6399_v50 = vld [vmem:[#allocation7 + $0xe0] sm:$0xff]  ;;  %v6402_v31 = vld [vmem:[#allocation7 + $0xe8] sm:$0xff] }
 0x6b5   :  { %2059 = vmatpush.msrb.mxu2 %v8620_v48  ;;  %2079 = vmatpush.msrb.mxu3 %v8621_v49  ;;  %8636 = vst [vmem:[#allocation141_spill] sm:$0xff] %v6399_v50  ;;  %v6405_v48 = vld [vmem:[#allocation7 + $0xf0] sm:$0xff]  ;;  %v6408_v49 = vld [vmem:[#allocation7 + $0xf8] sm:$0xff] }
 0x6b6   :  { %2020 = vmatpush.msrb.mxu0 %v8622_v26  ;;  %2040 = vmatpush.msrb.mxu1 %v8623_v42  ;;  %8637 = vst [vmem:[#allocation142_spill] sm:$0xff] %v6402_v31  ;;  %v6411_v26 = vld [vmem:[#allocation7 + $0xc0] sm:$0xff]  ;;  %v6414_v42 = vld [vmem:[#allocation7 + $0xc8] sm:$0xff] }
 0x6b7   :  { %2060 = vmatpush.msrb.mxu2 %v8624_v43  ;;  %2080 = vmatpush.msrb.mxu3 %v8625_v33  ;;  %8638 = vst [vmem:[#allocation144_spill] sm:$0xff] %v6405_v48  ;;  %v6417_v43 = vld [vmem:[#allocation7 + $0xd0] sm:$0xff]  ;;  %v6420_v33 = vld [vmem:[#allocation7 + $0xd8] sm:$0xff] }
 0x6b8   :  { %2021 = vmatpush.msrb.mxu0 %v8626_v37  ;;  %2041 = vmatpush.msrb.mxu1 %v8627_v27  ;;  %8639 = vst [vmem:[#allocation145_spill] sm:$0xff] %v6408_v49  ;;  %v6423_v37 = vld [vmem:[#allocation7 + $0xa0] sm:$0xff]  ;;  %v6426_v27 = vld [vmem:[#allocation7 + $0xa8] sm:$0xff] }
 0x6b9   :  { %2061 = vmatpush.msrb.mxu2 %v8628_v34  ;;  %2081 = vmatpush.msrb.mxu3 %v8629_v24  ;;  %8640 = vst [vmem:[#allocation146_spill] sm:$0xff] %v6411_v26  ;;  %v6429_v34 = vld [vmem:[#allocation7 + $0xb0] sm:$0xff]  ;;  %v6432_v24 = vld [vmem:[#allocation7 + $0xb8] sm:$0xff] }
 0x6ba   :  { %2022 = vmatpush.msrb.mxu0 %v8630_v32  ;;  %2042 = vmatpush.msrb.mxu1 %v8631_v7  ;;  %8641 = vst [vmem:[#allocation149_spill] sm:$0xff] %v6414_v42  ;;  %v6435_v32 = vld [vmem:[#allocation7 + $0x80] sm:$0xff]  ;;  %v6438_v7 = vld [vmem:[#allocation7 + $0x88] sm:$0xff] }
 0x6bb   :  { %2062 = vmatpush.msrb.mxu2 %v8632_v2  ;;  %2082 = vmatpush.msrb.mxu3 %v8633_v11  ;;  %8642 = vst [vmem:[#allocation151_spill] sm:$0xff] %v6417_v43  ;;  %v6441_v2 = vld [vmem:[#allocation7 + $0x90] sm:$0xff]  ;;  %v6444_v11 = vld [vmem:[#allocation7 + $0x98] sm:$0xff] }
 0x6bc   :  { %2023 = vmatpush.msrb.mxu0 %v8634_v21  ;;  %2043 = vmatpush.msrb.mxu1 %v8635_v53  ;;  %8643 = vst [vmem:[#allocation152_spill] sm:$0xff] %v6420_v33  ;;  %v6447_v21 = vld [vmem:[#allocation7 + $0x60] sm:$0xff]  ;;  %v6450_v53 = vld [vmem:[#allocation7 + $0x68] sm:$0xff] }
 0x6bd   :  { %2063 = vmatpush.msrb.mxu2 %v6051_v56  ;;  %2083 = vmatpush.msrb.mxu3 %v6054_v62  ;;  %v6312_v56 = vld [vmem:[#allocation7 + $0x1f8] sm:$0xff]  ;;  %v6327_v62 = vld [vmem:[#allocation7 + $0x1a0] sm:$0xff]  ;;  %8644 = vst [vmem:[#allocation153_spill] sm:$0xff] %v6423_v37 }
 0x6be   :  { %2024 = vmatpush.msrb.mxu0 %v6057_v19  ;;  %2044 = vmatpush.msrb.mxu1 %v6060_v5  ;;  %v6315_v19 = vld [vmem:[#allocation7 + $0x1c0] sm:$0xff]  ;;  %v6318_v5 = vld [vmem:[#allocation7 + $0x1c8] sm:$0xff]  ;;  %8645 = vst [vmem:[#allocation154_spill] sm:$0xff] %v6426_v27 }
 0x6bf   :  { %2064 = vmatpush.msrb.mxu2 %v6063_v58  ;;  %2084 = vmatpush.msrb.mxu3 %v6066_v61  ;;  %v6321_v58 = vld [vmem:[#allocation7 + $0x1d0] sm:$0xff]  ;;  %v6324_v61 = vld [vmem:[#allocation7 + $0x1d8] sm:$0xff]  ;;  %8646 = vst [vmem:[#allocation156_spill] sm:$0xff] %v6429_v34 }
 0x6c0   :  { %2111 = vmatpush.msra.mxu0 %v6303_v59  ;;  %2131 = vmatpush.msra.mxu1 %v6306_v1  ;;  %8647 = vst [vmem:[#allocation157_spill] sm:$0xff] %v6432_v24 }
 0x6c1   :  { %2151 = vmatpush.msra.mxu2 %v6309_v47  ;;  %2171 = vmatpush.msra.mxu3 %v6312_v56  ;;  %8648 = vst [vmem:[#allocation158_spill] sm:$0xff] %v6435_v32 }
 0x6c2   :  { %2112 = vmatpush.msra.mxu0 %v6315_v19  ;;  %2132 = vmatpush.msra.mxu1 %v6318_v5  ;;  %8649 = vst [vmem:[#allocation160_spill] sm:$0xff] %v6438_v7 }
 0x6c3   :  { %2152 = vmatpush.msra.mxu2 %v6321_v58  ;;  %2172 = vmatpush.msra.mxu3 %v6324_v61  ;;  %8650 = vst [vmem:[#allocation161_spill] sm:$0xff] %v6441_v2 }
 0x6c4   :  { %2113 = vmatpush.msra.mxu0 %v6327_v62  ;;  %2133 = vmatpush.msra.mxu1 %v6330_v18  ;;  %8651 = vst [vmem:[#allocation162_spill] sm:$0xff] %v6444_v11 }
 0x6c5   :  { %2153 = vmatpush.msra.mxu2 %v6333_v51  ;;  %2173 = vmatpush.msra.mxu3 %v6336_v54  ;;  %8652 = vst [vmem:[#allocation163_spill] sm:$0xff] %v6447_v21 }
 0x6c6   :  { %2114 = vmatpush.msra.mxu0 %v6339_v28  ;;  %2134 = vmatpush.msra.mxu1 %v6342_v14  ;;  %8653 = vst [vmem:[#allocation164_spill] sm:$0xff] %v6450_v53 }
 0x6c7   :  { %2154 = vmatpush.msra.mxu2 %v6345_v13  ;;  %2174 = vmatpush.msra.mxu3 %v6348_v60 }
 0x6c8   :  { %2115 = vmatpush.msra.mxu0 %v6351_v16  ;;  %2135 = vmatpush.msra.mxu1 %v6354_v4 }
 0x6c9   :  { %2155 = vmatpush.msra.mxu2 %v6357_v6  ;;  %2175 = vmatpush.msra.mxu3 %v6360_v8 }
 0x6ca   :  { %2116 = vmatpush.msra.mxu0 %v6363_v17  ;;  %2136 = vmatpush.msra.mxu1 %v6366_v63 }
 0x6cb   :  { %2156 = vmatpush.msra.mxu2 %v6369_v30  ;;  %2176 = vmatpush.msra.mxu3 %v6372_v15 }
 0x6cc   :  { %2117 = vmatpush.msra.mxu0 %v6375_v22  ;;  %2137 = vmatpush.msra.mxu1 %v6378_v0 }
 0x6cd   :  { %2157 = vmatpush.msra.mxu2 %v6381_v20  ;;  %2177 = vmatpush.msra.mxu3 %v6384_v39 }
 0x6ce   :  { %2118 = vmatpush.msra.mxu0 %v6387_v41  ;;  %2138 = vmatpush.msra.mxu1 %v6390_v36 }
 0x6cf   :  { %2158 = vmatpush.msra.mxu2 %v6393_v29  ;;  %2178 = vmatpush.msra.mxu3 %v6396_v10 }
 0x6d0   :  { %2119 = vmatpush.msra.mxu0 %v6399_v50  ;;  %2139 = vmatpush.msra.mxu1 %v6402_v31 }
 0x6d1   :  { %2159 = vmatpush.msra.mxu2 %v6405_v48  ;;  %2179 = vmatpush.msra.mxu3 %v6408_v49 }
 0x6d2   :  { %2120 = vmatpush.msra.mxu0 %v6411_v26  ;;  %2140 = vmatpush.msra.mxu1 %v6414_v42 }
 0x6d3   :  { %2160 = vmatpush.msra.mxu2 %v6417_v43  ;;  %2180 = vmatpush.msra.mxu3 %v6420_v33 }
 0x6d4   :  { %2121 = vmatpush.msra.mxu0 %v6423_v37  ;;  %2141 = vmatpush.msra.mxu1 %v6426_v27 }
 0x6d5   :  { %2161 = vmatpush.msra.mxu2 %v6429_v34  ;;  %2181 = vmatpush.msra.mxu3 %v6432_v24 }
 0x6d6   :  { %2122 = vmatpush.msra.mxu0 %v6435_v32  ;;  %2142 = vmatpush.msra.mxu1 %v6438_v7  ;;  %v6453_v32 = vld [vmem:[#allocation7 + $0x70] sm:$0xff]  ;;  %v6456_v7 = vld [vmem:[#allocation7 + $0x78] sm:$0xff] }
 0x6d7   :  { %2162 = vmatpush.msra.mxu2 %v6441_v2  ;;  %2182 = vmatpush.msra.mxu3 %v6444_v11  ;;  %8654 = vst [vmem:[#allocation165_spill] sm:$0xff] %v6453_v32  ;;  %v6459_v2 = vld [vmem:[#allocation7 + $0x40] sm:$0xff]  ;;  %v6462_v11 = vld [vmem:[#allocation7 + $0x48] sm:$0xff] }
 0x6d8   :  { %2123 = vmatpush.msra.mxu0 %v6447_v21  ;;  %2143 = vmatpush.msra.mxu1 %v6450_v53  ;;  %8655 = vst [vmem:[#allocation18_spill] sm:$0xff] %v6456_v7  ;;  %v6465_v21 = vld [vmem:[#allocation7 + $0x50] sm:$0xff]  ;;  %v6468_v53 = vld [vmem:[#allocation7 + $0x58] sm:$0xff] }
 0x6d9   :  { %2163 = vmatpush.msra.mxu2 %v6453_v32  ;;  %2183 = vmatpush.msra.mxu3 %v6456_v7  ;;  %8656 = vst [vmem:[#allocation19_spill] sm:$0xff] %v6459_v2  ;;  %v6471_v32 = vld [vmem:[#allocation7 + $0x20] sm:$0xff]  ;;  %v6474_v7 = vld [vmem:[#allocation7 + $0x28] sm:$0xff] }
 0x6da   :  { %2124 = vmatpush.msra.mxu0 %v6459_v2  ;;  %8657 = vst [vmem:[#allocation20_spill] sm:$0xff] %v6462_v11  ;;  %2144 = vmatpush.msra.mxu1 %v6462_v11  ;;  %v6477_v2 = vld [vmem:[#allocation7 + $0x30] sm:$0xff]  ;;  %v6480_v11 = vld [vmem:[#allocation7 + $0x38] sm:$0xff] }
 0x6db   :  { %8658 = vst [vmem:[#allocation21_spill] sm:$0xff] %v6465_v21  ;;  %2164 = vmatpush.msra.mxu2 %v6465_v21  ;;  %2184 = vmatpush.msra.mxu3 %v6468_v53  ;;  %v6483_v21 = vld [vmem:[#allocation7] sm:$0xff] }
 0x6dc   :  { %8659 = vst [vmem:[#allocation22_spill] sm:$0xff] %v6468_v53  ;;  %2125 = vmatpush.msra.mxu0 %v6471_v32  ;;  %2145 = vmatpush.msra.mxu1 %v6474_v7  ;;  %v6486_v53 = vld [vmem:[#allocation7 + $0x8] sm:$0xff] }
 0x6dd   :  { %8660 = vst [vmem:[#allocation23_spill] sm:$0xff] %v6471_v32  ;;  %2165 = vmatpush.msra.mxu2 %v6477_v2  ;;  %2185 = vmatpush.msra.mxu3 %v6480_v11  ;;  %v6489_v32 = vld [vmem:[#allocation7 + $0x10] sm:$0xff] }
 0x6de   :  { %8661 = vst [vmem:[#allocation24_spill] sm:$0xff] %v6474_v7  ;;  %2126 = vmatpush.msra.mxu0 %v6483_v21  ;;  %2146 = vmatpush.msra.mxu1 %v6486_v53  ;;  %v6492_v7 = vld [vmem:[#allocation7 + $0x18] sm:$0xff] }
 0x6df   :  { %8662 = vst [vmem:[#allocation25_spill] sm:$0xff] %v6477_v2  ;;  %2166 = vmatpush.msra.mxu2 %v6489_v32  ;;  %2186 = vmatpush.msra.mxu3 %v6492_v7  ;;  %v1897_v2 = vpop.permute.xlu2 %1896 }
 0x6e0   :  { %8663 = vst [vmem:[#allocation26_spill] sm:$0xff] %v6480_v11  ;;  %v1899_v34 = vmul.f32 %v1897_v2, %v8526_v25  ;;  %v1901_v26 = vmul.f32 %v1897_v2, %v4332_v45  ;;  %v1902_v49 = vmul.f32 %v1897_v2, %v4342_v55 }
 0x6e1   :  { %8664 = vst [vmem:[#allocation27_spill] sm:$0xff] %v6483_v21  ;;  %v1900_v21 = vmul.f32 %v1897_v2, %v8527_v52 }
 0x6e2   :  { %8665 = vst [vmem:[#allocation28_spill] sm:$0xff] %v6486_v53  ;;  %v1903_v37 = vadd.f32 %v1899_v34, %v8528_v38  ;;  %v1905_v52 = vadd.f32 %v1901_v26, %v8530_v57  ;;  %v1906_v31 = vadd.f32 %v1902_v49, %v4355_v46  ;;  %v6527_v49 = vld [vmem:[#allocation2 + $0x1f0] sm:$0xff] }
 0x6e3   :  { %8666 = vst [vmem:[#allocation29_spill] sm:$0xff] %v6489_v32  ;;  %v1904_v32 = vadd.f32 %v1900_v21, %v8529_v44 }
 0x6e4   :  { %8667 = vst [vmem:[#allocation30_spill] sm:$0xff] %v6492_v7 }
 0x719   :  { %v6495_v24 = vpop.f32.mrf.mxu0  ;;  %v6497_v11 = vpop.f32.mrf.mxu1 }
 0x720   :  { %v6501_v27 = vpop.f32.mrf.mxu2  ;;  %v6503_v53 = vpop.f32.mrf.mxu3 }
 0x721   :  { %v1924_v33 = vpop.f32.mrf.mxu0  ;;  %v1944_v43 = vpop.f32.mrf.mxu1 }
 0x722   :  { %v1987_v7 = vadd.f32 %v1924_v33, %v1903_v37  ;;  %v1988_v42 = vadd.f32 %v1944_v43, %v1904_v32 }
 0x724   :  { %v1991_v48 = vmul.f32 0.5, %v1987_v7  ;;  %v1995_v25 = vmul.f32 0.5, %v1988_v42 }
 0x726   :  { %2891 = vtanh.f32 %v1991_v48 }
 0x727   :  { %2893 = vtanh.f32 %v1995_v25 }
 0x728   :  { %v1964_v50 = vpop.f32.mrf.mxu2  ;;  %v1984_v34 = vpop.f32.mrf.mxu3 }
 0x729   :  { %v1989_v38 = vadd.f32 %v1964_v50, %v1905_v52  ;;  %v1990_v21 = vadd.f32 %v1984_v34, %v1906_v31  ;;  %v6530_v34 = vld [vmem:[#allocation2 + $0x1f8] sm:$0xff] }
 0x72b   :  { %2895 = vtanh.f32 %v1989_v38  ;;  %v2000_v44 = vmul.f32 0.5, %v1990_v21  ;;  %v6533_v21 = vld [vmem:[#allocation2 + $0x1c0] sm:$0xff] }
 0x72c   :  { %v2892_v33 = vpop.eup %2891 }
 0x72d   :  { %v2894_v43 = vpop.eup %2893  ;;  %v1993_v37 = vmul.f32 0.5, %v2892_v33  ;;  %2897 = vtanh.f32 %v2000_v44  ;;  %v6521_v44 = vld [vmem:[#allocation2 + $0x1e0] sm:$0xff]  ;;  %v6536_v33 = vld [vmem:[#allocation2 + $0x1c8] sm:$0xff] }
 0x72e   :  { %v1997_v32 = vmul.f32 0.5, %v2894_v43  ;;  %8668 = vst [vmem:[#allocation31_spill] sm:$0xff] %v6536_v33  ;;  %v6539_v43 = vld [vmem:[#allocation2 + $0x1d0] sm:$0xff] }
 0x72f   :  { %v1994_v2 = vadd.f32 0.5, %v1993_v37  ;;  %8669 = vst [vmem:[#allocation32_spill] sm:$0xff] %v6539_v43  ;;  %v6542_v37 = vld [vmem:[#allocation2 + $0x1d8] sm:$0xff] }
 0x730   :  { %v1998_v7 = vadd.f32 0.5, %v1997_v32  ;;  %8670 = vst [vmem:[#allocation33_spill] sm:$0xff] %v6542_v37  ;;  %v6545_v32 = vld [vmem:[#allocation2 + $0x1a0] sm:$0xff] }
 0x731   :  { %v2896_v42 = vpop.eup %2895  ;;  %8671 = vst [vmem:[#allocation34_spill] sm:$0xff] %v6545_v32 }
 0x732   :  { %v2004_v25 = vmul.f32 %v1998_v7, %v6150_v40  ;;  %v2005_v48 = vmul.f32 %v2896_v42, %v1994_v2  ;;  %v6524_v40 = vld [vmem:[#allocation2 + $0x1e8] sm:$0xff]  ;;  %v6551_v7 = vld [vmem:[#allocation2 + $0x1b0] sm:$0xff]  ;;  %v6554_v42 = vld [vmem:[#allocation2 + $0x1b8] sm:$0xff] }
 0x733   :  { %v2898_v26 = vpop.eup %2897  ;;  %v6548_v2 = vld [vmem:[#allocation2 + $0x1a8] sm:$0xff]  ;;  %8673 = vst [vmem:[#allocation36_spill] sm:$0xff] %v6551_v7 }
 0x734   :  { %v6512_v57 = vadd.f32 %v2005_v48, %v2004_v25  ;;  %v2002_v52 = vmul.f32 0.5, %v2898_v26  ;;  %8672 = vst [vmem:[#allocation35_spill] sm:$0xff] %v6548_v2  ;;  %v6557_v25 = vld [vmem:[#allocation2 + $0x180] sm:$0xff]  ;;  %v6560_v48 = vld [vmem:[#allocation2 + $0x188] sm:$0xff]  ;;  %v6563_v26 = vld [vmem:[#allocation2 + $0x190] sm:$0xff] }
 0x735   :  { %8674 = vst [vmem:[#allocation37_spill] sm:$0xff] %v6554_v42 }
 0x736   :  { %2899 = vtanh.f32 %v6512_v57  ;;  %v2003_v50 = vadd.f32 0.5, %v2002_v52  ;;  %8675 = vst [vmem:[#allocation38_spill] sm:$0xff] %v6557_v25  ;;  %v6566_v52 = vld [vmem:[#allocation2 + $0x198] sm:$0xff] }
 0x737   :  { %8676 = vst [vmem:[#allocation39_spill] sm:$0xff] %v6560_v48 }
 0x738   :  { %8677 = vst [vmem:[#allocation40_spill] sm:$0xff] %v6563_v26 }
 0x739   :  { %8678 = vst [vmem:[#allocation41_spill] sm:$0xff] %v6566_v52 }
 0x73c   :  { %v2900_v38 = vpop.eup %2899 }
 0x73d   :  { %v6515_v31 = vmul.f32 %v2900_v38, %v2003_v50  ;;  %v6569_v50 = vld [vmem:[#allocation2 + $0x160] sm:$0xff]  ;;  %v6572_v38 = vld [vmem:[#allocation2 + $0x168] sm:$0xff] }
 0x73e   :  { %8679 = vst [vmem:[#allocation42_spill] sm:$0xff] %v6569_v50 }
 0x73f   :  { %2025 = vmatmul.f32.vlgmr.msrb.gmra.mxu0 %v6515_v31  ;;  %2045 = vmatmul.f32.vlgmr.msrb.gmra.mxu1 %v6515_v31  ;;  %8680 = vst [vmem:[#allocation43_spill] sm:$0xff] %v6572_v38 }
 0x740   :  { %2065 = vmatmul.f32.vlgmr.msrb.gmra.mxu2 %v6515_v31  ;;  %2085 = vmatmul.f32.vlgmr.msrb.gmra.mxu3 %v6515_v31 }
 0x741   :  { %2206 = vmatpush.msrb.mxu0 %v6521_v44  ;;  %2226 = vmatpush.msrb.mxu1 %v6524_v40 }
 0x742   :  { %2246 = vmatpush.msrb.mxu2 %v6527_v49  ;;  %2266 = vmatpush.msrb.mxu3 %v6530_v34 }
 0x743   :  { %2207 = vmatpush.msrb.mxu0 %v6533_v21  ;;  %2227 = vmatpush.msrb.mxu1 %v6536_v33 }
 0x744   :  { %2247 = vmatpush.msrb.mxu2 %v6539_v43  ;;  %2267 = vmatpush.msrb.mxu3 %v6542_v37  ;;  %v1890_v37 = vadd.f32 %v6503_v53, %v8311_v35 }
 0x745   :  { %2208 = vmatpush.msrb.mxu0 %v6545_v32  ;;  %2228 = vmatpush.msrb.mxu1 %v6548_v2 }
 0x746   :  { %2248 = vmatpush.msrb.mxu2 %v6551_v7  ;;  %2268 = vmatpush.msrb.mxu3 %v6554_v42 }
 0x747   :  { %2209 = vmatpush.msrb.mxu0 %v6557_v25  ;;  %2229 = vmatpush.msrb.mxu1 %v6560_v48  ;;  %v6575_v25 = vld [vmem:[#allocation2 + $0x170] sm:$0xff]  ;;  %v6578_v48 = vld [vmem:[#allocation2 + $0x178] sm:$0xff] }
 0x748   :  { %2249 = vmatpush.msrb.mxu2 %v6563_v26  ;;  %2269 = vmatpush.msrb.mxu3 %v6566_v52  ;;  %8681 = vst [vmem:[#allocation44_spill] sm:$0xff] %v6575_v25  ;;  %v6581_v26 = vld [vmem:[#allocation2 + $0x140] sm:$0xff]  ;;  %v6584_v52 = vld [vmem:[#allocation2 + $0x148] sm:$0xff] }
 0x749   :  { %2210 = vmatpush.msrb.mxu0 %v6569_v50  ;;  %2230 = vmatpush.msrb.mxu1 %v6572_v38  ;;  %8682 = vst [vmem:[#allocation45_spill] sm:$0xff] %v6578_v48  ;;  %v6587_v50 = vld [vmem:[#allocation2 + $0x150] sm:$0xff]  ;;  %v6590_v38 = vld [vmem:[#allocation2 + $0x158] sm:$0xff] }
 0x74a   :  { %2250 = vmatpush.msrb.mxu2 %v6575_v25  ;;  %2270 = vmatpush.msrb.mxu3 %v6578_v48  ;;  %8683 = vst [vmem:[#allocation46_spill] sm:$0xff] %v6581_v26  ;;  %v6593_v25 = vld [vmem:[#allocation2 + $0x120] sm:$0xff]  ;;  %v6596_v48 = vld [vmem:[#allocation2 + $0x128] sm:$0xff] }
 0x74b   :  { %2211 = vmatpush.msrb.mxu0 %v6581_v26  ;;  %8684 = vst [vmem:[#allocation47_spill] sm:$0xff] %v6584_v52  ;;  %2231 = vmatpush.msrb.mxu1 %v6584_v52  ;;  %v6599_v26 = vld [vmem:[#allocation2 + $0x130] sm:$0xff]  ;;  %v6602_v52 = vld [vmem:[#allocation2 + $0x138] sm:$0xff] }
 0x74c   :  { %8685 = vst [vmem:[#allocation48_spill] sm:$0xff] %v6587_v50  ;;  %2251 = vmatpush.msrb.mxu2 %v6587_v50  ;;  %2271 = vmatpush.msrb.mxu3 %v6590_v38  ;;  %v6605_v50 = vld [vmem:[#allocation2 + $0x100] sm:$0xff] }
 0x74d   :  { %8686 = vst [vmem:[#allocation49_spill] sm:$0xff] %v6590_v38  ;;  %2212 = vmatpush.msrb.mxu0 %v6593_v25  ;;  %2232 = vmatpush.msrb.mxu1 %v6596_v48  ;;  %v6608_v38 = vld [vmem:[#allocation2 + $0x108] sm:$0xff] }
 0x74e   :  { %8687 = vst [vmem:[#allocation50_spill] sm:$0xff] %v6593_v25  ;;  %2252 = vmatpush.msrb.mxu2 %v6599_v26  ;;  %2272 = vmatpush.msrb.mxu3 %v6602_v52  ;;  %v6611_v25 = vld [vmem:[#allocation2 + $0x110] sm:$0xff] }
 0x74f   :  { %8688 = vst [vmem:[#allocation51_spill] sm:$0xff] %v6596_v48  ;;  %2213 = vmatpush.msrb.mxu0 %v6605_v50  ;;  %2233 = vmatpush.msrb.mxu1 %v6608_v38  ;;  %v6614_v48 = vld [vmem:[#allocation2 + $0x118] sm:$0xff] }
 0x750   :  { %8689 = vst [vmem:[#allocation52_spill] sm:$0xff] %v6599_v26  ;;  %2253 = vmatpush.msrb.mxu2 %v6611_v25  ;;  %2273 = vmatpush.msrb.mxu3 %v6614_v48  ;;  %v6617_v26 = vld [vmem:[#allocation2 + $0xe0] sm:$0xff] }
 0x751   :  { %8690 = vst [vmem:[#allocation53_spill] sm:$0xff] %v6602_v52  ;;  %2214 = vmatpush.msrb.mxu0 %v6617_v26  ;;  %v6620_v52 = vld [vmem:[#allocation2 + $0xe8] sm:$0xff] }
 0x752   :  { %8691 = vst [vmem:[#allocation54_spill] sm:$0xff] %v6605_v50  ;;  %2234 = vmatpush.msrb.mxu1 %v6620_v52  ;;  %v6623_v50 = vld [vmem:[#allocation2 + $0xf0] sm:$0xff] }
 0x753   :  { %8692 = vst [vmem:[#allocation55_spill] sm:$0xff] %v6608_v38  ;;  %2254 = vmatpush.msrb.mxu2 %v6623_v50  ;;  %v6626_v38 = vld [vmem:[#allocation2 + $0xf8] sm:$0xff] }
 0x754   :  { %8693 = vst [vmem:[#allocation56_spill] sm:$0xff] %v6611_v25  ;;  %2274 = vmatpush.msrb.mxu3 %v6626_v38  ;;  %v6629_v25 = vld [vmem:[#allocation2 + $0xc0] sm:$0xff] }
 0x755   :  { %8694 = vst [vmem:[#allocation57_spill] sm:$0xff] %v6614_v48  ;;  %2215 = vmatpush.msrb.mxu0 %v6629_v25  ;;  %v6632_v48 = vld [vmem:[#allocation2 + $0xc8] sm:$0xff] }
 0x756   :  { %8695 = vst [vmem:[#allocation58_spill] sm:$0xff] %v6617_v26  ;;  %2235 = vmatpush.msrb.mxu1 %v6632_v48  ;;  %v6635_v26 = vld [vmem:[#allocation2 + $0xd0] sm:$0xff] }
 0x757   :  { %8696 = vst [vmem:[#allocation59_spill] sm:$0xff] %v6620_v52  ;;  %2255 = vmatpush.msrb.mxu2 %v6635_v26  ;;  %v6638_v52 = vld [vmem:[#allocation2 + $0xd8] sm:$0xff] }
 0x758   :  { %8697 = vst [vmem:[#allocation60_spill] sm:$0xff] %v6623_v50  ;;  %2275 = vmatpush.msrb.mxu3 %v6638_v52  ;;  %v6641_v50 = vld [vmem:[#allocation2 + $0xa0] sm:$0xff] }
 0x759   :  { %8698 = vst [vmem:[#allocation61_spill] sm:$0xff] %v6626_v38  ;;  %2216 = vmatpush.msrb.mxu0 %v6641_v50  ;;  %v6644_v38 = vld [vmem:[#allocation2 + $0xa8] sm:$0xff] }
 0x75a   :  { %8699 = vst [vmem:[#allocation62_spill] sm:$0xff] %v6629_v25  ;;  %2236 = vmatpush.msrb.mxu1 %v6644_v38  ;;  %v6647_v25 = vld [vmem:[#allocation2 + $0xb0] sm:$0xff] }
 0x75b   :  { %8700 = vst [vmem:[#allocation63_spill] sm:$0xff] %v6632_v48  ;;  %2256 = vmatpush.msrb.mxu2 %v6647_v25  ;;  %v6650_v48 = vld [vmem:[#allocation2 + $0xb8] sm:$0xff] }
 0x75c   :  { %8701 = vst [vmem:[#allocation64_spill] sm:$0xff] %v6635_v26  ;;  %2276 = vmatpush.msrb.mxu3 %v6650_v48  ;;  %v6653_v26 = vld [vmem:[#allocation2 + $0x80] sm:$0xff] }
 0x75d   :  { %8702 = vst [vmem:[#allocation65_spill] sm:$0xff] %v6638_v52  ;;  %2217 = vmatpush.msrb.mxu0 %v6653_v26  ;;  %v6656_v52 = vld [vmem:[#allocation2 + $0x88] sm:$0xff] }
 0x75e   :  { %8703 = vst [vmem:[#allocation66_spill] sm:$0xff] %v6641_v50  ;;  %2237 = vmatpush.msrb.mxu1 %v6656_v52  ;;  %v6659_v50 = vld [vmem:[#allocation2 + $0x90] sm:$0xff] }
 0x75f   :  { %8704 = vst [vmem:[#allocation67_spill] sm:$0xff] %v6644_v38  ;;  %2257 = vmatpush.msrb.mxu2 %v6659_v50  ;;  %v6662_v38 = vld [vmem:[#allocation2 + $0x98] sm:$0xff] }
 0x760   :  { %8705 = vst [vmem:[#allocation68_spill] sm:$0xff] %v6647_v25  ;;  %2277 = vmatpush.msrb.mxu3 %v6662_v38  ;;  %v6665_v25 = vld [vmem:[#allocation2 + $0x60] sm:$0xff] }
 0x761   :  { %8706 = vst [vmem:[#allocation69_spill] sm:$0xff] %v6650_v48  ;;  %2218 = vmatpush.msrb.mxu0 %v6665_v25  ;;  %v6668_v48 = vld [vmem:[#allocation2 + $0x68] sm:$0xff] }
 0x762   :  { %8707 = vst [vmem:[#allocation70_spill] sm:$0xff] %v6653_v26  ;;  %2238 = vmatpush.msrb.mxu1 %v6668_v48  ;;  %v6671_v26 = vld [vmem:[#allocation2 + $0x70] sm:$0xff] }
 0x763   :  { %8708 = vst [vmem:[#allocation71_spill] sm:$0xff] %v6656_v52  ;;  %2258 = vmatpush.msrb.mxu2 %v6671_v26  ;;  %v6674_v52 = vld [vmem:[#allocation2 + $0x78] sm:$0xff] }
 0x764   :  { %8709 = vst [vmem:[#allocation72_spill] sm:$0xff] %v6659_v50  ;;  %2278 = vmatpush.msrb.mxu3 %v6674_v52  ;;  %v6677_v50 = vld [vmem:[#allocation2 + $0x40] sm:$0xff] }
 0x765   :  { %8710 = vst [vmem:[#allocation73_spill] sm:$0xff] %v6662_v38  ;;  %2219 = vmatpush.msrb.mxu0 %v6677_v50  ;;  %v6680_v38 = vld [vmem:[#allocation2 + $0x48] sm:$0xff] }
 0x766   :  { %8711 = vst [vmem:[#allocation74_spill] sm:$0xff] %v6665_v25  ;;  %2239 = vmatpush.msrb.mxu1 %v6680_v38  ;;  %v6683_v25 = vld [vmem:[#allocation2 + $0x50] sm:$0xff] }
 0x767   :  { %8712 = vst [vmem:[#allocation75_spill] sm:$0xff] %v6668_v48  ;;  %2259 = vmatpush.msrb.mxu2 %v6683_v25  ;;  %v6686_v48 = vld [vmem:[#allocation2 + $0x58] sm:$0xff] }
 0x768   :  { %8713 = vst [vmem:[#allocation76_spill] sm:$0xff] %v6671_v26  ;;  %2279 = vmatpush.msrb.mxu3 %v6686_v48  ;;  %v6689_v26 = vld [vmem:[#allocation2 + $0x20] sm:$0xff] }
 0x769   :  { %8714 = vst [vmem:[#allocation77_spill] sm:$0xff] %v6674_v52  ;;  %2220 = vmatpush.msrb.mxu0 %v6689_v26  ;;  %v6692_v52 = vld [vmem:[#allocation2 + $0x28] sm:$0xff] }
 0x76a   :  { %8715 = vst [vmem:[#allocation78_spill] sm:$0xff] %v6677_v50  ;;  %2240 = vmatpush.msrb.mxu1 %v6692_v52  ;;  %v6695_v50 = vld [vmem:[#allocation2 + $0x30] sm:$0xff] }
 0x76b   :  { %8716 = vst [vmem:[#allocation79_spill] sm:$0xff] %v6680_v38  ;;  %2260 = vmatpush.msrb.mxu2 %v6695_v50  ;;  %v6698_v38 = vld [vmem:[#allocation2 + $0x38] sm:$0xff] }
 0x76c   :  { %8717 = vst [vmem:[#allocation80_spill] sm:$0xff] %v6683_v25  ;;  %2280 = vmatpush.msrb.mxu3 %v6698_v38  ;;  %v6701_v25 = vld [vmem:[#allocation2] sm:$0xff] }
 0x76d   :  { %8718 = vst [vmem:[#allocation81_spill] sm:$0xff] %v6686_v48  ;;  %2221 = vmatpush.msrb.mxu0 %v6701_v25  ;;  %v6704_v48 = vld [vmem:[#allocation2 + $0x8] sm:$0xff] }
 0x76e   :  { %8719 = vst [vmem:[#allocation82_spill] sm:$0xff] %v6689_v26  ;;  %2241 = vmatpush.msrb.mxu1 %v6704_v48  ;;  %v6707_v26 = vld [vmem:[#allocation2 + $0x10] sm:$0xff] }
 0x76f   :  { %8720 = vst [vmem:[#allocation83_spill] sm:$0xff] %v6692_v52  ;;  %2261 = vmatpush.msrb.mxu2 %v6707_v26  ;;  %v6710_v52 = vld [vmem:[#allocation2 + $0x18] sm:$0xff] }
 0x770   :  { %8721 = vst [vmem:[#allocation84_spill] sm:$0xff] %v6695_v50  ;;  %2281 = vmatpush.msrb.mxu3 %v6710_v52  ;;  %v1830_v50 = vadd.f32 %v6495_v24, %v8309_v3 }
 0x771   :  { %8722 = vst [vmem:[#allocation85_spill] sm:$0xff] %v6698_v38  ;;  %v1850_v38 = vadd.f32 %v6497_v11, %v8589_v12 }
 0x772   :  { %8723 = vst [vmem:[#allocation86_spill] sm:$0xff] %v6701_v25 }
 0x773   :  { %8724 = vst [vmem:[#allocation87_spill] sm:$0xff] %v6704_v48 }
 0x774   :  { %8725 = vst [vmem:[#allocation88_spill] sm:$0xff] %v6707_v26  ;;  %v1870_v26 = vadd.f32 %v6501_v27, %v4505_v9 }
 0x775   :  { %8726 = vst [vmem:[#allocation89_spill] sm:$0xff] %v6710_v52 }
 0x7bc   :  { %v2026_v42 = vpop.f32.mrf.mxu0  ;;  %v2046_v25 = vpop.f32.mrf.mxu1 }
 0x7bd   :  { %v2089_v7 = vadd.f32 %v2026_v42, %v1830_v50  ;;  %v2090_v2 = vadd.f32 %v2046_v25, %v1850_v38 }
 0x7bf   :  { %v2093_v32 = vmul.f32 0.5, %v2089_v7  ;;  %v2097_v48 = vmul.f32 0.5, %v2090_v2 }
 0x7c1   :  { %2901 = vtanh.f32 %v2093_v32 }
 0x7c2   :  { %2903 = vtanh.f32 %v2097_v48 }
 0x7c3   :  { %v2066_v52 = vpop.f32.mrf.mxu2  ;;  %v2086_v43 = vpop.f32.mrf.mxu3 }
 0x7c4   :  { %v2091_v24 = vadd.f32 %v2066_v52, %v1870_v26  ;;  %v2092_v3 = vadd.f32 %v2086_v43, %v1890_v37  ;;  %v6734_v26 = vld [vmem:[#allocation5 + $0x1f8] sm:$0xff]  ;;  %v6737_v52 = vld [vmem:[#allocation5 + $0x1c0] sm:$0xff] }
 0x7c6   :  { %2905 = vtanh.f32 %v2091_v24  ;;  %v2102_v11 = vmul.f32 0.5, %v2092_v3  ;;  %v6740_v24 = vld [vmem:[#allocation5 + $0x1c8] sm:$0xff] }
 0x7c7   :  { %v2902_v12 = vpop.eup %2901 }
 0x7c8   :  { %v2904_v33 = vpop.eup %2903  ;;  %v2095_v42 = vmul.f32 0.5, %v2902_v12  ;;  %2907 = vtanh.f32 %v2102_v11  ;;  %v6725_v12 = vld [vmem:[#allocation5 + $0x1e0] sm:$0xff]  ;;  %v6743_v11 = vld [vmem:[#allocation5 + $0x1d0] sm:$0xff] }
 0x7c9   :  { %v2099_v25 = vmul.f32 0.5, %v2904_v33  ;;  %v6728_v33 = vld [vmem:[#allocation5 + $0x1e8] sm:$0xff] }
 0x7ca   :  { %v2096_v2 = vadd.f32 0.5, %v2095_v42  ;;  %v6746_v42 = vld [vmem:[#allocation5 + $0x1d8] sm:$0xff] }
 0x7cb   :  { %v2100_v32 = vadd.f32 0.5, %v2099_v25  ;;  %v6749_v25 = vld [vmem:[#allocation5 + $0x1a0] sm:$0xff] }
 0x7cc   :  { %v2906_v7 = vpop.eup %2905 }
 0x7cd   :  { %v2106_v27 = vmul.f32 %v2100_v32, %v6232_v23  ;;  %v2107_v50 = vmul.f32 %v2906_v7, %v2096_v2  ;;  %v6731_v23 = vld [vmem:[#allocation5 + $0x1f0] sm:$0xff]  ;;  %v6752_v2 = vld [vmem:[#allocation5 + $0x1a8] sm:$0xff]  ;;  %v6758_v7 = vld [vmem:[#allocation5 + $0x1b8] sm:$0xff] }
 0x7ce   :  { %v2908_v38 = vpop.eup %2907  ;;  %v6755_v32 = vld [vmem:[#allocation5 + $0x1b0] sm:$0xff] }
 0x7cf   :  { %v6722_v53 = vadd.f32 %v2107_v50, %v2106_v27  ;;  %v2104_v48 = vmul.f32 0.5, %v2908_v38  ;;  %v6765_v27 = vld [vmem:[#allocation5 + $0x180] sm:$0xff]  ;;  %v6768_v50 = vld [vmem:[#allocation5 + $0x188] sm:$0xff]  ;;  %v6771_v38 = vld [vmem:[#allocation5 + $0x190] sm:$0xff] }
 0x7d0   :  { %8727 = vst [vmem:[#allocation90_spill] sm:$0xff] %v6771_v38 }
 0x7d1   :  { %2909 = vtanh.f32 %v6722_v53  ;;  %v2105_v43 = vadd.f32 0.5, %v2104_v48  ;;  %v6774_v48 = vld [vmem:[#allocation5 + $0x198] sm:$0xff] }
 0x7d2   :  { %8728 = vst [vmem:[#allocation91_spill] sm:$0xff] %v6774_v48 }
 0x7d7   :  { %v2910_v37 = vpop.eup %2909 }
 0x7d8   :  { %v2110_v3 = vmul.f32 %v2910_v37, %v2105_v43  ;;  %v6777_v43 = vld [vmem:[#allocation5 + $0x160] sm:$0xff]  ;;  %v6783_v37 = vld [vmem:[#allocation5 + $0x170] sm:$0xff] }
 0x7d9   :  { %8729 = vst [vmem:[#allocation92_spill] sm:$0xff] %v6777_v43 }
 0x7da   :  { %2127 = vmatmul.f32.vlgmr.msra.gmra.mxu0 %v2110_v3  ;;  %2147 = vmatmul.f32.vlgmr.msra.gmra.mxu1 %v2110_v3  ;;  %8731 = vst [vmem:[#allocation94_spill] sm:$0xff] %v6783_v37 }
 0x7db   :  { %2167 = vmatmul.f32.vlgmr.msra.gmra.mxu2 %v2110_v3  ;;  %2187 = vmatmul.f32.vlgmr.msra.gmra.mxu3 %v2110_v3  ;;  %v6786_v3 = vld [vmem:[#allocation5 + $0x178] sm:$0xff] }
 0x7dc   :  { %2308 = vmatpush.msra.mxu0 %v6725_v12  ;;  %2328 = vmatpush.msra.mxu1 %v6728_v33  ;;  %8732 = vst [vmem:[#allocation95_spill] sm:$0xff] %v6786_v3 }
 0x7dd   :  { %2348 = vmatpush.msra.mxu2 %v6731_v23  ;;  %2368 = vmatpush.msra.mxu3 %v6734_v26 }
 0x7de   :  { %2309 = vmatpush.msra.mxu0 %v6737_v52  ;;  %2329 = vmatpush.msra.mxu1 %v6740_v24 }
 0x7df   :  { %2349 = vmatpush.msra.mxu2 %v6743_v11  ;;  %2369 = vmatpush.msra.mxu3 %v6746_v42 }
 0x7e0   :  { %2310 = vmatpush.msra.mxu0 %v6749_v25  ;;  %2330 = vmatpush.msra.mxu1 %v6752_v2 }
 0x7e1   :  { %2350 = vmatpush.msra.mxu2 %v6755_v32  ;;  %2370 = vmatpush.msra.mxu3 %v6758_v7 }
 0x7e2   :  { %2222 = vmatmul.f32.vlgmr.msrb.gmra.mxu0 %v6515_v31  ;;  %2242 = vmatmul.f32.vlgmr.msrb.gmra.mxu1 %v6515_v31 }
 0x7e3   :  { %2262 = vmatmul.f32.vlgmr.msrb.gmra.mxu2 %v6515_v31  ;;  %2282 = vmatmul.f32.vlgmr.msrb.gmra.mxu3 %v6515_v31  ;;  %v6780_v31 = vld [vmem:[#allocation5 + $0x168] sm:$0xff] }
 0x7e4   :  { %2311 = vmatpush.msra.mxu0 %v6765_v27  ;;  %2331 = vmatpush.msra.mxu1 %v6768_v50  ;;  %8730 = vst [vmem:[#allocation93_spill] sm:$0xff] %v6780_v31 }
 0x7e5   :  { %2351 = vmatpush.msra.mxu2 %v6771_v38  ;;  %2371 = vmatpush.msra.mxu3 %v6774_v48  ;;  %v6789_v38 = vld [vmem:[#allocation5 + $0x140] sm:$0xff]  ;;  %v6792_v48 = vld [vmem:[#allocation5 + $0x148] sm:$0xff] }
 0x7e6   :  { %2312 = vmatpush.msra.mxu0 %v6777_v43  ;;  %2332 = vmatpush.msra.mxu1 %v6780_v31  ;;  %8733 = vst [vmem:[#allocation96_spill] sm:$0xff] %v6789_v38  ;;  %v6795_v43 = vld [vmem:[#allocation5 + $0x150] sm:$0xff]  ;;  %v6798_v31 = vld [vmem:[#allocation5 + $0x158] sm:$0xff] }
 0x7e7   :  { %2352 = vmatpush.msra.mxu2 %v6783_v37  ;;  %2372 = vmatpush.msra.mxu3 %v6786_v3  ;;  %8734 = vst [vmem:[#allocation97_spill] sm:$0xff] %v6792_v48  ;;  %v6801_v37 = vld [vmem:[#allocation5 + $0x120] sm:$0xff]  ;;  %v6804_v3 = vld [vmem:[#allocation5 + $0x128] sm:$0xff] }
 0x7e8   :  { %2313 = vmatpush.msra.mxu0 %v6789_v38  ;;  %2333 = vmatpush.msra.mxu1 %v6792_v48  ;;  %8735 = vst [vmem:[#allocation98_spill] sm:$0xff] %v6795_v43  ;;  %v6807_v38 = vld [vmem:[#allocation5 + $0x130] sm:$0xff]  ;;  %v6810_v48 = vld [vmem:[#allocation5 + $0x138] sm:$0xff] }
 0x7e9   :  { %2353 = vmatpush.msra.mxu2 %v6795_v43  ;;  %8736 = vst [vmem:[#allocation147_spill] sm:$0xff] %v6798_v31  ;;  %2373 = vmatpush.msra.mxu3 %v6798_v31  ;;  %v6813_v43 = vld [vmem:[#allocation5 + $0x100] sm:$0xff]  ;;  %v6816_v31 = vld [vmem:[#allocation5 + $0x108] sm:$0xff] }
 0x7ea   :  { %8737 = vst [vmem:[#allocation150_spill] sm:$0xff] %v6801_v37  ;;  %2314 = vmatpush.msra.mxu0 %v6801_v37  ;;  %2334 = vmatpush.msra.mxu1 %v6804_v3  ;;  %v6819_v37 = vld [vmem:[#allocation5 + $0x110] sm:$0xff] }
 0x7eb   :  { %8738 = vst [vmem:[#allocation99_spill] sm:$0xff] %v6804_v3  ;;  %2354 = vmatpush.msra.mxu2 %v6807_v38  ;;  %2374 = vmatpush.msra.mxu3 %v6810_v48  ;;  %v6822_v3 = vld [vmem:[#allocation5 + $0x118] sm:$0xff] }
 0x7ec   :  { %8739 = vst [vmem:[#allocation100_spill] sm:$0xff] %v6807_v38  ;;  %2315 = vmatpush.msra.mxu0 %v6813_v43  ;;  %2335 = vmatpush.msra.mxu1 %v6816_v31  ;;  %v6825_v38 = vld [vmem:[#allocation5 + $0xe0] sm:$0xff] }
 0x7ed   :  { %8740 = vst [vmem:[#allocation101_spill] sm:$0xff] %v6810_v48  ;;  %2355 = vmatpush.msra.mxu2 %v6819_v37  ;;  %2375 = vmatpush.msra.mxu3 %v6822_v3  ;;  %v6828_v48 = vld [vmem:[#allocation5 + $0xe8] sm:$0xff] }
 0x7ee   :  { %8741 = vst [vmem:[#allocation102_spill] sm:$0xff] %v6813_v43  ;;  %2316 = vmatpush.msra.mxu0 %v6825_v38  ;;  %2336 = vmatpush.msra.mxu1 %v6828_v48  ;;  %v6831_v43 = vld [vmem:[#allocation5 + $0xf0] sm:$0xff] }
 0x7ef   :  { %8742 = vst [vmem:[#allocation103_spill] sm:$0xff] %v6816_v31  ;;  %2356 = vmatpush.msra.mxu2 %v6831_v43  ;;  %v6834_v31 = vld [vmem:[#allocation5 + $0xf8] sm:$0xff] }
 0x7f0   :  { %8743 = vst [vmem:[#allocation17_spill] sm:$0xff] %v6819_v37  ;;  %2376 = vmatpush.msra.mxu3 %v6834_v31  ;;  %v6837_v37 = vld [vmem:[#allocation5 + $0xc0] sm:$0xff] }
 0x7f1   :  { %8744 = vst [vmem:[#allocation104_spill] sm:$0xff] %v6822_v3  ;;  %2317 = vmatpush.msra.mxu0 %v6837_v37  ;;  %v6840_v3 = vld [vmem:[#allocation5 + $0xc8] sm:$0xff] }
 0x7f2   :  { %8745 = vst [vmem:[#allocation105_spill] sm:$0xff] %v6825_v38  ;;  %2337 = vmatpush.msra.mxu1 %v6840_v3  ;;  %v6843_v38 = vld [vmem:[#allocation5 + $0xd0] sm:$0xff] }
 0x7f3   :  { %8746 = vst [vmem:[#allocation106_spill] sm:$0xff] %v6828_v48  ;;  %2357 = vmatpush.msra.mxu2 %v6843_v38  ;;  %v6846_v48 = vld [vmem:[#allocation5 + $0xd8] sm:$0xff] }
 0x7f4   :  { %8747 = vst [vmem:[#allocation107_spill] sm:$0xff] %v6831_v43  ;;  %2377 = vmatpush.msra.mxu3 %v6846_v48  ;;  %v6849_v43 = vld [vmem:[#allocation5 + $0xa0] sm:$0xff] }
 0x7f5   :  { %8748 = vst [vmem:[#allocation108_spill] sm:$0xff] %v6834_v31  ;;  %2318 = vmatpush.msra.mxu0 %v6849_v43  ;;  %v6852_v31 = vld [vmem:[#allocation5 + $0xa8] sm:$0xff] }
 0x7f6   :  { %8749 = vst [vmem:[#allocation109_spill] sm:$0xff] %v6837_v37  ;;  %2338 = vmatpush.msra.mxu1 %v6852_v31  ;;  %v6855_v37 = vld [vmem:[#allocation5 + $0xb0] sm:$0xff] }
 0x7f7   :  { %8750 = vst [vmem:[#allocation110_spill] sm:$0xff] %v6840_v3  ;;  %2358 = vmatpush.msra.mxu2 %v6855_v37  ;;  %v6858_v3 = vld [vmem:[#allocation5 + $0xb8] sm:$0xff] }
 0x7f8   :  { %8751 = vst [vmem:[#allocation111_spill] sm:$0xff] %v6843_v38  ;;  %2378 = vmatpush.msra.mxu3 %v6858_v3  ;;  %v6861_v38 = vld [vmem:[#allocation5 + $0x80] sm:$0xff] }
 0x7f9   :  { %8752 = vst [vmem:[#allocation112_spill] sm:$0xff] %v6846_v48  ;;  %2319 = vmatpush.msra.mxu0 %v6861_v38  ;;  %v6864_v48 = vld [vmem:[#allocation5 + $0x88] sm:$0xff] }
 0x7fa   :  { %8753 = vst [vmem:[#allocation113_spill] sm:$0xff] %v6849_v43  ;;  %2339 = vmatpush.msra.mxu1 %v6864_v48  ;;  %v6867_v43 = vld [vmem:[#allocation5 + $0x90] sm:$0xff] }
 0x7fb   :  { %8754 = vst [vmem:[#allocation114_spill] sm:$0xff] %v6852_v31  ;;  %2359 = vmatpush.msra.mxu2 %v6867_v43  ;;  %v6870_v31 = vld [vmem:[#allocation5 + $0x98] sm:$0xff] }
 0x7fc   :  { %8755 = vst [vmem:[#allocation115_spill] sm:$0xff] %v6855_v37  ;;  %2379 = vmatpush.msra.mxu3 %v6870_v31  ;;  %v6873_v37 = vld [vmem:[#allocation5 + $0x60] sm:$0xff] }
 0x7fd   :  { %8756 = vst [vmem:[#allocation116_spill] sm:$0xff] %v6858_v3  ;;  %2320 = vmatpush.msra.mxu0 %v6873_v37  ;;  %v6876_v3 = vld [vmem:[#allocation5 + $0x68] sm:$0xff] }
 0x7fe   :  { %8757 = vst [vmem:[#allocation117_spill] sm:$0xff] %v6861_v38  ;;  %2340 = vmatpush.msra.mxu1 %v6876_v3  ;;  %v6879_v38 = vld [vmem:[#allocation5 + $0x70] sm:$0xff] }
 0x7ff   :  { %8758 = vst [vmem:[#allocation118_spill] sm:$0xff] %v6864_v48  ;;  %2360 = vmatpush.msra.mxu2 %v6879_v38  ;;  %v6882_v48 = vld [vmem:[#allocation5 + $0x78] sm:$0xff] }
 0x800   :  { %8759 = vst [vmem:[#allocation119_spill] sm:$0xff] %v6867_v43  ;;  %2380 = vmatpush.msra.mxu3 %v6882_v48  ;;  %v6885_v43 = vld [vmem:[#allocation5 + $0x40] sm:$0xff] }
 0x801   :  { %8760 = vst [vmem:[#allocation120_spill] sm:$0xff] %v6870_v31  ;;  %2321 = vmatpush.msra.mxu0 %v6885_v43  ;;  %v6888_v31 = vld [vmem:[#allocation5 + $0x48] sm:$0xff] }
 0x802   :  { %8761 = vst [vmem:[#allocation121_spill] sm:$0xff] %v6873_v37  ;;  %2341 = vmatpush.msra.mxu1 %v6888_v31  ;;  %v6891_v37 = vld [vmem:[#allocation5 + $0x50] sm:$0xff] }
 0x803   :  { %8762 = vst [vmem:[#allocation122_spill] sm:$0xff] %v6876_v3  ;;  %2361 = vmatpush.msra.mxu2 %v6891_v37  ;;  %v6894_v3 = vld [vmem:[#allocation5 + $0x58] sm:$0xff] }
 0x804   :  { %8763 = vst [vmem:[#allocation123_spill] sm:$0xff] %v6879_v38  ;;  %2381 = vmatpush.msra.mxu3 %v6894_v3  ;;  %v6897_v38 = vld [vmem:[#allocation5 + $0x20] sm:$0xff] }
 0x805   :  { %8764 = vst [vmem:[#allocation124_spill] sm:$0xff] %v6882_v48  ;;  %2322 = vmatpush.msra.mxu0 %v6897_v38  ;;  %v6900_v48 = vld [vmem:[#allocation5 + $0x28] sm:$0xff] }
 0x806   :  { %8765 = vst [vmem:[#allocation125_spill] sm:$0xff] %v6885_v43  ;;  %2342 = vmatpush.msra.mxu1 %v6900_v48  ;;  %v6903_v43 = vld [vmem:[#allocation5 + $0x30] sm:$0xff] }
 0x807   :  { %8766 = vst [vmem:[#allocation126_spill] sm:$0xff] %v6888_v31  ;;  %2362 = vmatpush.msra.mxu2 %v6903_v43  ;;  %v6906_v31 = vld [vmem:[#allocation5 + $0x38] sm:$0xff] }
 0x808   :  { %8767 = vst [vmem:[#allocation127_spill] sm:$0xff] %v6891_v37  ;;  %2382 = vmatpush.msra.mxu3 %v6906_v31  ;;  %v6909_v37 = vld [vmem:[#allocation5] sm:$0xff] }
 0x809   :  { %8768 = vst [vmem:[#allocation128_spill] sm:$0xff] %v6894_v3  ;;  %2323 = vmatpush.msra.mxu0 %v6909_v37  ;;  %v6912_v3 = vld [vmem:[#allocation5 + $0x8] sm:$0xff] }
 0x80a   :  { %8769 = vst [vmem:[#allocation129_spill] sm:$0xff] %v6897_v38  ;;  %2343 = vmatpush.msra.mxu1 %v6912_v3  ;;  %v6915_v38 = vld [vmem:[#allocation5 + $0x10] sm:$0xff] }
 0x80b   :  { %8770 = vst [vmem:[#allocation130_spill] sm:$0xff] %v6900_v48  ;;  %2363 = vmatpush.msra.mxu2 %v6915_v38  ;;  %v6918_v48 = vld [vmem:[#allocation5 + $0x18] sm:$0xff]  ;;  %2410 = vmatpush.msrb.mxu0 %v6303_v59 }
 0x80c   :  { %2383 = vmatpush.msra.mxu3 %v6918_v48  ;;  %2430 = vmatpush.msrb.mxu1 %v6306_v1  ;;  %v8771_v59 = vld [vmem:[#allocation141_spill] sm:$0xff]  ;;  %v8772_v1 = vld [vmem:[#allocation142_spill] sm:$0xff] }
 0x80d   :  { %2450 = vmatpush.msrb.mxu2 %v6309_v47  ;;  %2411 = vmatpush.msrb.mxu0 %v6315_v19  ;;  %v8773_v47 = vld [vmem:[#allocation144_spill] sm:$0xff]  ;;  %v8775_v19 = vld [vmem:[#allocation146_spill] sm:$0xff] }
 0x80e   :  { %2470 = vmatpush.msrb.mxu3 %v6312_v56  ;;  %2431 = vmatpush.msrb.mxu1 %v6318_v5  ;;  %v8774_v56 = vld [vmem:[#allocation145_spill] sm:$0xff] }
 0x80f   :  { %2451 = vmatpush.msrb.mxu2 %v6321_v58  ;;  %2412 = vmatpush.msrb.mxu0 %v6327_v62  ;;  %v8776_v5 = vld [vmem:[#allocation149_spill] sm:$0xff]  ;;  %v8777_v58 = vld [vmem:[#allocation151_spill] sm:$0xff] }
 0x810   :  { %2471 = vmatpush.msrb.mxu3 %v6324_v61  ;;  %2432 = vmatpush.msrb.mxu1 %v6330_v18  ;;  %v8778_v61 = vld [vmem:[#allocation152_spill] sm:$0xff]  ;;  %v8779_v62 = vld [vmem:[#allocation153_spill] sm:$0xff]  ;;  %v8780_v18 = vld [vmem:[#allocation154_spill] sm:$0xff] }
 0x811   :  { %2452 = vmatpush.msrb.mxu2 %v6333_v51  ;;  %2413 = vmatpush.msrb.mxu0 %v6339_v28  ;;  %v8781_v51 = vld [vmem:[#allocation156_spill] sm:$0xff]  ;;  %v8783_v28 = vld [vmem:[#allocation158_spill] sm:$0xff] }
 0x812   :  { %2472 = vmatpush.msrb.mxu3 %v6336_v54  ;;  %2433 = vmatpush.msrb.mxu1 %v6342_v14  ;;  %v8782_v54 = vld [vmem:[#allocation157_spill] sm:$0xff]  ;;  %v8784_v14 = vld [vmem:[#allocation160_spill] sm:$0xff] }
 0x813   :  { %2453 = vmatpush.msrb.mxu2 %v6345_v13  ;;  %2414 = vmatpush.msrb.mxu0 %v6351_v16  ;;  %v8785_v13 = vld [vmem:[#allocation161_spill] sm:$0xff]  ;;  %v8787_v16 = vld [vmem:[#allocation163_spill] sm:$0xff] }
 0x814   :  { %2473 = vmatpush.msrb.mxu3 %v6348_v60  ;;  %2434 = vmatpush.msrb.mxu1 %v6354_v4  ;;  %v8786_v60 = vld [vmem:[#allocation162_spill] sm:$0xff]  ;;  %v8788_v4 = vld [vmem:[#allocation164_spill] sm:$0xff] }
 0x815   :  { %2454 = vmatpush.msrb.mxu2 %v6357_v6  ;;  %2415 = vmatpush.msrb.mxu0 %v6363_v17  ;;  %v8789_v6 = vld [vmem:[#allocation165_spill] sm:$0xff]  ;;  %v8791_v17 = vld [vmem:[#allocation19_spill] sm:$0xff] }
 0x816   :  { %2474 = vmatpush.msrb.mxu3 %v6360_v8  ;;  %2435 = vmatpush.msrb.mxu1 %v6366_v63  ;;  %v8790_v8 = vld [vmem:[#allocation18_spill] sm:$0xff]  ;;  %v8792_v63 = vld [vmem:[#allocation20_spill] sm:$0xff] }
 0x817   :  { %2455 = vmatpush.msrb.mxu2 %v6369_v30  ;;  %2416 = vmatpush.msrb.mxu0 %v6375_v22  ;;  %v8793_v30 = vld [vmem:[#allocation21_spill] sm:$0xff]  ;;  %v8795_v22 = vld [vmem:[#allocation23_spill] sm:$0xff] }
 0x818   :  { %2475 = vmatpush.msrb.mxu3 %v6372_v15  ;;  %2436 = vmatpush.msrb.mxu1 %v6378_v0  ;;  %v8794_v15 = vld [vmem:[#allocation22_spill] sm:$0xff]  ;;  %v8796_v0 = vld [vmem:[#allocation24_spill] sm:$0xff] }
 0x819   :  { %2456 = vmatpush.msrb.mxu2 %v6381_v20  ;;  %2417 = vmatpush.msrb.mxu0 %v6387_v41  ;;  %v8797_v20 = vld [vmem:[#allocation25_spill] sm:$0xff]  ;;  %v8799_v41 = vld [vmem:[#allocation27_spill] sm:$0xff] }
 0x81a   :  { %2476 = vmatpush.msrb.mxu3 %v6384_v39  ;;  %2437 = vmatpush.msrb.mxu1 %v6390_v36  ;;  %v8798_v39 = vld [vmem:[#allocation26_spill] sm:$0xff]  ;;  %v8800_v36 = vld [vmem:[#allocation28_spill] sm:$0xff] }
 0x81b   :  { %2457 = vmatpush.msrb.mxu2 %v6393_v29  ;;  %2418 = vmatpush.msrb.mxu0 %v8771_v59  ;;  %v8801_v29 = vld [vmem:[#allocation29_spill] sm:$0xff]  ;;  %v2196_v59 = vpop.permute.xlu0 %2195 }
 0x81c   :  { %2477 = vmatpush.msrb.mxu3 %v6396_v10  ;;  %2438 = vmatpush.msrb.mxu1 %v8772_v1  ;;  %v8802_v10 = vld [vmem:[#allocation30_spill] sm:$0xff] }
 0x81d   :  { %2458 = vmatpush.msrb.mxu2 %v8773_v47  ;;  %2419 = vmatpush.msrb.mxu0 %v8775_v19 }
 0x81e   :  { %2478 = vmatpush.msrb.mxu3 %v8774_v56  ;;  %2439 = vmatpush.msrb.mxu1 %v8776_v5  ;;  %v8803_v56 = vld [vmem:[#allocation143_spill] sm:$0xff]  ;;  %v8804_v5 = vld [vmem:[#allocation148_spill] sm:$0xff] }
 0x81f   :  { %2459 = vmatpush.msrb.mxu2 %v8777_v58  ;;  %2420 = vmatpush.msrb.mxu0 %v8779_v62  ;;  %v2198_v19 = vmul.f32 %v2196_v59, %v8803_v56  ;;  %v2199_v58 = vmul.f32 %v2196_v59, %v8804_v5 }
 0x820   :  { %2479 = vmatpush.msrb.mxu3 %v8778_v61  ;;  %2440 = vmatpush.msrb.mxu1 %v8780_v18  ;;  %v8805_v18 = vld [vmem:[#allocation155_spill] sm:$0xff] }
 0x821   :  { %2460 = vmatpush.msrb.mxu2 %v8781_v51  ;;  %2421 = vmatpush.msrb.mxu0 %v8783_v28  ;;  %v2202_v51 = vadd.f32 %v2198_v19, %v8805_v18 }
 0x822   :  { %2480 = vmatpush.msrb.mxu3 %v8782_v54  ;;  %2441 = vmatpush.msrb.mxu1 %v8784_v14  ;;  %v8806_v54 = vld [vmem:[#allocation159_spill] sm:$0xff] }
 0x823   :  { %2461 = vmatpush.msrb.mxu2 %v8785_v13  ;;  %2422 = vmatpush.msrb.mxu0 %v8787_v16  ;;  %v2203_v28 = vadd.f32 %v2199_v58, %v8806_v54 }
 0x824   :  { %2481 = vmatpush.msrb.mxu3 %v8786_v60  ;;  %2442 = vmatpush.msrb.mxu1 %v8788_v4  ;;  %v2200_v4 = vmul.f32 %v2196_v59, %v4332_v45 }
 0x825   :  { %2462 = vmatpush.msrb.mxu2 %v8789_v6  ;;  %2423 = vmatpush.msrb.mxu0 %v8791_v17  ;;  %v2201_v6 = vmul.f32 %v2196_v59, %v4342_v55 }
 0x826   :  { %2482 = vmatpush.msrb.mxu3 %v8790_v8  ;;  %2443 = vmatpush.msrb.mxu1 %v8792_v63  ;;  %v8807_v63 = vld [vmem:[#allocation166_spill] sm:$0xff] }
 0x827   :  { %2463 = vmatpush.msrb.mxu2 %v8793_v30  ;;  %2424 = vmatpush.msrb.mxu0 %v8795_v22  ;;  %v2204_v30 = vadd.f32 %v2200_v4, %v8807_v63 }
 0x828   :  { %2483 = vmatpush.msrb.mxu3 %v8794_v15  ;;  %2444 = vmatpush.msrb.mxu1 %v8796_v0  ;;  %v2205_v15 = vadd.f32 %v2201_v6, %v4355_v46 }
 0x829   :  { %2464 = vmatpush.msrb.mxu2 %v8797_v20  ;;  %2425 = vmatpush.msrb.mxu0 %v8799_v41 }
 0x82a   :  { %2484 = vmatpush.msrb.mxu3 %v8798_v39  ;;  %2445 = vmatpush.msrb.mxu1 %v8800_v36 }
 0x82b   :  { %2465 = vmatpush.msrb.mxu2 %v8801_v29 }
 0x82c   :  { %2485 = vmatpush.msrb.mxu3 %v8802_v10 }
 0x857   :  { %v6985_v1 = vpop.f32.mrf.mxu0  ;;  %v6987_v47 = vpop.f32.mrf.mxu1 }
 0x85e   :  { %v6991_v61 = vpop.f32.mrf.mxu2  ;;  %v6993_v62 = vpop.f32.mrf.mxu3 }
 0x85f   :  { %v2223_v14 = vpop.f32.mrf.mxu0  ;;  %v2243_v13 = vpop.f32.mrf.mxu1 }
 0x860   :  { %v2286_v60 = vadd.f32 %v2223_v14, %v2202_v51  ;;  %v2287_v16 = vadd.f32 %v2243_v13, %v2203_v28 }
 0x862   :  { %v2290_v8 = vmul.f32 0.5, %v2286_v60  ;;  %v2294_v17 = vmul.f32 0.5, %v2287_v16 }
 0x864   :  { %2911 = vtanh.f32 %v2290_v8 }
 0x865   :  { %2913 = vtanh.f32 %v2294_v17  ;;  %v8809_v17 = vld [vmem:[#allocation32_spill] sm:$0xff] }
 0x866   :  { %v2263_v22 = vpop.f32.mrf.mxu2  ;;  %v2283_v0 = vpop.f32.mrf.mxu3 }
 0x867   :  { %v2288_v20 = vadd.f32 %v2263_v22, %v2204_v30  ;;  %v2289_v39 = vadd.f32 %v2283_v0, %v2205_v15  ;;  %v8810_v30 = vld [vmem:[#allocation33_spill] sm:$0xff]  ;;  %v8811_v15 = vld [vmem:[#allocation34_spill] sm:$0xff]  ;;  %v8812_v22 = vld [vmem:[#allocation35_spill] sm:$0xff] }
 0x868   :  { %v8813_v0 = vld [vmem:[#allocation36_spill] sm:$0xff] }
 0x869   :  { %2915 = vtanh.f32 %v2288_v20  ;;  %v2299_v41 = vmul.f32 0.5, %v2289_v39  ;;  %v8819_v20 = vld [vmem:[#allocation42_spill] sm:$0xff]  ;;  %v8820_v39 = vld [vmem:[#allocation43_spill] sm:$0xff] }
 0x86a   :  { %v2912_v36 = vpop.eup %2911 }
 0x86b   :  { %v2914_v29 = vpop.eup %2913  ;;  %v2292_v10 = vmul.f32 0.5, %v2912_v36  ;;  %2917 = vtanh.f32 %v2299_v41  ;;  %v8821_v41 = vld [vmem:[#allocation44_spill] sm:$0xff]  ;;  %v8822_v36 = vld [vmem:[#allocation45_spill] sm:$0xff] }
 0x86c   :  { %v2296_v19 = vmul.f32 0.5, %v2914_v29  ;;  %v8823_v29 = vld [vmem:[#allocation46_spill] sm:$0xff] }
 0x86d   :  { %v2293_v59 = vadd.f32 0.5, %v2292_v10  ;;  %v8824_v10 = vld [vmem:[#allocation47_spill] sm:$0xff] }
 0x86e   :  { %v2297_v58 = vadd.f32 0.5, %v2296_v19  ;;  %v8825_v19 = vld [vmem:[#allocation48_spill] sm:$0xff] }
 0x86f   :  { %v2916_v51 = vpop.eup %2915 }
 0x870   :  { %v2303_v28 = vmul.f32 %v2297_v58, %v6512_v57  ;;  %v2304_v14 = vmul.f32 %v2916_v51, %v2293_v59  ;;  %v8808_v57 = vld [vmem:[#allocation31_spill] sm:$0xff]  ;;  %v8826_v59 = vld [vmem:[#allocation49_spill] sm:$0xff]  ;;  %v8827_v58 = vld [vmem:[#allocation50_spill] sm:$0xff] }
 0x871   :  { %v2918_v13 = vpop.eup %2917  ;;  %v8828_v51 = vld [vmem:[#allocation51_spill] sm:$0xff] }
 0x872   :  { %v7002_v60 = vadd.f32 %v2304_v14, %v2303_v28  ;;  %v2301_v16 = vmul.f32 0.5, %v2918_v13  ;;  %v8829_v28 = vld [vmem:[#allocation52_spill] sm:$0xff]  ;;  %v8830_v14 = vld [vmem:[#allocation53_spill] sm:$0xff]  ;;  %v8831_v13 = vld [vmem:[#allocation54_spill] sm:$0xff] }
 0x874   :  { %2919 = vtanh.f32 %v7002_v60  ;;  %v2302_v4 = vadd.f32 0.5, %v2301_v16  ;;  %v8832_v16 = vld [vmem:[#allocation55_spill] sm:$0xff] }
 0x87a   :  { %v2920_v6 = vpop.eup %2919 }
 0x87b   :  { %v7005_v8 = vmul.f32 %v2920_v6, %v2302_v4  ;;  %v8833_v4 = vld [vmem:[#allocation56_spill] sm:$0xff]  ;;  %v8834_v6 = vld [vmem:[#allocation57_spill] sm:$0xff] }
 0x87d   :  { %2324 = vmatmul.f32.vlgmr.msra.gmra.mxu0 %v7005_v8  ;;  %2344 = vmatmul.f32.vlgmr.msra.gmra.mxu1 %v7005_v8 }
 0x87e   :  { %2364 = vmatmul.f32.vlgmr.msra.gmra.mxu2 %v7005_v8  ;;  %2384 = vmatmul.f32.vlgmr.msra.gmra.mxu3 %v7005_v8 }
 0x87f   :  { %2505 = vmatpush.msra.mxu0 %v6521_v44  ;;  %2525 = vmatpush.msra.mxu1 %v6524_v40  ;;  %v8814_v44 = vld [vmem:[#allocation37_spill] sm:$0xff]  ;;  %v8815_v40 = vld [vmem:[#allocation38_spill] sm:$0xff] }
 0x880   :  { %2545 = vmatpush.msra.mxu2 %v6527_v49  ;;  %2565 = vmatpush.msra.mxu3 %v6530_v34  ;;  %v8816_v49 = vld [vmem:[#allocation39_spill] sm:$0xff]  ;;  %v8817_v34 = vld [vmem:[#allocation40_spill] sm:$0xff] }
 0x881   :  { %2506 = vmatpush.msra.mxu0 %v6533_v21  ;;  %2526 = vmatpush.msra.mxu1 %v8808_v57  ;;  %v8818_v21 = vld [vmem:[#allocation41_spill] sm:$0xff]  ;;  %v8835_v57 = vld [vmem:[#allocation58_spill] sm:$0xff] }
 0x882   :  { %2546 = vmatpush.msra.mxu2 %v8809_v17  ;;  %2566 = vmatpush.msra.mxu3 %v8810_v30  ;;  %v8836_v17 = vld [vmem:[#allocation59_spill] sm:$0xff]  ;;  %v8837_v30 = vld [vmem:[#allocation60_spill] sm:$0xff] }
 0x883   :  { %2507 = vmatpush.msra.mxu0 %v8811_v15  ;;  %2527 = vmatpush.msra.mxu1 %v8812_v22  ;;  %v8838_v15 = vld [vmem:[#allocation61_spill] sm:$0xff]  ;;  %v8839_v22 = vld [vmem:[#allocation62_spill] sm:$0xff] }
 0x884   :  { %2547 = vmatpush.msra.mxu2 %v8813_v0  ;;  %2567 = vmatpush.msra.mxu3 %v8814_v44  ;;  %v8840_v0 = vld [vmem:[#allocation63_spill] sm:$0xff]  ;;  %v8841_v44 = vld [vmem:[#allocation64_spill] sm:$0xff] }
 0x885   :  { %2508 = vmatpush.msra.mxu0 %v8815_v40  ;;  %2528 = vmatpush.msra.mxu1 %v8816_v49  ;;  %v8842_v40 = vld [vmem:[#allocation65_spill] sm:$0xff]  ;;  %v8843_v49 = vld [vmem:[#allocation66_spill] sm:$0xff] }
 0x886   :  { %2548 = vmatpush.msra.mxu2 %v8817_v34  ;;  %2568 = vmatpush.msra.mxu3 %v8818_v21  ;;  %v8844_v34 = vld [vmem:[#allocation67_spill] sm:$0xff]  ;;  %v8845_v21 = vld [vmem:[#allocation68_spill] sm:$0xff] }
 0x887   :  { %2509 = vmatpush.msra.mxu0 %v8819_v20  ;;  %2529 = vmatpush.msra.mxu1 %v8820_v39  ;;  %v8846_v20 = vld [vmem:[#allocation69_spill] sm:$0xff]  ;;  %v8847_v39 = vld [vmem:[#allocation70_spill] sm:$0xff] }
 0x888   :  { %2549 = vmatpush.msra.mxu2 %v8821_v41  ;;  %2569 = vmatpush.msra.mxu3 %v8822_v36  ;;  %v8848_v41 = vld [vmem:[#allocation71_spill] sm:$0xff]  ;;  %v8849_v36 = vld [vmem:[#allocation72_spill] sm:$0xff] }
 0x889   :  { %2510 = vmatpush.msra.mxu0 %v8823_v29  ;;  %2530 = vmatpush.msra.mxu1 %v8824_v10  ;;  %v8850_v29 = vld [vmem:[#allocation73_spill] sm:$0xff]  ;;  %v8851_v10 = vld [vmem:[#allocation74_spill] sm:$0xff] }
 0x88a   :  { %2550 = vmatpush.msra.mxu2 %v8825_v19  ;;  %2570 = vmatpush.msra.mxu3 %v8826_v59  ;;  %v8852_v19 = vld [vmem:[#allocation75_spill] sm:$0xff]  ;;  %v8853_v59 = vld [vmem:[#allocation76_spill] sm:$0xff] }
 0x88b   :  { %2511 = vmatpush.msra.mxu0 %v8827_v58  ;;  %2531 = vmatpush.msra.mxu1 %v8828_v51  ;;  %v8854_v58 = vld [vmem:[#allocation77_spill] sm:$0xff]  ;;  %v8855_v51 = vld [vmem:[#allocation78_spill] sm:$0xff] }
 0x88c   :  { %2551 = vmatpush.msra.mxu2 %v8829_v28  ;;  %2571 = vmatpush.msra.mxu3 %v8830_v14  ;;  %v8856_v28 = vld [vmem:[#allocation79_spill] sm:$0xff]  ;;  %v8857_v14 = vld [vmem:[#allocation80_spill] sm:$0xff] }
 0x88d   :  { %2512 = vmatpush.msra.mxu0 %v8831_v13  ;;  %2532 = vmatpush.msra.mxu1 %v8832_v16  ;;  %v8858_v13 = vld [vmem:[#allocation81_spill] sm:$0xff]  ;;  %v8859_v16 = vld [vmem:[#allocation82_spill] sm:$0xff] }
 0x88e   :  { %2552 = vmatpush.msra.mxu2 %v8833_v4  ;;  %2572 = vmatpush.msra.mxu3 %v8834_v6  ;;  %v8860_v4 = vld [vmem:[#allocation83_spill] sm:$0xff]  ;;  %v8861_v6 = vld [vmem:[#allocation84_spill] sm:$0xff] }
 0x88f   :  { %2513 = vmatpush.msra.mxu0 %v8835_v57  ;;  %2533 = vmatpush.msra.mxu1 %v8836_v17  ;;  %v8862_v57 = vld [vmem:[#allocation85_spill] sm:$0xff]  ;;  %v8863_v17 = vld [vmem:[#allocation86_spill] sm:$0xff] }
 0x890   :  { %2553 = vmatpush.msra.mxu2 %v8837_v30  ;;  %2573 = vmatpush.msra.mxu3 %v8838_v15  ;;  %v8864_v30 = vld [vmem:[#allocation87_spill] sm:$0xff]  ;;  %v8865_v15 = vld [vmem:[#allocation88_spill] sm:$0xff] }
 0x891   :  { %2514 = vmatpush.msra.mxu0 %v8839_v22  ;;  %2534 = vmatpush.msra.mxu1 %v8840_v0  ;;  %v8866_v22 = vld [vmem:[#allocation89_spill] sm:$0xff]  ;;  %v8867_v0 = vld [vmem:[#allocation15_spill] sm:$0xff] }
 0x892   :  { %2554 = vmatpush.msra.mxu2 %v8841_v44  ;;  %2574 = vmatpush.msra.mxu3 %v8842_v40  ;;  %v2129_v44 = vadd.f32 %v6985_v1, %v8867_v0  ;;  %v8868_v40 = vld [vmem:[#allocation16_spill] sm:$0xff] }
 0x893   :  { %2515 = vmatpush.msra.mxu0 %v8843_v49  ;;  %2535 = vmatpush.msra.mxu1 %v8844_v34  ;;  %v2149_v49 = vadd.f32 %v6987_v47, %v8868_v40 }
 0x894   :  { %2555 = vmatpush.msra.mxu2 %v8845_v21  ;;  %2575 = vmatpush.msra.mxu3 %v8846_v20 }
 0x895   :  { %2516 = vmatpush.msra.mxu0 %v8847_v39  ;;  %2536 = vmatpush.msra.mxu1 %v8848_v41 }
 0x896   :  { %2556 = vmatpush.msra.mxu2 %v8849_v36  ;;  %2576 = vmatpush.msra.mxu3 %v8850_v29  ;;  %v2169_v29 = vadd.f32 %v6991_v61, %v4505_v9 }
 0x897   :  { %2517 = vmatpush.msra.mxu0 %v8851_v10  ;;  %2537 = vmatpush.msra.mxu1 %v8852_v19  ;;  %v2189_v10 = vadd.f32 %v6993_v62, %v8311_v35 }
 0x898   :  { %2557 = vmatpush.msra.mxu2 %v8853_v59  ;;  %2577 = vmatpush.msra.mxu3 %v8854_v58 }
 0x899   :  { %2518 = vmatpush.msra.mxu0 %v8855_v51  ;;  %2538 = vmatpush.msra.mxu1 %v8856_v28 }
 0x89a   :  { %2558 = vmatpush.msra.mxu2 %v8857_v14  ;;  %2578 = vmatpush.msra.mxu3 %v8858_v13 }
 0x89b   :  { %2519 = vmatpush.msra.mxu0 %v8859_v16  ;;  %2539 = vmatpush.msra.mxu1 %v8860_v4 }
 0x89c   :  { %2559 = vmatpush.msra.mxu2 %v8861_v6  ;;  %2579 = vmatpush.msra.mxu3 %v8862_v57 }
 0x89d   :  { %2520 = vmatpush.msra.mxu0 %v8863_v17  ;;  %2540 = vmatpush.msra.mxu1 %v8864_v30 }
 0x89e   :  { %2560 = vmatpush.msra.mxu2 %v8865_v15  ;;  %2580 = vmatpush.msra.mxu3 %v8866_v22 }
 0x8fa   :  { %v2325_v34 = vpop.f32.mrf.mxu0  ;;  %v2345_v21 = vpop.f32.mrf.mxu1 }
 0x8fb   :  { %v2388_v20 = vadd.f32 %v2325_v34, %v2129_v44  ;;  %v2389_v39 = vadd.f32 %v2345_v21, %v2149_v49  ;;  %v8885_v49 = vld [vmem:[#allocation17_spill] sm:$0xff]  ;;  %v8886_v34 = vld [vmem:[#allocation104_spill] sm:$0xff] }
 0x8fc   :  { %v8887_v21 = vld [vmem:[#allocation105_spill] sm:$0xff] }
 0x8fd   :  { %v2392_v41 = vmul.f32 0.5, %v2388_v20  ;;  %v2396_v36 = vmul.f32 0.5, %v2389_v39  ;;  %v8888_v20 = vld [vmem:[#allocation106_spill] sm:$0xff]  ;;  %v8889_v39 = vld [vmem:[#allocation107_spill] sm:$0xff] }
 0x8ff   :  { %2921 = vtanh.f32 %v2392_v41  ;;  %v8890_v41 = vld [vmem:[#allocation108_spill] sm:$0xff] }
 0x900   :  { %2923 = vtanh.f32 %v2396_v36  ;;  %v8891_v36 = vld [vmem:[#allocation109_spill] sm:$0xff] }
 0x901   :  { %v2365_v19 = vpop.f32.mrf.mxu2  ;;  %v2385_v59 = vpop.f32.mrf.mxu3 }
 0x902   :  { %v2390_v1 = vadd.f32 %v2365_v19, %v2169_v29  ;;  %v2391_v58 = vadd.f32 %v2385_v59, %v2189_v10  ;;  %v8892_v29 = vld [vmem:[#allocation110_spill] sm:$0xff]  ;;  %v8893_v10 = vld [vmem:[#allocation111_spill] sm:$0xff]  ;;  %v8894_v19 = vld [vmem:[#allocation112_spill] sm:$0xff] }
 0x903   :  { %v8895_v59 = vld [vmem:[#allocation113_spill] sm:$0xff] }
 0x904   :  { %2925 = vtanh.f32 %v2390_v1  ;;  %v2401_v47 = vmul.f32 0.5, %v2391_v58  ;;  %v8896_v1 = vld [vmem:[#allocation114_spill] sm:$0xff]  ;;  %v8897_v58 = vld [vmem:[#allocation115_spill] sm:$0xff] }
 0x905   :  { %v2922_v51 = vpop.eup %2921 }
 0x906   :  { %v2924_v28 = vpop.eup %2923  ;;  %v2394_v14 = vmul.f32 0.5, %v2922_v51  ;;  %2927 = vtanh.f32 %v2401_v47  ;;  %v8898_v47 = vld [vmem:[#allocation116_spill] sm:$0xff]  ;;  %v8899_v51 = vld [vmem:[#allocation117_spill] sm:$0xff] }
 0x907   :  { %v2398_v13 = vmul.f32 0.5, %v2924_v28  ;;  %v8900_v28 = vld [vmem:[#allocation118_spill] sm:$0xff] }
 0x908   :  { %v2395_v16 = vadd.f32 0.5, %v2394_v14  ;;  %v8901_v14 = vld [vmem:[#allocation119_spill] sm:$0xff] }
 0x909   :  { %v2399_v4 = vadd.f32 0.5, %v2398_v13  ;;  %v8902_v13 = vld [vmem:[#allocation120_spill] sm:$0xff] }
 0x90a   :  { %v2926_v6 = vpop.eup %2925 }
 0x90b   :  { %v2405_v61 = vmul.f32 %v2399_v4, %v6722_v53  ;;  %v2406_v57 = vmul.f32 %v2926_v6, %v2395_v16  ;;  %v8869_v53 = vld [vmem:[#allocation90_spill] sm:$0xff]  ;;  %v8903_v16 = vld [vmem:[#allocation121_spill] sm:$0xff]  ;;  %v8905_v6 = vld [vmem:[#allocation123_spill] sm:$0xff] }
 0x90c   :  { %v2928_v17 = vpop.eup %2927  ;;  %v8904_v4 = vld [vmem:[#allocation122_spill] sm:$0xff] }
 0x90d   :  { %v7084_v62 = vadd.f32 %v2406_v57, %v2405_v61  ;;  %v2403_v30 = vmul.f32 0.5, %v2928_v17  ;;  %v8906_v61 = vld [vmem:[#allocation124_spill] sm:$0xff]  ;;  %v8907_v57 = vld [vmem:[#allocation125_spill] sm:$0xff]  ;;  %v8908_v17 = vld [vmem:[#allocation126_spill] sm:$0xff] }
 0x90f   :  { %2929 = vtanh.f32 %v7084_v62  ;;  %v2404_v15 = vadd.f32 0.5, %v2403_v30  ;;  %v8909_v30 = vld [vmem:[#allocation127_spill] sm:$0xff] }
 0x915   :  { %v2930_v22 = vpop.eup %2929 }
 0x916   :  { %v2409_v44 = vmul.f32 %v2930_v22, %v2404_v15  ;;  %v8910_v15 = vld [vmem:[#allocation128_spill] sm:$0xff]  ;;  %v8911_v22 = vld [vmem:[#allocation129_spill] sm:$0xff] }
 0x918   :  { %2426 = vmatmul.f32.vlgmr.msrb.gmra.mxu0 %v2409_v44  ;;  %2446 = vmatmul.f32.vlgmr.msrb.gmra.mxu1 %v2409_v44 }
 0x919   :  { %2466 = vmatmul.f32.vlgmr.msrb.gmra.mxu2 %v2409_v44  ;;  %2486 = vmatmul.f32.vlgmr.msrb.gmra.mxu3 %v2409_v44  ;;  %v8912_v44 = vld [vmem:[#allocation130_spill] sm:$0xff] }
 0x91a   :  { %2607 = vmatpush.msrb.mxu0 %v6725_v12  ;;  %2627 = vmatpush.msrb.mxu1 %v6728_v33  ;;  %v8870_v12 = vld [vmem:[#allocation91_spill] sm:$0xff]  ;;  %v8871_v33 = vld [vmem:[#allocation92_spill] sm:$0xff] }
 0x91b   :  { %2647 = vmatpush.msrb.mxu2 %v6731_v23  ;;  %2667 = vmatpush.msrb.mxu3 %v6734_v26  ;;  %v8872_v23 = vld [vmem:[#allocation93_spill] sm:$0xff]  ;;  %v8873_v26 = vld [vmem:[#allocation94_spill] sm:$0xff] }
 0x91c   :  { %2608 = vmatpush.msrb.mxu0 %v6737_v52  ;;  %2628 = vmatpush.msrb.mxu1 %v6740_v24  ;;  %v8874_v52 = vld [vmem:[#allocation95_spill] sm:$0xff]  ;;  %v8875_v24 = vld [vmem:[#allocation96_spill] sm:$0xff] }
 0x91d   :  { %2648 = vmatpush.msrb.mxu2 %v6743_v11  ;;  %2668 = vmatpush.msrb.mxu3 %v6746_v42  ;;  %v8876_v11 = vld [vmem:[#allocation97_spill] sm:$0xff]  ;;  %v8877_v42 = vld [vmem:[#allocation98_spill] sm:$0xff] }
 0x91e   :  { %2609 = vmatpush.msrb.mxu0 %v6749_v25  ;;  %2629 = vmatpush.msrb.mxu1 %v6752_v2  ;;  %v8878_v25 = vld [vmem:[#allocation147_spill] sm:$0xff]  ;;  %v8879_v2 = vld [vmem:[#allocation150_spill] sm:$0xff] }
 0x91f   :  { %2649 = vmatpush.msrb.mxu2 %v6755_v32  ;;  %2669 = vmatpush.msrb.mxu3 %v6758_v7  ;;  %v8880_v32 = vld [vmem:[#allocation99_spill] sm:$0xff]  ;;  %v8881_v7 = vld [vmem:[#allocation100_spill] sm:$0xff] }
 0x920   :  { %2521 = vmatmul.f32.vlgmr.msra.gmra.mxu0 %v7005_v8  ;;  %2541 = vmatmul.f32.vlgmr.msra.gmra.mxu1 %v7005_v8 }
 0x921   :  { %2561 = vmatmul.f32.vlgmr.msra.gmra.mxu2 %v7005_v8  ;;  %2581 = vmatmul.f32.vlgmr.msra.gmra.mxu3 %v7005_v8  ;;  %v8884_v8 = vld [vmem:[#allocation103_spill] sm:$0xff] }
 0x922   :  { %2610 = vmatpush.msrb.mxu0 %v6765_v27  ;;  %2630 = vmatpush.msrb.mxu1 %v6768_v50  ;;  %v8882_v27 = vld [vmem:[#allocation101_spill] sm:$0xff]  ;;  %v8883_v50 = vld [vmem:[#allocation102_spill] sm:$0xff] }
 0x923   :  { %2650 = vmatpush.msrb.mxu2 %v8869_v53  ;;  %2670 = vmatpush.msrb.mxu3 %v8870_v12  ;;  %v2495_v53 = vpop.permute.xlu1 %2494 }
 0x924   :  { %2611 = vmatpush.msrb.mxu0 %v8871_v33  ;;  %2631 = vmatpush.msrb.mxu1 %v8872_v23  ;;  %v2497_v23 = vmul.f32 %v2495_v53, %v8803_v56  ;;  %v2500_v56 = vmul.f32 %v2495_v53, %v4342_v55 }
 0x925   :  { %2651 = vmatpush.msrb.mxu2 %v8873_v26  ;;  %2671 = vmatpush.msrb.mxu3 %v8874_v52  ;;  %v2498_v26 = vmul.f32 %v2495_v53, %v8804_v5 }
 0x926   :  { %2612 = vmatpush.msrb.mxu0 %v8875_v24  ;;  %2632 = vmatpush.msrb.mxu1 %v8876_v11 }
 0x927   :  { %2652 = vmatpush.msrb.mxu2 %v8877_v42  ;;  %2672 = vmatpush.msrb.mxu3 %v8878_v25  ;;  %v2499_v42 = vmul.f32 %v2495_v53, %v4332_v45 }
 0x928   :  { %2613 = vmatpush.msrb.mxu0 %v8879_v2  ;;  %2633 = vmatpush.msrb.mxu1 %v8880_v32 }
 0x929   :  { %2653 = vmatpush.msrb.mxu2 %v8881_v7  ;;  %2673 = vmatpush.msrb.mxu3 %v8882_v27  ;;  %v2503_v2 = vadd.f32 %v2499_v42, %v8807_v63 }
 0x92a   :  { %2614 = vmatpush.msrb.mxu0 %v8883_v50  ;;  %2634 = vmatpush.msrb.mxu1 %v8884_v8 }
 0x92b   :  { %2654 = vmatpush.msrb.mxu2 %v8885_v49  ;;  %2674 = vmatpush.msrb.mxu3 %v8886_v34 }
 0x92c   :  { %2615 = vmatpush.msrb.mxu0 %v8887_v21  ;;  %2635 = vmatpush.msrb.mxu1 %v8888_v20 }
 0x92d   :  { %2655 = vmatpush.msrb.mxu2 %v8889_v39  ;;  %2675 = vmatpush.msrb.mxu3 %v8890_v41 }
 0x92e   :  { %2616 = vmatpush.msrb.mxu0 %v8891_v36  ;;  %2636 = vmatpush.msrb.mxu1 %v8892_v29 }
 0x92f   :  { %2656 = vmatpush.msrb.mxu2 %v8893_v10  ;;  %2676 = vmatpush.msrb.mxu3 %v8894_v19 }
 0x930   :  { %2617 = vmatpush.msrb.mxu0 %v8895_v59  ;;  %2637 = vmatpush.msrb.mxu1 %v8896_v1  ;;  %v2723_v59 = vld [vmem:[#allocation8 + $0x70] sm:$0xff]  ;;  %v2722_v1 = vld [vmem:[#allocation8 + $0x68] sm:$0xff] }
 0x931   :  { %2657 = vmatpush.msrb.mxu2 %v8897_v58  ;;  %2677 = vmatpush.msrb.mxu3 %v8898_v47  ;;  %v2721_v58 = vld [vmem:[#allocation8 + $0x60] sm:$0xff]  ;;  %v2720_v47 = vld [vmem:[#allocation8 + $0x58] sm:$0xff] }
 0x932   :  { %2618 = vmatpush.msrb.mxu0 %v8899_v51  ;;  %2638 = vmatpush.msrb.mxu1 %v8900_v28  ;;  %v2718_v51 = vld [vmem:[#allocation8 + $0x48] sm:$0xff]  ;;  %v2717_v28 = vld [vmem:[#allocation8 + $0x40] sm:$0xff] }
 0x933   :  { %2658 = vmatpush.msrb.mxu2 %v8901_v14  ;;  %2678 = vmatpush.msrb.mxu3 %v8902_v13  ;;  %v2716_v14 = vld [vmem:[#allocation8 + $0x38] sm:$0xff]  ;;  %v2715_v13 = vld [vmem:[#allocation8 + $0x30] sm:$0xff] }
 0x934   :  { %2619 = vmatpush.msrb.mxu0 %v8903_v16  ;;  %2639 = vmatpush.msrb.mxu1 %v8904_v4  ;;  %v2714_v16 = vld [vmem:[#allocation8 + $0x28] sm:$0xff]  ;;  %v2713_v4 = vld [vmem:[#allocation8 + $0x20] sm:$0xff] }
 0x935   :  { %2659 = vmatpush.msrb.mxu2 %v8905_v6  ;;  %2679 = vmatpush.msrb.mxu3 %v8906_v61  ;;  %v2712_v6 = vld [vmem:[#allocation8 + $0x18] sm:$0xff]  ;;  %v2711_v61 = vld [vmem:[#allocation8 + $0x10] sm:$0xff] }
 0x936   :  { %2620 = vmatpush.msrb.mxu0 %v8907_v57  ;;  %2640 = vmatpush.msrb.mxu1 %v8908_v17  ;;  %v2710_v57 = vld [vmem:[#allocation8 + $0x8] sm:$0xff]  ;;  %v2709_v17 = vld [vmem:[#allocation8] sm:$0xff] }
 0x937   :  { %2660 = vmatpush.msrb.mxu2 %v8909_v30  ;;  %2680 = vmatpush.msrb.mxu3 %v8910_v15 }
 0x938   :  { %2621 = vmatpush.msrb.mxu0 %v8911_v22  ;;  %2641 = vmatpush.msrb.mxu1 %v8912_v44 }
 0x939   :  { %2661 = vmatpush.msrb.mxu2 %v6903_v43  ;;  %2681 = vmatpush.msrb.mxu3 %v6906_v31 }
 0x93a   :  { %2622 = vmatpush.msrb.mxu0 %v6909_v37  ;;  %2642 = vmatpush.msrb.mxu1 %v6912_v3  ;;  %v2501_v37 = vadd.f32 %v2497_v23, %v8805_v18  ;;  %v2502_v3 = vadd.f32 %v2498_v26, %v8806_v54  ;;  %v2504_v18 = vadd.f32 %v2500_v56, %v4355_v46 }
 0x93b   :  { %2662 = vmatpush.msrb.mxu2 %v6915_v38  ;;  %2682 = vmatpush.msrb.mxu3 %v6918_v48  ;;  %v2724_v38 = vld [vmem:[#allocation8 + $0x78] sm:$0xff] }
 0x93c   :  { %2729 = vmatpush.msra.mxu0 %v2724_v38 }
 0x93e   :  { %2730 = vmatpush.msra.mxu0 %v2723_v59 }
 0x940   :  { %2731 = vmatpush.msra.mxu0 %v2722_v1 }
 0x942   :  { %2732 = vmatpush.msra.mxu0 %v2721_v58 }
 0x944   :  { %2733 = vmatpush.msra.mxu0 %v2720_v47 }
 0x995   :  { %v7155_v12 = vpop.f32.mrf.mxu0  ;;  %v7157_v33 = vpop.f32.mrf.mxu1 }
 0x996   :  { %v2428_v30 = vadd.f32 %v7155_v12, %v8867_v0  ;;  %v2448_v15 = vadd.f32 %v7157_v33, %v8868_v40 }
 0x99c   :  { %v7161_v43 = vpop.f32.mrf.mxu2  ;;  %v7163_v31 = vpop.f32.mrf.mxu3 }
 0x99d   :  { %v2522_v52 = vpop.f32.mrf.mxu0  ;;  %v2542_v48 = vpop.f32.mrf.mxu1  ;;  %v2488_v38 = vadd.f32 %v7163_v31, %v8311_v35 }
 0x99e   :  { %v2585_v24 = vadd.f32 %v2522_v52, %v2501_v37  ;;  %v2586_v11 = vadd.f32 %v2542_v48, %v2502_v3  ;;  %v2468_v3 = vadd.f32 %v7161_v43, %v4505_v9 }
 0x9a0   :  { %v2589_v25 = vmul.f32 0.5, %v2585_v24  ;;  %v2593_v5 = vmul.f32 0.5, %v2586_v11 }
 0x9a2   :  { %2931 = vtanh.f32 %v2589_v25 }
 0x9a3   :  { %2933 = vtanh.f32 %v2593_v5 }
 0x9a4   :  { %v2562_v32 = vpop.f32.mrf.mxu2  ;;  %v2582_v54 = vpop.f32.mrf.mxu3 }
 0x9a5   :  { %v2587_v7 = vadd.f32 %v2562_v32, %v2503_v2  ;;  %v2588_v27 = vadd.f32 %v2582_v54, %v2504_v18 }
 0x9a7   :  { %2935 = vtanh.f32 %v2587_v7  ;;  %v2598_v50 = vmul.f32 0.5, %v2588_v27  ;;  %v2790_v7 = vld [vmem:[%s7195_s8] ss:$0 sm:$0xff] }
 0x9a8   :  { %v2932_v8 = vpop.eup %2931 }
 0x9a9   :  { %v2934_v49 = vpop.eup %2933  ;;  %v2591_v34 = vmul.f32 0.5, %v2932_v8  ;;  %2937 = vtanh.f32 %v2598_v50 }
 0x9aa   :  { %v2595_v45 = vmul.f32 0.5, %v2934_v49 }
 0x9ab   :  { %v2592_v55 = vadd.f32 0.5, %v2591_v34 }
 0x9ac   :  { %v2596_v21 = vadd.f32 0.5, %v2595_v45 }
 0x9ad   :  { %v2936_v20 = vpop.eup %2935 }
 0x9ae   :  { %v2602_v39 = vmul.f32 %v2596_v21, %v7002_v60  ;;  %v2603_v41 = vmul.f32 %v2936_v20, %v2592_v55  ;;  %v2719_v60 = vld [vmem:[#allocation8 + $0x50] sm:$0xff] }
 0x9af   :  { %v2938_v63 = vpop.eup %2937  ;;  %2734 = vmatpush.msra.mxu0 %v2719_v60 }
 0x9b0   :  { %v2604_v36 = vadd.f32 %v2603_v41, %v2602_v39  ;;  %v2600_v46 = vmul.f32 0.5, %v2938_v63 }
 0x9b1   :  { %2735 = vmatpush.msra.mxu0 %v2718_v51 }
 0x9b2   :  { %2939 = vtanh.f32 %v2604_v36  ;;  %v2601_v29 = vadd.f32 0.5, %v2600_v46 }
 0x9b3   :  { %2736 = vmatpush.msra.mxu0 %v2717_v28 }
 0x9b5   :  { %2737 = vmatpush.msra.mxu0 %v2716_v14 }
 0x9b7   :  { %2738 = vmatpush.msra.mxu0 %v2715_v13 }
 0x9b8   :  { %v2940_v10 = vpop.eup %2939 }
 0x9b9   :  { %v2606_v19 = vmul.f32 %v2940_v10, %v2601_v29  ;;  %2739 = vmatpush.msra.mxu0 %v2714_v16 }
 0x9bb   :  { %2623 = vmatmul.f32.vlgmr.msrb.gmra.mxu0 %v2606_v19  ;;  %2643 = vmatmul.f32.vlgmr.msrb.gmra.mxu1 %v2606_v19 }
 0x9bc   :  { %2663 = vmatmul.f32.vlgmr.msrb.gmra.mxu2 %v2606_v19  ;;  %2683 = vmatmul.f32.vlgmr.msrb.gmra.mxu3 %v2606_v19 }
 0x9bd   :  { %2740 = vmatpush.msra.mxu0 %v2713_v4 }
 0x9bf   :  { %2741 = vmatpush.msra.mxu0 %v2712_v6 }
 0x9c1   :  { %2742 = vmatpush.msra.mxu0 %v2711_v61 }
 0x9c3   :  { %2743 = vmatpush.msra.mxu0 %v2710_v57 }
 0x9c5   :  { %2744 = vmatpush.msra.mxu0 %v2709_v17 }
 0xa38   :  { %v2624_v22 = vpop.f32.mrf.mxu0  ;;  %v2644_v44 = vpop.f32.mrf.mxu1 }
 0xa39   :  { %v2687_v53 = vadd.f32 %v2624_v22, %v2428_v30  ;;  %v2688_v23 = vadd.f32 %v2644_v44, %v2448_v15 }
 0xa3b   :  { %v2691_v26 = vmul.f32 0.5, %v2687_v53  ;;  %v2695_v37 = vmul.f32 0.5, %v2688_v23 }
 0xa3d   :  { %2941 = vtanh.f32 %v2691_v26 }
 0xa3e   :  { %2943 = vtanh.f32 %v2695_v37 }
 0xa3f   :  { %v2664_v52 = vpop.f32.mrf.mxu2  ;;  %v2684_v48 = vpop.f32.mrf.mxu3 }
 0xa40   :  { %v2689_v0 = vadd.f32 %v2664_v52, %v2468_v3  ;;  %v2690_v12 = vadd.f32 %v2684_v48, %v2488_v38 }
 0xa42   :  { %2945 = vtanh.f32 %v2689_v0  ;;  %v2700_v40 = vmul.f32 0.5, %v2690_v12 }
 0xa43   :  { %v2942_v33 = vpop.eup %2941 }
 0xa44   :  { %v2944_v24 = vpop.eup %2943  ;;  %v2693_v11 = vmul.f32 0.5, %v2942_v33  ;;  %2947 = vtanh.f32 %v2700_v40 }
 0xa45   :  { %v2697_v42 = vmul.f32 0.5, %v2944_v24 }
 0xa46   :  { %v2694_v56 = vadd.f32 0.5, %v2693_v11 }
 0xa47   :  { %v2698_v25 = vadd.f32 0.5, %v2697_v42 }
 0xa48   :  { %v2946_v5 = vpop.eup %2945 }
 0xa49   :  { %v2704_v9 = vmul.f32 %v2698_v25, %v7084_v62  ;;  %v2705_v43 = vmul.f32 %v2946_v5, %v2694_v56 }
 0xa4a   :  { %v2948_v2 = vpop.eup %2947 }
 0xa4b   :  { %v2706_v35 = vadd.f32 %v2705_v43, %v2704_v9  ;;  %v2702_v31 = vmul.f32 0.5, %v2948_v2 }
 0xa4d   :  { %2949 = vtanh.f32 %v2706_v35  ;;  %v2703_v18 = vadd.f32 0.5, %v2702_v31 }
 0xa53   :  { %v2950_v32 = vpop.eup %2949 }
 0xa54   :  { %v2708_v54 = vmul.f32 %v2950_v32, %v2703_v18 }
 0xa56   :  { %2745 = vmatmul.f32.vlgmr.msra.gmra.mxu0 %v2708_v54 }
 0xad3   :  { %v2746_v62 = vpop.f32.mrf.mxu0 }
 0xad4   :  { %v2747_v27 = vadd.f32 %v2790_v7, %v2746_v62 }
 0xad6   :  { %2749 = vst [vmem:[#allocation10] sm:$0xff] %v2747_v27 }
 0xad7   :  { %2760 = dma.vmem_to_hbm [thread:$0]  %s2756_s2, 128, %s2758_s30, [#allocation4]  }
 0xad8   :  { %3653 = dma.done.wait [#allocation4], 128  }
 0xad9   :  { %3654 = vsyncadd [#allocation4], 4294967168 }
 0xada   :  { %2765 = vsyncpa [#allocation3], 1 }
 0xadb   :  { %2766 = vsyncpa [#allocation6], 1 }
 0xadc   :  { %2767 = vsyncpa [#allocation9], 1 }
 0xadd   :  { %2768 = vsyncpa [#allocation4], 1 }

</bundles_post_ra>
